<compile_context>
chip_gen: v5e
topology: v5e:2x2
jax: 0.10.0
libtpu: 0.0.40
codegen_flags: <defaults>
</compile_context>

<pallas_src>
import jax
import jax.numpy as jnp
import numpy as np
from jax import lax
from jax.experimental import pallas as pl
from jax.experimental.pallas import tpu as pltpu


def _make_resblock_kernel(H, W, C):
    def kernel(x_ref, w1_ref, b1_ref, w2_ref, b2_ref, o_ref, xpad_ref, hpad_ref):
        # Zero padded scratches every step (each core owns its scratch under a
        # "parallel" grid, so no program_id==0 init trick).
        xpad_ref[...] = jnp.zeros_like(xpad_ref)
        hpad_ref[...] = jnp.zeros_like(hpad_ref)

        x = x_ref[0]  # (H, W, C) f32 residual input
        xpad_ref[1:H + 1, 1:W + 1, :] = x.astype(xpad_ref.dtype)

        def conv3x3(src_ref, w_ref, b_ref):
            # 3x3 stride-1 pad-1 conv as 9 shifted bf16 MXU matmuls, f32 acc.
            acc = jnp.zeros((H * W, C), jnp.float32)
            for kh in range(3):
                for kw in range(3):
                    tap = src_ref[kh:kh + H, kw:kw + W, :]      # (H, W, C) bf16
                    acc = acc + jnp.dot(tap.reshape(H * W, C),
                                        w_ref[kh * 3 + kw],
                                        preferred_element_type=jnp.float32)
            return acc + b_ref[...]                              # folded BN bias

        # conv1 -> BN1 (folded) -> ReLU
        h1 = jnp.maximum(conv3x3(xpad_ref, w1_ref, b1_ref), 0.0)
        hpad_ref[1:H + 1, 1:W + 1, :] = h1.reshape(H, W, C).astype(hpad_ref.dtype)

        # conv2 -> BN2 (folded) -> + residual -> ReLU
        y2 = conv3x3(hpad_ref, w2_ref, b2_ref).reshape(H, W, C)
        o_ref[0] = jnp.maximum(y2 + x, 0.0).astype(o_ref.dtype)

    return kernel


def resblock_forward(x_nchw, params):
    """x_nchw: (N, C, H, W) f32 -> (N, C, H, W) f32 (ResBlock forward)."""
    N, C, H, W = x_nchw.shape
    x = jnp.transpose(x_nchw, (0, 2, 3, 1))  # NHWC: channels on the lane axis

    # Fold BN scale into conv weights; cast weights to bf16 for the MXU.
    w1 = (params["w1"] * params["scale1"]).reshape(9, C, C).astype(jnp.bfloat16)
    w2 = (params["w2"] * params["scale2"]).reshape(9, C, C).astype(jnp.bfloat16)
    b1 = params["bias1"].reshape(1, C).astype(jnp.float32)
    b2 = params["bias2"].reshape(1, C).astype(jnp.float32)

    kernel = _make_resblock_kernel(H, W, C)
    out_nhwc = pl.pallas_call(
        kernel,
        out_shape=jax.ShapeDtypeStruct((N, H, W, C), jnp.float32),
        grid_spec=pltpu.PrefetchScalarGridSpec(
            num_scalar_prefetch=0,
            grid=(N,),
            in_specs=[
                pl.BlockSpec((1, H, W, C), lambda n: (n, 0, 0, 0)),
                pl.BlockSpec((9, C, C), lambda n: (0, 0, 0)),
                pl.BlockSpec((1, C), lambda n: (0, 0)),
                pl.BlockSpec((9, C, C), lambda n: (0, 0, 0)),
                pl.BlockSpec((1, C), lambda n: (0, 0)),
            ],
            out_specs=pl.BlockSpec((1, H, W, C), lambda n: (n, 0, 0, 0)),
            scratch_shapes=[
                pltpu.VMEM((H + 2, W + 2, C), jnp.bfloat16),  # padded input
                pltpu.VMEM((H + 2, W + 2, C), jnp.bfloat16),  # padded intermediate
            ],
        ),
        compiler_params=pltpu.CompilerParams(
            dimension_semantics=("parallel",),
            vmem_limit_bytes=32 * 1024 * 1024,
        ),
    )(x, w1, b1, w2, b2)
    return jnp.transpose(out_nhwc, (0, 3, 1, 2))


def init_params(key, channel_num, eps=1e-5):
    """Deterministic synthetic ResBlock params: conv weights + folded BN affine."""
    params = {}
    for i in (1, 2):
        key, kw, kg, kb, km, kv = jax.random.split(key, 6)
        w = 0.05 * jax.random.normal(
            kw, (3, 3, channel_num, channel_num), jnp.float32)  # HWIO
        gamma = 1.0 + 0.1 * jax.random.normal(kg, (channel_num,), jnp.float32)
        beta = 0.1 * jax.random.normal(kb, (channel_num,), jnp.float32)
        rmean = 0.1 * jax.random.normal(km, (channel_num,), jnp.float32)
        rvar = jnp.abs(1.0 + 0.1 * jax.random.normal(kv, (channel_num,), jnp.float32))
        scale = gamma / jnp.sqrt(rvar + eps)
        bias = beta - rmean * scale
        params[f"w{i}"] = w
        params[f"scale{i}"] = scale
        params[f"bias{i}"] = bias
    return params


def reference_forward(x_nchw, params):
    """Pure-JAX f32 reference (XLA conv) for correctness check."""
    x = jnp.transpose(x_nchw, (0, 2, 3, 1))
    h = x
    for i in (1, 2):
        h = lax.conv_general_dilated(
            h, params[f"w{i}"], window_strides=(1, 1), padding=((1, 1), (1, 1)),
            dimension_numbers=("NHWC", "HWIO", "NHWC"))
        h = h * params[f"scale{i}"] + params[f"bias{i}"]
        if i == 1:
            h = jnp.maximum(h, 0.0)
    out = jnp.maximum(h + x, 0.0)
    return jnp.transpose(out, (0, 3, 1, 2))


if __name__ == "__main__":
    key = jax.random.PRNGKey(0)
    k_x, k_p = jax.random.split(key)

    # Small but lane-dense config: channel_num = 128 (C maps to the 128-lane axis).
    N, C, H, W = 2, 128, 16, 16
    x = jax.random.normal(k_x, (N, C, H, W), jnp.float32)
    params = init_params(k_p, C)

    out = jax.block_until_ready(jax.jit(resblock_forward)(x, params))
    ref = jax.block_until_ready(reference_forward(x, params))

    assert out.shape == (N, C, H, W), out.shape
    np.testing.assert_allclose(np.asarray(out), np.asarray(ref),
                               rtol=3e-2, atol=3e-2)  # bf16 matmul tolerance
    print("KERNEL_OK")
</pallas_src>

<mosaic_0001>
module attributes {stable_mosaic.version = 11 : i64} {
  func.func @kernel(%arg0: i32, %arg1: memref<1x16x16x128xf32, #tpu.memory_space<vmem>>, %arg2: memref<9x128x128xbf16, #tpu.memory_space<vmem>>, %arg3: memref<1x128xf32, #tpu.memory_space<vmem>>, %arg4: memref<9x128x128xbf16, #tpu.memory_space<vmem>>, %arg5: memref<1x128xf32, #tpu.memory_space<vmem>>, %arg6: memref<1x16x16x128xf32, #tpu.memory_space<vmem>>, %arg7: memref<18x18x128xbf16, #tpu.memory_space<vmem>>, %arg8: memref<18x18x128xbf16, #tpu.memory_space<vmem>>) attributes {dimension_semantics = [#tpu.dimension_semantics<parallel>], iteration_bounds = array<i64: 2>, scalar_prefetch = 0 : i64, scratch_operands = 2 : i64, tpu.core_type = #tpu.core_type<tc>, window_params = [{transform_indices = @transform_0, window_bounds = array<i64: 1, 16, 16, 128>}, {pipeline_mode = #tpu.pipeline_mode<synchronous>, transform_indices = @transform_1, window_bounds = array<i64: 9, 128, 128>}, {pipeline_mode = #tpu.pipeline_mode<synchronous>, transform_indices = @transform_2, window_bounds = array<i64: 1, 128>}, {pipeline_mode = #tpu.pipeline_mode<synchronous>, transform_indices = @transform_3, window_bounds = array<i64: 9, 128, 128>}, {pipeline_mode = #tpu.pipeline_mode<synchronous>, transform_indices = @transform_4, window_bounds = array<i64: 1, 128>}, {transform_indices = @transform_5, window_bounds = array<i64: 1, 16, 16, 128>}]} {
    %cst = arith.constant 0.000000e+00 : bf16
    %0 = vector.broadcast %cst : bf16 to vector<18x18x128xbf16>
    %c0 = arith.constant 0 : index
    %c0_0 = arith.constant 0 : index
    %c0_1 = arith.constant 0 : index
    %1 = vector.load %arg7[%c0, %c0_0, %c0_1] : memref<18x18x128xbf16, #tpu.memory_space<vmem>>, vector<18x18x128xbf16>
    tpu.vector_store %arg7[%c0, %c0_0, %c0_1], %0 {strides = array<i32>} : memref<18x18x128xbf16, #tpu.memory_space<vmem>>, vector<18x18x128xbf16>,
    %cst_2 = arith.constant 0.000000e+00 : bf16
    %2 = vector.broadcast %cst_2 : bf16 to vector<18x18x128xbf16>
    %c0_3 = arith.constant 0 : index
    %c0_4 = arith.constant 0 : index
    %c0_5 = arith.constant 0 : index
    %3 = vector.load %arg8[%c0_3, %c0_4, %c0_5] : memref<18x18x128xbf16, #tpu.memory_space<vmem>>, vector<18x18x128xbf16>
    tpu.vector_store %arg8[%c0_3, %c0_4, %c0_5], %2 {strides = array<i32>} : memref<18x18x128xbf16, #tpu.memory_space<vmem>>, vector<18x18x128xbf16>,
    %c0_6 = arith.constant 0 : index
    %c0_7 = arith.constant 0 : index
    %c0_8 = arith.constant 0 : index
    %c0_9 = arith.constant 0 : index
    %4 = vector.load %arg1[%c0_6, %c0_7, %c0_8, %c0_9] : memref<1x16x16x128xf32, #tpu.memory_space<vmem>>, vector<1x16x16x128xf32>
    %5 = vector.shape_cast %4 : vector<1x16x16x128xf32> to vector<16x16x128xf32>
    %6 = arith.truncf %5 : vector<16x16x128xf32> to vector<16x16x128xbf16>
    %c1 = arith.constant 1 : index
    %c1_10 = arith.constant 1 : index
    %c0_11 = arith.constant 0 : index
    %7 = vector.load %arg7[%c1, %c1_10, %c0_11] : memref<18x18x128xbf16, #tpu.memory_space<vmem>>, vector<16x16x128xbf16>
    tpu.vector_store %arg7[%c1, %c1_10, %c0_11], %6 {strides = array<i32>} : memref<18x18x128xbf16, #tpu.memory_space<vmem>>, vector<16x16x128xbf16>,
    %cst_12 = arith.constant 0.000000e+00 : f32
    %8 = vector.broadcast %cst_12 : f32 to vector<256x128xf32>
    %c0_13 = arith.constant 0 : index
    %c0_14 = arith.constant 0 : index
    %c0_15 = arith.constant 0 : index
    %9 = vector.load %arg7[%c0_13, %c0_14, %c0_15] : memref<18x18x128xbf16, #tpu.memory_space<vmem>>, vector<16x16x128xbf16>
    %10 = vector.shape_cast %9 : vector<16x16x128xbf16> to vector<256x128xbf16>
    %c0_16 = arith.constant 0 : index
    %c0_17 = arith.constant 0 : index
    %c0_18 = arith.constant 0 : index
    %11 = vector.load %arg2[%c0_16, %c0_17, %c0_18] : memref<9x128x128xbf16, #tpu.memory_space<vmem>>, vector<1x128x128xbf16>
    %12 = vector.shape_cast %11 : vector<1x128x128xbf16> to vector<128x128xbf16>
    %cst_19 = arith.constant dense<0.000000e+00> : vector<256x128xf32>
    %13 = tpu.matmul %10, %12, %cst_19 {dimension_numbers = #tpu.dot_dimension_numbers<[1], [0], [0], [1], [0, 0, 1, 1], [], []>} : vector<256x128xbf16>, vector<128x128xbf16>, vector<256x128xf32> -> vector<256x128xf32>
    %14 = arith.addf %8, %13 : vector<256x128xf32>
    %c0_20 = arith.constant 0 : index
    %c1_21 = arith.constant 1 : index
    %c0_22 = arith.constant 0 : index
    %15 = vector.load %arg7[%c0_20, %c1_21, %c0_22] : memref<18x18x128xbf16, #tpu.memory_space<vmem>>, vector<16x16x128xbf16>
    %16 = vector.shape_cast %15 : vector<16x16x128xbf16> to vector<256x128xbf16>
    %c1_23 = arith.constant 1 : index
    %c0_24 = arith.constant 0 : index
    %c0_25 = arith.constant 0 : index
    %17 = vector.load %arg2[%c1_23, %c0_24, %c0_25] : memref<9x128x128xbf16, #tpu.memory_space<vmem>>, vector<1x128x128xbf16>
    %18 = vector.shape_cast %17 : vector<1x128x128xbf16> to vector<128x128xbf16>
    %cst_26 = arith.constant dense<0.000000e+00> : vector<256x128xf32>
    %19 = tpu.matmul %16, %18, %cst_26 {dimension_numbers = #tpu.dot_dimension_numbers<[1], [0], [0], [1], [0, 0, 1, 1], [], []>} : vector<256x128xbf16>, vector<128x128xbf16>, vector<256x128xf32> -> vector<256x128xf32>
    %20 = arith.addf %14, %19 : vector<256x128xf32>
    %c0_27 = arith.constant 0 : index
    %c2 = arith.constant 2 : index
    %c0_28 = arith.constant 0 : index
    %21 = vector.load %arg7[%c0_27, %c2, %c0_28] : memref<18x18x128xbf16, #tpu.memory_space<vmem>>, vector<16x16x128xbf16>
    %22 = vector.shape_cast %21 : vector<16x16x128xbf16> to vector<256x128xbf16>
    %c2_29 = arith.constant 2 : index
    %c0_30 = arith.constant 0 : index
    %c0_31 = arith.constant 0 : index
    %23 = vector.load %arg2[%c2_29, %c0_30, %c0_31] : memref<9x128x128xbf16, #tpu.memory_space<vmem>>, vector<1x128x128xbf16>
    %24 = vector.shape_cast %23 : vector<1x128x128xbf16> to vector<128x128xbf16>
    %cst_32 = arith.constant dense<0.000000e+00> : vector<256x128xf32>
    %25 = tpu.matmul %22, %24, %cst_32 {dimension_numbers = #tpu.dot_dimension_numbers<[1], [0], [0], [1], [0, 0, 1, 1], [], []>} : vector<256x128xbf16>, vector<128x128xbf16>, vector<256x128xf32> -> vector<256x128xf32>
    %26 = arith.addf %20, %25 : vector<256x128xf32>
    %c1_33 = arith.constant 1 : index
    %c0_34 = arith.constant 0 : index
    %c0_35 = arith.constant 0 : index
    %27 = vector.load %arg7[%c1_33, %c0_34, %c0_35] : memref<18x18x128xbf16, #tpu.memory_space<vmem>>, vector<16x16x128xbf16>
    %28 = vector.shape_cast %27 : vector<16x16x128xbf16> to vector<256x128xbf16>
    %c3 = arith.constant 3 : index
    %c0_36 = arith.constant 0 : index
    %c0_37 = arith.constant 0 : index
    %29 = vector.load %arg2[%c3, %c0_36, %c0_37] : memref<9x128x128xbf16, #tpu.memory_space<vmem>>, vector<1x128x128xbf16>
    %30 = vector.shape_cast %29 : vector<1x128x128xbf16> to vector<128x128xbf16>
    %cst_38 = arith.constant dense<0.000000e+00> : vector<256x128xf32>
    %31 = tpu.matmul %28, %30, %cst_38 {dimension_numbers = #tpu.dot_dimension_numbers<[1], [0], [0], [1], [0, 0, 1, 1], [], []>} : vector<256x128xbf16>, vector<128x128xbf16>, vector<256x128xf32> -> vector<256x128xf32>
    %32 = arith.addf %26, %31 : vector<256x128xf32>
    %c1_39 = arith.constant 1 : index
    %c1_40 = arith.constant 1 : index
    %c0_41 = arith.constant 0 : index
    %33 = vector.load %arg7[%c1_39, %c1_40, %c0_41] : memref<18x18x128xbf16, #tpu.memory_space<vmem>>, vector<16x16x128xbf16>
    %34 = vector.shape_cast %33 : vector<16x16x128xbf16> to vector<256x128xbf16>
    %c4 = arith.constant 4 : index
    %c0_42 = arith.constant 0 : index
    %c0_43 = arith.constant 0 : index
    %35 = vector.load %arg2[%c4, %c0_42, %c0_43] : memref<9x128x128xbf16, #tpu.memory_space<vmem>>, vector<1x128x128xbf16>
    %36 = vector.shape_cast %35 : vector<1x128x128xbf16> to vector<128x128xbf16>
    %cst_44 = arith.constant dense<0.000000e+00> : vector<256x128xf32>
    %37 = tpu.matmul %34, %36, %cst_44 {dimension_numbers = #tpu.dot_dimension_numbers<[1], [0], [0], [1], [0, 0, 1, 1], [], []>} : vector<256x128xbf16>, vector<128x128xbf16>, vector<256x128xf32> -> vector<256x128xf32>
    %38 = arith.addf %32, %37 : vector<256x128xf32>
    %c1_45 = arith.constant 1 : index
    %c2_46 = arith.constant 2 : index
    %c0_47 = arith.constant 0 : index
    %39 = vector.load %arg7[%c1_45, %c2_46, %c0_47] : memref<18x18x128xbf16, #tpu.memory_space<vmem>>, vector<16x16x128xbf16>
    %40 = vector.shape_cast %39 : vector<16x16x128xbf16> to vector<256x128xbf16>
    %c5 = arith.constant 5 : index
    %c0_48 = arith.constant 0 : index
    %c0_49 = arith.constant 0 : index
    %41 = vector.load %arg2[%c5, %c0_48, %c0_49] : memref<9x128x128xbf16, #tpu.memory_space<vmem>>, vector<1x128x128xbf16>
    %42 = vector.shape_cast %41 : vector<1x128x128xbf16> to vector<128x128xbf16>
    %cst_50 = arith.constant dense<0.000000e+00> : vector<256x128xf32>
    %43 = tpu.matmul %40, %42, %cst_50 {dimension_numbers = #tpu.dot_dimension_numbers<[1], [0], [0], [1], [0, 0, 1, 1], [], []>} : vector<256x128xbf16>, vector<128x128xbf16>, vector<256x128xf32> -> vector<256x128xf32>
    %44 = arith.addf %38, %43 : vector<256x128xf32>
    %c2_51 = arith.constant 2 : index
    %c0_52 = arith.constant 0 : index
    %c0_53 = arith.constant 0 : index
    %45 = vector.load %arg7[%c2_51, %c0_52, %c0_53] : memref<18x18x128xbf16, #tpu.memory_space<vmem>>, vector<16x16x128xbf16>
    %46 = vector.shape_cast %45 : vector<16x16x128xbf16> to vector<256x128xbf16>
    %c6 = arith.constant 6 : index
    %c0_54 = arith.constant 0 : index
    %c0_55 = arith.constant 0 : index
    %47 = vector.load %arg2[%c6, %c0_54, %c0_55] : memref<9x128x128xbf16, #tpu.memory_space<vmem>>, vector<1x128x128xbf16>
    %48 = vector.shape_cast %47 : vector<1x128x128xbf16> to vector<128x128xbf16>
    %cst_56 = arith.constant dense<0.000000e+00> : vector<256x128xf32>
    %49 = tpu.matmul %46, %48, %cst_56 {dimension_numbers = #tpu.dot_dimension_numbers<[1], [0], [0], [1], [0, 0, 1, 1], [], []>} : vector<256x128xbf16>, vector<128x128xbf16>, vector<256x128xf32> -> vector<256x128xf32>
    %50 = arith.addf %44, %49 : vector<256x128xf32>
    %c2_57 = arith.constant 2 : index
    %c1_58 = arith.constant 1 : index
    %c0_59 = arith.constant 0 : index
    %51 = vector.load %arg7[%c2_57, %c1_58, %c0_59] : memref<18x18x128xbf16, #tpu.memory_space<vmem>>, vector<16x16x128xbf16>
    %52 = vector.shape_cast %51 : vector<16x16x128xbf16> to vector<256x128xbf16>
    %c7 = arith.constant 7 : index
    %c0_60 = arith.constant 0 : index
    %c0_61 = arith.constant 0 : index
    %53 = vector.load %arg2[%c7, %c0_60, %c0_61] : memref<9x128x128xbf16, #tpu.memory_space<vmem>>, vector<1x128x128xbf16>
    %54 = vector.shape_cast %53 : vector<1x128x128xbf16> to vector<128x128xbf16>
    %cst_62 = arith.constant dense<0.000000e+00> : vector<256x128xf32>
    %55 = tpu.matmul %52, %54, %cst_62 {dimension_numbers = #tpu.dot_dimension_numbers<[1], [0], [0], [1], [0, 0, 1, 1], [], []>} : vector<256x128xbf16>, vector<128x128xbf16>, vector<256x128xf32> -> vector<256x128xf32>
    %56 = arith.addf %50, %55 : vector<256x128xf32>
    %c2_63 = arith.constant 2 : index
    %c2_64 = arith.constant 2 : index
    %c0_65 = arith.constant 0 : index
    %57 = vector.load %arg7[%c2_63, %c2_64, %c0_65] : memref<18x18x128xbf16, #tpu.memory_space<vmem>>, vector<16x16x128xbf16>
    %58 = vector.shape_cast %57 : vector<16x16x128xbf16> to vector<256x128xbf16>
    %c8 = arith.constant 8 : index
    %c0_66 = arith.constant 0 : index
    %c0_67 = arith.constant 0 : index
    %59 = vector.load %arg2[%c8, %c0_66, %c0_67] : memref<9x128x128xbf16, #tpu.memory_space<vmem>>, vector<1x128x128xbf16>
    %60 = vector.shape_cast %59 : vector<1x128x128xbf16> to vector<128x128xbf16>
    %cst_68 = arith.constant dense<0.000000e+00> : vector<256x128xf32>
    %61 = tpu.matmul %58, %60, %cst_68 {dimension_numbers = #tpu.dot_dimension_numbers<[1], [0], [0], [1], [0, 0, 1, 1], [], []>} : vector<256x128xbf16>, vector<128x128xbf16>, vector<256x128xf32> -> vector<256x128xf32>
    %62 = arith.addf %56, %61 : vector<256x128xf32>
    %c0_69 = arith.constant 0 : index
    %c0_70 = arith.constant 0 : index
    %63 = vector.load %arg3[%c0_69, %c0_70] : memref<1x128xf32, #tpu.memory_space<vmem>>, vector<1x128xf32>
    %64 = vector.broadcast %63 : vector<1x128xf32> to vector<256x128xf32>
    %65 = arith.addf %62, %64 : vector<256x128xf32>
    %cst_71 = arith.constant 0.000000e+00 : f32
    %66 = vector.broadcast %cst_71 : f32 to vector<256x128xf32>
    %67 = arith.maximumf %65, %66 : vector<256x128xf32>
    %68 = vector.shape_cast %67 : vector<256x128xf32> to vector<16x16x128xf32>
    %69 = arith.truncf %68 : vector<16x16x128xf32> to vector<16x16x128xbf16>
    %c1_72 = arith.constant 1 : index
    %c1_73 = arith.constant 1 : index
    %c0_74 = arith.constant 0 : index
    %70 = vector.load %arg8[%c1_72, %c1_73, %c0_74] : memref<18x18x128xbf16, #tpu.memory_space<vmem>>, vector<16x16x128xbf16>
    tpu.vector_store %arg8[%c1_72, %c1_73, %c0_74], %69 {strides = array<i32>} : memref<18x18x128xbf16, #tpu.memory_space<vmem>>, vector<16x16x128xbf16>,
    %cst_75 = arith.constant 0.000000e+00 : f32
    %71 = vector.broadcast %cst_75 : f32 to vector<256x128xf32>
    %c0_76 = arith.constant 0 : index
    %c0_77 = arith.constant 0 : index
    %c0_78 = arith.constant 0 : index
    %72 = vector.load %arg8[%c0_76, %c0_77, %c0_78] : memref<18x18x128xbf16, #tpu.memory_space<vmem>>, vector<16x16x128xbf16>
    %73 = vector.shape_cast %72 : vector<16x16x128xbf16> to vector<256x128xbf16>
    %c0_79 = arith.constant 0 : index
    %c0_80 = arith.constant 0 : index
    %c0_81 = arith.constant 0 : index
    %74 = vector.load %arg4[%c0_79, %c0_80, %c0_81] : memref<9x128x128xbf16, #tpu.memory_space<vmem>>, vector<1x128x128xbf16>
    %75 = vector.shape_cast %74 : vector<1x128x128xbf16> to vector<128x128xbf16>
    %cst_82 = arith.constant dense<0.000000e+00> : vector<256x128xf32>
    %76 = tpu.matmul %73, %75, %cst_82 {dimension_numbers = #tpu.dot_dimension_numbers<[1], [0], [0], [1], [0, 0, 1, 1], [], []>} : vector<256x128xbf16>, vector<128x128xbf16>, vector<256x128xf32> -> vector<256x128xf32>
    %77 = arith.addf %71, %76 : vector<256x128xf32>
    %c0_83 = arith.constant 0 : index
    %c1_84 = arith.constant 1 : index
    %c0_85 = arith.constant 0 : index
    %78 = vector.load %arg8[%c0_83, %c1_84, %c0_85] : memref<18x18x128xbf16, #tpu.memory_space<vmem>>, vector<16x16x128xbf16>
    %79 = vector.shape_cast %78 : vector<16x16x128xbf16> to vector<256x128xbf16>
    %c1_86 = arith.constant 1 : index
    %c0_87 = arith.constant 0 : index
    %c0_88 = arith.constant 0 : index
    %80 = vector.load %arg4[%c1_86, %c0_87, %c0_88] : memref<9x128x128xbf16, #tpu.memory_space<vmem>>, vector<1x128x128xbf16>
    %81 = vector.shape_cast %80 : vector<1x128x128xbf16> to vector<128x128xbf16>
    %cst_89 = arith.constant dense<0.000000e+00> : vector<256x128xf32>
    %82 = tpu.matmul %79, %81, %cst_89 {dimension_numbers = #tpu.dot_dimension_numbers<[1], [0], [0], [1], [0, 0, 1, 1], [], []>} : vector<256x128xbf16>, vector<128x128xbf16>, vector<256x128xf32> -> vector<256x128xf32>
    %83 = arith.addf %77, %82 : vector<256x128xf32>
    %c0_90 = arith.constant 0 : index
    %c2_91 = arith.constant 2 : index
    %c0_92 = arith.constant 0 : index
    %84 = vector.load %arg8[%c0_90, %c2_91, %c0_92] : memref<18x18x128xbf16, #tpu.memory_space<vmem>>, vector<16x16x128xbf16>
    %85 = vector.shape_cast %84 : vector<16x16x128xbf16> to vector<256x128xbf16>
    %c2_93 = arith.constant 2 : index
    %c0_94 = arith.constant 0 : index
    %c0_95 = arith.constant 0 : index
    %86 = vector.load %arg4[%c2_93, %c0_94, %c0_95] : memref<9x128x128xbf16, #tpu.memory_space<vmem>>, vector<1x128x128xbf16>
    %87 = vector.shape_cast %86 : vector<1x128x128xbf16> to vector<128x128xbf16>
    %cst_96 = arith.constant dense<0.000000e+00> : vector<256x128xf32>
    %88 = tpu.matmul %85, %87, %cst_96 {dimension_numbers = #tpu.dot_dimension_numbers<[1], [0], [0], [1], [0, 0, 1, 1], [], []>} : vector<256x128xbf16>, vector<128x128xbf16>, vector<256x128xf32> -> vector<256x128xf32>
    %89 = arith.addf %83, %88 : vector<256x128xf32>
    %c1_97 = arith.constant 1 : index
    %c0_98 = arith.constant 0 : index
    %c0_99 = arith.constant 0 : index
    %90 = vector.load %arg8[%c1_97, %c0_98, %c0_99] : memref<18x18x128xbf16, #tpu.memory_space<vmem>>, vector<16x16x128xbf16>
    %91 = vector.shape_cast %90 : vector<16x16x128xbf16> to vector<256x128xbf16>
    %c3_100 = arith.constant 3 : index
    %c0_101 = arith.constant 0 : index
    %c0_102 = arith.constant 0 : index
    %92 = vector.load %arg4[%c3_100, %c0_101, %c0_102] : memref<9x128x128xbf16, #tpu.memory_space<vmem>>, vector<1x128x128xbf16>
    %93 = vector.shape_cast %92 : vector<1x128x128xbf16> to vector<128x128xbf16>
    %cst_103 = arith.constant dense<0.000000e+00> : vector<256x128xf32>
    %94 = tpu.matmul %91, %93, %cst_103 {dimension_numbers = #tpu.dot_dimension_numbers<[1], [0], [0], [1], [0, 0, 1, 1], [], []>} : vector<256x128xbf16>, vector<128x128xbf16>, vector<256x128xf32> -> vector<256x128xf32>
    %95 = arith.addf %89, %94 : vector<256x128xf32>
    %c1_104 = arith.constant 1 : index
    %c1_105 = arith.constant 1 : index
    %c0_106 = arith.constant 0 : index
    %96 = vector.load %arg8[%c1_104, %c1_105, %c0_106] : memref<18x18x128xbf16, #tpu.memory_space<vmem>>, vector<16x16x128xbf16>
    %97 = vector.shape_cast %96 : vector<16x16x128xbf16> to vector<256x128xbf16>
    %c4_107 = arith.constant 4 : index
    %c0_108 = arith.constant 0 : index
    %c0_109 = arith.constant 0 : index
    %98 = vector.load %arg4[%c4_107, %c0_108, %c0_109] : memref<9x128x128xbf16, #tpu.memory_space<vmem>>, vector<1x128x128xbf16>
    %99 = vector.shape_cast %98 : vector<1x128x128xbf16> to vector<128x128xbf16>
    %cst_110 = arith.constant dense<0.000000e+00> : vector<256x128xf32>
    %100 = tpu.matmul %97, %99, %cst_110 {dimension_numbers = #tpu.dot_dimension_numbers<[1], [0], [0], [1], [0, 0, 1, 1], [], []>} : vector<256x128xbf16>, vector<128x128xbf16>, vector<256x128xf32> -> vector<256x128xf32>
    %101 = arith.addf %95, %100 : vector<256x128xf32>
    %c1_111 = arith.constant 1 : index
    %c2_112 = arith.constant 2 : index
    %c0_113 = arith.constant 0 : index
    %102 = vector.load %arg8[%c1_111, %c2_112, %c0_113] : memref<18x18x128xbf16, #tpu.memory_space<vmem>>, vector<16x16x128xbf16>
    %103 = vector.shape_cast %102 : vector<16x16x128xbf16> to vector<256x128xbf16>
    %c5_114 = arith.constant 5 : index
    %c0_115 = arith.constant 0 : index
    %c0_116 = arith.constant 0 : index
    %104 = vector.load %arg4[%c5_114, %c0_115, %c0_116] : memref<9x128x128xbf16, #tpu.memory_space<vmem>>, vector<1x128x128xbf16>
    %105 = vector.shape_cast %104 : vector<1x128x128xbf16> to vector<128x128xbf16>
    %cst_117 = arith.constant dense<0.000000e+00> : vector<256x128xf32>
    %106 = tpu.matmul %103, %105, %cst_117 {dimension_numbers = #tpu.dot_dimension_numbers<[1], [0], [0], [1], [0, 0, 1, 1], [], []>} : vector<256x128xbf16>, vector<128x128xbf16>, vector<256x128xf32> -> vector<256x128xf32>
    %107 = arith.addf %101, %106 : vector<256x128xf32>
    %c2_118 = arith.constant 2 : index
    %c0_119 = arith.constant 0 : index
    %c0_120 = arith.constant 0 : index
    %108 = vector.load %arg8[%c2_118, %c0_119, %c0_120] : memref<18x18x128xbf16, #tpu.memory_space<vmem>>, vector<16x16x128xbf16>
    %109 = vector.shape_cast %108 : vector<16x16x128xbf16> to vector<256x128xbf16>
    %c6_121 = arith.constant 6 : index
    %c0_122 = arith.constant 0 : index
    %c0_123 = arith.constant 0 : index
    %110 = vector.load %arg4[%c6_121, %c0_122, %c0_123] : memref<9x128x128xbf16, #tpu.memory_space<vmem>>, vector<1x128x128xbf16>
    %111 = vector.shape_cast %110 : vector<1x128x128xbf16> to vector<128x128xbf16>
    %cst_124 = arith.constant dense<0.000000e+00> : vector<256x128xf32>
    %112 = tpu.matmul %109, %111, %cst_124 {dimension_numbers = #tpu.dot_dimension_numbers<[1], [0], [0], [1], [0, 0, 1, 1], [], []>} : vector<256x128xbf16>, vector<128x128xbf16>, vector<256x128xf32> -> vector<256x128xf32>
    %113 = arith.addf %107, %112 : vector<256x128xf32>
    %c2_125 = arith.constant 2 : index
    %c1_126 = arith.constant 1 : index
    %c0_127 = arith.constant 0 : index
    %114 = vector.load %arg8[%c2_125, %c1_126, %c0_127] : memref<18x18x128xbf16, #tpu.memory_space<vmem>>, vector<16x16x128xbf16>
    %115 = vector.shape_cast %114 : vector<16x16x128xbf16> to vector<256x128xbf16>
    %c7_128 = arith.constant 7 : index
    %c0_129 = arith.constant 0 : index
    %c0_130 = arith.constant 0 : index
    %116 = vector.load %arg4[%c7_128, %c0_129, %c0_130] : memref<9x128x128xbf16, #tpu.memory_space<vmem>>, vector<1x128x128xbf16>
    %117 = vector.shape_cast %116 : vector<1x128x128xbf16> to vector<128x128xbf16>
    %cst_131 = arith.constant dense<0.000000e+00> : vector<256x128xf32>
    %118 = tpu.matmul %115, %117, %cst_131 {dimension_numbers = #tpu.dot_dimension_numbers<[1], [0], [0], [1], [0, 0, 1, 1], [], []>} : vector<256x128xbf16>, vector<128x128xbf16>, vector<256x128xf32> -> vector<256x128xf32>
    %119 = arith.addf %113, %118 : vector<256x128xf32>
    %c2_132 = arith.constant 2 : index
    %c2_133 = arith.constant 2 : index
    %c0_134 = arith.constant 0 : index
    %120 = vector.load %arg8[%c2_132, %c2_133, %c0_134] : memref<18x18x128xbf16, #tpu.memory_space<vmem>>, vector<16x16x128xbf16>
    %121 = vector.shape_cast %120 : vector<16x16x128xbf16> to vector<256x128xbf16>
    %c8_135 = arith.constant 8 : index
    %c0_136 = arith.constant 0 : index
    %c0_137 = arith.constant 0 : index
    %122 = vector.load %arg4[%c8_135, %c0_136, %c0_137] : memref<9x128x128xbf16, #tpu.memory_space<vmem>>, vector<1x128x128xbf16>
    %123 = vector.shape_cast %122 : vector<1x128x128xbf16> to vector<128x128xbf16>
    %cst_138 = arith.constant dense<0.000000e+00> : vector<256x128xf32>
    %124 = tpu.matmul %121, %123, %cst_138 {dimension_numbers = #tpu.dot_dimension_numbers<[1], [0], [0], [1], [0, 0, 1, 1], [], []>} : vector<256x128xbf16>, vector<128x128xbf16>, vector<256x128xf32> -> vector<256x128xf32>
    %125 = arith.addf %119, %124 : vector<256x128xf32>
    %c0_139 = arith.constant 0 : index
    %c0_140 = arith.constant 0 : index
    %126 = vector.load %arg5[%c0_139, %c0_140] : memref<1x128xf32, #tpu.memory_space<vmem>>, vector<1x128xf32>
    %127 = vector.broadcast %126 : vector<1x128xf32> to vector<256x128xf32>
    %128 = arith.addf %125, %127 : vector<256x128xf32>
    %129 = vector.shape_cast %128 : vector<256x128xf32> to vector<16x16x128xf32>
    %130 = arith.addf %129, %5 : vector<16x16x128xf32>
    %cst_141 = arith.constant 0.000000e+00 : f32
    %131 = vector.broadcast %cst_141 : f32 to vector<16x16x128xf32>
    %132 = arith.maximumf %130, %131 : vector<16x16x128xf32>
    %c0_142 = arith.constant 0 : index
    %c0_143 = arith.constant 0 : index
    %c0_144 = arith.constant 0 : index
    %c0_145 = arith.constant 0 : index
    %133 = vector.load %arg6[%c0_142, %c0_143, %c0_144, %c0_145] : memref<1x16x16x128xf32, #tpu.memory_space<vmem>>, vector<1x16x16x128xf32>
    %134 = vector.shape_cast %133 : vector<1x16x16x128xf32> to vector<16x16x128xf32>
    %135 = vector.shape_cast %132 : vector<16x16x128xf32> to vector<1x16x16x128xf32>
    tpu.vector_store %arg6[%c0_142, %c0_143, %c0_144, %c0_145], %135 {strides = array<i32>} : memref<1x16x16x128xf32, #tpu.memory_space<vmem>>, vector<1x16x16x128xf32>,
    return
  }
  func.func @transform_0(%arg0: i32) -> (i32, i32, i32, i32) {
    %c0_i32 = arith.constant 0 : i32
    %c0_i32_0 = arith.constant 0 : i32
    %c0_i32_1 = arith.constant 0 : i32
    %c0_i32_2 = arith.constant 0 : i32
    return %arg0, %c0_i32, %c0_i32_0, %c0_i32_1 : i32, i32, i32, i32
  }
  func.func @transform_1(%arg0: i32) -> (i32, i32, i32) {
    %c0_i32 = arith.constant 0 : i32
    %c0_i32_0 = arith.constant 0 : i32
    %c0_i32_1 = arith.constant 0 : i32
    %c0_i32_2 = arith.constant 0 : i32
    return %c0_i32, %c0_i32_0, %c0_i32_1 : i32, i32, i32
  }
  func.func @transform_2(%arg0: i32) -> (i32, i32) {
    %c0_i32 = arith.constant 0 : i32
    %c0_i32_0 = arith.constant 0 : i32
    %c0_i32_1 = arith.constant 0 : i32
    return %c0_i32, %c0_i32_0 : i32, i32
  }
  func.func @transform_3(%arg0: i32) -> (i32, i32, i32) {
    %c0_i32 = arith.constant 0 : i32
    %c0_i32_0 = arith.constant 0 : i32
    %c0_i32_1 = arith.constant 0 : i32
    %c0_i32_2 = arith.constant 0 : i32
    return %c0_i32, %c0_i32_0, %c0_i32_1 : i32, i32, i32
  }
  func.func @transform_4(%arg0: i32) -> (i32, i32) {
    %c0_i32 = arith.constant 0 : i32
    %c0_i32_0 = arith.constant 0 : i32
    %c0_i32_1 = arith.constant 0 : i32
    return %c0_i32, %c0_i32_0 : i32, i32
  }
  func.func @transform_5(%arg0: i32) -> (i32, i32, i32, i32) {
    %c0_i32 = arith.constant 0 : i32
    %c0_i32_0 = arith.constant 0 : i32
    %c0_i32_1 = arith.constant 0 : i32
    %c0_i32_2 = arith.constant 0 : i32
    return %arg0, %c0_i32, %c0_i32_0, %c0_i32_1 : i32, i32, i32, i32
  }
}

</mosaic_0001>

<bundles_post_ra>
// kernel: resblock_forward.1
= control target key start
LH: loop header
LB: loop body
LE: loop exit
PB: predicated region body
PF: predicated region fallthrough
CT: control target
= control target key end

     0   :  { %10 = vsyncpa [#allocation5], 0  ;;  %s15893_s0 = inlined_call_operand.vmem [shape: f32[2,16,16,128], index: 0, kind: input, shape index: {}]   ;;  %s15894_s1 = inlined_call_operand.vmem [shape: bf16[9,128,128], index: 1, kind: input, shape index: {}]   ;;  %s15895_s2 = inlined_call_operand.vmem [shape: f32[1,128], index: 2, kind: input, shape index: {}]   ;;  %s15896_s3 = inlined_call_operand.vmem [shape: bf16[9,128,128], index: 3, kind: input, shape index: {}]   ;;  %s15897_s4 = inlined_call_operand.vmem [shape: f32[1,128], index: 4, kind: input, shape index: {}]   ;;  %s15898_s5 = inlined_call_operand.hbm [shape: f32[2,16,16,128], index: 5, kind: output, shape index: {}]  }
   0x1   :  { %12 = vsyncpa [#allocation5 + $0x1], 0  ;;  %s11685_s18 = smov 0   ;;  %s11687_s19 = smov 0  }
   0x2   :  { %s11689_s20 = smov 0   ;;  %s11691_s21 = smov 0  }
   0x3 LB: > { %s11706_s22 = sadd.s32 4294967295, %s11650_s21   ;;  %s9894_s23 = sadd.s32 4294967294, %s11650_s21   ;;  %s11650_s21 = sphi %s11691_s21, %s16164_s21   ;;  %s11646_s20 = sphi %s11689_s20, %s16163_s20   ;;  %s11642_s19 = sphi %s11687_s19, %s16162_s19   ;;  %s11638_s18 = sphi %s11685_s18, %s16161_s18  }
   0x4   : > { %s11710_s24 = sadd.s32 1, %s11650_s21   ;;  %s135_s25 = sadd.s32 1, %s11646_s20 }
   0x5   : > { %s132_s26 = ssub.s32 %s11650_s21, %s11710_s24  ;;  %p145_p0 = scmp.ne.s32.totalorder %s11646_s20, %s11642_s19 }
   0x6   : > { %p133_p1 = scmp.eq.s32.totalorder %s132_s26, 0  ;;  %p146_p2 = scmp.eq.s32.totalorder %s11706_s22, 1 }
   0x7   : > { %p151_p3 = scmp.ne.s32.totalorder %s11642_s19, %s11638_s18  ;;  %p152_p4 = scmp.eq.s32.totalorder %s9894_s23, 1 }
   0x8   : > { %s11721_s27 = scalar_select %p133_p1, %s11646_s20, %s135_s25  }
   0x9   : > { %p11723_p5 = por %p146_p2, %p145_p0  ;;  %p11727_p6 = por %p152_p4, %p151_p3 }
   0xa   : > { %p9897_p7 = scmp.ge.s32.totalorder %s11650_s21, 1  ;;  %p190_p8 = scmp.lt.s32.totalorder %s11650_s21, 3 }
   0xc   : > { %p191_p9 = pnand %p9897_p7, %p190_p8 }
   0xe   : > { %194 = sbr.rel (%p191_p9) target bundleno = 1600 (0x640), region = 40 }
  0x13   : > { %v11250_v0 = vld [vmem:[%s15894_s1 + $0x78] sm:$0xff]  ;;  %v11652_v2 = vmov 0   ;;  %v11249_v3 = vld [vmem:[%s15894_s1 + $0x70] sm:$0xff]  ;;  %v11248_v5 = vld [vmem:[%s15894_s1 + $0x68] sm:$0xff]  ;;  %vm901_vm0 = vsmask.f32 3328 }
  0x14   : > { %v11242_v1 = vld [vmem:[%s15894_s1 + $0x38] sm:$0xff]  ;;  %224 = vst [vmem:[#allocation2] sm:$0xf] %v11652_v2  ;;  %1417 = vmatpush.bf16.msra.mxu0 %v11250_v0  ;;  %v11241_v4 = vld [vmem:[%s15894_s1 + $0x30] sm:$0xff]  ;;  %11460 = vmatpush.bf16.msra.mxu2 %v11250_v0  ;;  %v11240_v6 = vld [vmem:[%s15894_s1 + $0x28] sm:$0xff]  ;;  %p218_p10 = scmp.lt.s32.totalorder %s11706_s22, 1 }
  0x15   : > { %11468 = vmatpush.bf16.msra.mxu3 %v11242_v1  ;;  %225 = vst [vmem:[#allocation2 + $0x4] sm:$0xf] %v11652_v2  ;;  %1650 = vmatpush.bf16.msra.mxu1 %v11242_v1  ;;  %v11247_v11 = vld [vmem:[%s15894_s1 + $0x60] sm:$0xff]  ;;  %v11246_v20 = vld [vmem:[%s15894_s1 + $0x58] sm:$0xff]  ;;  %vm902_vm1 = vsmask.f32 7440 }
  0x16   : > { %226 = vst [vmem:[#allocation2 + $0x8] sm:$0x1] %v11652_v2  ;;  %v11239_v12 = vld [vmem:[%s15894_s1 + $0x20] sm:$0xff]  ;;  %v11238_v21 = vld [vmem:[%s15894_s1 + $0x18] sm:$0xff]  ;;  %v11245_v25 = vld [vmem:[%s15894_s1 + $0x50] sm:$0xff]  ;;  %s219_s30 = scalar_select %p218_p10, %s11706_s22, 1 }
  0x17   : > { %227 = vst [vmem:[#allocation2 + $0xc] sm:$0xf] %v11652_v2  ;;  %v11237_v26 = vld [vmem:[%s15894_s1 + $0x10] sm:$0xff]  ;;  %vm11786_vm2 = vmor %vm901_vm0, %vm902_vm1  ;;  %v11244_v31 = vld [vmem:[%s15894_s1 + $0x48] sm:$0xff]  ;;  %vm720_vm3 = vcmask 1043456   ;;  %vm727_vm7 = vcmask 1040384  }
  0x18   : > { %1418 = vmatpush.bf16.msra.mxu0 %v11249_v3  ;;  %228 = vst [vmem:[#allocation2 + $0x10] sm:$0xf] %v11652_v2  ;;  %11461 = vmatpush.bf16.msra.mxu2 %v11249_v3  ;;  %v11236_v32 = vld [vmem:[%s15894_s1 + $0x8] sm:$0xff]  ;;  %v11243_v37 = vld [vmem:[%s15894_s1 + $0x40] sm:$0xff]  ;;  %s11218_s6 = sshll.u32 %s219_s30, 8  ;;  %v11258_v0 = vld [vmem:[%s15894_s1 + $0xb8] sm:$0xff] }
  0x19   : > { %11469 = vmatpush.bf16.msra.mxu3 %v11241_v4  ;;  %1651 = vmatpush.bf16.msra.mxu1 %v11241_v4  ;;  %229 = vst [vmem:[#allocation2 + $0x14] sm:$0x1] %v11652_v2  ;;  %v11235_v38 = vld [vmem:[%s15894_s1] sm:$0xff]  ;;  %s11876_s9 = scalar_lea.vmem %s15893_s0, %s11218_s6  ;;  %vm396_vm4 = vsmask.f32 256  ;;  %v11282_v3 = vld [vmem:[%s15894_s1 + $0xf8] sm:$0xff] }
  0x1a   : > { %230 = vst [vmem:[#allocation2 + $0x18] sm:$0xf] %v11652_v2  ;;  %v346_v40 = vld [vmem:[%s11876_s9 + $0x70] sm:$0xff]  ;;  %v347_v41 = vld [vmem:[%s11876_s9 + $0x78] sm:$0xff]  ;;  %v332_v42 = vld [vmem:[%s11876_s9] sm:$0xff]  ;;  %vm1787_vm11 = vcmask 1042432  }
  0x1b   : > { %v837_v7 = vld [vmem:[#allocation2] sm:$0xf]  ;;  %231 = vst [vmem:[#allocation2 + $0x1c] sm:$0xf] %v11652_v2  ;;  %v378_v43 = vpack.c.bf16 %v346_v40, %v346_v40  ;;  %v379_v44 = vpack.c.bf16 %v347_v41, %v347_v41  ;;  %v11889_v45 = vpack.c.bf16 %v332_v42, %v332_v42  ;;  %v333_v46 = vld [vmem:[%s11876_s9 + $0x8] sm:$0xff]  ;;  %v334_v57 = vld [vmem:[%s11876_s9 + $0x10] sm:$0xff] }
  0x1c   : > { %v838_v8 = vld [vmem:[#allocation2 + $0x4] sm:$0xf]  ;;  %v905_v9 = vshrl.u32 %v837_v7, 16  ;;  %v908_v10 = vshll.u32 %v837_v7, 16  ;;  %1419 = vmatpush.bf16.msra.mxu0 %v11248_v5  ;;  %232 = vst [vmem:[#allocation2 + $0x20] sm:$0x1] %v11652_v2  ;;  %11462 = vmatpush.bf16.msra.mxu2 %v11248_v5  ;;  %v11897_v50 = vpack.c.bf16 %v333_v46, %v333_v46  ;;  %v11923_v5 = vpack.c.bf16 %v334_v57, %v334_v57  ;;  %vm11952_vm10 = vmand %vm727_vm7, %vm396_vm4 }
  0x1d   : > { %11470 = vmatpush.bf16.msra.mxu3 %v11240_v6  ;;  %v914_v13 = vshll.u32 %v838_v8, 16  ;;  %v918_v14 = vshrl.u32 %v838_v8, 16  ;;  %1652 = vmatpush.bf16.msra.mxu1 %v11240_v6  ;;  %v885_v15 = vld [vmem:[#allocation2 + $0x8] sm:$0x1]  ;;  %233 = vst [vmem:[#allocation2 + $0x24] sm:$0xf] %v11652_v2 }
  0x1e   : > { %v907_v16 = vrot.slane %v905_v9, 4  ;;  %v910_v17 = vrot.slane %v908_v10, 5  ;;  %234 = vst [vmem:[#allocation2 + $0x28] sm:$0xf] %v11652_v2  ;;  %v924_v24 = vshll.u32 %v885_v15, 16  ;;  %v519_v47 = vshrl.u32 %v378_v43, 16 }
  0x1f   : > { %v916_v18 = vrot.slane %v914_v13, 5  ;;  %v920_v19 = vrot.slane %v918_v14, 4  ;;  %235 = vst [vmem:[#allocation2 + $0x2c] sm:$0x1] %v11652_v2  ;;  %v527_v48 = vshrl.u32 %v379_v44, 16  ;;  %v348_v49 = vld [vmem:[%s11876_s9 + $0x80] sm:$0xff] }
  0x20   : > { %1420 = vmatpush.bf16.msra.mxu0 %v11247_v11  ;;  %v911_v22 = vor.u32 %v910_v17, %v907_v16  ;;  %236 = vst [vmem:[#allocation2 + $0x30] sm:$0xf] %v11652_v2  ;;  %11463 = vmatpush.bf16.msra.mxu2 %v11247_v11  ;;  %v926_v29 = vrot.slane %v924_v24, 5  ;;  %v400_v51 = vshrl.u32 %v11889_v45, 16  ;;  %v349_v52 = vld [vmem:[%s11876_s9 + $0x88] sm:$0xff]  ;;  %v11902_v53 = vpack.c.bf16 %v348_v49, %v348_v49  ;;  %v335_v60 = vld [vmem:[%s11876_s9 + $0x18] sm:$0xff] }
  0x21   : > { %11471 = vmatpush.bf16.msra.mxu3 %v11239_v12  ;;  %v921_v23 = vor.u32 %v920_v19, %v916_v18  ;;  %1653 = vmatpush.bf16.msra.mxu1 %v11239_v12  ;;  %237 = vst [vmem:[#allocation2 + $0x34] sm:$0xf] %v11652_v2  ;;  %vm397_vm5 = vsmask.f32 4368  ;;  %v521_v54 = vrot.slane %v519_v47, 7  ;;  %v529_v55 = vrot.slane %v527_v48, 7 }
  0x22   : > { %238 = vst [vmem:[#allocation2 + $0x38] sm:$0x1] %v11652_v2  ;;  %v912_v27 = vrot.slane %v911_v22, 4  ;;  %v530_v56 = vshll.u32 %v379_v44, 16  ;;  %v522_v58 = vshll.u32 %v378_v43, 16  ;;  %v11907_v59 = vpack.c.bf16 %v349_v52, %v349_v52  ;;  %v11219_v1 = vld [vmem:[#allocation2] sm:$0xff]  ;;  %vm11936_vm8 = vmor %vm396_vm4, %vm397_vm5 }
  0x23   : > { %239 = vst [vmem:[#allocation2 + $0x3c] sm:$0xf] %v11652_v2  ;;  %v922_v28 = vrot.slane %v921_v23, 4  ;;  %vm721_vm6 = vsmask.f32 7938  ;;  %v11911_v61 = vrot.slane %v400_v51, 7  ;;  %v11929_v9 = vpack.c.bf16 %v335_v60, %v335_v60 }
  0x24   : > { %1421 = vmatpush.bf16.msra.mxu0 %v11246_v20  ;;  %240 = vst [vmem:[#allocation2 + $0x40] sm:$0xf] %v11652_v2  ;;  %11464 = vmatpush.bf16.msra.mxu2 %v11246_v20  ;;  %v917_v33 = vsel %vm11786_vm2, %v912_v27, %v916_v18  ;;  %v403_v62 = vshll.u32 %v11889_v45, 16  ;;  %v408_v63 = vshrl.u32 %v11897_v50, 16  ;;  %v536_v4 = vshrl.u32 %v11902_v53, 16  ;;  %v11290_v8 = vld [vmem:[%s15894_s1 + $0x138] sm:$0xff]  ;;  %vm11944_vm9 = vmand %vm720_vm3, %vm721_vm6 }
  0x25   : > { %11472 = vmatpush.bf16.msra.mxu3 %v11238_v21  ;;  %1654 = vmatpush.bf16.msra.mxu1 %v11238_v21  ;;  %241 = vst [vmem:[#allocation2 + $0x44] sm:$0x1] %v11652_v2  ;;  %v927_v34 = vsel %vm11786_vm2, %v922_v28, %v926_v29  ;;  %v1305_v35 = vunpack.c.l.b16 %v917_v33  ;;  %v525_v6 = vrot.slane %v521_v54, 4  ;;  %v532_v7 = vor.u32 %v530_v56, %v529_v55  ;;  %v350_v10 = vld [vmem:[%s11876_s9 + $0x90] sm:$0xff]  ;;  %v351_v11 = vld [vmem:[%s11876_s9 + $0x98] sm:$0xff]  ;;  %s215_s25 = sand.u32 1, %s11642_s19  }
  0x26   : > { %242 = vst [vmem:[#allocation2 + $0x48] sm:$0xf] %v11652_v2  ;;  %v1306_v36 = vunpack.c.l.b16 %v927_v34  ;;  %v524_v13 = vor.u32 %v522_v58, %v521_v54  ;;  %v534_v14 = vrot.slane %v529_v55, 4  ;;  %v544_v16 = vshrl.u32 %v11907_v59, 16  ;;  %v723_v29 = vld [vmem:[#allocation2 + $0xc] sm:$0xf] }
  0x27   : > { %243 = vst [vmem:[#allocation2 + $0x4c] sm:$0xf] %v11652_v2  ;;  %v382_v17 = vpack.c.bf16 %v350_v10, %v350_v10  ;;  %v410_v20 = vrot.slane %v408_v63, 7  ;;  %v411_v21 = vshll.u32 %v11897_v50, 16  ;;  %v383_v22 = vpack.c.bf16 %v351_v11, %v351_v11  ;;  %v729_v41 = vld [vmem:[#allocation2 + $0x14] sm:$0x1] }
  0x28   : > { %1422 = vmatpush.bf16.msra.mxu0 %v11245_v25  ;;  %244 = vst [vmem:[#allocation2 + $0x50] sm:$0x1] %v11652_v2  ;;  %11465 = vmatpush.bf16.msra.mxu2 %v11245_v25  ;;  %v1337_v39 = vpack.c.b16 %v1306_v36, %v1305_v35  ;;  %v405_v24 = vor.u32 %v403_v62, %v11911_v61  ;;  %v538_v25 = vrot.slane %v536_v4, 7  ;;  %v417_v27 = vshrl.u32 %v11923_v5, 16  ;;  %v337_v4 = vld [vmem:[%s11876_s9 + $0x28] sm:$0xff]  ;;  %s9898_s26 = sshll.u32 %s215_s25, 8 }
  0x29   : > { %11473 = vmatpush.bf16.msra.mxu3 %v11237_v26  ;;  %1655 = vmatpush.bf16.msra.mxu1 %v11237_v26  ;;  %245 = vst [vmem:[#allocation2 + $0x54] sm:$0xf] %v11652_v2  ;;  %v539_v26 = vshll.u32 %v11902_v53, 16  ;;  %v533_v28 = vsel %vm11936_vm8, %v525_v6, %v532_v7  ;;  %v546_v34 = vrot.slane %v544_v16, 7  ;;  %v547_v35 = vshll.u32 %v11907_v59, 16  ;;  %v11281_v16 = vld [vmem:[%s15894_s1 + $0xf0] sm:$0xff] }
  0x2a   : > { %246 = vst [vmem:[#allocation2 + $0x58] sm:$0xf] %v11652_v2  ;;  %v561_v36 = vshrl.u32 %v383_v22, 16  ;;  %v415_v40 = vrot.slane %v410_v20, 4  ;;  %v724_v42 = vsel %vm11944_vm9, %v405_v24, %v723_v29  ;;  %v419_v45 = vrot.slane %v417_v27, 7  ;;  %v352_v27 = vld [vmem:[%s11876_s9 + $0xa0] sm:$0xff] }
  0x2b   : > { %247 = vst [vmem:[#allocation2 + $0x5c] sm:$0x1] %v11652_v2  ;;  %v541_v43 = vor.u32 %v539_v26, %v538_v25  ;;  %v420_v46 = vshll.u32 %v11923_v5, 16  ;;  %v428_v48 = vshll.u32 %v11929_v9, 16  ;;  %v556_v50 = vshll.u32 %v382_v17, 16  ;;  %s15657_s30 = scalar_lea.vmem [#allocation4], %s9898_s26 }
  0x2c   : > { %1423 = vmatpush.bf16.msra.mxu0 %v11244_v31  ;;  %248 = vst [vmem:[#allocation2 + $0x60] sm:$0xf] %v11652_v2  ;;  %11466 = vmatpush.bf16.msra.mxu2 %v11244_v31  ;;  %v425_v31 = vshrl.u32 %v11929_v9, 16  ;;  %v542_v51 = vrot.slane %v538_v25, 4  ;;  %v549_v52 = vor.u32 %v547_v35, %v546_v34  ;;  %v563_v53 = vrot.slane %v561_v36, 7  ;;  %s11459_s6 = sshll.u32 %s11706_s22, 8 }
  0x2d   : > { %11474 = vmatpush.bf16.msra.mxu3 %v11236_v32  ;;  %1656 = vmatpush.bf16.msra.mxu1 %v11236_v32  ;;  %249 = vst [vmem:[#allocation2 + $0x64] sm:$0xf] %v11652_v2  ;;  %v553_v32 = vshrl.u32 %v382_v17, 16  ;;  %v564_v54 = vshll.u32 %v383_v22, 16  ;;  %v730_v56 = vsel %vm11952_vm10, %v415_v40, %v729_v41  ;;  %v551_v57 = vrot.slane %v546_v34, 4  ;;  %v11289_v17 = vld [vmem:[%s15894_s1 + $0x130] sm:$0xff]  ;;  %s9828_s10 = scalar_lea.hbm %s15898_s5, %s11459_s6 }
  0x2e   : > { %250 = vst [vmem:[#allocation2 + $0x68] sm:$0x1] %v11652_v2  ;;  %v427_v47 = vrot.slane %v425_v31, 7  ;;  %v11983_v59 = vor.u32 %v420_v46, %v419_v45  ;;  %v423_v60 = vrot.slane %v419_v45, 4  ;;  %v550_v5 = vsel %vm11936_vm8, %v542_v51, %v549_v52  ;;  %v736_v6 = vld [vmem:[#allocation2 + $0x20] sm:$0x1] }
  0x2f   : > { %251 = vst [vmem:[#allocation2 + $0x6c] sm:$0xf] %v11652_v2  ;;  %v555_v49 = vrot.slane %v553_v32, 7  ;;  %v566_v7 = vor.u32 %v564_v54, %v563_v53  ;;  %v11995_v10 = vpack.c.bf16 %v337_v4, %v337_v4  ;;  %v568_v11 = vrot.slane %v563_v53, 4  ;;  %s9829_s11 = sshll.u32 %s15657_s30, 4  ;;  %s9831_s12 = sshll.u32 %s9828_s10, 4  ;;  %s9830_s11 = int_to_ptr.vmem [resolvable:$true] %s9829_s11  ;;  %s9832_s12 = int_to_ptr.hbm [resolvable:$true] %s9831_s12 }
  0x30   : > { %1424 = vmatpush.bf16.msra.mxu0 %v11243_v37  ;;  %252 = vst [vmem:[#allocation2 + $0x70] sm:$0xf] %v11652_v2  ;;  %11467 = vmatpush.bf16.msra.mxu2 %v11243_v37  ;;  %v430_v62 = vor.u32 %v428_v48, %v427_v47  ;;  %v432_v63 = vrot.slane %v427_v47, 4  ;;  %vm1788_vm12 = vcmask 1046532   ;;  %s9817_s22 = scalar_lea.sflag [#allocation5], %s215_s25  ;;  %s11602_s13 = sshra.s32 %s9832_s12, 4  ;;  %s11603_s13 = int_to_ptr.hbm [resolvable:$true] %s11602_s13 }
  0x31   : > { %11475 = vmatpush.bf16.msra.mxu3 %v11235_v38  ;;  %253 = vst [vmem:[#allocation2 + $0x74] sm:$0x1] %v11652_v2  ;;  %1657 = vmatpush.bf16.msra.mxu1 %v11235_v38  ;;  %v406_v38 = vrot.slane %v11911_v61, 4  ;;  %v11985_v61 = vld [vmem:[#allocation2 + $0x18] sm:$0xf]  ;;  %v442_v26 = vshrl.u32 %v11995_v10, 16  ;;  %vm12348_vm13 = vmor %vm1787_vm11, %vm1788_vm12  ;;  %p11609_p0 = scmp.lt.s32.totalorder %s11603_s13, %s15898_s5 }
  0x32   : > { %254 = vst [vmem:[#allocation2 + $0x78] sm:$0xf] %v11652_v2  ;;  %v431_v22 = vsel %vm11936_vm8, %v423_v60, %v430_v62  ;;  %v737_v24 = vsel %vm11952_vm10, %v432_v63, %v736_v6  ;;  %s11604_s14 = scalar_lea.hbm %s11603_s13, 256  ;;  %s11608_s17 = scalar_lea.hbm %s15898_s5, 512 }
  0x33   : > { %1425 = vmatmul.bf16.vlgmr.msra.gmra.mxu0 %v1337_v39  ;;  %255 = vst [vmem:[#allocation2 + $0x7c] sm:$0xf] %v11652_v2  ;;  %v774_v15 = vld [vmem:[#allocation2 + $0x60] sm:$0xf]  ;;  %v413_v39 = vor.u32 %v411_v21, %v410_v20  ;;  %p11605_p11 = scmp.ne.s32.totalorder %s11603_s13, %s11604_s14  ;;  %p11610_p1 = scmp.lt.s32.totalorder %s11608_s17, %s11604_s14 }
  0x34   : > { %256 = vst [vmem:[#allocation2 + $0x80] sm:$0x1] %v11652_v2  ;;  %2031 = vmatpush.bf16.msrb.mxu2 %v11258_v0  ;;  %1658 = vmatmul.bf16.vlgmr.msra.gmra.mxu1 %v11219_v1  ;;  %v775_v33 = vsel %vm11944_vm9, %v524_v13, %v774_v15  ;;  %v11987_v0 = vor.u32 %v556_v50, %v555_v49  ;;  %v559_v1 = vrot.slane %v555_v49, 4  ;;  %v11257_v15 = vld [vmem:[%s15894_s1 + $0xb0] sm:$0xff] }
  0x35   : > { %257 = vst [vmem:[#allocation2 + $0x84] sm:$0xf] %v11652_v2  ;;  %v778_v19 = vld [vmem:[#allocation2 + $0x68] sm:$0x1]  ;;  %2345 = vmatpush.bf16.msrb.mxu3 %v11282_v3  ;;  %3027 = vmatpush.bf16.msrb.mxu0 %v11290_v8  ;;  %v414_v55 = vsel %vm11936_vm8, %v406_v38, %v413_v39  ;;  %v336_v3 = vld [vmem:[%s11876_s9 + $0x20] sm:$0xff]  ;;  %v12028_v39 = vpack.c.bf16 %v352_v27, %v352_v27  ;;  %p11606_p12 = pnand %p11605_p11, %p11723_p5  ;;  %p11611_p2 = por %p11610_p1, %p11609_p0 }
  0x36   : > { %258 = vst [vmem:[#allocation2 + $0x88] sm:$0xf] %v11652_v2  ;;  %v779_v37 = vsel %vm11952_vm10, %v534_v14, %v778_v19  ;;  %v781_v44 = vld [vmem:[#allocation2 + $0x6c] sm:$0xf]  ;;  %v368_v9 = vpack.c.bf16 %v336_v3, %v336_v3  ;;  %v733_v19 = vsel %vm11944_vm9, %v11983_v59, %v11985_v61 }
  0x37   : > { %259 = vst [vmem:[#allocation2 + $0x8c] sm:$0x1] %v11652_v2  ;;  %v782_v58 = vsel %vm11944_vm9, %v541_v43, %v781_v44  ;;  %p11607_p13 = pneg %p11606_p12 }
  0x38   : > { %260 = vst [vmem:[#allocation2 + $0x90] sm:$0xf] %v11652_v2  ;;  %v434_v20 = vshrl.u32 %v368_v9, 16  ;;  %2032 = vmatpush.bf16.msrb.mxu2 %v11257_v15  ;;  %v437_v44 = vshll.u32 %v368_v9, 16 }
  0x39   : > { %261 = vst [vmem:[#allocation2 + $0x94] sm:$0xf] %v11652_v2  ;;  %v11993_v8 = vld [vmem:[#allocation2 + $0x78] sm:$0xf]  ;;  %2346 = vmatpush.bf16.msrb.mxu3 %v11281_v16  ;;  %3028 = vmatpush.bf16.msrb.mxu0 %v11289_v17  ;;  %p11612_p3 = pnand %p11611_p2, %p11607_p13 }
  0x3a   : > { %262 = vst [vmem:[#allocation2 + $0x98] sm:$0x1] %v11652_v2  ;;  %v789_v25 = vsel %vm11944_vm9, %v11987_v0, %v11993_v8  ;;  %v12024_v34 = vrot.slane %v434_v20, 7 }
  0x3b   : > { %263 = vst [vmem:[#allocation2 + $0x9c] sm:$0xf] %v11652_v2  ;;  %v792_v13 = vld [vmem:[#allocation2 + $0x80] sm:$0x1] }
  0x3c   : > { %264 = vst [vmem:[#allocation2 + $0xa0] sm:$0xf] %v11652_v2  ;;  %v793_v38 = vsel %vm11952_vm10, %v568_v11, %v792_v13 }
  0x3d   : > { %265 = vst [vmem:[#allocation2 + $0xa4] sm:$0x1] %v11652_v2 }
  0x3e   : > { %266 = vst [vmem:[#allocation2 + $0xa8] sm:$0xf] %v11652_v2 }
  0x3f   : > { %267 = vst [vmem:[#allocation2 + $0xac] sm:$0xf] %v11652_v2 }
  0x40   : > { %268 = vst [vmem:[#allocation2 + $0xb0] sm:$0x1] %v11652_v2 }
  0x41   : > { %269 = vst [vmem:[#allocation2 + $0xb4] sm:$0xf] %v11652_v2 }
  0x42   : > { %270 = vst [vmem:[#allocation2 + $0xb8] sm:$0xf] %v11652_v2 }
  0x43   : > { %271 = vst [vmem:[#allocation2 + $0xbc] sm:$0x1] %v11652_v2 }
  0x44   : > { %272 = vst [vmem:[#allocation2 + $0xc0] sm:$0xf] %v11652_v2 }
  0x45   : > { %273 = vst [vmem:[#allocation2 + $0xc4] sm:$0xf] %v11652_v2 }
  0x46   : > { %274 = vst [vmem:[#allocation2 + $0xc8] sm:$0x1] %v11652_v2 }
  0x47   : > { %275 = vst [vmem:[#allocation2 + $0xcc] sm:$0xf] %v11652_v2 }
  0x48   : > { %276 = vst [vmem:[#allocation2 + $0xd0] sm:$0xf] %v11652_v2 }
  0x49   : > { %277 = vst [vmem:[#allocation2 + $0xd4] sm:$0x1] %v11652_v2 }
  0x4a   : > { %278 = vst [vmem:[#allocation3] sm:$0xf] %v11652_v2 }
  0x4b   : > { %279 = vst [vmem:[#allocation3 + $0x4] sm:$0xf] %v11652_v2 }
  0x4c   : > { %280 = vst [vmem:[#allocation3 + $0x8] sm:$0x1] %v11652_v2 }
  0x4d   : > { %281 = vst [vmem:[#allocation3 + $0xc] sm:$0xf] %v11652_v2 }
  0x4e   : > { %282 = vst [vmem:[#allocation3 + $0x10] sm:$0xf] %v11652_v2 }
  0x4f   : > { %283 = vst [vmem:[#allocation3 + $0x14] sm:$0x1] %v11652_v2 }
  0x50   : > { %284 = vst [vmem:[#allocation3 + $0x18] sm:$0xf] %v11652_v2 }
  0x51   : > { %285 = vst [vmem:[#allocation3 + $0x1c] sm:$0xf] %v11652_v2 }
  0x52   : > { %286 = vst [vmem:[#allocation3 + $0x20] sm:$0x1] %v11652_v2 }
  0x53   : > { %287 = vst [vmem:[#allocation3 + $0x24] sm:$0xf] %v11652_v2 }
  0x54   : > { %288 = vst [vmem:[#allocation3 + $0x28] sm:$0xf] %v11652_v2 }
  0x55   : > { %289 = vst [vmem:[#allocation3 + $0x2c] sm:$0x1] %v11652_v2 }
  0x56   : > { %290 = vst [vmem:[#allocation3 + $0x30] sm:$0xf] %v11652_v2 }
  0x57   : > { %291 = vst [vmem:[#allocation3 + $0x34] sm:$0xf] %v11652_v2 }
  0x58   : > { %292 = vst [vmem:[#allocation3 + $0x38] sm:$0x1] %v11652_v2 }
  0x59   : > { %293 = vst [vmem:[#allocation3 + $0x3c] sm:$0xf] %v11652_v2 }
  0x5a   : > { %294 = vst [vmem:[#allocation3 + $0x40] sm:$0xf] %v11652_v2 }
  0x5b   : > { %295 = vst [vmem:[#allocation3 + $0x44] sm:$0x1] %v11652_v2 }
  0x5c   : > { %296 = vst [vmem:[#allocation3 + $0x48] sm:$0xf] %v11652_v2 }
  0x5d   : > { %297 = vst [vmem:[#allocation3 + $0x4c] sm:$0xf] %v11652_v2 }
  0x5e   : > { %298 = vst [vmem:[#allocation3 + $0x50] sm:$0x1] %v11652_v2 }
  0x5f   : > { %299 = vst [vmem:[#allocation3 + $0x54] sm:$0xf] %v11652_v2 }
  0x60   : > { %300 = vst [vmem:[#allocation3 + $0x58] sm:$0xf] %v11652_v2 }
  0x61   : > { %301 = vst [vmem:[#allocation3 + $0x5c] sm:$0x1] %v11652_v2 }
  0x62   : > { %302 = vst [vmem:[#allocation3 + $0x60] sm:$0xf] %v11652_v2 }
  0x63   : > { %303 = vst [vmem:[#allocation3 + $0x64] sm:$0xf] %v11652_v2 }
  0x64   : > { %304 = vst [vmem:[#allocation3 + $0x68] sm:$0x1] %v11652_v2 }
  0x65   : > { %305 = vst [vmem:[#allocation3 + $0x6c] sm:$0xf] %v11652_v2 }
  0x66   : > { %306 = vst [vmem:[#allocation3 + $0x70] sm:$0xf] %v11652_v2 }
  0x67   : > { %307 = vst [vmem:[#allocation3 + $0x74] sm:$0x1] %v11652_v2 }
  0x68   : > { %308 = vst [vmem:[#allocation3 + $0x78] sm:$0xf] %v11652_v2 }
  0x69   : > { %309 = vst [vmem:[#allocation3 + $0x7c] sm:$0xf] %v11652_v2 }
  0x6a   : > { %310 = vst [vmem:[#allocation3 + $0x80] sm:$0x1] %v11652_v2 }
  0x6b   : > { %311 = vst [vmem:[#allocation3 + $0x84] sm:$0xf] %v11652_v2 }
  0x6c   : > { %312 = vst [vmem:[#allocation3 + $0x88] sm:$0xf] %v11652_v2 }
  0x6d   : > { %313 = vst [vmem:[#allocation3 + $0x8c] sm:$0x1] %v11652_v2 }
  0x6e   : > { %314 = vst [vmem:[#allocation3 + $0x90] sm:$0xf] %v11652_v2 }
  0x6f   : > { %315 = vst [vmem:[#allocation3 + $0x94] sm:$0xf] %v11652_v2 }
  0x70   : > { %316 = vst [vmem:[#allocation3 + $0x98] sm:$0x1] %v11652_v2 }
  0x71   : > { %317 = vst [vmem:[#allocation3 + $0x9c] sm:$0xf] %v11652_v2 }
  0x72   : > { %318 = vst [vmem:[#allocation3 + $0xa0] sm:$0xf] %v11652_v2 }
  0x73   : > { %319 = vst [vmem:[#allocation3 + $0xa4] sm:$0x1] %v11652_v2 }
  0x74   : > { %320 = vst [vmem:[#allocation3 + $0xa8] sm:$0xf] %v11652_v2 }
  0x75   : > { %321 = vst [vmem:[#allocation3 + $0xac] sm:$0xf] %v11652_v2 }
  0x76   : > { %322 = vst [vmem:[#allocation3 + $0xb0] sm:$0x1] %v11652_v2 }
  0x77   : > { %323 = vst [vmem:[#allocation3 + $0xb4] sm:$0xf] %v11652_v2 }
  0x78   : > { %324 = vst [vmem:[#allocation3 + $0xb8] sm:$0xf] %v11652_v2 }
  0x79   : > { %325 = vst [vmem:[#allocation3 + $0xbc] sm:$0x1] %v11652_v2 }
  0x7a   : > { %326 = vst [vmem:[#allocation3 + $0xc0] sm:$0xf] %v11652_v2 }
  0x7b   : > { %327 = vst [vmem:[#allocation3 + $0xc4] sm:$0xf] %v11652_v2 }
  0x7c   : > { %328 = vst [vmem:[#allocation3 + $0xc8] sm:$0x1] %v11652_v2 }
  0x7d   : > { %329 = vst [vmem:[#allocation3 + $0xcc] sm:$0xf] %v11652_v2 }
  0x7e   : > { %330 = vst [vmem:[#allocation3 + $0xd0] sm:$0xf] %v11652_v2 }
  0x7f   : > { %331 = vst [vmem:[#allocation3 + $0xd4] sm:$0x1] %v11652_v2  ;;  %v785_v2 = vld [vmem:[#allocation2 + $0x74] sm:$0x1] }
  0x80   : > { %776 = vst [vmem:[#allocation2 + $0x60] sm:$0xf] %v775_v33  ;;  %v786_v14 = vsel %vm11952_vm10, %v551_v57, %v785_v2  ;;  %v567_v33 = vsel %vm11936_vm8, %v559_v1, %v566_v7  ;;  %v439_v1 = vor.u32 %v437_v44, %v12024_v34 }
  0x81   : > { %777 = vst [vmem:[#allocation2 + $0x64] sm:$0xf] %v533_v28 }
  0x82   : > { %780 = vst [vmem:[#allocation2 + $0x68] sm:$0x1] %v779_v37 }
  0x83   : > { %725 = vst [vmem:[#allocation2 + $0xc] sm:$0xf] %v724_v42 }
  0x84   : > { %726 = vst [vmem:[#allocation2 + $0x10] sm:$0xf] %v414_v55 }
  0x85   : > { %731 = vst [vmem:[#allocation2 + $0x14] sm:$0x1] %v730_v56 }
  0x86   : > { %783 = vst [vmem:[#allocation2 + $0x6c] sm:$0xf] %v782_v58 }
  0x87   : > { %v853_v21 = vld [vmem:[#allocation2 + $0x60] sm:$0xf]  ;;  %784 = vst [vmem:[#allocation2 + $0x70] sm:$0xf] %v550_v5 }
  0x88   : > { %v11227_v28 = vld [vmem:[#allocation2 + $0x60] sm:$0xff]  ;;  %v1097_v31 = vshrl.u32 %v853_v21, 16  ;;  %v1100_v32 = vshll.u32 %v853_v21, 16  ;;  %787 = vst [vmem:[#allocation2 + $0x74] sm:$0x1] %v786_v14 }
  0x89   : > { %v854_v29 = vld [vmem:[#allocation2 + $0x64] sm:$0xf]  ;;  %v893_v35 = vld [vmem:[#allocation2 + $0x68] sm:$0x1]  ;;  %1698 = vmatmul.bf16.vlgmr.msra.gmra.mxu3 %v11227_v28  ;;  %734 = vst [vmem:[#allocation2 + $0x18] sm:$0xf] %v733_v19 }
  0x8a   : > { %v1106_v36 = vshll.u32 %v854_v29, 16  ;;  %v1110_v37 = vshrl.u32 %v854_v29, 16  ;;  %v1099_v40 = vrot.slane %v1097_v31, 4  ;;  %v1102_v41 = vrot.slane %v1100_v32, 5  ;;  %v839_v43 = vld [vmem:[#allocation2 + $0xc] sm:$0xf] }
  0x8b   : > { %v1116_v42 = vshll.u32 %v893_v35, 16  ;;  %v840_v47 = vld [vmem:[#allocation2 + $0x10] sm:$0xf]  ;;  %v929_v48 = vshrl.u32 %v839_v43, 16  ;;  %v932_v49 = vshll.u32 %v839_v43, 16  ;;  %v440_v35 = vrot.slane %v12024_v34, 4 }
  0x8c   : > { %v1108_v45 = vrot.slane %v1106_v36, 5  ;;  %v1112_v46 = vrot.slane %v1110_v37, 4  ;;  %v1103_v50 = vor.u32 %v1102_v41, %v1099_v40  ;;  %v886_v52 = vld [vmem:[#allocation2 + $0x14] sm:$0x1]  ;;  %v938_v53 = vshll.u32 %v840_v47, 16  ;;  %v11220_v55 = vld [vmem:[#allocation2 + $0xc] sm:$0xff] }
  0x8d   : > { %v1118_v51 = vrot.slane %v1116_v42, 5  ;;  %v942_v54 = vshrl.u32 %v840_v47, 16  ;;  %v931_v2 = vrot.slane %v929_v48, 4  ;;  %v934_v57 = vrot.slane %v932_v49, 5  ;;  %v855_v59 = vld [vmem:[#allocation2 + $0x6c] sm:$0xf]  ;;  %1663 = vmatmul.bf16.gmra.mxu1 %v11220_v55 }
  0x8e   : > { %v1113_v56 = vor.u32 %v1112_v46, %v1108_v45  ;;  %v948_v58 = vshll.u32 %v886_v52, 16  ;;  %v1104_v60 = vrot.slane %v1103_v50, 4  ;;  %v940_v61 = vrot.slane %v938_v53, 5  ;;  %v856_v63 = vld [vmem:[#allocation2 + $0x70] sm:$0xf]  ;;  %v11256_v34 = vld [vmem:[%s15894_s1 + $0xa8] sm:$0xff] }
  0x8f   : > { %v944_v62 = vrot.slane %v942_v54, 4  ;;  %v935_v4 = vor.u32 %v934_v57, %v931_v2  ;;  %v1121_v6 = vshrl.u32 %v855_v59, 16  ;;  %v894_v11 = vld [vmem:[#allocation2 + $0x74] sm:$0x1]  ;;  %v1124_v13 = vshll.u32 %v855_v59, 16  ;;  %v11228_v43 = vld [vmem:[#allocation2 + $0x6c] sm:$0xff]  ;;  %2033 = vmatpush.bf16.msrb.mxu2 %v11256_v34 }
  0x90   : > { %v1114_v3 = vrot.slane %v1113_v56, 4  ;;  %v950_v5 = vrot.slane %v948_v58, 5  ;;  %v1109_v7 = vsel %vm11786_vm2, %v1104_v60, %v1108_v45  ;;  %v1130_v14 = vshll.u32 %v856_v63, 16  ;;  %735 = vst [vmem:[#allocation2 + $0x1c] sm:$0xf] %v431_v22  ;;  %v11280_v45 = vld [vmem:[%s15894_s1 + $0xe8] sm:$0xff] }
  0x91   : > { %v945_v9 = vor.u32 %v944_v62, %v940_v61  ;;  %v1321_v16 = vunpack.c.l.b16 %v1109_v7  ;;  %v936_v17 = vrot.slane %v935_v4, 4  ;;  %v1123_v20 = vrot.slane %v1121_v6, 4  ;;  %738 = vst [vmem:[#allocation2 + $0x20] sm:$0x1] %v737_v24  ;;  %v739_v21 = vld [vmem:[#allocation2 + $0x24] sm:$0xf]  ;;  %2347 = vmatpush.bf16.msrb.mxu3 %v11280_v45 }
  0x92   : > { %v1119_v15 = vsel %vm11786_vm2, %v1114_v3, %v1118_v51  ;;  %v1126_v19 = vrot.slane %v1124_v13, 5  ;;  %v1132_v29 = vrot.slane %v1130_v14, 5  ;;  %790 = vst [vmem:[#allocation2 + $0x78] sm:$0xf] %v789_v25  ;;  %v1134_v31 = vshrl.u32 %v856_v63, 16  ;;  %v353_v24 = vld [vmem:[%s11876_s9 + $0xa8] sm:$0xff] }
  0x93   : > { %v1322_v27 = vunpack.c.l.b16 %v1119_v15  ;;  %v946_v28 = vrot.slane %v945_v9, 4  ;;  %v941_v22 = vsel %vm11786_vm2, %v936_v17, %v940_v61  ;;  %v1140_v32 = vshll.u32 %v894_v11, 16  ;;  %791 = vst [vmem:[#allocation2 + $0x7c] sm:$0xf] %v567_v33  ;;  %v841_v44 = vld [vmem:[#allocation2 + $0x18] sm:$0xf] }
  0x94   : > { %v1307_v40 = vunpack.c.l.b16 %v941_v22  ;;  %v1127_v41 = vor.u32 %v1126_v19, %v1123_v20  ;;  %794 = vst [vmem:[#allocation2 + $0x80] sm:$0x1] %v793_v38  ;;  %v1136_v0 = vrot.slane %v1134_v31, 4  ;;  %v12048_v25 = vrot.slane %v442_v26, 7  ;;  %v11288_v52 = vld [vmem:[%s15894_s1 + $0x128] sm:$0xff] }
  0x95   : > { %v1345_v36 = vpack.c.b16 %v1322_v27, %v1321_v16  ;;  %v951_v37 = vsel %vm11786_vm2, %v946_v28, %v950_v5  ;;  %v1142_v8 = vrot.slane %v1140_v32, 5  ;;  %v445_v38 = vshll.u32 %v11995_v10, 16  ;;  %3029 = vmatpush.bf16.msrb.mxu0 %v11288_v52  ;;  %v743_v31 = vld [vmem:[#allocation2 + $0x2c] sm:$0x1] }
  0x96   : > { %v1308_v42 = vunpack.c.l.b16 %v951_v37  ;;  %v1128_v33 = vrot.slane %v1127_v41, 4  ;;  %v740_v46 = vsel %vm11944_vm9, %v439_v1, %v739_v21  ;;  %v12059_v47 = vpack.c.bf16 %v353_v24, %v353_v24  ;;  %v339_v41 = vld [vmem:[%s11876_s9 + $0x38] sm:$0xff] }
  0x97   : > { %1465 = vmatmul.bf16.vlgmr.msra.gmra.mxu2 %v1345_v36  ;;  %v1137_v48 = vor.u32 %v1136_v0, %v1132_v29  ;;  %v842_v49 = vld [vmem:[#allocation2 + $0x1c] sm:$0xf]  ;;  %v953_v50 = vshrl.u32 %v841_v44, 16  ;;  %v956_v51 = vshll.u32 %v841_v44, 16  ;;  %v447_v56 = vor.u32 %v445_v38, %v12048_v25  ;;  %741 = vst [vmem:[#allocation2 + $0x24] sm:$0xf] %v740_v46 }
  0x98   : > { %v1338_v26 = vpack.c.b16 %v1308_v42, %v1307_v40  ;;  %v1133_v53 = vsel %vm11786_vm2, %v1128_v33, %v1132_v29  ;;  %v887_v54 = vld [vmem:[#allocation2 + $0x20] sm:$0x1]  ;;  %v962_v55 = vshll.u32 %v842_v49, 16  ;;  %v966_v10 = vshrl.u32 %v842_v49, 16  ;;  %v11221_v3 = vld [vmem:[#allocation2 + $0x18] sm:$0xff]  ;;  %v338_v40 = vld [vmem:[%s11876_s9 + $0x30] sm:$0xff] }
  0x99   : > { %v1138_v2 = vrot.slane %v1137_v48, 4  ;;  %v12067_v57 = vunpack.c.l.b16 %v1133_v53  ;;  %v955_v58 = vrot.slane %v953_v50, 4  ;;  %v958_v59 = vrot.slane %v956_v51, 5  ;;  %v857_v60 = vld [vmem:[#allocation2 + $0x78] sm:$0xf]  ;;  %1703 = vmatmul.bf16.gmra.mxu3 %v11228_v43 }
  0x9a   : > { %1430 = vmatmul.bf16.gmra.mxu0 %v1338_v26  ;;  %v964_v61 = vrot.slane %v962_v55, 5  ;;  %v968_v62 = vrot.slane %v966_v10, 4  ;;  %v972_v63 = vshll.u32 %v887_v54, 16  ;;  %v858_v1 = vld [vmem:[#allocation2 + $0x7c] sm:$0xf]  ;;  %v448_v4 = vsel %vm11936_vm8, %v440_v35, %v447_v56 }
  0x9b   : > { %v1143_v5 = vsel %vm11786_vm2, %v1138_v2, %v1142_v8  ;;  %v959_v6 = vor.u32 %v958_v59, %v955_v58  ;;  %v895_v7 = vld [vmem:[#allocation2 + $0x80] sm:$0x1]  ;;  %v1145_v9 = vshrl.u32 %v857_v60, 16  ;;  %v1148_v11 = vshll.u32 %v857_v60, 16  ;;  %742 = vst [vmem:[#allocation2 + $0x28] sm:$0xf] %v448_v4 }
  0x9c   : > { %v1324_v13 = vunpack.c.l.b16 %v1143_v5  ;;  %v969_v14 = vor.u32 %v968_v62, %v964_v61  ;;  %v974_v15 = vrot.slane %v972_v63, 5  ;;  %v1154_v16 = vshll.u32 %v858_v1, 16  ;;  %v795_v59 = vld [vmem:[#allocation2 + $0x84] sm:$0xf]  ;;  %v11229_v60 = vld [vmem:[#allocation2 + $0x78] sm:$0xff] }
  0x9d   : > { %v960_v17 = vrot.slane %v959_v6, 4  ;;  %v1147_v20 = vrot.slane %v1145_v9, 4  ;;  %v1150_v21 = vrot.slane %v1148_v11, 5  ;;  %v1158_v27 = vshrl.u32 %v858_v1, 16  ;;  %1668 = vmatmul.bf16.gmra.mxu1 %v11221_v3  ;;  %v11255_v3 = vld [vmem:[%s15894_s1 + $0xa0] sm:$0xff] }
  0x9e   : > { %v1346_v28 = vpack.c.b16 %v1324_v13, %v12067_v57  ;;  %v970_v19 = vrot.slane %v969_v14, 4  ;;  %v1156_v29 = vrot.slane %v1154_v16, 5  ;;  %v1164_v22 = vshll.u32 %v895_v7, 16  ;;  %v843_v37 = vld [vmem:[#allocation2 + $0x24] sm:$0xf]  ;;  %2034 = vmatpush.bf16.msrb.mxu2 %v11255_v3 }
  0x9f   : > { %v965_v32 = vsel %vm11786_vm2, %v960_v17, %v964_v61  ;;  %v1151_v35 = vor.u32 %v1150_v21, %v1147_v20  ;;  %v1160_v24 = vrot.slane %v1158_v27, 4  ;;  %v449_v36 = vrot.slane %v12048_v25, 4  ;;  %v11279_v4 = vld [vmem:[%s15894_s1 + $0xe0] sm:$0xff]  ;;  %v799_v16 = vld [vmem:[#allocation2 + $0x8c] sm:$0x1] }
  0xa0   : > { %v975_v42 = vsel %vm11786_vm2, %v970_v19, %v974_v15  ;;  %v1309_v43 = vunpack.c.l.b16 %v965_v32  ;;  %v1166_v0 = vrot.slane %v1164_v22, 5  ;;  %v977_v8 = vshrl.u32 %v843_v37, 16  ;;  %v11287_v6 = vld [vmem:[%s15894_s1 + $0x120] sm:$0xff]  ;;  %2348 = vmatpush.bf16.msrb.mxu3 %v11279_v4  ;;  %v746_v17 = vld [vmem:[#allocation2 + $0x30] sm:$0xf] }
  0xa1   : > { %v1310_v33 = vunpack.c.l.b16 %v975_v42  ;;  %v1152_v44 = vrot.slane %v1151_v35, 4  ;;  %v1161_v34 = vor.u32 %v1160_v24, %v1156_v29  ;;  %v744_v45 = vsel %vm11952_vm10, %v449_v36, %v743_v31  ;;  %v354_v19 = vld [vmem:[%s11876_s9 + $0xb0] sm:$0xff]  ;;  %3030 = vmatpush.bf16.msrb.mxu0 %v11287_v6  ;;  %v355_v24 = vld [vmem:[%s11876_s9 + $0xb8] sm:$0xff]  ;;  %v340_v36 = vld [vmem:[%s11876_s9 + $0x40] sm:$0xff] }
  0xa2   : > { %745 = vst [vmem:[#allocation2 + $0x2c] sm:$0x1] %v744_v45  ;;  %v844_v38 = vld [vmem:[#allocation2 + $0x28] sm:$0xf]  ;;  %v979_v46 = vrot.slane %v977_v8, 4  ;;  %v980_v26 = vshll.u32 %v843_v37, 16  ;;  %v370_v25 = vpack.c.bf16 %v338_v40, %v338_v40  ;;  %v12083_v48 = vpack.c.bf16 %v339_v41, %v339_v41 }
  0xa3   : > { %v1339_v49 = vpack.c.b16 %v1310_v33, %v1309_v43  ;;  %v1157_v50 = vsel %vm11786_vm2, %v1152_v44, %v1156_v29  ;;  %v1162_v51 = vrot.slane %v1161_v34, 4  ;;  %v986_v52 = vshll.u32 %v844_v38, 16  ;;  %v11222_v35 = vld [vmem:[#allocation2 + $0x24] sm:$0xff] }
  0xa4   : > { %v12087_v53 = vunpack.c.l.b16 %v1157_v50  ;;  %v982_v54 = vrot.slane %v980_v26, 5  ;;  %v990_v55 = vshrl.u32 %v844_v38, 16  ;;  %v570_v10 = vshrl.u32 %v12028_v39, 16  ;;  %v341_v43 = vld [vmem:[%s11876_s9 + $0x48] sm:$0xff] }
  0xa5   : > { %v1167_v56 = vsel %vm11786_vm2, %v1162_v51, %v1166_v0  ;;  %v988_v2 = vrot.slane %v986_v52, 5  ;;  %v573_v57 = vshll.u32 %v12028_v39, 16  ;;  %v578_v58 = vshrl.u32 %v12059_v47, 16  ;;  %v356_v0 = vld [vmem:[%s11876_s9 + $0xc0] sm:$0xff] }
  0xa6   : > { %v12094_v61 = vunpack.c.l.b16 %v1167_v56  ;;  %v983_v62 = vor.u32 %v982_v54, %v979_v46  ;;  %v992_v63 = vrot.slane %v990_v55, 4  ;;  %v572_v1 = vrot.slane %v570_v10, 7  ;;  %v750_v54 = vld [vmem:[#allocation2 + $0x38] sm:$0x1] }
  0xa7   : > { %1470 = vmatmul.bf16.gmra.mxu2 %v1346_v28  ;;  %v580_v5 = vrot.slane %v578_v58, 7  ;;  %v581_v39 = vshll.u32 %v12059_v47, 16  ;;  %v451_v7 = vshrl.u32 %v370_v25, 16  ;;  %v454_v9 = vshll.u32 %v370_v25, 16 }
  0xa8   : > { %v1347_v11 = vpack.c.b16 %v12094_v61, %v12087_v53  ;;  %v984_v13 = vrot.slane %v983_v62, 4  ;;  %v993_v14 = vor.u32 %v992_v63, %v988_v2  ;;  %v575_v15 = vor.u32 %v573_v57, %v572_v1 }
  0xa9   : > { %v888_v47 = vld [vmem:[#allocation2 + $0x2c] sm:$0x1]  ;;  %v576_v20 = vrot.slane %v572_v1, 4  ;;  %v583_v21 = vor.u32 %v581_v39, %v580_v5  ;;  %v585_v27 = vrot.slane %v580_v5, 4  ;;  %v453_v28 = vrot.slane %v451_v7, 7  ;;  %1708 = vmatmul.bf16.gmra.mxu3 %v11229_v60 }
  0xaa   : > { %1435 = vmatmul.bf16.gmra.mxu0 %v1339_v49  ;;  %v989_v29 = vsel %vm11786_vm2, %v984_v13, %v988_v2  ;;  %v994_v22 = vrot.slane %v993_v14, 4  ;;  %v996_v31 = vshll.u32 %v888_v47, 16  ;;  %v796_v32 = vsel %vm11944_vm9, %v575_v15, %v795_v59  ;;  %v802_v5 = vld [vmem:[#allocation2 + $0x90] sm:$0xf] }
  0xab   : > { %v12115_v37 = vunpack.c.l.b16 %v989_v29  ;;  %v584_v40 = vsel %vm11936_vm8, %v576_v20, %v583_v21  ;;  %797 = vst [vmem:[#allocation2 + $0x84] sm:$0xf] %v796_v32  ;;  %v800_v41 = vsel %vm11952_vm10, %v585_v27, %v799_v16  ;;  %v456_v42 = vor.u32 %v454_v9, %v453_v28  ;;  %v806_v16 = vld [vmem:[#allocation2 + $0x98] sm:$0x1]  ;;  %v753_v32 = vld [vmem:[#allocation2 + $0x3c] sm:$0xf] }
  0xac   : > { %v998_v8 = vrot.slane %v996_v31, 5  ;;  %798 = vst [vmem:[#allocation2 + $0x88] sm:$0xf] %v584_v40  ;;  %v457_v33 = vrot.slane %v453_v28, 4  ;;  %v459_v44 = vshrl.u32 %v12083_v48, 16  ;;  %v462_v34 = vshll.u32 %v12083_v48, 16 }
  0xad   : > { %801 = vst [vmem:[#allocation2 + $0x8c] sm:$0x1] %v800_v41  ;;  %v747_v45 = vsel %vm11944_vm9, %v456_v42, %v746_v17  ;;  %v386_v38 = vpack.c.bf16 %v354_v19, %v354_v19  ;;  %v387_v46 = vpack.c.bf16 %v355_v24, %v355_v24  ;;  %v372_v26 = vpack.c.bf16 %v340_v36, %v340_v36  ;;  %v11254_v41 = vld [vmem:[%s15894_s1 + $0x98] sm:$0xff] }
  0xae   : > { %v999_v25 = vsel %vm11786_vm2, %v994_v22, %v998_v8  ;;  %1673 = vmatmul.bf16.gmra.mxu1 %v11222_v35  ;;  %v461_v49 = vrot.slane %v459_v44, 7  ;;  %748 = vst [vmem:[#allocation2 + $0x30] sm:$0xf] %v747_v45  ;;  %v12129_v50 = vpack.c.bf16 %v341_v43, %v341_v43  ;;  %v12131_v51 = vpack.c.bf16 %v356_v0, %v356_v0  ;;  %v11278_v42 = vld [vmem:[%s15894_s1 + $0xd8] sm:$0xff] }
  0xaf   : > { %v1312_v52 = vunpack.c.l.b16 %v999_v25  ;;  %v587_v48 = vshrl.u32 %v386_v38, 16  ;;  %v590_v55 = vshll.u32 %v386_v38, 16  ;;  %v595_v10 = vshrl.u32 %v387_v46, 16  ;;  %v11286_v0 = vld [vmem:[%s15894_s1 + $0x118] sm:$0xff]  ;;  %2035 = vmatpush.bf16.msrb.mxu2 %v11254_v41  ;;  %2349 = vmatpush.bf16.msrb.mxu3 %v11278_v42 }
  0xb0   : > { %v464_v56 = vor.u32 %v462_v34, %v461_v49  ;;  %v466_v2 = vrot.slane %v461_v49, 4  ;;  %v598_v57 = vshll.u32 %v387_v46, 16  ;;  %v468_v58 = vshrl.u32 %v372_v26, 16  ;;  %3031 = vmatpush.bf16.msrb.mxu0 %v11286_v0 }
  0xb1   : > { %v1340_v59 = vpack.c.b16 %v1312_v52, %v12115_v37  ;;  %v589_v60 = vrot.slane %v587_v48, 7  ;;  %v597_v62 = vrot.slane %v595_v10, 7  ;;  %v471_v63 = vshll.u32 %v372_v26, 16 }
  0xb2   : > { %v859_v1 = vld [vmem:[#allocation2 + $0x84] sm:$0xf]  ;;  %v465_v3 = vsel %vm11936_vm8, %v457_v33, %v464_v56  ;;  %v751_v4 = vsel %vm11952_vm10, %v466_v2, %v750_v54  ;;  %v12138_v39 = vrot.slane %v468_v58, 7  ;;  %v476_v6 = vshrl.u32 %v12129_v50, 16 }
  0xb3   : > { %v860_v7 = vld [vmem:[#allocation2 + $0x88] sm:$0xf]  ;;  %v1169_v9 = vshrl.u32 %v859_v1, 16  ;;  %v1172_v13 = vshll.u32 %v859_v1, 16  ;;  %v592_v14 = vor.u32 %v590_v55, %v589_v60  ;;  %v593_v15 = vrot.slane %v589_v60, 4 }
  0xb4   : > { %v11230_v17 = vld [vmem:[#allocation2 + $0x84] sm:$0xff]  ;;  %v896_v47 = vld [vmem:[#allocation2 + $0x8c] sm:$0x1]  ;;  %v1178_v20 = vshll.u32 %v860_v7, 16  ;;  %v1182_v21 = vshrl.u32 %v860_v7, 16  ;;  %v600_v27 = vor.u32 %v598_v57, %v597_v62  ;;  %v473_v28 = vor.u32 %v471_v63, %v12138_v39 }
  0xb5   : > { %749 = vst [vmem:[#allocation2 + $0x34] sm:$0xf] %v465_v3  ;;  %v1171_v19 = vrot.slane %v1169_v9, 4  ;;  %v1174_v29 = vrot.slane %v1172_v13, 5  ;;  %v1188_v22 = vshll.u32 %v896_v47, 16  ;;  %v602_v31 = vrot.slane %v597_v62, 4 }
  0xb6   : > { %752 = vst [vmem:[#allocation2 + $0x38] sm:$0x1] %v751_v4  ;;  %v1180_v35 = vrot.slane %v1178_v20, 5  ;;  %v1184_v24 = vrot.slane %v1182_v21, 4  ;;  %v845_v36 = vld [vmem:[#allocation2 + $0x30] sm:$0xf]  ;;  %v601_v37 = vsel %vm11936_vm8, %v593_v15, %v600_v27  ;;  %v803_v40 = vsel %vm11944_vm9, %v592_v14, %v802_v5 }
  0xb7   : > { %1475 = vmatmul.bf16.gmra.mxu2 %v1347_v11  ;;  %v1175_v43 = vor.u32 %v1174_v29, %v1171_v19  ;;  %v1190_v53 = vrot.slane %v1188_v22, 5  ;;  %v1001_v61 = vshrl.u32 %v845_v36, 16  ;;  %v1004_v11 = vshll.u32 %v845_v36, 16  ;;  %804 = vst [vmem:[#allocation2 + $0x90] sm:$0xf] %v803_v40  ;;  %v357_v63 = vld [vmem:[%s11876_s9 + $0xc8] sm:$0xff] }
  0xb8   : > { %v1185_v8 = vor.u32 %v1184_v24, %v1180_v35  ;;  %805 = vst [vmem:[#allocation2 + $0x94] sm:$0xf] %v601_v37  ;;  %v807_v33 = vsel %vm11952_vm10, %v602_v31, %v806_v16  ;;  %v474_v44 = vrot.slane %v12138_v39, 4  ;;  %v478_v34 = vrot.slane %v476_v6, 7  ;;  %v757_v54 = vld [vmem:[#allocation2 + $0x44] sm:$0x1] }
  0xb9   : > { %v1176_v45 = vrot.slane %v1175_v43, 4  ;;  %v1003_v38 = vrot.slane %v1001_v61, 4  ;;  %v1006_v46 = vrot.slane %v1004_v11, 5  ;;  %808 = vst [vmem:[#allocation2 + $0x98] sm:$0x1] %v807_v33  ;;  %v479_v26 = vshll.u32 %v12129_v50, 16  ;;  %1713 = vmatmul.bf16.gmra.mxu3 %v11230_v17 }
  0xba   : > { %1440 = vmatmul.bf16.gmra.mxu0 %v1340_v59  ;;  %v1186_v25 = vrot.slane %v1185_v8, 4  ;;  %v483_v49 = vrot.slane %v478_v34, 4  ;;  %v754_v52 = vsel %vm11944_vm9, %v473_v28, %v753_v32  ;;  %v604_v57 = vshrl.u32 %v12131_v51, 16  ;;  %v342_v8 = vld [vmem:[%s11876_s9 + $0x50] sm:$0xff] }
  0xbb   : > { %v1181_v48 = vsel %vm11786_vm2, %v1176_v45, %v1180_v35  ;;  %v1007_v10 = vor.u32 %v1006_v46, %v1003_v38  ;;  %v481_v2 = vor.u32 %v479_v26, %v478_v34  ;;  %755 = vst [vmem:[#allocation2 + $0x3c] sm:$0xf] %v754_v52  ;;  %v12174_v17 = vpack.c.bf16 %v357_v63, %v357_v63  ;;  %v809_v46 = vld [vmem:[#allocation2 + $0x9c] sm:$0xf] }
  0xbc   : > { %v846_v55 = vld [vmem:[#allocation2 + $0x34] sm:$0xf]  ;;  %v1191_v50 = vsel %vm11786_vm2, %v1186_v25, %v1190_v53  ;;  %v1327_v58 = vunpack.c.l.b16 %v1181_v48  ;;  %v758_v9 = vsel %vm11952_vm10, %v483_v49, %v757_v54  ;;  %v12178_v37 = vrot.slane %v604_v57, 7 }
  0xbd   : > { %v11223_v56 = vld [vmem:[#allocation2 + $0x30] sm:$0xff]  ;;  %v889_v59 = vld [vmem:[#allocation2 + $0x38] sm:$0x1]  ;;  %v1010_v60 = vshll.u32 %v846_v55, 16  ;;  %v1014_v62 = vshrl.u32 %v846_v55, 16  ;;  %v1328_v1 = vunpack.c.l.b16 %v1191_v50  ;;  %v1008_v3 = vrot.slane %v1007_v10, 4 }
  0xbe   : > { %v1020_v4 = vshll.u32 %v889_v59, 16  ;;  %v482_v5 = vsel %vm11936_vm8, %v474_v44, %v481_v2  ;;  %v861_v7 = vld [vmem:[#allocation2 + $0x90] sm:$0xf]  ;;  %1678 = vmatmul.bf16.gmra.mxu1 %v11223_v56  ;;  %759 = vst [vmem:[#allocation2 + $0x44] sm:$0x1] %v758_v9  ;;  %v607_v0 = vshll.u32 %v12131_v51, 16 }
  0xbf   : > { %v1012_v39 = vrot.slane %v1010_v60, 5  ;;  %v1016_v6 = vrot.slane %v1014_v62, 4  ;;  %756 = vst [vmem:[#allocation2 + $0x40] sm:$0xf] %v482_v5  ;;  %v862_v14 = vld [vmem:[#allocation2 + $0x94] sm:$0xf]  ;;  %v1348_v19 = vpack.c.b16 %v1328_v1, %v1327_v58  ;;  %v374_v58 = vpack.c.bf16 %v342_v8, %v342_v8 }
  0xc0   : > { %v1022_v13 = vrot.slane %v1020_v4, 5  ;;  %v1193_v15 = vshrl.u32 %v861_v7, 16  ;;  %v1196_v16 = vshll.u32 %v861_v7, 16  ;;  %v897_v21 = vld [vmem:[#allocation2 + $0x98] sm:$0x1]  ;;  %v1202_v27 = vshll.u32 %v862_v14, 16 }
  0xc1   : > { %v1013_v47 = vsel %vm11786_vm2, %v1008_v3, %v1012_v39  ;;  %v1017_v20 = vor.u32 %v1016_v6, %v1012_v39  ;;  %v1206_v28 = vshrl.u32 %v862_v14, 16  ;;  %v1212_v31 = vshll.u32 %v897_v21, 16  ;;  %v11231_v26 = vld [vmem:[#allocation2 + $0x90] sm:$0xff]  ;;  %v343_v50 = vld [vmem:[%s11876_s9 + $0x58] sm:$0xff]  ;;  %v813_v9 = vld [vmem:[#allocation2 + $0xa4] sm:$0x1] }
  0xc2   : > { %v1195_v29 = vrot.slane %v1193_v15, 4  ;;  %v1198_v22 = vrot.slane %v1196_v16, 5  ;;  %v1204_v35 = vrot.slane %v1202_v27, 5  ;;  %v847_v36 = vld [vmem:[#allocation2 + $0x3c] sm:$0xf]  ;;  %v1313_v40 = vunpack.c.l.b16 %v1013_v47  ;;  %v11253_v48 = vld [vmem:[%s15894_s1 + $0x90] sm:$0xff] }
  0xc3   : > { %v1018_v32 = vrot.slane %v1017_v20, 4  ;;  %v1208_v24 = vrot.slane %v1206_v28, 4  ;;  %v1025_v42 = vshrl.u32 %v847_v36, 16  ;;  %v1028_v43 = vshll.u32 %v847_v36, 16  ;;  %v11277_v51 = vld [vmem:[%s15894_s1 + $0xd0] sm:$0xff]  ;;  %2036 = vmatpush.bf16.msrb.mxu2 %v11253_v48 }
  0xc4   : > { %v1199_v41 = vor.u32 %v1198_v22, %v1195_v29  ;;  %v1214_v11 = vrot.slane %v1212_v31, 5  ;;  %v609_v54 = vor.u32 %v607_v0, %v12178_v37  ;;  %v612_v2 = vshrl.u32 %v12174_v17, 16  ;;  %v11285_v57 = vld [vmem:[%s15894_s1 + $0x110] sm:$0xff]  ;;  %2350 = vmatpush.bf16.msrb.mxu3 %v11277_v51  ;;  %v359_v29 = vld [vmem:[%s11876_s9 + $0xd8] sm:$0xff]  ;;  %v344_v22 = vld [vmem:[%s11876_s9 + $0x60] sm:$0xff] }
  0xc5   : > { %v1023_v53 = vsel %vm11786_vm2, %v1018_v32, %v1022_v13  ;;  %v1209_v61 = vor.u32 %v1208_v24, %v1204_v35  ;;  %v1027_v45 = vrot.slane %v1025_v42, 4  ;;  %v1030_v38 = vrot.slane %v1028_v43, 5  ;;  %v890_v10 = vld [vmem:[#allocation2 + $0x44] sm:$0x1]  ;;  %3032 = vmatpush.bf16.msrb.mxu0 %v11285_v57  ;;  %v358_v21 = vld [vmem:[%s11876_s9 + $0xd0] sm:$0xff] }
  0xc6   : > { %v1314_v33 = vunpack.c.l.b16 %v1023_v53  ;;  %v1200_v44 = vrot.slane %v1199_v41, 4  ;;  %v848_v34 = vld [vmem:[#allocation2 + $0x40] sm:$0xf]  ;;  %v1044_v3 = vshll.u32 %v890_v10, 16  ;;  %v610_v4 = vrot.slane %v12178_v37, 4 }
  0xc7   : > { %1480 = vmatmul.bf16.gmra.mxu2 %v1348_v19  ;;  %v1210_v25 = vrot.slane %v1209_v61, 4  ;;  %v1034_v49 = vshll.u32 %v848_v34, 16  ;;  %v1038_v52 = vshrl.u32 %v848_v34, 16  ;;  %v1031_v56 = vor.u32 %v1030_v38, %v1027_v45  ;;  %v11224_v13 = vld [vmem:[#allocation2 + $0x3c] sm:$0xff]  ;;  %v760_v53 = vld [vmem:[#allocation2 + $0x48] sm:$0xf] }
  0xc8   : > { %v1341_v55 = vpack.c.b16 %v1314_v33, %v1313_v40  ;;  %v1205_v59 = vsel %vm11786_vm2, %v1200_v44, %v1204_v35  ;;  %v614_v5 = vrot.slane %v612_v2, 7  ;;  %v615_v6 = vshll.u32 %v12174_v17, 16  ;;  %v764_v33 = vld [vmem:[#allocation2 + $0x50] sm:$0x1] }
  0xc9   : > { %v1215_v60 = vsel %vm11786_vm2, %v1210_v25, %v1214_v11  ;;  %v1036_v62 = vrot.slane %v1034_v49, 5  ;;  %v1040_v63 = vrot.slane %v1038_v52, 4  ;;  %v1032_v1 = vrot.slane %v1031_v56, 4  ;;  %1718 = vmatmul.bf16.gmra.mxu3 %v11231_v26  ;;  %v816_v25 = vld [vmem:[#allocation2 + $0xa8] sm:$0xf] }
  0xca   : > { %1445 = vmatmul.bf16.gmra.mxu0 %v1341_v55  ;;  %v810_v7 = vsel %vm11944_vm9, %v609_v54, %v809_v46  ;;  %v375_v14 = vpack.c.bf16 %v343_v50, %v343_v50  ;;  %v12204_v15 = vunpack.c.l.b16 %v1205_v59  ;;  %v1330_v16 = vunpack.c.l.b16 %v1215_v60  ;;  %v345_v55 = vld [vmem:[%s11876_s9 + $0x68] sm:$0xff]  ;;  %v820_v50 = vld [vmem:[#allocation2 + $0xb0] sm:$0x1] }
  0xcb   : > { %v1041_v39 = vor.u32 %v1040_v63, %v1036_v62  ;;  %v1046_v47 = vrot.slane %v1044_v3, 5  ;;  %v619_v20 = vrot.slane %v614_v5, 4  ;;  %811 = vst [vmem:[#allocation2 + $0x9c] sm:$0xf] %v810_v7  ;;  %v1037_v27 = vsel %vm11786_vm2, %v1032_v1, %v1036_v62 }
  0xcc   : > { %v617_v28 = vor.u32 %v615_v6, %v614_v5  ;;  %v485_v19 = vshrl.u32 %v374_v58, 16  ;;  %v488_v32 = vshll.u32 %v374_v58, 16  ;;  %v493_v35 = vshrl.u32 %v375_v14, 16  ;;  %v361_v6 = vld [vmem:[%s11876_s9 + $0xe8] sm:$0xff] }
  0xcd   : > { %v1042_v17 = vrot.slane %v1041_v39, 4  ;;  %v814_v31 = vsel %vm11952_vm10, %v619_v20, %v813_v9  ;;  %v496_v24 = vshll.u32 %v375_v14, 16  ;;  %v390_v41 = vpack.c.bf16 %v358_v21, %v358_v21  ;;  %v360_v39 = vld [vmem:[%s11876_s9 + $0xe0] sm:$0xff] }
  0xce   : > { %v618_v37 = vsel %vm11936_vm8, %v610_v4, %v617_v28  ;;  %815 = vst [vmem:[#allocation2 + $0xa4] sm:$0x1] %v814_v31  ;;  %1683 = vmatmul.bf16.gmra.mxu1 %v11224_v13  ;;  %v487_v40 = vrot.slane %v485_v19, 7  ;;  %v1315_v42 = vunpack.c.l.b16 %v1037_v27  ;;  %v495_v43 = vrot.slane %v493_v35, 7  ;;  %v11284_v28 = vld [vmem:[%s15894_s1 + $0x108] sm:$0xff] }
  0xcf   : > { %v1047_v36 = vsel %vm11786_vm2, %v1042_v17, %v1046_v47  ;;  %812 = vst [vmem:[#allocation2 + $0xa0] sm:$0xf] %v618_v37  ;;  %v391_v61 = vpack.c.bf16 %v359_v29, %v359_v29  ;;  %v12217_v11 = vpack.c.bf16 %v344_v22, %v344_v22  ;;  %v621_v44 = vshrl.u32 %v390_v41, 16  ;;  %v11252_v47 = vld [vmem:[%s15894_s1 + $0x88] sm:$0xff]  ;;  %3033 = vmatpush.bf16.msrb.mxu0 %v11284_v28 }
  0xd0   : > { %v490_v0 = vor.u32 %v488_v32, %v487_v40  ;;  %v491_v8 = vrot.slane %v487_v40, 4  ;;  %v624_v34 = vshll.u32 %v390_v41, 16  ;;  %v1316_v45 = vunpack.c.l.b16 %v1047_v36  ;;  %v11276_v17 = vld [vmem:[%s15894_s1 + $0xc8] sm:$0xff]  ;;  %2037 = vmatpush.bf16.msrb.mxu2 %v11252_v47 }
  0xd1   : > { %v498_v38 = vor.u32 %v496_v24, %v495_v43  ;;  %v500_v46 = vrot.slane %v495_v43, 4  ;;  %v629_v26 = vshrl.u32 %v391_v61, 16  ;;  %v1349_v49 = vpack.c.b16 %v1330_v16, %v12204_v15  ;;  %2351 = vmatpush.bf16.msrb.mxu3 %v11276_v17 }
  0xd2   : > { %v863_v52 = vld [vmem:[#allocation2 + $0x9c] sm:$0xf]  ;;  %v761_v54 = vsel %vm11944_vm9, %v490_v0, %v760_v53  ;;  %v623_v48 = vrot.slane %v621_v44, 7  ;;  %v632_v51 = vshll.u32 %v391_v61, 16  ;;  %v502_v62 = vshrl.u32 %v12217_v11, 16 }
  0xd3   : > { %v1217_v10 = vshrl.u32 %v863_v52, 16  ;;  %v1220_v56 = vshll.u32 %v863_v52, 16  ;;  %v499_v2 = vsel %vm11936_vm8, %v491_v8, %v498_v38  ;;  %762 = vst [vmem:[#allocation2 + $0x48] sm:$0xf] %v761_v54  ;;  %v765_v57 = vsel %vm11952_vm10, %v500_v46, %v764_v33  ;;  %v11298_v44 = vld [vmem:[%s15894_s1 + $0x178] sm:$0xff] }
  0xd4   : > { %763 = vst [vmem:[#allocation2 + $0x4c] sm:$0xf] %v499_v2  ;;  %v626_v58 = vor.u32 %v624_v34, %v623_v48  ;;  %v627_v59 = vrot.slane %v623_v48, 4  ;;  %v631_v60 = vrot.slane %v629_v26, 7  ;;  %v1342_v63 = vpack.c.b16 %v1316_v45, %v1315_v42  ;;  %3453 = vmatpush.bf16.msrb.mxu1 %v11298_v44  ;;  %v11251_v44 = vld [vmem:[%s15894_s1 + $0x80] sm:$0xff] }
  0xd5   : > { %v898_v1 = vld [vmem:[#allocation2 + $0xa4] sm:$0x1]  ;;  %v1219_v3 = vrot.slane %v1217_v10, 4  ;;  %v1222_v4 = vrot.slane %v1220_v56, 5  ;;  %766 = vst [vmem:[#allocation2 + $0x50] sm:$0x1] %v765_v57  ;;  %v12228_v5 = vpack.c.bf16 %v345_v55, %v345_v55  ;;  %v12252_v42 = vpack.c.bf16 %v360_v39, %v360_v39  ;;  %2038 = vmatpush.bf16.msrb.mxu2 %v11251_v44 }
  0xd6   : > { %v11232_v7 = vld [vmem:[#allocation2 + $0x9c] sm:$0xff]  ;;  %v1236_v13 = vshll.u32 %v898_v1, 16  ;;  %v634_v14 = vor.u32 %v632_v51, %v631_v60  ;;  %v636_v15 = vrot.slane %v631_v60, 4  ;;  %v817_v16 = vsel %vm11944_vm9, %v626_v58, %v816_v25 }
  0xd7   : > { %1485 = vmatmul.bf16.gmra.mxu2 %v1349_v49  ;;  %v864_v9 = vld [vmem:[#allocation2 + $0xa0] sm:$0xf]  ;;  %v1223_v20 = vor.u32 %v1222_v4, %v1219_v3  ;;  %818 = vst [vmem:[#allocation2 + $0xa8] sm:$0xf] %v817_v16  ;;  %v12247_v31 = vrot.slane %v502_v62, 7  ;;  %v505_v36 = vshll.u32 %v12217_v11, 16  ;;  %v12254_v43 = vpack.c.bf16 %v361_v6, %v361_v6 }
  0xd8   : > { %v1226_v21 = vshll.u32 %v864_v9, 16  ;;  %v1230_v27 = vshrl.u32 %v864_v9, 16  ;;  %v1238_v19 = vrot.slane %v1236_v13, 5  ;;  %v635_v29 = vsel %vm11936_vm8, %v627_v59, %v634_v14 }
  0xd9   : > { %v821_v22 = vsel %vm11952_vm10, %v636_v15, %v820_v50  ;;  %v1224_v32 = vrot.slane %v1223_v20, 4  ;;  %819 = vst [vmem:[#allocation2 + $0xac] sm:$0xf] %v635_v29  ;;  %1723 = vmatmul.bf16.gmra.mxu3 %v11232_v7  ;;  %v508_v40 = vrot.slane %v12247_v31, 4  ;;  %v510_v41 = vshrl.u32 %v12228_v5, 16 }
  0xda   : > { %1450 = vmatmul.bf16.gmra.mxu0 %v1342_v63  ;;  %v1228_v35 = vrot.slane %v1226_v21, 5  ;;  %v1232_v24 = vrot.slane %v1230_v27, 4  ;;  %v849_v37 = vld [vmem:[#allocation2 + $0x48] sm:$0xf]  ;;  %822 = vst [vmem:[#allocation2 + $0xb0] sm:$0x1] %v821_v22  ;;  %v507_v26 = vor.u32 %v505_v36, %v12247_v31 }
  0xdb   : > { %v850_v0 = vld [vmem:[#allocation2 + $0x4c] sm:$0xf]  ;;  %v1049_v8 = vshrl.u32 %v849_v37, 16  ;;  %v1052_v33 = vshll.u32 %v849_v37, 16  ;;  %v512_v10 = vrot.slane %v510_v41, 7  ;;  %v513_v56 = vshll.u32 %v12228_v5, 16 }
  0xdc   : > { %v1229_v53 = vsel %vm11786_vm2, %v1224_v32, %v1228_v35  ;;  %v1233_v61 = vor.u32 %v1232_v24, %v1228_v35  ;;  %v11225_v11 = vld [vmem:[#allocation2 + $0x48] sm:$0xff]  ;;  %v891_v45 = vld [vmem:[#allocation2 + $0x50] sm:$0x1]  ;;  %v1058_v38 = vshll.u32 %v850_v0, 16  ;;  %v1062_v46 = vshrl.u32 %v850_v0, 16 }
  0xdd   : > { %v1331_v34 = vunpack.c.l.b16 %v1229_v53  ;;  %v1051_v49 = vrot.slane %v1049_v8, 4  ;;  %v1054_v52 = vrot.slane %v1052_v33, 5  ;;  %v1068_v54 = vshll.u32 %v891_v45, 16  ;;  %v767_v15 = vld [vmem:[#allocation2 + $0x54] sm:$0xf] }
  0xde   : > { %v1234_v25 = vrot.slane %v1233_v61, 4  ;;  %v1060_v48 = vrot.slane %v1058_v38, 5  ;;  %v1064_v51 = vrot.slane %v1062_v46, 4  ;;  %v865_v55 = vld [vmem:[#allocation2 + $0xa8] sm:$0xf]  ;;  %1688 = vmatmul.bf16.gmra.mxu1 %v11225_v11  ;;  %v515_v1 = vor.u32 %v513_v56, %v512_v10  ;;  %v11297_v36 = vld [vmem:[%s15894_s1 + $0x170] sm:$0xff] }
  0xdf   : > { %v1055_v57 = vor.u32 %v1054_v52, %v1051_v49  ;;  %v1070_v50 = vrot.slane %v1068_v54, 5  ;;  %v1241_v58 = vshrl.u32 %v865_v55, 16  ;;  %v1244_v63 = vshll.u32 %v865_v55, 16  ;;  %v771_v29 = vld [vmem:[#allocation2 + $0x5c] sm:$0x1]  ;;  %3454 = vmatpush.bf16.msrb.mxu1 %v11297_v36 }
  0xe0   : > { %v1239_v2 = vsel %vm11786_vm2, %v1234_v25, %v1238_v19  ;;  %v1065_v60 = vor.u32 %v1064_v51, %v1060_v48  ;;  %v866_v62 = vld [vmem:[#allocation2 + $0xac] sm:$0xf]  ;;  %v516_v21 = vsel %vm11936_vm8, %v508_v40, %v515_v1  ;;  %v517_v35 = vrot.slane %v512_v10, 4  ;;  %v827_v51 = vld [vmem:[#allocation2 + $0xbc] sm:$0x1] }
  0xe1   : > { %v1332_v59 = vunpack.c.l.b16 %v1239_v2  ;;  %v1056_v3 = vrot.slane %v1055_v57, 4  ;;  %v899_v4 = vld [vmem:[#allocation2 + $0xb0] sm:$0x1]  ;;  %v1243_v39 = vrot.slane %v1241_v58, 4  ;;  %v1250_v6 = vshll.u32 %v866_v62, 16  ;;  %v11233_v31 = vld [vmem:[#allocation2 + $0xa8] sm:$0xff] }
  0xe2   : > { %v1254_v7 = vshrl.u32 %v866_v62, 16  ;;  %v1066_v13 = vrot.slane %v1065_v60, 4  ;;  %v1246_v14 = vrot.slane %v1244_v63, 5  ;;  %v1260_v5 = vshll.u32 %v899_v4, 16  ;;  %770 = vst [vmem:[#allocation2 + $0x58] sm:$0xf] %v516_v21 }
  0xe3   : > { %v1350_v9 = vpack.c.b16 %v1332_v59, %v1331_v34  ;;  %v1061_v16 = vsel %vm11786_vm2, %v1056_v3, %v1060_v48  ;;  %v1252_v47 = vrot.slane %v1250_v6, 5  ;;  %v768_v24 = vsel %vm11944_vm9, %v507_v26, %v767_v15  ;;  %v2466_v37 = vld [vmem:[#allocation2 + $0xc] sm:$0xf]  ;;  %v11275_v34 = vld [vmem:[%s15894_s1 + $0xc0] sm:$0xff]  ;;  %v823_v26 = vld [vmem:[#allocation2 + $0xb4] sm:$0xf] }
  0xe4   : > { %v1256_v20 = vrot.slane %v1254_v7, 4  ;;  %v1071_v27 = vsel %vm11786_vm2, %v1066_v13, %v1070_v50  ;;  %v1317_v17 = vunpack.c.l.b16 %v1061_v16  ;;  %v1247_v28 = vor.u32 %v1246_v14, %v1243_v39  ;;  %769 = vst [vmem:[#allocation2 + $0x54] sm:$0xf] %v768_v24  ;;  %v12298_v55 = vld [vmem:[#allocation2 + $0x10] sm:$0xf]  ;;  %2352 = vmatpush.bf16.msrb.mxu3 %v11275_v34  ;;  %v11295_v60 = vld [vmem:[%s15894_s1 + $0x160] sm:$0xff]  ;;  %v1659_v34 = vpop.f32.mrf.mxu1 }
  0xe5   : > { %v1262_v19 = vrot.slane %v1260_v5, 5  ;;  %v1318_v22 = vunpack.c.l.b16 %v1071_v27  ;;  %v638_v41 = vshrl.u32 %v12252_v42, 16  ;;  %v641_v53 = vshll.u32 %v12252_v42, 16  ;;  %v11296_v42 = vld [vmem:[%s15894_s1 + $0x168] sm:$0xff] }
  0xe6   : > { %v1257_v32 = vor.u32 %v1256_v20, %v1252_v47  ;;  %v1248_v40 = vrot.slane %v1247_v28, 4  ;;  %v646_v61 = vshrl.u32 %v12254_v43, 16  ;;  %v772_v33 = vsel %vm11952_vm10, %v517_v35, %v771_v29  ;;  %3455 = vmatpush.bf16.msrb.mxu1 %v11296_v42  ;;  %v12316_v28 = vld [vmem:[#allocation2 + $0x14] sm:$0x1] }
  0xe7   : > { %1490 = vmatmul.bf16.gmra.mxu2 %v1350_v9  ;;  %v1343_v0 = vpack.c.b16 %v1318_v22, %v1317_v17  ;;  %v649_v11 = vshll.u32 %v12254_v43, 16  ;;  %773 = vst [vmem:[#allocation2 + $0x5c] sm:$0x1] %v772_v33  ;;  %v640_v38 = vrot.slane %v638_v41, 7  ;;  %v11283_v43 = vld [vmem:[%s15894_s1 + $0x100] sm:$0xff]  ;;  %v2515_v25 = vshrl.u32 %v2466_v37, 16 }
  0xe8   : > { %v1258_v8 = vrot.slane %v1257_v32, 4  ;;  %v1253_v45 = vsel %vm11786_vm2, %v1248_v40, %v1252_v47  ;;  %v648_v46 = vrot.slane %v646_v61, 7  ;;  %3034 = vmatpush.bf16.msrb.mxu0 %v11283_v43  ;;  %v2518_v57 = vshll.u32 %v2466_v37, 16  ;;  %v11294_v17 = vld [vmem:[%s15894_s1 + $0x158] sm:$0xff] }
  0xe9   : > { %1728 = vmatmul.bf16.gmra.mxu3 %v11233_v31  ;;  %v643_v52 = vor.u32 %v641_v53, %v640_v38  ;;  %v644_v54 = vrot.slane %v640_v38, 4  ;;  %v1333_v10 = vunpack.c.l.b16 %v1253_v45  ;;  %v852_v56 = vld [vmem:[#allocation2 + $0x58] sm:$0xf]  ;;  %v12305_v62 = vrot.slane %v2515_v25, 4  ;;  %v11293_v25 = vld [vmem:[%s15894_s1 + $0x150] sm:$0xff] }
  0xea   : > { %1455 = vmatmul.bf16.gmra.mxu0 %v1343_v0  ;;  %v1263_v49 = vsel %vm11786_vm2, %v1258_v8, %v1262_v19  ;;  %v651_v48 = vor.u32 %v649_v11, %v648_v46  ;;  %v653_v2 = vrot.slane %v648_v46, 4  ;;  %v1082_v50 = vshll.u32 %v852_v56, 16  ;;  %3456 = vmatpush.bf16.msrb.mxu1 %v11295_v60  ;;  %v1426_v11 = vpop.f32.mrf.mxu0 }
  0xeb   : > { %v1086_v58 = vshrl.u32 %v852_v56, 16  ;;  %v1334_v63 = vunpack.c.l.b16 %v1263_v49  ;;  %v851_v1 = vld [vmem:[#allocation2 + $0x54] sm:$0xf]  ;;  %v824_v3 = vsel %vm11944_vm9, %v643_v52, %v823_v26  ;;  %v2524_v6 = vshll.u32 %v12298_v55, 16  ;;  %v11322_v26 = vld [vmem:[%s15894_s1 + $0x1b8] sm:$0xff] }
  0xec   : > { %v652_v59 = vsel %vm11936_vm8, %v644_v54, %v651_v48  ;;  %v828_v4 = vsel %vm11952_vm10, %v653_v2, %v827_v51  ;;  %v11226_v39 = vld [vmem:[#allocation2 + $0x54] sm:$0xff]  ;;  %v1073_v7 = vshrl.u32 %v851_v1, 16  ;;  %v1076_v9 = vshll.u32 %v851_v1, 16  ;;  %825 = vst [vmem:[#allocation2 + $0xb4] sm:$0xf] %v824_v3  ;;  %3768 = vmatpush.bf16.msra.mxu2 %v11322_v26 }
  0xed   : > { %826 = vst [vmem:[#allocation2 + $0xb8] sm:$0xf] %v652_v59  ;;  %v1084_v13 = vrot.slane %v1082_v50, 5  ;;  %v1088_v14 = vrot.slane %v1086_v58, 4  ;;  %v2520_v15 = vrot.slane %v2518_v57, 5  ;;  %v2528_v16 = vshrl.u32 %v12298_v55, 16 }
  0xee   : > { %v892_v5 = vld [vmem:[#allocation2 + $0x5c] sm:$0x1]  ;;  %829 = vst [vmem:[#allocation2 + $0xbc] sm:$0x1] %v828_v4  ;;  %1693 = vmatmul.bf16.gmra.mxu1 %v11226_v39  ;;  %v1075_v47 = vrot.slane %v1073_v7, 4  ;;  %v1078_v20 = vrot.slane %v1076_v9, 5  ;;  %v1351_v22 = vpack.c.b16 %v1334_v63, %v1333_v10  ;;  %v12327_v43 = vadd.f32 %v1659_v34, %v1426_v11 }
  0xef   : > { %v1089_v21 = vor.u32 %v1088_v14, %v1084_v13  ;;  %v1092_v27 = vshll.u32 %v892_v5, 16  ;;  %v12318_v19 = vrot.slane %v2524_v6, 5  ;;  %v2530_v29 = vrot.slane %v2528_v16, 4  ;;  %3457 = vmatpush.bf16.msrb.mxu1 %v11294_v17  ;;  %v11330_v51 = vld [vmem:[%s15894_s1 + $0x1f8] sm:$0xff]  ;;  %v11292_v58 = vld [vmem:[%s15894_s1 + $0x148] sm:$0xff]  ;;  %v11291_v14 = vld [vmem:[%s15894_s1 + $0x140] sm:$0xff] }
  0xf0   : > { %v1079_v31 = vor.u32 %v1078_v20, %v1075_v47  ;;  %v2521_v40 = vor.u32 %v2520_v15, %v12305_v62  ;;  %v2534_v41 = vshll.u32 %v12316_v28, 16  ;;  %4450 = vmatpush.bf16.msra.mxu3 %v11330_v51  ;;  %v11338_v63 = vld [vmem:[%s15894_s1 + $0x238] sm:$0xff]  ;;  %v3148_v1 = vld [vmem:[#allocation2 + $0xc] sm:$0xe]  ;;  %v3214_v3 = vrot.slane %v12298_v55, 5 }
  0xf1   : > { %v1090_v32 = vrot.slane %v1089_v21, 4  ;;  %v1094_v35 = vrot.slane %v1092_v27, 5  ;;  %v2531_v44 = vor.u32 %v2530_v29, %v12318_v19  ;;  %v10269_v6 = vrot.slane %v3148_v1, 9  ;;  %4876 = vmatpush.bf16.msra.mxu0 %v11338_v63  ;;  %v2469_v16 = vld [vmem:[#allocation2 + $0x18] sm:$0xf] }
  0xf2   : > { %v1080_v24 = vrot.slane %v1079_v31, 4  ;;  %v2522_v60 = vrot.slane %v2521_v40, 4  ;;  %v2536_v62 = vrot.slane %v2534_v41, 5  ;;  %v3217_v7 = vrot.slane %v12316_v28, 5  ;;  %v2470_v47 = vld [vmem:[#allocation2 + $0x1c] sm:$0xf] }
  0xf3   : > { %v1095_v36 = vsel %vm11786_vm2, %v1090_v32, %v1094_v35  ;;  %v867_v0 = vld [vmem:[#allocation2 + $0xb4] sm:$0xf]  ;;  %3458 = vmatpush.bf16.msrb.mxu1 %v11293_v25  ;;  %v2532_v39 = vrot.slane %v2531_v44, 4  ;;  %v3216_v55 = vrot.slane %v3214_v3, 4  ;;  %v3215_v15 = vsel %vm12348_vm13, %v10269_v6, %v3214_v3  ;;  %v1739_v32 = vld [vmem:[#allocation2] sm:$0xe]  ;;  %v12376_v3 = vpop.f32.mrf.mxu0 }
  0xf4   : > { %v868_v37 = vld [vmem:[#allocation2 + $0xb8] sm:$0xf]  ;;  %v1320_v53 = vunpack.c.l.b16 %v1095_v36  ;;  %v1085_v42 = vsel %vm11786_vm2, %v1080_v24, %v1084_v13  ;;  %v1265_v38 = vshrl.u32 %v867_v0, 16  ;;  %v1268_v46 = vshll.u32 %v867_v0, 16  ;;  %v11520_v40 = vld [vmem:[#allocation2 + $0x4] sm:$0xf] }
  0xf5   : > { %v11234_v61 = vld [vmem:[#allocation2 + $0xb4] sm:$0xff]  ;;  %v1274_v8 = vshll.u32 %v868_v37, 16  ;;  %v1278_v33 = vshrl.u32 %v868_v37, 16  ;;  %v900_v45 = vld [vmem:[#allocation2 + $0xbc] sm:$0x1]  ;;  %v1319_v49 = vunpack.c.l.b16 %v1085_v42  ;;  %v2527_v27 = vsel %vm11786_vm2, %v2522_v60, %v12318_v19  ;;  %v11259_v25 = vld [vmem:[#allocation2 + $0xc] sm:$0xff] }
  0xf6   : > { %v1284_v48 = vshll.u32 %v900_v45, 16  ;;  %v1267_v10 = vrot.slane %v1265_v38, 4  ;;  %v1270_v56 = vrot.slane %v1268_v46, 5  ;;  %v3218_v17 = vsel %vm12348_vm13, %v3216_v55, %v3217_v7  ;;  %v11521_v38 = vld [vmem:[#allocation2 + $0x8] sm:$0x1] }
  0xf7   : > { %1495 = vmatmul.bf16.gmra.mxu2 %v1351_v22  ;;  %v1276_v52 = vrot.slane %v1274_v8, 5  ;;  %v1280_v54 = vrot.slane %v1278_v33, 4  ;;  %v1344_v2 = vpack.c.b16 %v1320_v53, %v1319_v49  ;;  %3459 = vmatpush.bf16.msrb.mxu1 %v11292_v58  ;;  %v2537_v29 = vsel %vm11786_vm2, %v2532_v39, %v2536_v62  ;;  %v12368_v53 = vpop.f32.mrf.mxu1  ;;  %v2471_v26 = vld [vmem:[#allocation2 + $0x20] sm:$0x1]  ;;  %v12374_v63 = vld [vmem:[#allocation2 + $0x28] sm:$0xf] }
  0xf8   : > { %v1286_v50 = vrot.slane %v1284_v48, 5  ;;  %v1271_v59 = vor.u32 %v1270_v56, %v1267_v10  ;;  %v3341_v22 = vunpack.c.l.b16 %v3215_v15  ;;  %v3342_v31 = vunpack.c.l.b16 %v3218_v17 }
  0xf9   : > { %v1281_v57 = vor.u32 %v1280_v54, %v1276_v52  ;;  %1733 = vmatmul.bf16.gmra.mxu3 %v11234_v61  ;;  %v2539_v35 = vshrl.u32 %v2469_v16, 16  ;;  %v2542_v24 = vshll.u32 %v2469_v16, 16  ;;  %v2548_v36 = vshll.u32 %v2470_v47, 16 }
  0xfa   : > { %1460 = vmatmul.bf16.gmra.mxu0 %v1344_v2  ;;  %v1272_v9 = vrot.slane %v1271_v59, 4  ;;  %v2552_v37 = vshrl.u32 %v2470_v47, 16  ;;  %v1792_v41 = vrot.slane %v11520_v40, 5  ;;  %v3373_v19 = vpack.c.b16 %v3342_v31, %v3341_v22  ;;  %v3149_v2 = vld [vmem:[#allocation2 + $0x18] sm:$0xe] }
  0xfb   : > { %v1282_v4 = vrot.slane %v1281_v57, 4  ;;  %3460 = vmatpush.bf16.msrb.mxu1 %v11291_v14  ;;  %v2915_v0 = vunpack.c.l.b16 %v2527_v27  ;;  %v2916_v8 = vunpack.c.l.b16 %v2537_v29  ;;  %v10045_v33 = vrot.slane %v1739_v32, 9  ;;  %v2472_v57 = vld [vmem:[#allocation2 + $0x24] sm:$0xf]  ;;  %v11522_v29 = vld [vmem:[#allocation2 + $0x10] sm:$0xf] }
  0xfc   : > { %v1277_v20 = vsel %vm11786_vm2, %v1272_v9, %v1276_v52  ;;  %v2541_v11 = vrot.slane %v2539_v35, 4  ;;  %v2544_v44 = vrot.slane %v2542_v24, 5  ;;  %v2550_v34 = vrot.slane %v2548_v36, 5  ;;  %v1740_v31 = vld [vmem:[#allocation2 + $0xc] sm:$0xe] }
  0xfd   : > { %v1287_v5 = vsel %vm11786_vm2, %v1282_v4, %v1286_v50  ;;  %v1335_v28 = vunpack.c.l.b16 %v1277_v20  ;;  %v2554_v42 = vrot.slane %v2552_v37, 4  ;;  %v1794_v45 = vrot.slane %v1792_v41, 4 }
  0xfe   : > { %v1336_v21 = vunpack.c.l.b16 %v1287_v5  ;;  %3461 = vmatmul.bf16.vlgmr.msrb.gmra.mxu1 %v3373_v19  ;;  %v1795_v46 = vrot.slane %v11521_v38, 5  ;;  %v2947_v49 = vpack.c.b16 %v2916_v8, %v2915_v0  ;;  %v1793_v52 = vsel %vm12348_vm13, %v10045_v33, %v1792_v41  ;;  %v2474_v19 = vld [vmem:[#allocation2 + $0x2c] sm:$0x1]  ;;  %v11260_v33 = vld [vmem:[#allocation2 + $0x18] sm:$0xff]  ;;  %v11321_v38 = vld [vmem:[%s15894_s1 + $0x1b0] sm:$0xff] }
  0xff   : > { %v2545_v54 = vor.u32 %v2544_v44, %v2541_v11  ;;  %v2555_v48 = vor.u32 %v2554_v42, %v2550_v34  ;;  %v2558_v51 = vshll.u32 %v2471_v26, 16  ;;  %v3221_v56 = vrot.slane %v2470_v47, 5  ;;  %v11523_v44 = vld [vmem:[#allocation2 + $0x14] sm:$0x1]  ;;  %3769 = vmatpush.bf16.msra.mxu2 %v11321_v38  ;;  %v2477_v38 = vld [vmem:[#allocation2 + $0x38] sm:$0x1] }
 0x100   : > { %v1352_v61 = vpack.c.b16 %v1336_v21, %v1335_v28  ;;  %v1796_v10 = vsel %vm12348_vm13, %v1794_v45, %v1795_v46  ;;  %v1919_v50 = vunpack.c.l.b16 %v1793_v52  ;;  %v10270_v59 = vrot.slane %v3149_v2, 9  ;;  %v11329_v46 = vld [vmem:[%s15894_s1 + $0x1f0] sm:$0xff] }
 0x101   : > { %v3223_v60 = vrot.slane %v3221_v56, 4  ;;  %v3224_v62 = vrot.slane %v2471_v26, 5  ;;  %v1920_v1 = vunpack.c.l.b16 %v1796_v10  ;;  %v2546_v4 = vrot.slane %v2545_v54, 4  ;;  %4451 = vmatpush.bf16.msra.mxu3 %v11329_v46 }
 0x102   : > { %v2556_v39 = vrot.slane %v2555_v48, 4  ;;  %v2560_v6 = vrot.slane %v2558_v51, 5  ;;  %v3222_v9 = vsel %vm12348_vm13, %v10270_v59, %v3221_v56  ;;  %v2563_v55 = vshrl.u32 %v2472_v57, 16 }
 0x103   : > { %v3225_v14 = vsel %vm12348_vm13, %v3223_v60, %v3224_v62  ;;  %v2566_v5 = vshll.u32 %v2472_v57, 16  ;;  %v3343_v15 = vunpack.c.l.b16 %v3222_v9  ;;  %v2572_v47 = vshll.u32 %v12374_v63, 16  ;;  %v11337_v57 = vld [vmem:[%s15894_s1 + $0x230] sm:$0xff] }
 0x104   : > { %v3344_v16 = vunpack.c.l.b16 %v3225_v14  ;;  %v2576_v20 = vshrl.u32 %v12374_v63, 16  ;;  %v2551_v21 = vsel %vm11786_vm2, %v2546_v4, %v2550_v34  ;;  %v2561_v27 = vsel %vm11786_vm2, %v2556_v39, %v2560_v6  ;;  %4877 = vmatpush.bf16.msra.mxu0 %v11337_v57 }
 0x105   : > { %v1951_v28 = vpack.c.b16 %v1920_v1, %v1919_v50  ;;  %v1799_v22 = vrot.slane %v11522_v29, 5  ;;  %v2565_v32 = vrot.slane %v2563_v55, 4  ;;  %v2568_v35 = vrot.slane %v2566_v5, 5  ;;  %v3150_v50 = vld [vmem:[#allocation2 + $0x24] sm:$0xe] }
 0x106   : > { %v3374_v17 = vpack.c.b16 %v3344_v16, %v3343_v15  ;;  %v12388_v24 = vrot.slane %v2572_v47, 5  ;;  %v2578_v36 = vrot.slane %v2576_v20, 4  ;;  %v2917_v37 = vunpack.c.l.b16 %v2551_v21 }
 0x107   : > { %1500 = vmatmul.bf16.gmra.mxu2 %v1352_v61  ;;  %v2918_v40 = vunpack.c.l.b16 %v2561_v27  ;;  %v10046_v0 = vrot.slane %v1740_v31, 9  ;;  %v1801_v11 = vrot.slane %v1799_v22, 4  ;;  %v1802_v34 = vrot.slane %v11523_v44, 5  ;;  %v1741_v27 = vld [vmem:[#allocation2 + $0x18] sm:$0xe] }
 0x108   : > { %v2569_v42 = vor.u32 %v2568_v35, %v2565_v32  ;;  %v2579_v45 = vor.u32 %v2578_v36, %v12388_v24  ;;  %v3228_v48 = vrot.slane %v12374_v63, 5  ;;  %v10271_v60 = vrot.slane %v3150_v50, 9  ;;  %v2475_v63 = vld [vmem:[#allocation2 + $0x30] sm:$0xf]  ;;  %v11524_v32 = vld [vmem:[#allocation2 + $0x1c] sm:$0xf] }
 0x109   : > { %2353 = vmatmul.bf16.vlgmr.msrb.gmra.mxu3 %v11259_v25  ;;  %v2948_v26 = vpack.c.b16 %v2918_v40, %v2917_v37  ;;  %v1800_v54 = vsel %vm12348_vm13, %v10046_v0, %v1799_v22  ;;  %v1803_v10 = vsel %vm12348_vm13, %v1801_v11, %v1802_v34  ;;  %v3231_v1 = vrot.slane %v2474_v19, 5 }
 0x10a   : > { %3035 = vmatmul.bf16.vlgmr.msrb.gmra.mxu0 %v2947_v49  ;;  %v1664_v58 = vpop.f32.mrf.mxu1  ;;  %v2582_v49 = vshll.u32 %v2474_v19, 16  ;;  %v2570_v56 = vrot.slane %v2569_v42, 4  ;;  %v2580_v2 = vrot.slane %v2579_v45, 4  ;;  %v3230_v62 = vrot.slane %v3228_v48, 4  ;;  %v11525_v42 = vld [vmem:[#allocation2 + $0x20] sm:$0x1] }
 0x10b   : > { %v3229_v39 = vsel %vm12348_vm13, %v10271_v60, %v3228_v48  ;;  %v1921_v9 = vunpack.c.l.b16 %v1800_v54  ;;  %v1922_v14 = vunpack.c.l.b16 %v1803_v10  ;;  %v2587_v21 = vshrl.u32 %v2475_v63, 16  ;;  %v2478_v60 = vld [vmem:[#allocation2 + $0x3c] sm:$0xf] }
 0x10c   : > { %v1699_v7 = vpop.f32.mrf.mxu3  ;;  %v3232_v6 = vsel %vm12348_vm13, %v3230_v62, %v3231_v1  ;;  %v3345_v5 = vunpack.c.l.b16 %v3229_v39  ;;  %v2575_v47 = vsel %vm11786_vm2, %v2570_v56, %v12388_v24  ;;  %v1806_v35 = vrot.slane %v11524_v32, 5 }
 0x10d   : > { %v3346_v15 = vunpack.c.l.b16 %v3232_v6  ;;  %v1952_v37 = vpack.c.b16 %v1922_v14, %v1921_v9  ;;  %v2919_v40 = vunpack.c.l.b16 %v2575_v47  ;;  %v10047_v24 = vrot.slane %v1741_v27, 9  ;;  %v12435_v6 = vld [vmem:[#allocation2 + $0x40] sm:$0xf] }
 0x10e   : > { %3466 = vmatmul.bf16.gmra.mxu1 %v3374_v17  ;;  %v2589_v0 = vrot.slane %v2587_v21, 4  ;;  %v1808_v34 = vrot.slane %v1806_v35, 4  ;;  %v1809_v45 = vrot.slane %v11525_v42, 5  ;;  %v2606_v10 = vshll.u32 %v2477_v38, 16 }
 0x10f   : > { %v3375_v17 = vpack.c.b16 %v3346_v15, %v3345_v5  ;;  %v3238_v39 = vrot.slane %v2477_v38, 5  ;;  %v2611_v47 = vshrl.u32 %v2478_v60, 16 }
 0x110   : > { %v2608_v5 = vrot.slane %v2606_v10, 5  ;;  %v11527_v10 = vld [vmem:[#allocation2 + $0x2c] sm:$0x1] }
 0x112   : > { %v1666_v41 = vpop.f32.mrf.mxu1 }
 0x114   : > { %v1701_v61 = vpop.f32.mrf.mxu3 }
 0x117   : > { %2039 = vmatmul.bf16.vlgmr.msrb.gmra.mxu2 %v1951_v28  ;;  %v1431_v8 = vpop.f32.mrf.mxu0  ;;  %v2590_v28 = vshll.u32 %v2475_v63, 16 }
 0x118   : > { %v12397_v25 = vadd.f32 %v1664_v58, %v1431_v8  ;;  %v2584_v58 = vrot.slane %v2582_v49, 5 }
 0x119   : > { %2358 = vmatmul.bf16.gmra.mxu3 %v11260_v33  ;;  %v2592_v8 = vrot.slane %v2590_v28, 5  ;;  %v2620_v28 = vshll.u32 %v12435_v6, 16 }
 0x11a   : > { %v1466_v52 = vpop.f32.mrf.mxu2  ;;  %3040 = vmatmul.bf16.gmra.mxu0 %v2948_v26  ;;  %v1669_v59 = vpop.f32.mrf.mxu1  ;;  %v2585_v20 = vsel %vm11786_vm2, %v2580_v2, %v2584_v58  ;;  %v11261_v26 = vld [vmem:[#allocation2 + $0x24] sm:$0xff]  ;;  %v1810_v2 = vsel %vm12348_vm13, %v1808_v34, %v1809_v45  ;;  %v3151_v58 = vld [vmem:[#allocation2 + $0x30] sm:$0xe] }
 0x11b   : > { %v12402_v51 = vadd.f32 %v1699_v7, %v1466_v52  ;;  %v12413_v7 = vld [vmem:[#allocation2 + $0x34] sm:$0xf]  ;;  %v1807_v52 = vsel %vm12348_vm13, %v10047_v24, %v1806_v35  ;;  %v2593_v54 = vor.u32 %v2592_v8, %v2589_v0  ;;  %v10272_v1 = vrot.slane %v3151_v58, 9  ;;  %v11328_v58 = vld [vmem:[%s15894_s1 + $0x1e8] sm:$0xff] }
 0x11c   : > { %v1704_v4 = vpop.f32.mrf.mxu3  ;;  %v2596_v29 = vshll.u32 %v12413_v7, 16  ;;  %v2600_v22 = vshrl.u32 %v12413_v7, 16  ;;  %v3235_v57 = vrot.slane %v12413_v7, 5  ;;  %v1924_v9 = vunpack.c.l.b16 %v1810_v2  ;;  %4452 = vmatpush.bf16.msra.mxu3 %v11328_v58 }
 0x11d   : > { %v2594_v14 = vrot.slane %v2593_v54, 4  ;;  %v2613_v0 = vrot.slane %v2611_v47, 4  ;;  %v12451_v42 = vrot.slane %v2620_v28, 5  ;;  %v11262_v54 = vld [vmem:[#allocation2 + $0x30] sm:$0xff] }
 0x11e   : > { %3471 = vmatmul.bf16.gmra.mxu1 %v3375_v17  ;;  %v2598_v33 = vrot.slane %v2596_v29, 5  ;;  %v2602_v11 = vrot.slane %v2600_v22, 4  ;;  %v3237_v63 = vrot.slane %v3235_v57, 4  ;;  %v2624_v29 = vshrl.u32 %v12435_v6, 16 }
 0x11f   : > { %v1433_v55 = vpop.f32.mrf.mxu0 }
 0x120   : > { %v12415_v16 = vadd.f32 %v1666_v41, %v1433_v55  ;;  %v2920_v41 = vunpack.c.l.b16 %v2585_v20  ;;  %v2603_v48 = vor.u32 %v2602_v11, %v2598_v33  ;;  %v3239_v7 = vsel %vm12348_vm13, %v3237_v63, %v3238_v39  ;;  %v1742_v11 = vld [vmem:[#allocation2 + $0x24] sm:$0xe] }
 0x121   : > { %v2614_v20 = vshll.u32 %v2478_v60, 16  ;;  %v3348_v17 = vunpack.c.l.b16 %v3239_v7  ;;  %v3152_v7 = vld [vmem:[#allocation2 + $0x3c] sm:$0xe] }
 0x122   : > { %v1468_v31 = vpop.f32.mrf.mxu2  ;;  %v1671_v19 = vpop.f32.mrf.mxu1  ;;  %v2604_v55 = vrot.slane %v2603_v48, 4 }
 0x123   : > { %v12424_v36 = vadd.f32 %v1701_v61, %v1468_v31  ;;  %v2949_v61 = vpack.c.b16 %v2920_v41, %v2919_v40  ;;  %v2599_v31 = vsel %vm11786_vm2, %v2594_v14, %v2598_v33  ;;  %v11526_v41 = vld [vmem:[#allocation2 + $0x28] sm:$0xf]  ;;  %v2616_v34 = vrot.slane %v2614_v20, 5  ;;  %v2480_v33 = vld [vmem:[#allocation2 + $0x44] sm:$0x1] }
 0x124   : > { %v1706_v44 = vpop.f32.mrf.mxu3  ;;  %v2609_v32 = vsel %vm11786_vm2, %v2604_v55, %v2608_v5  ;;  %v1813_v24 = vrot.slane %v11526_v41, 5  ;;  %v2921_v45 = vunpack.c.l.b16 %v2599_v31  ;;  %v12476_v31 = vld [vmem:[#allocation2 + $0x4c] sm:$0xf] }
 0x125   : > { %v2922_v38 = vunpack.c.l.b16 %v2609_v32 }
 0x126   : > { %v1815_v48 = vrot.slane %v1813_v24, 4 }
 0x127   : > { %2044 = vmatmul.bf16.gmra.mxu2 %v1952_v37  ;;  %v1436_v46 = vpop.f32.mrf.mxu0  ;;  %v2950_v60 = vpack.c.b16 %v2922_v38, %v2921_v45 }
 0x128   : > { %v12426_v49 = vadd.f32 %v1669_v59, %v1436_v46  ;;  %v1923_v59 = vunpack.c.l.b16 %v1807_v52 }
 0x129   : > { %2363 = vmatmul.bf16.gmra.mxu3 %v11261_v26 }
 0x12a   : > { %v1471_v56 = vpop.f32.mrf.mxu2  ;;  %3045 = vmatmul.bf16.gmra.mxu0 %v2949_v61  ;;  %v1953_v40 = vpack.c.b16 %v1924_v9, %v1923_v59  ;;  %v10048_v61 = vrot.slane %v1742_v11, 9  ;;  %v3242_v9 = vrot.slane %v12435_v6, 5  ;;  %v2481_v6 = vld [vmem:[#allocation2 + $0x48] sm:$0xf] }
 0x12b   : > { %v12433_v50 = vadd.f32 %v1704_v4, %v1471_v56  ;;  %v1674_v62 = vpop.f32.mrf.mxu1  ;;  %v3236_v4 = vsel %vm12348_vm13, %v10272_v1, %v3235_v57  ;;  %v1816_v56 = vrot.slane %v11527_v10, 5  ;;  %v11320_v57 = vld [vmem:[%s15894_s1 + $0x1a8] sm:$0xff]  ;;  %v2630_v1 = vshll.u32 %v2480_v33, 16 }
 0x12c   : > { %v1709_v15 = vpop.f32.mrf.mxu3  ;;  %v3347_v27 = vunpack.c.l.b16 %v3236_v4  ;;  %3770 = vmatpush.bf16.msra.mxu2 %v11320_v57  ;;  %v1814_v39 = vsel %vm12348_vm13, %v10048_v61, %v1813_v24  ;;  %v2638_v38 = vshll.u32 %v2481_v6, 16  ;;  %v2648_v61 = vshrl.u32 %v12476_v31, 16 }
 0x12d   : > { %v1817_v55 = vsel %vm12348_vm13, %v1815_v48, %v1816_v56  ;;  %v2632_v47 = vrot.slane %v2630_v1, 5  ;;  %v1925_v32 = vunpack.c.l.b16 %v1814_v39 }
 0x12e   : > { %v3376_v35 = vpack.c.b16 %v3348_v17, %v3347_v27  ;;  %v3244_v27 = vrot.slane %v3242_v9, 4  ;;  %v3245_v17 = vrot.slane %v2480_v33, 5  ;;  %v2644_v33 = vshll.u32 %v12476_v31, 16 }
 0x12f   : > { %v1438_v21 = vpop.f32.mrf.mxu0  ;;  %v2640_v58 = vrot.slane %v2638_v38, 5  ;;  %v2650_v1 = vrot.slane %v2648_v61, 4 }
 0x130   : > { %v12443_v22 = vadd.f32 %v1671_v19, %v1438_v21  ;;  %v2626_v19 = vrot.slane %v2624_v29, 4  ;;  %3476 = vmatmul.bf16.gmra.mxu1 %v3376_v35  ;;  %v10273_v21 = vrot.slane %v3152_v7, 9  ;;  %v3246_v29 = vsel %vm12348_vm13, %v3244_v27, %v3245_v17 }
 0x131   : > { %v1926_v35 = vunpack.c.l.b16 %v1817_v55  ;;  %v3350_v41 = vunpack.c.l.b16 %v3246_v29  ;;  %v3249_v29 = vrot.slane %v12476_v31, 5 }
 0x132   : > { %v1473_v37 = vpop.f32.mrf.mxu2  ;;  %v2627_v2 = vor.u32 %v2626_v19, %v12451_v42  ;;  %v3243_v28 = vsel %vm12348_vm13, %v10273_v21, %v3242_v9  ;;  %v1743_v19 = vld [vmem:[#allocation2 + $0x30] sm:$0xe]  ;;  %v11529_v9 = vld [vmem:[#allocation2 + $0x38] sm:$0x1] }
 0x133   : > { %v12449_v8 = vadd.f32 %v1706_v44, %v1473_v37  ;;  %v1676_v46 = vpop.f32.mrf.mxu1  ;;  %v2617_v44 = vor.u32 %v2616_v34, %v2613_v0  ;;  %v2635_v34 = vshrl.u32 %v2481_v6, 16  ;;  %v1954_v10 = vpack.c.b16 %v1926_v35, %v1925_v32  ;;  %v3153_v35 = vld [vmem:[#allocation2 + $0x48] sm:$0xe] }
 0x134   : > { %v1711_v26 = vpop.f32.mrf.mxu3  ;;  %v2628_v4 = vrot.slane %v2627_v2, 4  ;;  %v1823_v55 = vrot.slane %v11529_v9, 5 }
 0x135   : > { %v2618_v5 = vrot.slane %v2617_v44, 4  ;;  %v2637_v57 = vrot.slane %v2635_v34, 4  ;;  %v12498_v34 = vld [vmem:[#allocation2 + $0x58] sm:$0xf] }
 0x136   : > { %v2633_v11 = vsel %vm11786_vm2, %v2628_v4, %v2632_v47 }
 0x137   : > { %2049 = vmatmul.bf16.gmra.mxu2 %v1953_v40  ;;  %v1441_v52 = vpop.f32.mrf.mxu0  ;;  %v3349_v40 = vunpack.c.l.b16 %v3243_v28  ;;  %v2623_v0 = vsel %vm11786_vm2, %v2618_v5, %v12451_v42  ;;  %v2924_v44 = vunpack.c.l.b16 %v2633_v11  ;;  %v10049_v42 = vrot.slane %v1743_v19, 9  ;;  %v2483_v5 = vld [vmem:[#allocation2 + $0x50] sm:$0x1] }
 0x138   : > { %v12460_v59 = vadd.f32 %v1674_v62, %v1441_v52  ;;  %v11336_v62 = vld [vmem:[%s15894_s1 + $0x228] sm:$0xff]  ;;  %v2923_v56 = vunpack.c.l.b16 %v2623_v0  ;;  %v2641_v21 = vor.u32 %v2640_v58, %v2637_v57  ;;  %v2654_v17 = vshll.u32 %v2483_v5, 16 }
 0x139   : > { %2368 = vmatmul.bf16.gmra.mxu3 %v11262_v54  ;;  %4878 = vmatpush.bf16.msra.mxu0 %v11336_v62  ;;  %v3377_v45 = vpack.c.b16 %v3350_v41, %v3349_v40  ;;  %v11528_v54 = vld [vmem:[#allocation2 + $0x34] sm:$0xf]  ;;  %v11263_v62 = vld [vmem:[#allocation2 + $0x3c] sm:$0xff]  ;;  %v10274_v41 = vrot.slane %v3153_v35, 9  ;;  %v3251_v0 = vrot.slane %v3249_v29, 4  ;;  %v3252_v11 = vrot.slane %v2483_v5, 5 }
 0x13a   : > { %v1476_v63 = vpop.f32.mrf.mxu2  ;;  %3050 = vmatmul.bf16.gmra.mxu0 %v2950_v60  ;;  %v1820_v48 = vrot.slane %v11528_v54, 5  ;;  %v2646_v60 = vrot.slane %v2644_v33, 5  ;;  %v2656_v33 = vrot.slane %v2654_v17, 5  ;;  %v11530_v5 = vld [vmem:[#allocation2 + $0x40] sm:$0xf] }
 0x13b   : > { %v12465_v14 = vadd.f32 %v1709_v15, %v1476_v63  ;;  %v1679_v20 = vpop.f32.mrf.mxu1  ;;  %v3253_v31 = vsel %vm12348_vm13, %v3251_v0, %v3252_v11  ;;  %v11531_v0 = vld [vmem:[#allocation2 + $0x44] sm:$0x1] }
 0x13c   : > { %v1714_v15 = vpop.f32.mrf.mxu3  ;;  %v1822_v39 = vrot.slane %v1820_v48, 4  ;;  %v1821_v47 = vsel %vm12348_vm13, %v10049_v42, %v1820_v48  ;;  %v2651_v27 = vor.u32 %v2650_v1, %v2646_v60  ;;  %v2672_v42 = vshrl.u32 %v12498_v34, 16 }
 0x13d   : > { %v1830_v11 = vrot.slane %v11531_v0, 5  ;;  %v1745_v0 = vld [vmem:[#allocation2 + $0x48] sm:$0xe] }
 0x13e   : > { %v1824_v28 = vsel %vm12348_vm13, %v1822_v39, %v1823_v55  ;;  %v2652_v38 = vrot.slane %v2651_v27, 4 }
 0x13f   : > { %v1443_v37 = vpop.f32.mrf.mxu0  ;;  %v1928_v19 = vunpack.c.l.b16 %v1824_v28 }
 0x140   : > { %v12478_v24 = vadd.f32 %v1676_v46, %v1443_v37  ;;  %3481 = vmatmul.bf16.gmra.mxu1 %v3377_v45  ;;  %v2484_v37 = vld [vmem:[#allocation2 + $0x54] sm:$0xf]  ;;  %v2642_v45 = vrot.slane %v2641_v21, 4  ;;  %v2657_v1 = vsel %vm11786_vm2, %v2652_v38, %v2656_v33  ;;  %v11327_v38 = vld [vmem:[%s15894_s1 + $0x1e0] sm:$0xff] }
 0x141   : > { %v2662_v54 = vshll.u32 %v2484_v37, 16  ;;  %4453 = vmatpush.bf16.msra.mxu3 %v11327_v38 }
 0x142   : > { %v1478_v52 = vpop.f32.mrf.mxu2  ;;  %v2647_v58 = vsel %vm11786_vm2, %v2642_v45, %v2646_v60  ;;  %v2486_v60 = vld [vmem:[#allocation2 + $0x5c] sm:$0x1]  ;;  %v11319_v45 = vld [vmem:[%s15894_s1 + $0x1a0] sm:$0xff] }
 0x143   : > { %v12487_v46 = vadd.f32 %v1711_v26, %v1478_v52  ;;  %v1681_v2 = vpop.f32.mrf.mxu1  ;;  %v2951_v26 = vpack.c.b16 %v2924_v44, %v2923_v56  ;;  %v2659_v52 = vshrl.u32 %v2484_v37, 16  ;;  %v3352_v56 = vunpack.c.l.b16 %v3253_v31  ;;  %3771 = vmatpush.bf16.msra.mxu2 %v11319_v45 }
 0x144   : > { %v1716_v63 = vpop.f32.mrf.mxu3  ;;  %v2668_v44 = vshll.u32 %v12498_v34, 16  ;;  %v2664_v21 = vrot.slane %v2662_v54, 5  ;;  %v2925_v17 = vunpack.c.l.b16 %v2647_v58  ;;  %v2678_v31 = vshll.u32 %v2486_v60, 16  ;;  %v3154_v58 = vld [vmem:[#allocation2 + $0x54] sm:$0xe] }
 0x146   : > { %v12514_v27 = vrot.slane %v2668_v44, 5 }
 0x147   : > { %2054 = vmatmul.bf16.gmra.mxu2 %v1954_v10  ;;  %v1446_v4 = vpop.f32.mrf.mxu0 }
 0x148   : > { %v12489_v7 = vadd.f32 %v1679_v20, %v1446_v4  ;;  %v1927_v20 = vunpack.c.l.b16 %v1821_v47  ;;  %v1827_v4 = vrot.slane %v11530_v5, 5  ;;  %v1744_v47 = vld [vmem:[#allocation2 + $0x3c] sm:$0xe]  ;;  %v3259_v5 = vrot.slane %v2486_v60, 5 }
 0x149   : > { %2373 = vmatmul.bf16.gmra.mxu3 %v11263_v62  ;;  %v2661_v62 = vrot.slane %v2659_v52, 4  ;;  %v10050_v35 = vrot.slane %v1744_v47, 9  ;;  %v12539_v47 = vld [vmem:[#allocation2 + $0x64] sm:$0xf] }
 0x14a   : > { %v1481_v6 = vpop.f32.mrf.mxu2  ;;  %3055 = vmatmul.bf16.gmra.mxu0 %v2951_v26  ;;  %v1955_v55 = vpack.c.b16 %v1928_v19, %v1927_v20  ;;  %v11264_v20 = vld [vmem:[#allocation2 + $0x48] sm:$0xff]  ;;  %v2696_v45 = vshrl.u32 %v12539_v47, 16 }
 0x14b   : > { %v12496_v32 = vadd.f32 %v1714_v15, %v1481_v6  ;;  %v1684_v40 = vpop.f32.mrf.mxu1  ;;  %v3250_v15 = vsel %vm12348_vm13, %v10274_v41, %v3249_v29  ;;  %v2926_v6 = vunpack.c.l.b16 %v2657_v1  ;;  %v1829_v41 = vrot.slane %v1827_v4, 4 }
 0x14c   : > { %v1719_v61 = vpop.f32.mrf.mxu3  ;;  %v3351_v10 = vunpack.c.l.b16 %v3250_v15  ;;  %v1828_v54 = vsel %vm12348_vm13, %v10050_v35, %v1827_v4  ;;  %v2680_v1 = vrot.slane %v2678_v31, 5 }
 0x14d   : > { %15913 = vst [vmem:[#allocation7_spill] sm:$0xff] %v12496_v32  ;;  %v2952_v33 = vpack.c.b16 %v2926_v6, %v2925_v17 }
 0x14e   : > { %v3378_v39 = vpack.c.b16 %v3352_v56, %v3351_v10  ;;  %v1831_v56 = vsel %vm12348_vm13, %v1829_v41, %v1830_v11 }
 0x14f   : > { %v1448_v48 = vpop.f32.mrf.mxu0 }
 0x150   : > { %v12506_v57 = vadd.f32 %v1681_v2, %v1448_v48  ;;  %v2674_v2 = vrot.slane %v2672_v42, 4  ;;  %3486 = vmatmul.bf16.gmra.mxu1 %v3378_v39  ;;  %v3256_v48 = vrot.slane %v12498_v34, 5  ;;  %v2487_v34 = vld [vmem:[#allocation2 + $0x60] sm:$0xf] }
 0x151   : > { %v2683_v41 = vshrl.u32 %v2487_v34, 16 }
 0x152   : > { %v1483_v9 = vpop.f32.mrf.mxu2  ;;  %v2675_v19 = vor.u32 %v2674_v2, %v12514_v27  ;;  %v1930_v2 = vunpack.c.l.b16 %v1831_v56 }
 0x153   : > { %v12512_v26 = vadd.f32 %v1716_v63, %v1483_v9  ;;  %v1686_v28 = vpop.f32.mrf.mxu1  ;;  %v2665_v63 = vor.u32 %v2664_v21, %v2661_v62  ;;  %v10275_v9 = vrot.slane %v3154_v58, 9  ;;  %v1929_v21 = vunpack.c.l.b16 %v1828_v54 }
 0x154   : > { %v1721_v29 = vpop.f32.mrf.mxu3  ;;  %v2676_v42 = vrot.slane %v2675_v19, 4  ;;  %v2692_v19 = vshll.u32 %v12539_v47, 16  ;;  %v2698_v58 = vrot.slane %v2696_v45, 4 }
 0x155   : > { %15914 = vst [vmem:[#allocation8_spill] sm:$0xff] %v12512_v26  ;;  %v2666_v44 = vrot.slane %v2665_v63, 4  ;;  %v3257_v4 = vsel %vm12348_vm13, %v10275_v9, %v3256_v48  ;;  %v2686_v63 = vshll.u32 %v2487_v34, 16  ;;  %v2489_v34 = vld [vmem:[#allocation2 + $0x68] sm:$0x1] }
 0x156   : > { %v3353_v6 = vunpack.c.l.b16 %v3257_v4 }
 0x157   : > { %2059 = vmatmul.bf16.gmra.mxu2 %v1955_v55  ;;  %v1451_v37 = vpop.f32.mrf.mxu0  ;;  %v3258_v55 = vrot.slane %v3256_v48, 4  ;;  %v2671_v60 = vsel %vm11786_vm2, %v2666_v44, %v12514_v27  ;;  %v10051_v27 = vrot.slane %v1745_v0, 9  ;;  %v2685_v44 = vrot.slane %v2683_v41, 4 }
 0x158   : > { %v12523_v15 = vadd.f32 %v1684_v40, %v1451_v37  ;;  %v11335_v40 = vld [vmem:[%s15894_s1 + $0x220] sm:$0xff]  ;;  %v2927_v54 = vunpack.c.l.b16 %v2671_v60  ;;  %v3263_v41 = vrot.slane %v12539_v47, 5 }
 0x159   : > { %2378 = vmatmul.bf16.gmra.mxu3 %v11264_v20  ;;  %4879 = vmatpush.bf16.msra.mxu0 %v11335_v40  ;;  %v3260_v62 = vsel %vm12348_vm13, %v3258_v55, %v3259_v5  ;;  %v2681_v20 = vsel %vm11786_vm2, %v2676_v42, %v2680_v1  ;;  %v2688_v42 = vrot.slane %v2686_v63, 5  ;;  %v2694_v40 = vrot.slane %v2692_v19, 5  ;;  %v11533_v55 = vld [vmem:[#allocation2 + $0x50] sm:$0x1]  ;;  %v2490_v63 = vld [vmem:[#allocation2 + $0x6c] sm:$0xf] }
 0x15a   : > { %v1486_v52 = vpop.f32.mrf.mxu2  ;;  %3060 = vmatmul.bf16.gmra.mxu0 %v2952_v33  ;;  %v3354_v35 = vunpack.c.l.b16 %v3260_v62  ;;  %v11532_v33 = vld [vmem:[#allocation2 + $0x4c] sm:$0xf]  ;;  %v2928_v48 = vunpack.c.l.b16 %v2681_v20  ;;  %v1837_v5 = vrot.slane %v11533_v55, 5  ;;  %v11265_v62 = vld [vmem:[#allocation2 + $0x54] sm:$0xff]  ;;  %v3265_v45 = vrot.slane %v3263_v41, 4 }
 0x15b   : > { %v12528_v10 = vadd.f32 %v1719_v61, %v1486_v52  ;;  %v1689_v39 = vpop.f32.mrf.mxu1  ;;  %v1834_v31 = vrot.slane %v11532_v33, 5  ;;  %v1956_v52 = vpack.c.b16 %v1930_v2, %v1929_v21  ;;  %v2689_v2 = vor.u32 %v2688_v42, %v2685_v44  ;;  %v12561_v33 = vld [vmem:[#allocation2 + $0x70] sm:$0xf] }
 0x15c   : > { %v1724_v61 = vpop.f32.mrf.mxu3  ;;  %v3379_v11 = vpack.c.b16 %v3354_v35, %v3353_v6  ;;  %v2699_v6 = vor.u32 %v2698_v58, %v2694_v40  ;;  %v2702_v35 = vshll.u32 %v2489_v34, 16  ;;  %v2707_v44 = vshrl.u32 %v2490_v63, 16 }
 0x15d   : > { %15915 = vst [vmem:[#allocation9_spill] sm:$0xff] %v12528_v10  ;;  %v1836_v9 = vrot.slane %v1834_v31, 4  ;;  %v1835_v21 = vsel %vm12348_vm13, %v10051_v27, %v1834_v31  ;;  %v2710_v42 = vshll.u32 %v2490_v63, 16  ;;  %v1746_v63 = vld [vmem:[#allocation2 + $0x54] sm:$0xe] }
 0x15f   : > { %v1453_v17 = vpop.f32.mrf.mxu0  ;;  %v1838_v20 = vsel %vm12348_vm13, %v1836_v9, %v1837_v5 }
 0x160   : > { %v12541_v37 = vadd.f32 %v1686_v28, %v1453_v17  ;;  %3491 = vmatmul.bf16.gmra.mxu1 %v3379_v11  ;;  %v3155_v11 = vld [vmem:[#allocation2 + $0x60] sm:$0xe]  ;;  %v1932_v31 = vunpack.c.l.b16 %v1838_v20 }
 0x161   : > { %v10276_v19 = vrot.slane %v3155_v11, 9 }
 0x162   : > { %v1488_v38 = vpop.f32.mrf.mxu2 }
 0x163   : > { %v12550_v28 = vadd.f32 %v1721_v29, %v1488_v38  ;;  %v1691_v56 = vpop.f32.mrf.mxu1  ;;  %v2953_v29 = vpack.c.b16 %v2928_v48, %v2927_v54  ;;  %v3266_v38 = vrot.slane %v2489_v34, 5  ;;  %v2700_v54 = vrot.slane %v2699_v6, 4 }
 0x164   : > { %v1726_v1 = vpop.f32.mrf.mxu3  ;;  %v2704_v48 = vrot.slane %v2702_v35, 5  ;;  %v3264_v47 = vsel %vm12348_vm13, %v10276_v19, %v3263_v41  ;;  %v2716_v34 = vshll.u32 %v12561_v33, 16  ;;  %v2709_v41 = vrot.slane %v2707_v44, 4  ;;  %v11318_v44 = vld [vmem:[%s15894_s1 + $0x198] sm:$0xff] }
 0x165   : > { %15916 = vst [vmem:[#allocation10_spill] sm:$0xff] %v12550_v28  ;;  %v3355_v55 = vunpack.c.l.b16 %v3264_v47  ;;  %v2712_v19 = vrot.slane %v2710_v42, 5  ;;  %v11326_v42 = vld [vmem:[%s15894_s1 + $0x1d8] sm:$0xff]  ;;  %3772 = vmatpush.bf16.msra.mxu2 %v11318_v44 }
 0x166   : > { %4454 = vmatpush.bf16.msra.mxu3 %v11326_v42 }
 0x167   : > { %2064 = vmatmul.bf16.gmra.mxu2 %v1956_v52  ;;  %v1456_v4 = vpop.f32.mrf.mxu0  ;;  %v2690_v52 = vrot.slane %v2689_v2, 4 }
 0x168   : > { %v12552_v17 = vadd.f32 %v1689_v39, %v1456_v4  ;;  %v1931_v39 = vunpack.c.l.b16 %v1835_v21  ;;  %v2720_v4 = vshrl.u32 %v12561_v33, 16  ;;  %v2705_v21 = vsel %vm11786_vm2, %v2700_v54, %v2704_v48  ;;  %v11266_v54 = vld [vmem:[#allocation2 + $0x60] sm:$0xff] }
 0x169   : > { %2383 = vmatmul.bf16.gmra.mxu3 %v11265_v62  ;;  %v2930_v47 = vunpack.c.l.b16 %v2705_v21 }
 0x16a   : > { %v1491_v60 = vpop.f32.mrf.mxu2  ;;  %3065 = vmatmul.bf16.gmra.mxu0 %v2953_v29  ;;  %v2695_v29 = vsel %vm11786_vm2, %v2690_v52, %v2694_v40  ;;  %v1957_v35 = vpack.c.b16 %v1932_v31, %v1931_v39  ;;  %v2492_v40 = vld [vmem:[#allocation2 + $0x74] sm:$0x1]  ;;  %v11535_v39 = vld [vmem:[#allocation2 + $0x5c] sm:$0x1] }
 0x16b   : > { %v12559_v0 = vadd.f32 %v1724_v61, %v1491_v60  ;;  %v3267_v61 = vsel %vm12348_vm13, %v3265_v45, %v3266_v38  ;;  %v1694_v9 = vpop.f32.mrf.mxu1  ;;  %v11534_v60 = vld [vmem:[#allocation2 + $0x58] sm:$0xf]  ;;  %v12577_v45 = vrot.slane %v2716_v34, 5  ;;  %v2929_v38 = vunpack.c.l.b16 %v2695_v29 }
 0x16c   : > { %v1729_v27 = vpop.f32.mrf.mxu3  ;;  %v3356_v5 = vunpack.c.l.b16 %v3267_v61  ;;  %v1841_v20 = vrot.slane %v11534_v60, 5  ;;  %v10052_v61 = vrot.slane %v1746_v63, 9  ;;  %v1844_v31 = vrot.slane %v11535_v39, 5  ;;  %v2493_v39 = vld [vmem:[#allocation2 + $0x78] sm:$0xf] }
 0x16d   : > { %15917 = vst [vmem:[#allocation11_spill] sm:$0xff] %v12559_v0  ;;  %v11537_v0 = vld [vmem:[#allocation2 + $0x68] sm:$0x1] }
 0x16e   : > { %v3380_v2 = vpack.c.b16 %v3356_v5, %v3355_v55  ;;  %v1843_v48 = vrot.slane %v1841_v20, 4  ;;  %v2954_v55 = vpack.c.b16 %v2930_v47, %v2929_v38  ;;  %v2726_v5 = vshll.u32 %v2492_v40, 16 }
 0x16f   : > { %v1458_v58 = vpop.f32.mrf.mxu0  ;;  %v1851_v28 = vrot.slane %v11537_v0, 5 }
 0x170   : > { %v12569_v62 = vadd.f32 %v1691_v56, %v1458_v58  ;;  %v2722_v56 = vrot.slane %v2720_v4, 4  ;;  %3496 = vmatmul.bf16.gmra.mxu1 %v3380_v2  ;;  %v2713_v58 = vor.u32 %v2712_v19, %v2709_v41  ;;  %v1842_v2 = vsel %vm12348_vm13, %v10052_v61, %v1841_v20  ;;  %v3156_v19 = vld [vmem:[#allocation2 + $0x6c] sm:$0xe] }
 0x171   : > { %v1845_v60 = vsel %vm12348_vm13, %v1843_v48, %v1844_v31  ;;  %v10277_v38 = vrot.slane %v3156_v19, 9  ;;  %v1933_v61 = vunpack.c.l.b16 %v1842_v2  ;;  %v2734_v2 = vshll.u32 %v2493_v39, 16 }
 0x172   : > { %v1493_v6 = vpop.f32.mrf.mxu2  ;;  %v2714_v41 = vrot.slane %v2713_v58, 4 }
 0x173   : > { %v12575_v11 = vadd.f32 %v1726_v1, %v1493_v6  ;;  %v2723_v1 = vor.u32 %v2722_v56, %v12577_v45  ;;  %v1696_v4 = vpop.f32.mrf.mxu1  ;;  %v3270_v6 = vrot.slane %v12561_v33, 5  ;;  %v2728_v56 = vrot.slane %v2726_v5, 5 }
 0x174   : > { %v1731_v52 = vpop.f32.mrf.mxu3  ;;  %v2719_v58 = vsel %vm11786_vm2, %v2714_v41, %v12577_v45  ;;  %v11536_v41 = vld [vmem:[#allocation2 + $0x64] sm:$0xf] }
 0x175   : > { %15918 = vst [vmem:[#allocation12_spill] sm:$0xff] %v12575_v11  ;;  %v2724_v63 = vrot.slane %v2723_v1, 4  ;;  %v3272_v47 = vrot.slane %v3270_v6, 4  ;;  %v3271_v20 = vsel %vm12348_vm13, %v10277_v38, %v3270_v6  ;;  %v2731_v1 = vshrl.u32 %v2493_v39, 16 }
 0x176   : > { %v3357_v48 = vunpack.c.l.b16 %v3271_v20 }
 0x177   : > { %2069 = vmatmul.bf16.gmra.mxu2 %v1957_v35  ;;  %v1461_v34 = vpop.f32.mrf.mxu0 }
 0x178   : > { %v12586_v21 = vadd.f32 %v1694_v9, %v1461_v34  ;;  %v3273_v9 = vrot.slane %v2492_v40, 5  ;;  %v2729_v40 = vsel %vm11786_vm2, %v2724_v63, %v2728_v56  ;;  %v11334_v34 = vld [vmem:[%s15894_s1 + $0x218] sm:$0xff]  ;;  %v1848_v63 = vrot.slane %v11536_v41, 5 }
 0x179   : > { %2388 = vmatmul.bf16.gmra.mxu3 %v11266_v54  ;;  %v1934_v54 = vunpack.c.l.b16 %v1845_v60  ;;  %4880 = vmatpush.bf16.msra.mxu0 %v11334_v34 }
 0x17a   : > { %v1496_v29 = vpop.f32.mrf.mxu2  ;;  %3070 = vmatmul.bf16.gmra.mxu0 %v2954_v55  ;;  %v3274_v33 = vsel %vm12348_vm13, %v3272_v47, %v3273_v9  ;;  %v1747_v55 = vld [vmem:[#allocation2 + $0x60] sm:$0xe]  ;;  %v2931_v47 = vunpack.c.l.b16 %v2719_v58  ;;  %v2932_v9 = vunpack.c.l.b16 %v2729_v40  ;;  %v1850_v11 = vrot.slane %v1848_v63, 4 }
 0x17b   : > { %v12591_v35 = vadd.f32 %v1729_v27, %v1496_v29  ;;  %v12599_v27 = vld [vmem:[#allocation2 + $0x7c] sm:$0xf]  ;;  %v3358_v31 = vunpack.c.l.b16 %v3274_v33  ;;  %v12606_v5 = vpop.f32.mrf.mxu1  ;;  %v1958_v38 = vpack.c.b16 %v1934_v54, %v1933_v61  ;;  %v10053_v20 = vrot.slane %v1747_v55, 9 }
 0x17c   : > { %v1734_v44 = vpop.f32.mrf.mxu3  ;;  %v2740_v6 = vshll.u32 %v12599_v27, 16  ;;  %v2744_v60 = vshrl.u32 %v12599_v27, 16  ;;  %v2733_v33 = vrot.slane %v2731_v1, 4  ;;  %v2955_v41 = vpack.c.b16 %v2932_v9, %v2931_v47  ;;  %v12628_v47 = vld [vmem:[#allocation2 + $0x88] sm:$0xf] }
 0x17d   : > { %15919 = vst [vmem:[#allocation13_spill] sm:$0xff] %v12591_v35  ;;  %v3381_v29 = vpack.c.b16 %v3358_v31, %v3357_v48  ;;  %v2736_v48 = vrot.slane %v2734_v2, 5  ;;  %v1849_v61 = vsel %vm12348_vm13, %v10053_v20, %v1848_v63  ;;  %v1852_v34 = vsel %vm12348_vm13, %v1850_v11, %v1851_v28  ;;  %v3157_v2 = vld [vmem:[#allocation2 + $0x78] sm:$0xe] }
 0x17e   : > { %v2742_v39 = vrot.slane %v2740_v6, 5  ;;  %v2746_v31 = vrot.slane %v2744_v60, 4  ;;  %v3277_v0 = vrot.slane %v12599_v27, 5  ;;  %v2496_v6 = vld [vmem:[#allocation2 + $0x84] sm:$0xf]  ;;  %v1935_v60 = vunpack.c.l.b16 %v1849_v61 }
 0x17f   : > { %v1463_v42 = vpop.f32.mrf.mxu0  ;;  %v2737_v54 = vor.u32 %v2736_v48, %v2733_v33  ;;  %v1936_v9 = vunpack.c.l.b16 %v1852_v34  ;;  %v2758_v27 = vshll.u32 %v2496_v6, 16  ;;  %v2764_v61 = vshll.u32 %v12628_v47, 16 }
 0x180   : > { %v12613_v45 = vadd.f32 %v1696_v4, %v1463_v42  ;;  %3501 = vmatmul.bf16.gmra.mxu1 %v3381_v29  ;;  %v2495_v4 = vld [vmem:[#allocation2 + $0x80] sm:$0x1]  ;;  %v11267_v42 = vld [vmem:[#allocation2 + $0x6c] sm:$0xff]  ;;  %v2747_v58 = vor.u32 %v2746_v31, %v2742_v39  ;;  %v3279_v63 = vrot.slane %v3277_v0, 4 }
 0x181   : > { %v2750_v40 = vshll.u32 %v2495_v4, 16  ;;  %v2738_v20 = vrot.slane %v2737_v54, 4 }
 0x182   : > { %v1498_v19 = vpop.f32.mrf.mxu2  ;;  %v2748_v33 = vrot.slane %v2747_v58, 4 }
 0x183   : > { %v12615_v56 = vadd.f32 %v1731_v52, %v1498_v19  ;;  %v12621_v1 = vpop.f32.mrf.mxu1  ;;  %v10278_v19 = vrot.slane %v3157_v2, 9  ;;  %v2752_v48 = vrot.slane %v2750_v40, 5  ;;  %v2743_v54 = vsel %vm11786_vm2, %v2738_v20, %v2742_v39  ;;  %v2498_v20 = vld [vmem:[#allocation2 + $0x8c] sm:$0x1] }
 0x184   : > { %v1736_v35 = vpop.f32.mrf.mxu3  ;;  %v1959_v2 = vpack.c.b16 %v1936_v9, %v1935_v60  ;;  %v2933_v10 = vunpack.c.l.b16 %v2743_v54  ;;  %v11539_v9 = vld [vmem:[#allocation2 + $0x74] sm:$0x1] }
 0x185   : > { %15920 = vst [vmem:[#allocation14_spill] sm:$0xff] %v12615_v56  ;;  %v3278_v28 = vsel %vm12348_vm13, %v10278_v19, %v3277_v0  ;;  %v2753_v58 = vsel %vm11786_vm2, %v2748_v33, %v2752_v48 }
 0x186   : > { %v2934_v39 = vunpack.c.l.b16 %v2753_v58 }
 0x187   : > { %2074 = vmatmul.bf16.gmra.mxu2 %v1958_v38  ;;  %v12617_v52 = vpop.f32.mrf.mxu0  ;;  %v3280_v38 = vrot.slane %v2495_v4, 5  ;;  %v2768_v4 = vshrl.u32 %v12628_v47, 16 }
 0x189   : > { %2393 = vmatmul.bf16.gmra.mxu3 %v11267_v42  ;;  %v3281_v11 = vsel %vm12348_vm13, %v3279_v63, %v3280_v38  ;;  %v3359_v42 = vunpack.c.l.b16 %v3278_v28  ;;  %v1748_v28 = vld [vmem:[#allocation2 + $0x6c] sm:$0xe]  ;;  %v2770_v56 = vrot.slane %v2768_v4, 4  ;;  %v2774_v4 = vshll.u32 %v2498_v20, 16 }
 0x18a   : > { %v1501_v55 = vpop.f32.mrf.mxu2  ;;  %3075 = vmatmul.bf16.gmra.mxu0 %v2955_v41  ;;  %v3360_v41 = vunpack.c.l.b16 %v3281_v11  ;;  %v2760_v11 = vrot.slane %v2758_v27, 5  ;;  %v10054_v48 = vrot.slane %v1748_v28, 9  ;;  %v11317_v27 = vld [vmem:[%s15894_s1 + $0x190] sm:$0xff] }
 0x18b   : > { %v12626_v29 = vadd.f32 %v1734_v44, %v1501_v55  ;;  %v2755_v44 = vshrl.u32 %v2496_v6, 16  ;;  %v12642_v40 = vpop.f32.mrf.mxu1  ;;  %v11538_v6 = vld [vmem:[#allocation2 + $0x70] sm:$0xf]  ;;  %3773 = vmatpush.bf16.msra.mxu2 %v11317_v27  ;;  %v2776_v27 = vrot.slane %v2774_v4, 5 }
 0x18c   : > { %v2354_v31 = vpop.f32.mrf.mxu3  ;;  %v3382_v34 = vpack.c.b16 %v3360_v41, %v3359_v42  ;;  %v1855_v19 = vrot.slane %v11538_v6, 5  ;;  %v11268_v42 = vld [vmem:[#allocation2 + $0x78] sm:$0xff]  ;;  %v1858_v41 = vrot.slane %v11539_v9, 5  ;;  %v2499_v6 = vld [vmem:[#allocation2 + $0x90] sm:$0xf] }
 0x18d   : > { %15921 = vst [vmem:[#allocation15_spill] sm:$0xff] %v12626_v29  ;;  %v2757_v63 = vrot.slane %v2755_v44, 4  ;;  %v12646_v29 = vrot.slane %v2764_v61, 5  ;;  %v2956_v61 = vpack.c.b16 %v2934_v39, %v2933_v10  ;;  %v3158_v39 = vld [vmem:[#allocation2 + $0x84] sm:$0xe] }
 0x18e   : > { %v1857_v60 = vrot.slane %v1855_v19, 4  ;;  %v12667_v9 = vld [vmem:[#allocation2 + $0x94] sm:$0xf] }
 0x18f   : > { %v12636_v55 = vpop.f32.mrf.mxu0  ;;  %v2761_v44 = vor.u32 %v2760_v11, %v2757_v63 }
 0x190   : > { %3506 = vmatmul.bf16.gmra.mxu1 %v3382_v34  ;;  %v11325_v34 = vld [vmem:[%s15894_s1 + $0x1d0] sm:$0xff]  ;;  %v1859_v10 = vsel %vm12348_vm13, %v1857_v60, %v1858_v41 }
 0x191   : > { %v2762_v28 = vrot.slane %v2761_v44, 4  ;;  %4455 = vmatpush.bf16.msra.mxu3 %v11325_v34 }
 0x192   : > { %v1503_v0 = vpop.f32.mrf.mxu2 }
 0x193   : > { %v12644_v38 = vadd.f32 %v1736_v35, %v1503_v0  ;;  %v2771_v35 = vor.u32 %v2770_v56, %v12646_v29  ;;  %v12656_v58 = vpop.f32.mrf.mxu1  ;;  %v3284_v56 = vrot.slane %v12628_v47, 5 }
 0x194   : > { %v12648_v33 = vpop.f32.mrf.mxu3 }
 0x195   : > { %15922 = vst [vmem:[#allocation16_spill] sm:$0xff] %v12644_v38  ;;  %v2772_v11 = vrot.slane %v2771_v35, 4  ;;  %v10279_v38 = vrot.slane %v3158_v39, 9  ;;  %v3286_v26 = vrot.slane %v3284_v56, 4  ;;  %v2788_v35 = vshll.u32 %v12667_v9, 16 }
 0x197   : > { %2079 = vmatmul.bf16.gmra.mxu2 %v1959_v2  ;;  %v12654_v54 = vpop.f32.mrf.mxu0  ;;  %v1856_v2 = vsel %vm12348_vm13, %v10054_v48, %v1855_v19  ;;  %v3287_v19 = vrot.slane %v2498_v20, 5  ;;  %v3285_v41 = vsel %vm12348_vm13, %v10279_v38, %v3284_v56  ;;  %v2792_v20 = vshrl.u32 %v12667_v9, 16 }
 0x198   : > { %v1937_v47 = vunpack.c.l.b16 %v1856_v2  ;;  %v3361_v4 = vunpack.c.l.b16 %v3285_v41  ;;  %v1662_v2 = vadd.f32 %v12368_v53, %v12376_v3  ;;  %v2767_v38 = vsel %vm11786_vm2, %v2762_v28, %v12646_v29  ;;  %v11540_v29 = vld [vmem:[#allocation2 + $0x7c] sm:$0xf] }
 0x199   : > { %2398 = vmatmul.bf16.gmra.mxu3 %v11268_v42  ;;  %v2779_v42 = vshrl.u32 %v2499_v6, 16  ;;  %v3288_v44 = vsel %vm12348_vm13, %v3286_v26, %v3287_v19  ;;  %v2777_v26 = vsel %vm11786_vm2, %v2772_v11, %v2776_v27  ;;  %v1749_v19 = vld [vmem:[#allocation2 + $0x78] sm:$0xe]  ;;  %v1862_v28 = vrot.slane %v11540_v29, 5 }
 0x19a   : > { %v2040_v0 = vpop.f32.mrf.mxu2  ;;  %3080 = vmatmul.bf16.gmra.mxu0 %v2956_v61  ;;  %v1938_v61 = vunpack.c.l.b16 %v1859_v10  ;;  %v3362_v34 = vunpack.c.l.b16 %v3288_v44  ;;  %v2794_v11 = vrot.slane %v2792_v20, 4  ;;  %v2935_v41 = vunpack.c.l.b16 %v2767_v38  ;;  %v11269_v20 = vld [vmem:[#allocation2 + $0x84] sm:$0xff] }
 0x19b   : > { %v2120_v63 = vadd.f32 %v2040_v0, %v12327_v43  ;;  %v11370_v43 = vld [vmem:[%s15896_s3 + $0x78] sm:$0xff]  ;;  %v2782_v0 = vshll.u32 %v2499_v6, 16  ;;  %v2781_v53 = vrot.slane %v2779_v42, 4  ;;  %v2936_v44 = vunpack.c.l.b16 %v2777_v26 }
 0x19c   : > { %v12672_v60 = vpop.f32.mrf.mxu3  ;;  %6107 = vmatpush.bf16.msra.mxu1 %v11370_v43  ;;  %v3383_v10 = vpack.c.b16 %v3362_v34, %v3361_v4  ;;  %v1960_v27 = vpack.c.b16 %v1938_v61, %v1937_v47  ;;  %v2501_v43 = vld [vmem:[#allocation2 + $0x98] sm:$0x1]  ;;  %v11541_v34 = vld [vmem:[#allocation2 + $0x80] sm:$0x1] }
 0x19d   : > { %v2434_v48 = vadd.f32 %v2354_v31, %v2120_v63  ;;  %v11333_v63 = vld [vmem:[%s15894_s1 + $0x210] sm:$0xff]  ;;  %v2784_v3 = vrot.slane %v2782_v0, 5  ;;  %v1864_v0 = vrot.slane %v1862_v28, 4  ;;  %v1865_v32 = vrot.slane %v11541_v34, 5 }
 0x19e   : > { %4881 = vmatpush.bf16.msra.mxu0 %v11333_v63  ;;  %v2798_v29 = vshll.u32 %v2501_v43, 16  ;;  %v2957_v61 = vpack.c.b16 %v2936_v44, %v2935_v41 }
 0x19f   : > { %v3116_v31 = vadd.f32 %v12617_v52, %v2434_v48  ;;  %v12691_v6 = vpop.f32.mrf.mxu0  ;;  %v12693_v52 = vpop.f32.mrf.mxu1  ;;  %v12698_v48 = vrot.slane %v2788_v35, 5  ;;  %v2785_v4 = vor.u32 %v2784_v3, %v2781_v53  ;;  %v1866_v53 = vsel %vm12348_vm13, %v1864_v0, %v1865_v32 }
 0x1a0   : > { %3511 = vmatmul.bf16.gmra.mxu1 %v3383_v10  ;;  %v1940_v44 = vunpack.c.l.b16 %v1866_v53 }
 0x1a1   : > { %v12689_v56 = vadd.f32 %v12606_v5, %v3116_v31  ;;  %v2795_v35 = vor.u32 %v2794_v11, %v12698_v48  ;;  %v2786_v26 = vrot.slane %v2785_v4, 4  ;;  %v2502_v11 = vld [vmem:[#allocation2 + $0x9c] sm:$0xf] }
 0x1a2   : > { %v2042_v39 = vpop.f32.mrf.mxu2 }
 0x1a3   : > { %15923 = vst [vmem:[#allocation17_spill] sm:$0xff] %v12689_v56  ;;  %v2121_v5 = vadd.f32 %v2042_v39, %v1662_v2  ;;  %v10055_v56 = vrot.slane %v1749_v19, 9  ;;  %v2796_v3 = vrot.slane %v2795_v35, 4  ;;  %v2800_v39 = vrot.slane %v2798_v29, 5 }
 0x1a4   : > { %v12701_v42 = vpop.f32.mrf.mxu3  ;;  %v2791_v32 = vsel %vm11786_vm2, %v2786_v26, %v12698_v48  ;;  %v2806_v29 = vshll.u32 %v2502_v11, 16  ;;  %v1750_v48 = vld [vmem:[#allocation2 + $0x84] sm:$0xe] }
 0x1a5   : > { %v2435_v31 = vadd.f32 %v12648_v33, %v2121_v5  ;;  %v1863_v33 = vsel %vm12348_vm13, %v10055_v56, %v1862_v28  ;;  %v3294_v56 = vrot.slane %v2501_v43, 5 }
 0x1a6   : > { %v1939_v41 = vunpack.c.l.b16 %v1863_v33 }
 0x1a7   : > { %2084 = vmatmul.bf16.gmra.mxu2 %v1960_v27  ;;  %v3117_v47 = vadd.f32 %v12636_v55, %v2435_v31  ;;  %v12708_v38 = vpop.f32.mrf.mxu0  ;;  %v12712_v63 = vpop.f32.mrf.mxu1  ;;  %v3291_v55 = vrot.slane %v12667_v9, 5  ;;  %v12722_v31 = vld [vmem:[#allocation2 + $0xa0] sm:$0xf] }
 0x1a8   : > { %v2816_v33 = vshrl.u32 %v12722_v31, 16 }
 0x1a9   : > { %v12706_v2 = vadd.f32 %v12621_v1, %v3117_v47  ;;  %2403 = vmatmul.bf16.gmra.mxu3 %v11269_v20  ;;  %v3159_v1 = vld [vmem:[#allocation2 + $0x90] sm:$0xe]  ;;  %v3293_v27 = vrot.slane %v3291_v55, 4  ;;  %v11542_v47 = vld [vmem:[#allocation2 + $0x88] sm:$0xf] }
 0x1aa   : > { %v2045_v10 = vpop.f32.mrf.mxu2  ;;  %3085 = vmatmul.bf16.gmra.mxu0 %v2957_v61  ;;  %v10280_v5 = vrot.slane %v3159_v1, 9  ;;  %v1869_v20 = vrot.slane %v11542_v47, 5  ;;  %v2812_v61 = vshll.u32 %v12722_v31, 16 }
 0x1ab   : > { %v2122_v19 = vadd.f32 %v2045_v10, %v12397_v25  ;;  %v2801_v25 = vsel %vm11786_vm2, %v2796_v3, %v2800_v39  ;;  %v3295_v43 = vsel %vm12348_vm13, %v3293_v27, %v3294_v56  ;;  %v2808_v27 = vrot.slane %v2806_v29, 5 }
 0x1ac   : > { %v12724_v9 = vpop.f32.mrf.mxu3  ;;  %v3292_v4 = vsel %vm12348_vm13, %v10280_v5, %v3291_v55  ;;  %v3364_v35 = vunpack.c.l.b16 %v3295_v43  ;;  %v2937_v55 = vunpack.c.l.b16 %v2791_v32  ;;  %v1871_v56 = vrot.slane %v1869_v20, 4  ;;  %v11316_v32 = vld [vmem:[%s15894_s1 + $0x188] sm:$0xff] }
 0x1ad   : > { %v2436_v28 = vadd.f32 %v12672_v60, %v2122_v19  ;;  %v2803_v60 = vshrl.u32 %v2502_v11, 16  ;;  %v3363_v34 = vunpack.c.l.b16 %v3292_v4  ;;  %v2938_v19 = vunpack.c.l.b16 %v2801_v25  ;;  %3774 = vmatpush.bf16.msra.mxu2 %v11316_v32 }
 0x1ae   : > { %v10056_v11 = vrot.slane %v1750_v48, 9  ;;  %v2818_v43 = vrot.slane %v2816_v33, 4  ;;  %v11324_v33 = vld [vmem:[%s15894_s1 + $0x1c8] sm:$0xff] }
 0x1af   : > { %v3118_v0 = vadd.f32 %v12654_v54, %v2436_v28  ;;  %v12738_v10 = vpop.f32.mrf.mxu0  ;;  %v12740_v53 = vpop.f32.mrf.mxu1  ;;  %v3384_v3 = vpack.c.b16 %v3364_v35, %v3363_v34  ;;  %v1961_v54 = vpack.c.b16 %v1940_v44, %v1939_v41  ;;  %v2805_v5 = vrot.slane %v2803_v60, 4  ;;  %v11543_v28 = vld [vmem:[#allocation2 + $0x8c] sm:$0x1]  ;;  %v2504_v34 = vld [vmem:[#allocation2 + $0xa4] sm:$0x1]  ;;  %v11270_v44 = vld [vmem:[#allocation2 + $0x90] sm:$0xff]  ;;  %4456 = vmatpush.bf16.msra.mxu3 %v11324_v33 }
 0x1b0   : > { %v1872_v4 = vrot.slane %v11543_v28, 5  ;;  %v2958_v25 = vpack.c.b16 %v2938_v19, %v2937_v55  ;;  %v1870_v60 = vsel %vm12348_vm13, %v10056_v11, %v1869_v20  ;;  %v3298_v20 = vrot.slane %v12722_v31, 5  ;;  %v12769_v11 = vld [vmem:[#allocation2 + $0xac] sm:$0xf]  ;;  %v11544_v31 = vld [vmem:[#allocation2 + $0x94] sm:$0xf] }
 0x1b1   : > { %v12736_v26 = vadd.f32 %v12642_v40, %v3118_v0  ;;  %3516 = vmatmul.bf16.gmra.mxu1 %v3384_v3  ;;  %v12743_v40 = vrot.slane %v2812_v61, 5  ;;  %v1941_v55 = vunpack.c.l.b16 %v1870_v60  ;;  %v3301_v28 = vrot.slane %v2504_v34, 5 }
 0x1b2   : > { %v2047_v39 = vpop.f32.mrf.mxu2  ;;  %v1873_v35 = vsel %vm12348_vm13, %v1871_v56, %v1872_v4  ;;  %v3300_v56 = vrot.slane %v3298_v20, 4 }
 0x1b3   : > { %v2123_v1 = vadd.f32 %v2047_v39, %v12415_v16  ;;  %v2809_v16 = vor.u32 %v2808_v27, %v2805_v5  ;;  %v2505_v39 = vld [vmem:[#allocation2 + $0xa8] sm:$0xf] }
 0x1b4   : > { %v12746_v47 = vpop.f32.mrf.mxu3 }
 0x1b5   : > { %v2437_v0 = vadd.f32 %v12701_v42, %v2123_v1  ;;  %v2819_v42 = vor.u32 %v2818_v43, %v12743_v40  ;;  %v2810_v19 = vrot.slane %v2809_v16, 4  ;;  %v3160_v1 = vld [vmem:[#allocation2 + $0x9c] sm:$0xe]  ;;  %v1751_v16 = vld [vmem:[#allocation2 + $0x90] sm:$0xe] }
 0x1b6   : > { %v10281_v27 = vrot.slane %v3160_v1, 9 }
 0x1b7   : > { %2089 = vmatmul.bf16.gmra.mxu2 %v1961_v54  ;;  %v3119_v41 = vadd.f32 %v12691_v6, %v2437_v0  ;;  %v12760_v48 = vpop.f32.mrf.mxu0  ;;  %v2822_v6 = vshll.u32 %v2504_v34, 16  ;;  %v12762_v61 = vpop.f32.mrf.mxu1  ;;  %v2820_v5 = vrot.slane %v2819_v42, 4  ;;  %v1876_v0 = vrot.slane %v11544_v31, 5 }
 0x1b8   : > { %v3299_v32 = vsel %vm12348_vm13, %v10281_v27, %v3298_v20  ;;  %v2830_v34 = vshll.u32 %v2505_v39, 16  ;;  %v2815_v33 = vsel %vm11786_vm2, %v2810_v19, %v12743_v40  ;;  %v11545_v19 = vld [vmem:[#allocation2 + $0x98] sm:$0x1] }
 0x1b9   : > { %v12758_v29 = vadd.f32 %v12656_v58, %v3119_v41  ;;  %2408 = vmatmul.bf16.gmra.mxu3 %v11270_v44  ;;  %v1942_v58 = vunpack.c.l.b16 %v1873_v35  ;;  %v2824_v43 = vrot.slane %v2822_v6, 5  ;;  %v2827_v41 = vshrl.u32 %v2505_v39, 16 }
 0x1ba   : > { %v2050_v3 = vpop.f32.mrf.mxu2  ;;  %3090 = vmatmul.bf16.gmra.mxu0 %v2958_v25  ;;  %v3302_v25 = vsel %vm12348_vm13, %v3300_v56, %v3301_v28  ;;  %v3365_v35 = vunpack.c.l.b16 %v3299_v32  ;;  %v2840_v6 = vshrl.u32 %v12769_v11, 16  ;;  %v1878_v40 = vrot.slane %v1876_v0, 4 }
 0x1bb   : > { %15924 = vst [vmem:[#allocation18_spill] sm:$0xff] %v12758_v29  ;;  %v2124_v54 = vadd.f32 %v2050_v3, %v12426_v49  ;;  %v11369_v49 = vld [vmem:[%s15896_s3 + $0x70] sm:$0xff]  ;;  %v3366_v42 = vunpack.c.l.b16 %v3302_v25  ;;  %v2825_v39 = vsel %vm11786_vm2, %v2820_v5, %v2824_v43  ;;  %v2829_v28 = vrot.slane %v2827_v41, 4 }
 0x1bc   : > { %v12775_v44 = vpop.f32.mrf.mxu3  ;;  %6108 = vmatpush.bf16.msra.mxu1 %v11369_v49  ;;  %v1962_v49 = vpack.c.b16 %v1942_v58, %v1941_v55  ;;  %v2842_v43 = vrot.slane %v2840_v6, 4  ;;  %v2940_v32 = vunpack.c.l.b16 %v2825_v39  ;;  %v2507_v25 = vld [vmem:[#allocation2 + $0xb0] sm:$0x1]  ;;  %v2508_v39 = vld [vmem:[#allocation2 + $0xb4] sm:$0xf] }
 0x1bd   : > { %v2438_v4 = vadd.f32 %v12724_v9, %v2124_v54  ;;  %v2836_v9 = vshll.u32 %v12769_v11, 16  ;;  %v10057_v54 = vrot.slane %v1751_v16, 9  ;;  %v3385_v27 = vpack.c.b16 %v3366_v42, %v3365_v35  ;;  %v363_v35 = vld [vmem:[%s11876_s9 + $0xf8] sm:$0xff] }
 0x1be   : > { %v2939_v16 = vunpack.c.l.b16 %v2815_v33  ;;  %v395_v29 = vpack.c.bf16 %v363_v35, %v363_v35  ;;  %v2846_v6 = vshll.u32 %v2507_v25, 16 }
 0x1bf   : > { %v3120_v60 = vadd.f32 %v12708_v38, %v2438_v4  ;;  %v12790_v20 = vpop.f32.mrf.mxu0  ;;  %v12794_v1 = vpop.f32.mrf.mxu1  ;;  %v11332_v38 = vld [vmem:[%s15894_s1 + $0x208] sm:$0xff]  ;;  %v2832_v4 = vrot.slane %v2830_v34, 5  ;;  %v12800_v5 = vrot.slane %v2836_v9, 5  ;;  %v11271_v34 = vld [vmem:[#allocation2 + $0x9c] sm:$0xff] }
 0x1c0   : > { %4882 = vmatpush.bf16.msra.mxu0 %v11332_v38 }
 0x1c1   : > { %v12788_v3 = vadd.f32 %v12693_v52, %v3120_v60  ;;  %v1879_v52 = vrot.slane %v11545_v19, 5  ;;  %3521 = vmatmul.bf16.gmra.mxu1 %v3385_v27  ;;  %v362_v60 = vld [vmem:[%s11876_s9 + $0xf0] sm:$0xff]  ;;  %v2833_v58 = vor.u32 %v2832_v4, %v2829_v28  ;;  %v2843_v9 = vor.u32 %v2842_v43, %v12800_v5  ;;  %v12821_v4 = vld [vmem:[#allocation2 + $0xb8] sm:$0xf] }
 0x1c2   : > { %v2052_v56 = vpop.f32.mrf.mxu2 }
 0x1c3   : > { %15925 = vst [vmem:[#allocation19_spill] sm:$0xff] %v12788_v3  ;;  %v2125_v31 = vadd.f32 %v2052_v56, %v12443_v22  ;;  %v394_v3 = vpack.c.bf16 %v362_v60, %v362_v60  ;;  %v1877_v22 = vsel %vm12348_vm13, %v10057_v54, %v1876_v0  ;;  %v1880_v55 = vsel %vm12348_vm13, %v1878_v40, %v1879_v52 }
 0x1c4   : > { %v12805_v19 = vpop.f32.mrf.mxu3  ;;  %v1943_v0 = vunpack.c.l.b16 %v1877_v22  ;;  %v1944_v54 = vunpack.c.l.b16 %v1880_v55  ;;  %v663_v40 = vshrl.u32 %v395_v29, 16  ;;  %v2834_v28 = vrot.slane %v2833_v58, 4 }
 0x1c5   : > { %v2439_v42 = vadd.f32 %v12746_v47, %v2125_v31  ;;  %v655_v33 = vshrl.u32 %v394_v3, 16  ;;  %v2959_v47 = vpack.c.b16 %v2940_v32, %v2939_v16  ;;  %v2848_v16 = vrot.slane %v2846_v6, 5  ;;  %v3161_v32 = vld [vmem:[#allocation2 + $0xa8] sm:$0xe] }
 0x1c6   : > { %v2851_v60 = vshrl.u32 %v2508_v39, 16  ;;  %v10282_v35 = vrot.slane %v3161_v32, 9  ;;  %v3308_v22 = vrot.slane %v2507_v25, 5  ;;  %v2854_v55 = vshll.u32 %v2508_v39, 16  ;;  %v830_v39 = vld [vmem:[#allocation2 + $0xc0] sm:$0xf] }
 0x1c7   : > { %2094 = vmatmul.bf16.gmra.mxu2 %v1962_v49  ;;  %v3121_v41 = vadd.f32 %v12738_v10, %v2439_v42  ;;  %v12816_v27 = vpop.f32.mrf.mxu0  ;;  %v12818_v56 = vpop.f32.mrf.mxu1  ;;  %v3305_v10 = vrot.slane %v12769_v11, 5  ;;  %v657_v31 = vrot.slane %v655_v33, 7  ;;  %v658_v49 = vshll.u32 %v394_v3, 16 }
 0x1c8   : > { %15926 = vst [vmem:[#allocation20_spill] sm:$0xff] %v12818_v56  ;;  %v2860_v11 = vshll.u32 %v12821_v4, 16  ;;  %v666_v56 = vshll.u32 %v395_v29, 16  ;;  %v2839_v29 = vsel %vm11786_vm2, %v2834_v28, %v12800_v5  ;;  %v1752_v28 = vld [vmem:[#allocation2 + $0x9c] sm:$0xe] }
 0x1c9   : > { %v12814_v38 = vadd.f32 %v12712_v63, %v3121_v41  ;;  %2413 = vmatmul.bf16.gmra.mxu3 %v11271_v34  ;;  %v2844_v63 = vrot.slane %v2843_v9, 4  ;;  %v3307_v42 = vrot.slane %v3305_v10, 4  ;;  %v665_v41 = vrot.slane %v663_v40, 7  ;;  %v11546_v40 = vld [vmem:[#allocation2 + $0xa0] sm:$0xf] }
 0x1ca   : > { %v2055_v52 = vpop.f32.mrf.mxu2  ;;  %3095 = vmatmul.bf16.gmra.mxu0 %v2959_v47  ;;  %v2864_v34 = vshrl.u32 %v12821_v4, 16  ;;  %v660_v9 = vor.u32 %v658_v49, %v657_v31 }
 0x1cb   : > { %v2126_v43 = vadd.f32 %v2055_v52, %v12460_v59  ;;  %v3306_v59 = vsel %vm12348_vm13, %v10282_v35, %v3305_v10  ;;  %v3309_v3 = vsel %vm12348_vm13, %v3307_v42, %v3308_v22  ;;  %v1963_v52 = vpack.c.b16 %v1944_v54, %v1943_v0  ;;  %v834_v42 = vld [vmem:[#allocation2 + $0xc8] sm:$0x1] }
 0x1cc   : > { %v12826_v33 = vpop.f32.mrf.mxu3  ;;  %v3367_v6 = vunpack.c.l.b16 %v3306_v59  ;;  %v3368_v47 = vunpack.c.l.b16 %v3309_v3  ;;  %v2849_v49 = vsel %vm11786_vm2, %v2844_v63, %v2848_v16  ;;  %v2853_v54 = vrot.slane %v2851_v60, 4 }
 0x1cd   : > { %v2440_v58 = vadd.f32 %v12775_v44, %v2126_v43  ;;  %v661_v44 = vrot.slane %v657_v31, 4  ;;  %v1883_v43 = vrot.slane %v11546_v40, 5  ;;  %v668_v31 = vor.u32 %v666_v56, %v665_v41 }
 0x1ce   : > { %v3386_v35 = vpack.c.b16 %v3368_v47, %v3367_v6  ;;  %v2856_v22 = vrot.slane %v2854_v55, 5  ;;  %v831_v5 = vsel %vm11944_vm9, %v660_v9, %v830_v39  ;;  %v12849_v59 = vrot.slane %v2860_v11, 5  ;;  %v11547_v6 = vld [vmem:[#allocation2 + $0xa4] sm:$0x1] }
 0x1cf   : > { %v3122_v25 = vadd.f32 %v12760_v48, %v2440_v58  ;;  %v12840_v32 = vpop.f32.mrf.mxu0  ;;  %v12844_v48 = vpop.f32.mrf.mxu1  ;;  %v670_v58 = vrot.slane %v665_v41, 4  ;;  %v2866_v3 = vrot.slane %v2864_v34, 4  ;;  %v669_v63 = vsel %vm11936_vm8, %v661_v44, %v668_v31  ;;  %832 = vst [vmem:[#allocation2 + $0xc0] sm:$0xf] %v831_v5  ;;  %v2510_v41 = vld [vmem:[#allocation2 + $0xbc] sm:$0x1] }
 0x1d0   : > { %v2941_v16 = vunpack.c.l.b16 %v2839_v29  ;;  %v2942_v56 = vunpack.c.l.b16 %v2849_v49  ;;  %833 = vst [vmem:[#allocation2 + $0xc4] sm:$0xf] %v669_v63  ;;  %v10058_v11 = vrot.slane %v1752_v28, 9  ;;  %v1885_v9 = vrot.slane %v1883_v43, 4  ;;  %v11315_v29 = vld [vmem:[%s15894_s1 + $0x180] sm:$0xff] }
 0x1d1   : > { %v12838_v10 = vadd.f32 %v12740_v53, %v3122_v25  ;;  %3526 = vmatmul.bf16.gmra.mxu1 %v3386_v35  ;;  %v835_v60 = vsel %vm11952_vm10, %v670_v58, %v834_v42  ;;  %v11272_v25 = vld [vmem:[#allocation2 + $0xa8] sm:$0xff]  ;;  %v1886_v47 = vrot.slane %v11547_v6, 5  ;;  %v2857_v44 = vor.u32 %v2856_v22, %v2853_v54  ;;  %3775 = vmatpush.bf16.msra.mxu2 %v11315_v29  ;;  %v3162_v5 = vld [vmem:[#allocation2 + $0xb4] sm:$0xe] }
 0x1d2   : > { %v2057_v0 = vpop.f32.mrf.mxu2  ;;  %836 = vst [vmem:[#allocation2 + $0xc8] sm:$0x1] %v835_v60  ;;  %v2867_v39 = vor.u32 %v2866_v3, %v12849_v59  ;;  %v2870_v40 = vshll.u32 %v2510_v41, 16  ;;  %v1884_v42 = vsel %vm12348_vm13, %v10058_v11, %v1883_v43  ;;  %v10283_v28 = vrot.slane %v3162_v5, 9 }
 0x1d3   : > { %v2127_v53 = vadd.f32 %v2057_v0, %v12478_v24  ;;  %v3312_v0 = vrot.slane %v12821_v4, 5  ;;  %v2858_v22 = vrot.slane %v2857_v44, 4  ;;  %v3315_v63 = vrot.slane %v2510_v41, 5  ;;  %v11368_v4 = vld [vmem:[%s15896_s3 + $0x68] sm:$0xff] }
 0x1d4   : > { %v12856_v24 = vpop.f32.mrf.mxu3  ;;  %v2868_v58 = vrot.slane %v2867_v39, 4  ;;  %v1945_v43 = vunpack.c.l.b16 %v1884_v42  ;;  %6109 = vmatpush.bf16.msra.mxu1 %v11368_v4 }
 0x1d5   : > { %v2441_v55 = vadd.f32 %v12805_v19, %v2127_v53  ;;  %v2960_v19 = vpack.c.b16 %v2942_v56, %v2941_v16  ;;  %v2872_v53 = vrot.slane %v2870_v40, 5  ;;  %v3314_v3 = vrot.slane %v3312_v0, 4  ;;  %v11331_v40 = vld [vmem:[%s15894_s1 + $0x200] sm:$0xff] }
 0x1d6   : > { %v3313_v60 = vsel %vm12348_vm13, %v10283_v28, %v3312_v0  ;;  %4883 = vmatpush.bf16.msra.mxu0 %v11331_v40 }
 0x1d7   : > { %2099 = vmatmul.bf16.gmra.mxu2 %v1963_v52  ;;  %v3123_v34 = vadd.f32 %v12790_v20, %v2441_v55  ;;  %v12866_v35 = vpop.f32.mrf.mxu0  ;;  %v12868_v52 = vpop.f32.mrf.mxu1  ;;  %v11323_v20 = vld [vmem:[%s15894_s1 + $0x1c0] sm:$0xff]  ;;  %v3316_v55 = vsel %vm12348_vm13, %v3314_v3, %v3315_v63  ;;  %v2873_v6 = vsel %vm11786_vm2, %v2868_v58, %v2872_v53 }
 0x1d8   : > { %4457 = vmatpush.bf16.msra.mxu3 %v11323_v20  ;;  %v12889_v11 = vld [vmem:[#allocation2 + $0xc4] sm:$0xf]  ;;  %v2944_v58 = vunpack.c.l.b16 %v2873_v6 }
 0x1d9   : > { %v12864_v49 = vadd.f32 %v12762_v61, %v3123_v34  ;;  %2418 = vmatmul.bf16.gmra.mxu3 %v11272_v25  ;;  %v1887_v61 = vsel %vm12348_vm13, %v1885_v9, %v1886_v47  ;;  %v3370_v34 = vunpack.c.l.b16 %v3316_v55  ;;  %v2863_v25 = vsel %vm11786_vm2, %v2858_v22, %v12849_v59  ;;  %v2513_v53 = vld [vmem:[#allocation2 + $0xc8] sm:$0x1]  ;;  %v11549_v55 = vld [vmem:[#allocation2 + $0xb0] sm:$0x1] }
 0x1da   : > { %v2060_v31 = vpop.f32.mrf.mxu2  ;;  %3100 = vmatmul.bf16.gmra.mxu0 %v2960_v19  ;;  %v1946_v9 = vunpack.c.l.b16 %v1887_v61  ;;  %v1753_v19 = vld [vmem:[#allocation2 + $0xa8] sm:$0xe]  ;;  %v2884_v59 = vshll.u32 %v12889_v11, 16  ;;  %v11548_v61 = vld [vmem:[#allocation2 + $0xac] sm:$0xf] }
 0x1db   : > { %v2128_v54 = vadd.f32 %v2060_v31, %v12489_v7  ;;  %v2511_v7 = vld [vmem:[#allocation2 + $0xc0] sm:$0xf]  ;;  %v2888_v31 = vshrl.u32 %v12889_v11, 16  ;;  %v1890_v22 = vrot.slane %v11548_v61, 5  ;;  %v10059_v5 = vrot.slane %v1753_v19, 9 }
 0x1dc   : > { %v12883_v56 = vpop.f32.mrf.mxu3  ;;  %v2875_v47 = vshrl.u32 %v2511_v7, 16  ;;  %v2878_v44 = vshll.u32 %v2511_v7, 16  ;;  %v3319_v19 = vrot.slane %v12889_v11, 5 }
 0x1dd   : > { %v2442_v16 = vadd.f32 %v12826_v33, %v2128_v54  ;;  %v3369_v33 = vunpack.c.l.b16 %v3313_v60  ;;  %v1964_v54 = vpack.c.b16 %v1946_v9, %v1945_v43  ;;  %v2890_v4 = vrot.slane %v2888_v31, 4 }
 0x1de   : > { %v2877_v28 = vrot.slane %v2875_v47, 4  ;;  %v2880_v3 = vrot.slane %v2878_v44, 5  ;;  %v1892_v43 = vrot.slane %v1890_v22, 4  ;;  %v2894_v9 = vshll.u32 %v2513_v53, 16 }
 0x1df   : > { %v3124_v41 = vadd.f32 %v12816_v27, %v2442_v16  ;;  %v12900_v29 = vpop.f32.mrf.mxu0  ;;  %v12902_v27 = vpop.f32.mrf.mxu1  ;;  %v3387_v20 = vpack.c.b16 %v3370_v34, %v3369_v33  ;;  %v2886_v16 = vrot.slane %v2884_v59, 5  ;;  %v1891_v34 = vsel %vm12348_vm13, %v10059_v5, %v1890_v22 }
 0x1e0   : > { %v1947_v59 = vunpack.c.l.b16 %v1891_v34  ;;  %v2896_v31 = vrot.slane %v2894_v9, 5  ;;  %v3321_v61 = vrot.slane %v3319_v19, 4  ;;  %v3322_v22 = vrot.slane %v2513_v53, 5 }
 0x1e1   : > { %v12898_v39 = vadd.f32 %v12794_v1, %v3124_v41  ;;  %v2943_v1 = vunpack.c.l.b16 %v2863_v25  ;;  %3531 = vmatmul.bf16.gmra.mxu1 %v3387_v20  ;;  %v1893_v41 = vrot.slane %v11549_v55, 5  ;;  %v2881_v25 = vor.u32 %v2880_v3, %v2877_v28 }
 0x1e2   : > { %v2062_v42 = vpop.f32.mrf.mxu2 }
 0x1e3   : > { %v2129_v0 = vadd.f32 %v2062_v42, %v12506_v57  ;;  %v11273_v57 = vld [vmem:[#allocation2 + $0xb4] sm:$0xff]  ;;  %v2961_v33 = vpack.c.b16 %v2944_v58, %v2943_v1  ;;  %v1894_v20 = vsel %vm12348_vm13, %v1892_v43, %v1893_v41  ;;  %v3163_v42 = vld [vmem:[#allocation2 + $0xc0] sm:$0xe] }
 0x1e4   : > { %v2381_v7 = vpop.f32.mrf.mxu3  ;;  %v10284_v1 = vrot.slane %v3163_v42, 9  ;;  %v1948_v55 = vunpack.c.l.b16 %v1894_v20 }
 0x1e5   : > { %v2443_v63 = vadd.f32 %v12856_v24, %v2129_v0  ;;  %v2891_v24 = vor.u32 %v2890_v4, %v2886_v16  ;;  %v12924_v0 = vld [vmem:[#allocation2 + $0x1c] sm:$0xf] }
 0x1e6   : > { %v3320_v3 = vsel %vm12348_vm13, %v10284_v1, %v3319_v19  ;;  %v3947_v4 = vshll.u32 %v12924_v0, 16 }
 0x1e7   : > { %2104 = vmatmul.bf16.gmra.mxu2 %v1964_v54  ;;  %v12912_v60 = vadd.f32 %v12840_v32, %v2443_v63  ;;  %v12916_v6 = vpop.f32.mrf.mxu0  ;;  %v12918_v47 = vpop.f32.mrf.mxu1  ;;  %v3889_v32 = vld [vmem:[#allocation2 + $0x18] sm:$0xf]  ;;  %v2882_v54 = vrot.slane %v2881_v25, 4  ;;  %v2892_v11 = vrot.slane %v2891_v24, 4  ;;  %v3323_v63 = vsel %vm12348_vm13, %v3321_v61, %v3322_v22  ;;  %v3891_v22 = vld [vmem:[#allocation2 + $0x20] sm:$0x1] }
 0x1e8   : > { %v3938_v5 = vshrl.u32 %v3889_v32, 16  ;;  %v3941_v28 = vshll.u32 %v3889_v32, 16  ;;  %v3371_v53 = vunpack.c.l.b16 %v3320_v3  ;;  %v3372_v41 = vunpack.c.l.b16 %v3323_v63  ;;  %v1754_v32 = vld [vmem:[#allocation2 + $0xb4] sm:$0xe]  ;;  %v11551_v63 = vld [vmem:[#allocation2 + $0xbc] sm:$0x1] }
 0x1e9   : > { %2423 = vmatmul.bf16.gmra.mxu3 %v11273_v57  ;;  %v3951_v57 = vshrl.u32 %v12924_v0, 16  ;;  %v2887_v25 = vsel %vm11786_vm2, %v2882_v54, %v2886_v16  ;;  %v2897_v24 = vsel %vm11786_vm2, %v2892_v11, %v2896_v31  ;;  %v3949_v42 = vrot.slane %v3947_v4, 5  ;;  %v4571_v4 = vld [vmem:[#allocation2 + $0x18] sm:$0xe] }
 0x1ea   : > { %v2065_v44 = vpop.f32.mrf.mxu2  ;;  %3105 = vmatmul.bf16.gmra.mxu0 %v2961_v33  ;;  %v3388_v19 = vpack.c.b16 %v3372_v41, %v3371_v53  ;;  %v3943_v20 = vrot.slane %v3941_v28, 5  ;;  %v1965_v61 = vpack.c.b16 %v1948_v55, %v1947_v59  ;;  %v2946_v3 = vunpack.c.l.b16 %v2897_v24  ;;  %v11274_v28 = vld [vmem:[#allocation2 + $0xc0] sm:$0xff] }
 0x1eb   : > { %v2130_v40 = vadd.f32 %v2065_v44, %v12523_v15  ;;  %v3953_v1 = vrot.slane %v3951_v57, 4  ;;  %v10060_v54 = vrot.slane %v1754_v32, 9  ;;  %v1900_v31 = vrot.slane %v11551_v63, 5 }
 0x1ec   : > { %v2384_v15 = vpop.f32.mrf.mxu3 }
 0x1ed   : > { %v2444_v58 = vadd.f32 %v12883_v56, %v2130_v40  ;;  %v11550_v56 = vld [vmem:[#allocation2 + $0xb8] sm:$0xf]  ;;  %v3940_v40 = vrot.slane %v3938_v5, 4  ;;  %v3954_v41 = vor.u32 %v3953_v1, %v3949_v42 }
 0x1ee   : > { %v1897_v9 = vrot.slane %v11550_v56, 5  ;;  %v3957_v56 = vshll.u32 %v3891_v22, 16 }
 0x1ef   : > { %v3126_v43 = vadd.f32 %v12866_v35, %v2444_v58  ;;  %v12937_v34 = vpop.f32.mrf.mxu0  ;;  %v12943_v44 = vpop.f32.mrf.mxu1  ;;  %v2945_v58 = vunpack.c.l.b16 %v2887_v25  ;;  %v3944_v53 = vor.u32 %v3943_v20, %v3940_v40  ;;  %v4640_v20 = vrot.slane %v3891_v22, 5 }
 0x1f1   : > { %v12935_v33 = vadd.f32 %v12844_v48, %v3126_v43  ;;  %3536 = vmatmul.bf16.gmra.mxu1 %v3388_v19  ;;  %v1899_v43 = vrot.slane %v1897_v9, 4  ;;  %v2962_v59 = vpack.c.b16 %v2946_v3, %v2945_v58  ;;  %v3945_v19 = vrot.slane %v3944_v53, 4 }
 0x1f2   : > { %v2067_v35 = vpop.f32.mrf.mxu2 }
 0x1f3   : > { %v2131_v48 = vadd.f32 %v2067_v35, %v12541_v37  ;;  %v4637_v37 = vrot.slane %v12924_v0, 5  ;;  %v1901_v24 = vsel %vm12348_vm13, %v1899_v43, %v1900_v31  ;;  %v3955_v35 = vrot.slane %v3954_v41, 4 }
 0x1f4   : > { %v2386_v11 = vpop.f32.mrf.mxu3  ;;  %v10493_v0 = vrot.slane %v4571_v4, 9  ;;  %v1950_v3 = vunpack.c.l.b16 %v1901_v24 }
 0x1f5   : > { %v2445_v16 = vadd.f32 %v2381_v7, %v2131_v48  ;;  %v1898_v7 = vsel %vm12348_vm13, %v10060_v54, %v1897_v9  ;;  %v4639_v40 = vrot.slane %v4637_v37, 4  ;;  %v11367_v9 = vld [vmem:[%s15896_s3 + $0x60] sm:$0xff]  ;;  %v3950_v54 = vsel %vm11786_vm2, %v3945_v19, %v3949_v42 }
 0x1f6   : > { %v3892_v48 = vld [vmem:[#allocation2 + $0x24] sm:$0xf]  ;;  %v1949_v58 = vunpack.c.l.b16 %v1898_v7  ;;  %6110 = vmatpush.bf16.msra.mxu1 %v11367_v9 }
 0x1f7   : > { %2109 = vmatmul.bf16.gmra.mxu2 %v1965_v61  ;;  %v12947_v5 = vadd.f32 %v12900_v29, %v2445_v16  ;;  %v12950_v57 = vpop.f32.mrf.mxu0  ;;  %v12954_v55 = vpop.f32.mrf.mxu1  ;;  %v3959_v29 = vrot.slane %v3957_v56, 5  ;;  %v12962_v61 = vld [vmem:[#allocation2 + $0x28] sm:$0xf]  ;;  %v4641_v63 = vsel %vm12348_vm13, %v4639_v40, %v4640_v20  ;;  %v3962_v31 = vshrl.u32 %v3892_v48, 16  ;;  %v3894_v40 = vld [vmem:[#allocation2 + $0x2c] sm:$0x1] }
 0x1f8   : > { %v3965_v43 = vshll.u32 %v3892_v48, 16  ;;  %v3971_v53 = vshll.u32 %v12962_v61, 16  ;;  %v3975_v41 = vshrl.u32 %v12962_v61, 16  ;;  %v4765_v24 = vunpack.c.l.b16 %v4641_v63  ;;  %v12990_v63 = vld [vmem:[#allocation2 + $0x34] sm:$0xf] }
 0x1f9   : > { %2428 = vmatmul.bf16.gmra.mxu3 %v11274_v28  ;;  %v3960_v22 = vsel %vm11786_vm2, %v3955_v35, %v3959_v29  ;;  %v1966_v28 = vpack.c.b16 %v1950_v3, %v1949_v58  ;;  %v3964_v19 = vrot.slane %v3962_v31, 4  ;;  %v3981_v3 = vshll.u32 %v3894_v40, 16 }
 0x1fa   : > { %v2070_v25 = vpop.f32.mrf.mxu2  ;;  %3110 = vmatmul.bf16.gmra.mxu0 %v2962_v59  ;;  %v4338_v59 = vunpack.c.l.b16 %v3950_v54  ;;  %v4339_v7 = vunpack.c.l.b16 %v3960_v22  ;;  %v3967_v35 = vrot.slane %v3965_v43, 5  ;;  %v3973_v29 = vrot.slane %v3971_v53, 5  ;;  %v4572_v22 = vld [vmem:[#allocation2 + $0x24] sm:$0xe] }
 0x1fb   : > { %v2132_v32 = vadd.f32 %v2070_v25, %v12552_v17  ;;  %v4644_v54 = vrot.slane %v12962_v61, 5  ;;  %v3983_v43 = vrot.slane %v3981_v3, 5  ;;  %v11299_v3 = vld [vmem:[#allocation2 + $0x18] sm:$0xff] }
 0x1fc   : > { %v2389_v16 = vpop.f32.mrf.mxu3  ;;  %v3968_v48 = vor.u32 %v3967_v35, %v3964_v19 }
 0x1fd   : > { %v2446_v1 = vadd.f32 %v2384_v15, %v2132_v32  ;;  %v4638_v15 = vsel %vm12348_vm13, %v10493_v0, %v4637_v37  ;;  %v3977_v32 = vrot.slane %v3975_v41, 4 }
 0x1fe   : > { %v4764_v25 = vunpack.c.l.b16 %v4638_v15 }
 0x1ff   : > { %v3128_v17 = vadd.f32 %v12916_v6, %v2446_v1  ;;  %v12978_v6 = vpop.f32.mrf.mxu0  ;;  %v12980_v4 = vpop.f32.mrf.mxu1  ;;  %v4370_v1 = vpack.c.b16 %v4339_v7, %v4338_v59  ;;  %v3978_v58 = vor.u32 %v3977_v32, %v3973_v29  ;;  %v4647_v59 = vrot.slane %v3894_v40, 5 }
 0x200   : > { %v4796_v9 = vpack.c.b16 %v4765_v24, %v4764_v25  ;;  %v3995_v25 = vshll.u32 %v12990_v63, 16 }
 0x201   : > { %v12976_v42 = vadd.f32 %v12902_v27, %v3128_v17  ;;  %v3979_v31 = vrot.slane %v3978_v58, 4 }
 0x202   : > { %v2072_v56 = vpop.f32.mrf.mxu2 }
 0x203   : > { %v2133_v37 = vadd.f32 %v2072_v56, %v12569_v62  ;;  %v10494_v56 = vrot.slane %v4572_v22, 9  ;;  %v3984_v35 = vsel %vm11786_vm2, %v3979_v31, %v3983_v43 }
 0x204   : > { %v2391_v27 = vpop.f32.mrf.mxu3  ;;  %v4341_v22 = vunpack.c.l.b16 %v3984_v35 }
 0x205   : > { %v2447_v0 = vadd.f32 %v2386_v11, %v2133_v37  ;;  %v3895_v11 = vld [vmem:[#allocation2 + $0x30] sm:$0xf] }
 0x206   : > { %v3986_v61 = vshrl.u32 %v3895_v11, 16  ;;  %v3989_v7 = vshll.u32 %v3895_v11, 16 }
 0x207   : > { %2114 = vmatmul.bf16.gmra.mxu2 %v1966_v28  ;;  %v12984_v20 = vadd.f32 %v12937_v34, %v2447_v0  ;;  %v12986_v62 = vpop.f32.mrf.mxu0  ;;  %v3969_v34 = vrot.slane %v3968_v48, 4  ;;  %v12992_v53 = vpop.f32.mrf.mxu1  ;;  %v4646_v28 = vrot.slane %v4644_v54, 4  ;;  %v4645_v0 = vsel %vm12348_vm13, %v10494_v56, %v4644_v54 }
 0x208   : > { %v3997_v48 = vrot.slane %v3995_v25, 5 }
 0x209   : > { %4458 = vmatmul.bf16.vlgmr.msra.gmra.mxu3 %v4370_v1  ;;  %v3974_v19 = vsel %vm11786_vm2, %v3969_v34, %v3973_v29  ;;  %v4648_v40 = vsel %vm12348_vm13, %v4646_v28, %v4647_v59 }
 0x20a   : > { %v2075_v17 = vpop.f32.mrf.mxu2  ;;  %4884 = vmatmul.bf16.vlgmr.msra.gmra.mxu0 %v4796_v9  ;;  %v3988_v9 = vrot.slane %v3986_v61, 4  ;;  %v4767_v11 = vunpack.c.l.b16 %v4648_v40 }
 0x20b   : > { %v2134_v15 = vadd.f32 %v2075_v17, %v12586_v21  ;;  %v3999_v21 = vshrl.u32 %v12990_v63, 16  ;;  %v4340_v17 = vunpack.c.l.b16 %v3974_v19 }
 0x20c   : > { %v2394_v37 = vpop.f32.mrf.mxu3 }
 0x20d   : > { %v2448_v41 = vadd.f32 %v2389_v16, %v2134_v15  ;;  %v4001_v58 = vrot.slane %v3999_v21, 4  ;;  %v4766_v15 = vunpack.c.l.b16 %v4645_v0  ;;  %v4371_v59 = vpack.c.b16 %v4341_v22, %v4340_v17 }
 0x20f   : > { %v3130_v24 = vadd.f32 %v12950_v57, %v2448_v41  ;;  %v13004_v32 = vpop.f32.mrf.mxu0  ;;  %v3991_v57 = vrot.slane %v3989_v7, 5  ;;  %v13011_v43 = vpop.f32.mrf.mxu1  ;;  %v4002_v41 = vor.u32 %v4001_v58, %v3997_v48  ;;  %v4797_v61 = vpack.c.b16 %v4767_v11, %v4766_v15  ;;  %v4573_v7 = vld [vmem:[#allocation2 + $0x30] sm:$0xe] }
 0x210   : > { %v10495_v0 = vrot.slane %v4573_v7, 9 }
 0x211   : > { %v13002_v16 = vadd.f32 %v12943_v44, %v3130_v24  ;;  %v3897_v44 = vld [vmem:[#allocation2 + $0x38] sm:$0x1]  ;;  %v3992_v54 = vor.u32 %v3991_v57, %v3988_v9  ;;  %v3898_v9 = vld [vmem:[#allocation2 + $0x3c] sm:$0xf]  ;;  %v13023_v57 = vld [vmem:[#allocation2 + $0x40] sm:$0xf] }
 0x212   : > { %v2077_v1 = vpop.f32.mrf.mxu2  ;;  %v4005_v56 = vshll.u32 %v3897_v44, 16  ;;  %v4013_v15 = vshll.u32 %v3898_v9, 16  ;;  %v4019_v11 = vshll.u32 %v13023_v57, 16 }
 0x213   : > { %v2135_v29 = vadd.f32 %v2077_v1, %v12613_v45  ;;  %v4651_v45 = vrot.slane %v12990_v63, 5  ;;  %v3993_v24 = vrot.slane %v3992_v54, 4  ;;  %v4654_v1 = vrot.slane %v3897_v44, 5  ;;  %v11366_v63 = vld [vmem:[%s15896_s3 + $0x58] sm:$0xff] }
 0x214   : > { %v2396_v31 = vpop.f32.mrf.mxu3  ;;  %v4007_v19 = vrot.slane %v4005_v56, 5  ;;  %6111 = vmatpush.bf16.msra.mxu1 %v11366_v63  ;;  %v4010_v44 = vshrl.u32 %v3898_v9, 16 }
 0x215   : > { %v2449_v34 = vadd.f32 %v2391_v27, %v2135_v29  ;;  %v4003_v27 = vrot.slane %v4002_v41, 4  ;;  %v4653_v40 = vrot.slane %v4651_v45, 4  ;;  %v3998_v29 = vsel %vm11786_vm2, %v3993_v24, %v3997_v48 }
 0x216   : > { %v4652_v17 = vsel %vm12348_vm13, %v10495_v0, %v4651_v45  ;;  %v4023_v48 = vshrl.u32 %v13023_v57, 16  ;;  %v4342_v41 = vunpack.c.l.b16 %v3998_v29  ;;  %v4015_v24 = vrot.slane %v4013_v15, 5  ;;  %v3900_v0 = vld [vmem:[#allocation2 + $0x44] sm:$0x1]  ;;  %v13053_v15 = vld [vmem:[#allocation2 + $0x4c] sm:$0xf] }
 0x217   : > { %3776 = vmatmul.bf16.vlgmr.msra.gmra.mxu2 %v11299_v3  ;;  %v13014_v28 = vadd.f32 %v12978_v6, %v2449_v34  ;;  %v13017_v25 = vpop.f32.mrf.mxu0  ;;  %v13034_v22 = vpop.f32.mrf.mxu1 }
 0x218   : > { %15927 = vst [vmem:[#allocation21_spill] sm:$0xff] %v13034_v22 }
 0x219   : > { %4463 = vmatmul.bf16.gmra.mxu3 %v4371_v59  ;;  %v11300_v59 = vld [vmem:[#allocation2 + $0x24] sm:$0xff] }
 0x21a   : > { %v2080_v21 = vpop.f32.mrf.mxu2  ;;  %4889 = vmatmul.bf16.gmra.mxu0 %v4797_v61  ;;  %v4768_v61 = vunpack.c.l.b16 %v4652_v17 }
 0x21b   : > { %v2136_v35 = vadd.f32 %v2080_v21, %v12402_v51  ;;  %v4008_v51 = vsel %vm11786_vm2, %v4003_v27, %v4007_v19  ;;  %v4012_v21 = vrot.slane %v4010_v44, 4  ;;  %v4021_v27 = vrot.slane %v4019_v11, 5  ;;  %v3901_v44 = vld [vmem:[#allocation2 + $0x48] sm:$0xf] }
 0x21c   : > { %v2399_v58 = vpop.f32.mrf.mxu3  ;;  %v4343_v45 = vunpack.c.l.b16 %v4008_v51  ;;  %v4025_v19 = vrot.slane %v4023_v48, 4 }
 0x21d   : > { %v2450_v6 = vadd.f32 %v2394_v37, %v2136_v35  ;;  %v4655_v37 = vsel %vm12348_vm13, %v4653_v40, %v4654_v1  ;;  %v4016_v63 = vor.u32 %v4015_v24, %v4012_v21  ;;  %v4047_v21 = vshrl.u32 %v13053_v15, 16 }
 0x21e   : > { %v4769_v7 = vunpack.c.l.b16 %v4655_v37  ;;  %v4372_v1 = vpack.c.b16 %v4343_v45, %v4342_v41  ;;  %v4026_v9 = vor.u32 %v4025_v19, %v4021_v27  ;;  %v4574_v37 = vld [vmem:[#allocation2 + $0x3c] sm:$0xe] }
 0x21f   : > { %v3132_v3 = vadd.f32 %v12986_v62, %v2450_v6  ;;  %v13041_v34 = vpop.f32.mrf.mxu0  ;;  %v13050_v17 = vpop.f32.mrf.mxu1  ;;  %v10496_v41 = vrot.slane %v4574_v37, 9 }
 0x220   : > { %v4798_v6 = vpack.c.b16 %v4769_v7, %v4768_v61  ;;  %v4027_v11 = vrot.slane %v4026_v9, 4  ;;  %v4037_v61 = vshll.u32 %v3901_v44, 16  ;;  %v4043_v7 = vshll.u32 %v13053_v15, 16 }
 0x221   : > { %v13039_v62 = vadd.f32 %v12980_v4, %v3132_v3  ;;  %v4658_v3 = vrot.slane %v13023_v57, 5  ;;  %v4034_v57 = vshrl.u32 %v3901_v44, 16 }
 0x222   : > { %v2082_v54 = vpop.f32.mrf.mxu2  ;;  %v4045_v9 = vrot.slane %v4043_v7, 5  ;;  %v4575_v7 = vld [vmem:[#allocation2 + $0x48] sm:$0xe] }
 0x223   : > { %v2137_v56 = vadd.f32 %v2082_v54, %v12424_v36  ;;  %v4029_v36 = vshll.u32 %v3900_v0, 16 }
 0x224   : > { %v2401_v40 = vpop.f32.mrf.mxu3 }
 0x225   : > { %v2451_v35 = vadd.f32 %v2396_v31, %v2137_v56  ;;  %v4031_v48 = vrot.slane %v4029_v36, 5  ;;  %v4660_v56 = vrot.slane %v4658_v3, 4  ;;  %v4049_v36 = vrot.slane %v4047_v21, 4 }
 0x227   : > { %3781 = vmatmul.bf16.gmra.mxu2 %v11300_v59  ;;  %v13045_v4 = vadd.f32 %v13004_v32, %v2451_v35  ;;  %v13047_v29 = vpop.f32.mrf.mxu0  ;;  %v4017_v32 = vrot.slane %v4016_v63, 4  ;;  %v4661_v59 = vrot.slane %v3900_v0, 5  ;;  %v4032_v19 = vsel %vm11786_vm2, %v4027_v11, %v4031_v48  ;;  %v13072_v11 = vpop.f32.mrf.mxu1 }
 0x228   : > { %v4659_v0 = vsel %vm12348_vm13, %v10496_v41, %v4658_v3  ;;  %v4036_v63 = vrot.slane %v4034_v57, 4  ;;  %15928 = vst [vmem:[#allocation22_spill] sm:$0xff] %v13072_v11  ;;  %v4050_v41 = vor.u32 %v4049_v36, %v4045_v9  ;;  %v13084_v36 = vld [vmem:[#allocation2 + $0x58] sm:$0xf] }
 0x229   : > { %4468 = vmatmul.bf16.gmra.mxu3 %v4372_v1  ;;  %v4022_v24 = vsel %vm11786_vm2, %v4017_v32, %v4021_v27  ;;  %v4662_v1 = vsel %vm12348_vm13, %v4660_v56, %v4661_v59  ;;  %v4770_v44 = vunpack.c.l.b16 %v4659_v0 }
 0x22a   : > { %v2085_v51 = vpop.f32.mrf.mxu2  ;;  %4894 = vmatmul.bf16.gmra.mxu0 %v4798_v6  ;;  %v4344_v37 = vunpack.c.l.b16 %v4022_v24  ;;  %v4771_v32 = vunpack.c.l.b16 %v4662_v1  ;;  %v10497_v1 = vrot.slane %v4575_v7, 9 }
 0x22b   : > { %v2138_v31 = vadd.f32 %v2085_v51, %v12433_v50  ;;  %v11301_v51 = vld [vmem:[#allocation2 + $0x30] sm:$0xff] }
 0x22c   : > { %v2404_v45 = vpop.f32.mrf.mxu3 }
 0x22d   : > { %v2452_v54 = vadd.f32 %v2399_v58, %v2138_v31  ;;  %v4345_v31 = vunpack.c.l.b16 %v4032_v19  ;;  %v4051_v19 = vrot.slane %v4050_v41, 4 }
 0x22f   : > { %v3134_v50 = vadd.f32 %v13017_v25, %v2452_v54  ;;  %v13065_v35 = vpop.f32.mrf.mxu0  ;;  %v4039_v25 = vrot.slane %v4037_v61, 5  ;;  %v4373_v57 = vpack.c.b16 %v4345_v31, %v4344_v37  ;;  %v4799_v61 = vpack.c.b16 %v4771_v32, %v4770_v44 }
 0x231   : > { %v13063_v58 = vadd.f32 %v13011_v43, %v3134_v50  ;;  %v3903_v43 = vld [vmem:[#allocation2 + $0x50] sm:$0x1]  ;;  %v4040_v54 = vor.u32 %v4039_v25, %v4036_v63  ;;  %v3904_v25 = vld [vmem:[#allocation2 + $0x54] sm:$0xf] }
 0x232   : > { %v2087_v6 = vpop.f32.mrf.mxu2  ;;  %v4053_v56 = vshll.u32 %v3903_v43, 16  ;;  %v4668_v63 = vrot.slane %v3903_v43, 5  ;;  %v4058_v44 = vshrl.u32 %v3904_v25, 16  ;;  %v4061_v32 = vshll.u32 %v3904_v25, 16 }
 0x233   : > { %v2139_v27 = vadd.f32 %v2087_v6, %v12449_v8  ;;  %v4665_v8 = vrot.slane %v13053_v15, 5  ;;  %v4041_v24 = vrot.slane %v4040_v54, 4  ;;  %v11365_v15 = vld [vmem:[%s15896_s3 + $0x50] sm:$0xff]  ;;  %v4071_v54 = vshrl.u32 %v13084_v36, 16 }
 0x234   : > { %v2406_v3 = vpop.f32.mrf.mxu3  ;;  %v4055_v0 = vrot.slane %v4053_v56, 5  ;;  %6112 = vmatpush.bf16.msra.mxu1 %v11365_v15 }
 0x235   : > { %v2453_v48 = vadd.f32 %v2401_v40, %v2139_v27  ;;  %v4667_v6 = vrot.slane %v4665_v8, 4  ;;  %v4046_v37 = vsel %vm11786_vm2, %v4041_v24, %v4045_v9  ;;  %v4060_v24 = vrot.slane %v4058_v44, 4  ;;  %v4576_v44 = vld [vmem:[#allocation2 + $0x54] sm:$0xe] }
 0x236   : > { %v4056_v31 = vsel %vm11786_vm2, %v4051_v19, %v4055_v0  ;;  %v4346_v56 = vunpack.c.l.b16 %v4046_v37  ;;  %v4063_v19 = vrot.slane %v4061_v32, 5 }
 0x237   : > { %3786 = vmatmul.bf16.gmra.mxu2 %v11301_v51  ;;  %v13075_v59 = vadd.f32 %v13041_v34, %v2453_v48  ;;  %v13078_v21 = vpop.f32.mrf.mxu0  ;;  %v3517_v51 = vpop.f32.mrf.mxu1  ;;  %v4669_v43 = vsel %vm12348_vm13, %v4667_v6, %v4668_v63  ;;  %v4067_v48 = vshll.u32 %v13084_v36, 16  ;;  %v3906_v6 = vld [vmem:[#allocation2 + $0x5c] sm:$0x1] }
 0x239   : > { %15929 = vst [vmem:[#allocation23_spill] sm:$0xff] %v13075_v59  ;;  %4473 = vmatmul.bf16.gmra.mxu3 %v4373_v57  ;;  %v4069_v0 = vrot.slane %v4067_v48, 5  ;;  %v3907_v48 = vld [vmem:[#allocation2 + $0x60] sm:$0xf] }
 0x23a   : > { %v2090_v50 = vpop.f32.mrf.mxu2  ;;  %4899 = vmatmul.bf16.gmra.mxu0 %v4799_v61  ;;  %v4347_v61 = vunpack.c.l.b16 %v4056_v31 }
 0x23b   : > { %v2140_v40 = vadd.f32 %v2090_v50, %v12465_v14  ;;  %v4773_v50 = vunpack.c.l.b16 %v4669_v43 }
 0x23c   : > { %v2409_v27 = vpop.f32.mrf.mxu3 }
 0x23d   : > { %v2454_v34 = vadd.f32 %v2404_v45, %v2140_v40  ;;  %v4666_v45 = vsel %vm12348_vm13, %v10497_v1, %v4665_v8  ;;  %v11302_v8 = vld [vmem:[#allocation2 + $0x3c] sm:$0xff]  ;;  %v4073_v40 = vrot.slane %v4071_v54, 4  ;;  %v13112_v54 = vld [vmem:[#allocation2 + $0x64] sm:$0xf] }
 0x23e   : > { %v4772_v7 = vunpack.c.l.b16 %v4666_v45  ;;  %v4672_v45 = vrot.slane %v13084_v36, 5  ;;  %v4091_v36 = vshll.u32 %v13112_v54, 16 }
 0x23f   : > { %v3136_v14 = vadd.f32 %v13047_v29, %v2454_v34  ;;  %v13100_v29 = vpop.f32.mrf.mxu0  ;;  %v4374_v34 = vpack.c.b16 %v4347_v61, %v4346_v56  ;;  %v13106_v25 = vpop.f32.mrf.mxu1  ;;  %v4074_v37 = vor.u32 %v4073_v40, %v4069_v0  ;;  %v4095_v40 = vshrl.u32 %v13112_v54, 16 }
 0x240   : > { %v4800_v15 = vpack.c.b16 %v4773_v50, %v4772_v7  ;;  %15932 = vst [vmem:[#allocation26_spill] sm:$0xff] %v13106_v25  ;;  %v4674_v61 = vrot.slane %v4672_v45, 4  ;;  %v4675_v7 = vrot.slane %v3906_v6, 5 }
 0x241   : > { %v13098_v9 = vadd.f32 %v13050_v17, %v3136_v14  ;;  %v4077_v14 = vshll.u32 %v3906_v6, 16 }
 0x242   : > { %v2092_v41 = vpop.f32.mrf.mxu2 }
 0x243   : > { %15930 = vst [vmem:[#allocation24_spill] sm:$0xff] %v13098_v9  ;;  %v2141_v57 = vadd.f32 %v2092_v41, %v12487_v46  ;;  %v4064_v46 = vor.u32 %v4063_v19, %v4060_v24  ;;  %v4075_v41 = vrot.slane %v4074_v37, 4  ;;  %v4079_v56 = vrot.slane %v4077_v14, 5 }
 0x244   : > { %v2411_v63 = vpop.f32.mrf.mxu3  ;;  %v4082_v24 = vshrl.u32 %v3907_v48, 16  ;;  %v4085_v19 = vshll.u32 %v3907_v48, 16  ;;  %v4676_v37 = vsel %vm12348_vm13, %v4674_v61, %v4675_v7 }
 0x245   : > { %v2455_v1 = vadd.f32 %v2406_v3, %v2141_v57  ;;  %v15933_v3 = vld [vmem:[#allocation7_spill] sm:$0xff] }
 0x247   : > { %3791 = vmatmul.bf16.gmra.mxu2 %v11302_v8  ;;  %v13104_v17 = vadd.f32 %v13065_v35, %v2455_v1  ;;  %v13108_v31 = vpop.f32.mrf.mxu0  ;;  %v4065_v35 = vrot.slane %v4064_v46, 4  ;;  %v10498_v8 = vrot.slane %v4576_v44, 9  ;;  %v4084_v44 = vrot.slane %v4082_v24, 4 }
 0x249   : > { %15931 = vst [vmem:[#allocation25_spill] sm:$0xff] %v13104_v17  ;;  %4478 = vmatmul.bf16.gmra.mxu3 %v4374_v34  ;;  %v4070_v34 = vsel %vm11786_vm2, %v4065_v35, %v4069_v0  ;;  %v4673_v6 = vsel %vm12348_vm13, %v10498_v8, %v4672_v45  ;;  %v15935_v0 = vld [vmem:[#allocation8_spill] sm:$0xff]  ;;  %v11303_v35 = vld [vmem:[#allocation2 + $0x48] sm:$0xff] }
 0x24a   : > { %v2095_v43 = vpop.f32.mrf.mxu2  ;;  %4904 = vmatmul.bf16.gmra.mxu0 %v4800_v15  ;;  %v4080_v15 = vsel %vm11786_vm2, %v4075_v41, %v4079_v56  ;;  %v4348_v41 = vunpack.c.l.b16 %v4070_v34  ;;  %v3909_v56 = vld [vmem:[#allocation2 + $0x68] sm:$0x1] }
 0x24b   : > { %v2142_v32 = vadd.f32 %v2095_v43, %v15933_v3  ;;  %v3522_v43 = vpop.f32.mrf.mxu1  ;;  %v4093_v3 = vrot.slane %v4091_v36, 5  ;;  %v4101_v11 = vshll.u32 %v3909_v56, 16  ;;  %v4679_v36 = vrot.slane %v13112_v54, 5  ;;  %v11364_v54 = vld [vmem:[%s15896_s3 + $0x48] sm:$0xff] }
 0x24c   : > { %v2414_v50 = vpop.f32.mrf.mxu3  ;;  %6113 = vmatpush.bf16.msra.mxu1 %v11364_v54  ;;  %v3912_v54 = vld [vmem:[#allocation2 + $0x74] sm:$0x1] }
 0x24d   : > { %v2456_v57 = vadd.f32 %v2409_v27, %v2142_v32  ;;  %v4097_v32 = vrot.slane %v4095_v40, 4 }
 0x24f   : > { %v3138_v1 = vadd.f32 %v13078_v21, %v2456_v57  ;;  %v13123_v27 = vpop.f32.mrf.mxu0  ;;  %v4087_v21 = vrot.slane %v4085_v19, 5  ;;  %v4774_v57 = vunpack.c.l.b16 %v4673_v6  ;;  %v4098_v8 = vor.u32 %v4097_v32, %v4093_v3 }
 0x250   : > { %v4103_v6 = vrot.slane %v4101_v11, 5 }
 0x251   : > { %v13121_v46 = vadd.f32 %v3517_v51, %v3138_v1  ;;  %v4349_v51 = vunpack.c.l.b16 %v4080_v15  ;;  %v4775_v1 = vunpack.c.l.b16 %v4676_v37  ;;  %v4088_v45 = vor.u32 %v4087_v21, %v4084_v44  ;;  %v4577_v37 = vld [vmem:[#allocation2 + $0x60] sm:$0xe]  ;;  %v3910_v44 = vld [vmem:[#allocation2 + $0x6c] sm:$0xf] }
 0x252   : > { %v2097_v14 = vpop.f32.mrf.mxu2  ;;  %v4099_v15 = vrot.slane %v4098_v8, 4  ;;  %v10499_v32 = vrot.slane %v4577_v37, 9  ;;  %v11304_v37 = vld [vmem:[#allocation2 + $0x54] sm:$0xff] }
 0x253   : > { %15934 = vst [vmem:[#allocation7_spill] sm:$0xff] %v13121_v46  ;;  %v2143_v48 = vadd.f32 %v2097_v14, %v15935_v0  ;;  %v4375_v7 = vpack.c.b16 %v4349_v51, %v4348_v41  ;;  %v4801_v24 = vpack.c.b16 %v4775_v1, %v4774_v57  ;;  %v4089_v34 = vrot.slane %v4088_v45, 4  ;;  %v13137_v21 = vpop.f32.mrf.mxu1 }
 0x254   : > { %v2416_v46 = vpop.f32.mrf.mxu3  ;;  %v4681_v0 = vrot.slane %v4679_v36, 4  ;;  %v4104_v41 = vsel %vm11786_vm2, %v4099_v15, %v4103_v6  ;;  %v4106_v51 = vshrl.u32 %v3910_v44, 16  ;;  %v4109_v1 = vshll.u32 %v3910_v44, 16  ;;  %v15940_v15 = vld [vmem:[#allocation10_spill] sm:$0xff] }
 0x255   : > { %v2457_v25 = vadd.f32 %v2411_v63, %v2143_v48  ;;  %v15937_v63 = vld [vmem:[#allocation9_spill] sm:$0xff]  ;;  %v4682_v48 = vrot.slane %v3909_v56, 5  ;;  %v4094_v11 = vsel %vm11786_vm2, %v4089_v34, %v4093_v3  ;;  %v4351_v34 = vunpack.c.l.b16 %v4104_v41 }
 0x256   : > { %15938 = vst [vmem:[#allocation9_spill] sm:$0xff] %v13137_v21 }
 0x257   : > { %3796 = vmatmul.bf16.gmra.mxu2 %v11303_v35  ;;  %v13131_v61 = vadd.f32 %v13100_v29, %v2457_v25  ;;  %v13133_v19 = vpop.f32.mrf.mxu0  ;;  %v13139_v29 = vld [vmem:[#allocation2 + $0x70] sm:$0xf]  ;;  %v4683_v3 = vsel %vm12348_vm13, %v4681_v0, %v4682_v48 }
 0x258   : > { %v4119_v56 = vshrl.u32 %v13139_v29, 16 }
 0x259   : > { %15936 = vst [vmem:[#allocation8_spill] sm:$0xff] %v13131_v61  ;;  %4483 = vmatmul.bf16.gmra.mxu3 %v4375_v7  ;;  %v4680_v7 = vsel %vm12348_vm13, %v10499_v32, %v4679_v36 }
 0x25a   : > { %v2100_v40 = vpop.f32.mrf.mxu2  ;;  %4909 = vmatmul.bf16.gmra.mxu0 %v4801_v24  ;;  %v4121_v44 = vrot.slane %v4119_v56, 4  ;;  %v3913_v56 = vld [vmem:[#allocation2 + $0x78] sm:$0xf] }
 0x25b   : > { %v2144_v14 = vadd.f32 %v2100_v40, %v15937_v63  ;;  %v4350_v40 = vunpack.c.l.b16 %v4094_v11  ;;  %v4111_v63 = vrot.slane %v4109_v1, 5  ;;  %v4125_v11 = vshll.u32 %v3912_v54, 16 }
 0x25c   : > { %v2419_v35 = vpop.f32.mrf.mxu3 }
 0x25d   : > { %v2458_v25 = vadd.f32 %v2414_v50, %v2144_v14  ;;  %v4115_v50 = vshll.u32 %v13139_v29, 16  ;;  %v4376_v36 = vpack.c.b16 %v4351_v34, %v4350_v40 }
 0x25f   : > { %v3140_v57 = vadd.f32 %v13108_v31, %v2458_v25  ;;  %v13153_v8 = vpop.f32.mrf.mxu0  ;;  %v4108_v31 = vrot.slane %v4106_v51, 4  ;;  %v4117_v14 = vrot.slane %v4115_v50, 5  ;;  %v4777_v25 = vunpack.c.l.b16 %v4683_v3  ;;  %v4578_v50 = vld [vmem:[#allocation2 + $0x6c] sm:$0xe]  ;;  %v13166_v3 = vld [vmem:[#allocation2 + $0x7c] sm:$0xf] }
 0x260   : > { %v4686_v51 = vrot.slane %v13139_v29, 5  ;;  %v4133_v29 = vshll.u32 %v3913_v56, 16 }
 0x261   : > { %v13151_v45 = vadd.f32 %v3522_v43, %v3140_v57  ;;  %v4776_v43 = vunpack.c.l.b16 %v4680_v7  ;;  %v4112_v0 = vor.u32 %v4111_v63, %v4108_v31  ;;  %v4122_v48 = vor.u32 %v4121_v44, %v4117_v14 }
 0x262   : > { %v2102_v24 = vpop.f32.mrf.mxu2  ;;  %v10500_v31 = vrot.slane %v4578_v50, 9  ;;  %v4139_v44 = vshll.u32 %v13166_v3, 16 }
 0x263   : > { %15939 = vst [vmem:[#allocation27_spill] sm:$0xff] %v13151_v45  ;;  %v2145_v6 = vadd.f32 %v2102_v24, %v15940_v15  ;;  %v3527_v45 = vpop.f32.mrf.mxu1  ;;  %v4802_v41 = vpack.c.b16 %v4777_v25, %v4776_v43  ;;  %v4113_v40 = vrot.slane %v4112_v0, 4  ;;  %v4123_v34 = vrot.slane %v4122_v48, 4 }
 0x264   : > { %v2421_v21 = vpop.f32.mrf.mxu3  ;;  %v4688_v15 = vrot.slane %v4686_v51, 4  ;;  %v4143_v43 = vshrl.u32 %v13166_v3, 16 }
 0x265   : > { %v2459_v57 = vadd.f32 %v2416_v46, %v2145_v6  ;;  %v15942_v46 = vld [vmem:[#allocation11_spill] sm:$0xff]  ;;  %v4689_v6 = vrot.slane %v3912_v54, 5  ;;  %v4687_v54 = vsel %vm12348_vm13, %v10500_v31, %v4686_v51 }
 0x267   : > { %3801 = vmatmul.bf16.gmra.mxu2 %v11304_v37  ;;  %v13161_v32 = vadd.f32 %v13123_v27, %v2459_v57  ;;  %v13164_v1 = vpop.f32.mrf.mxu0  ;;  %v4127_v27 = vrot.slane %v4125_v11, 5  ;;  %v4130_v37 = vshrl.u32 %v3913_v56, 16  ;;  %v4141_v56 = vrot.slane %v4139_v44, 5 }
 0x269   : > { %15941 = vst [vmem:[#allocation10_spill] sm:$0xff] %v13161_v32  ;;  %4488 = vmatmul.bf16.gmra.mxu3 %v4376_v36  ;;  %v4118_v36 = vsel %vm11786_vm2, %v4113_v40, %v4117_v14  ;;  %v4128_v48 = vsel %vm11786_vm2, %v4123_v34, %v4127_v27  ;;  %v4132_v11 = vrot.slane %v4130_v37, 4 }
 0x26a   : > { %v2105_v7 = vpop.f32.mrf.mxu2  ;;  %4914 = vmatmul.bf16.gmra.mxu0 %v4802_v41  ;;  %v4352_v34 = vunpack.c.l.b16 %v4118_v36  ;;  %v4353_v27 = vunpack.c.l.b16 %v4128_v48 }
 0x26b   : > { %v2146_v24 = vadd.f32 %v2105_v7, %v15942_v46  ;;  %v13174_v0 = vpop.f32.mrf.mxu1  ;;  %v4145_v7 = vrot.slane %v4143_v43, 4  ;;  %v3915_v46 = vld [vmem:[#allocation2 + $0x80] sm:$0x1]  ;;  %v4693_v43 = vrot.slane %v13166_v3, 5 }
 0x26c   : > { %v2424_v25 = vpop.f32.mrf.mxu3  ;;  %15943 = vst [vmem:[#allocation11_spill] sm:$0xff] %v13174_v0  ;;  %v4778_v0 = vunpack.c.l.b16 %v4687_v54  ;;  %v4579_v54 = vld [vmem:[#allocation2 + $0x78] sm:$0xe] }
 0x26d   : > { %v2460_v63 = vadd.f32 %v2419_v35, %v2146_v24  ;;  %v4690_v35 = vsel %vm12348_vm13, %v4688_v15, %v4689_v6  ;;  %v15945_v24 = vld [vmem:[#allocation12_spill] sm:$0xff]  ;;  %v4146_v15 = vor.u32 %v4145_v7, %v4141_v56  ;;  %v4149_v6 = vshll.u32 %v3915_v46, 16  ;;  %v3916_v7 = vld [vmem:[#allocation2 + $0x84] sm:$0xf] }
 0x26e   : > { %v4779_v51 = vunpack.c.l.b16 %v4690_v35 }
 0x26f   : > { %v3142_v57 = vadd.f32 %v13133_v19, %v2460_v63  ;;  %v13184_v50 = vpop.f32.mrf.mxu0  ;;  %v4135_v19 = vrot.slane %v4133_v29, 5  ;;  %v11305_v63 = vld [vmem:[#allocation2 + $0x60] sm:$0xff]  ;;  %v4377_v29 = vpack.c.b16 %v4353_v27, %v4352_v34  ;;  %v4147_v36 = vrot.slane %v4146_v15, 4 }
 0x270   : > { %v4803_v44 = vpack.c.b16 %v4779_v51, %v4778_v0  ;;  %v4151_v48 = vrot.slane %v4149_v6, 5  ;;  %v4154_v27 = vshrl.u32 %v3916_v7, 16  ;;  %v4157_v51 = vshll.u32 %v3916_v7, 16  ;;  %v11306_v7 = vld [vmem:[#allocation2 + $0x6c] sm:$0xff] }
 0x271   : > { %v13182_v41 = vadd.f32 %v3527_v45, %v3142_v57  ;;  %v4136_v32 = vor.u32 %v4135_v19, %v4132_v11  ;;  %v15947_v11 = vld [vmem:[#allocation13_spill] sm:$0xff] }
 0x272   : > { %v2107_v14 = vpop.f32.mrf.mxu2 }
 0x273   : > { %15944 = vst [vmem:[#allocation28_spill] sm:$0xff] %v13182_v41  ;;  %v2147_v40 = vadd.f32 %v2107_v14, %v15945_v24  ;;  %v4137_v14 = vrot.slane %v4136_v32, 4  ;;  %v13194_v24 = vld [vmem:[#allocation2 + $0x88] sm:$0xf]  ;;  %v4152_v32 = vsel %vm11786_vm2, %v4147_v36, %v4151_v48  ;;  %v4156_v48 = vrot.slane %v4154_v27, 4 }
 0x274   : > { %v2426_v45 = vpop.f32.mrf.mxu3  ;;  %v4167_v15 = vshrl.u32 %v13194_v24, 16  ;;  %v5530_v27 = vld [vmem:[#allocation3] sm:$0xf] }
 0x275   : > { %v2461_v31 = vadd.f32 %v2421_v21, %v2147_v40  ;;  %v3532_v21 = vpop.f32.mrf.mxu1  ;;  %v4695_v40 = vrot.slane %v4693_v43, 4  ;;  %v4142_v3 = vsel %vm11786_vm2, %v4137_v14, %v4141_v56  ;;  %v4355_v14 = vunpack.c.l.b16 %v4152_v32 }
 0x276   : > { %v4354_v56 = vunpack.c.l.b16 %v4142_v3 }
 0x277   : > { %3806 = vmatmul.bf16.gmra.mxu2 %v11305_v63  ;;  %v13188_v37 = vadd.f32 %v13153_v8, %v2461_v31  ;;  %v13191_v57 = vpop.f32.mrf.mxu0  ;;  %v10501_v8 = vrot.slane %v4579_v54, 9  ;;  %v4696_v63 = vrot.slane %v3915_v46, 5  ;;  %v4163_v31 = vshll.u32 %v13194_v24, 16 }
 0x278   : > { %v4159_v54 = vrot.slane %v4157_v51, 5  ;;  %v4378_v32 = vpack.c.b16 %v4355_v14, %v4354_v56  ;;  %v5531_v51 = vld [vmem:[#allocation3 + $0x4] sm:$0xf] }
 0x279   : > { %15946 = vst [vmem:[#allocation12_spill] sm:$0xff] %v13188_v37  ;;  %4493 = vmatmul.bf16.gmra.mxu3 %v4377_v29  ;;  %v4694_v29 = vsel %vm12348_vm13, %v10501_v8, %v4693_v43  ;;  %v4697_v46 = vsel %vm12348_vm13, %v4695_v40, %v4696_v63 }
 0x27a   : > { %v2110_v35 = vpop.f32.mrf.mxu2  ;;  %4919 = vmatmul.bf16.gmra.mxu0 %v4803_v44  ;;  %v4781_v8 = vunpack.c.l.b16 %v4697_v46  ;;  %v5608_v46 = vshrl.u32 %v5531_v51, 16 }
 0x27b   : > { %v2148_v19 = vadd.f32 %v2110_v35, %v15947_v11  ;;  %v13211_v35 = vrot.slane %v4163_v31, 5  ;;  %v4169_v11 = vrot.slane %v4167_v15, 4  ;;  %v5595_v15 = vshrl.u32 %v5530_v27, 16 }
 0x27c   : > { %v2429_v34 = vpop.f32.mrf.mxu3 }
 0x27d   : > { %v2462_v0 = vadd.f32 %v2424_v25, %v2148_v19  ;;  %v15949_v19 = vld [vmem:[#allocation14_spill] sm:$0xff]  ;;  %v13214_v43 = vpop.f32.mrf.mxu1  ;;  %v4170_v40 = vor.u32 %v4169_v11, %v13211_v35  ;;  %v5597_v56 = vrot.slane %v5595_v15, 4  ;;  %v13226_v15 = vld [vmem:[#allocation2 + $0x94] sm:$0xf] }
 0x27e   : > { %15950 = vst [vmem:[#allocation14_spill] sm:$0xff] %v13214_v43 }
 0x27f   : > { %v3144_v6 = vadd.f32 %v13164_v1, %v2462_v0  ;;  %v13207_v44 = vpop.f32.mrf.mxu0  ;;  %v3918_v0 = vld [vmem:[#allocation2 + $0x8c] sm:$0x1] }
 0x280   : > { %v4173_v63 = vshll.u32 %v3918_v0, 16 }
 0x281   : > { %v13205_v25 = vadd.f32 %v3532_v21, %v3144_v6  ;;  %v4780_v21 = vunpack.c.l.b16 %v4694_v29  ;;  %v4580_v29 = vld [vmem:[#allocation2 + $0x84] sm:$0xe] }
 0x282   : > { %v2112_v36 = vpop.f32.mrf.mxu2  ;;  %v4175_v41 = vrot.slane %v4173_v63, 5 }
 0x283   : > { %15948 = vst [vmem:[#allocation13_spill] sm:$0xff] %v13205_v25  ;;  %v2149_v1 = vadd.f32 %v2112_v36, %v15949_v19  ;;  %v4160_v25 = vor.u32 %v4159_v54, %v4156_v48  ;;  %v5598_v36 = vshll.u32 %v5530_v27, 16  ;;  %v5604_v19 = vshll.u32 %v5531_v51, 16  ;;  %v3919_v54 = vld [vmem:[#allocation2 + $0x90] sm:$0xf] }
 0x284   : > { %v13216_v3 = vpop.f32.mrf.mxu3  ;;  %v4804_v43 = vpack.c.b16 %v4781_v8, %v4780_v21  ;;  %v10502_v21 = vrot.slane %v4580_v29, 9  ;;  %v4703_v51 = vrot.slane %v3918_v0, 5 }
 0x285   : > { %v2463_v6 = vadd.f32 %v2426_v45, %v2149_v1  ;;  %v4700_v45 = vrot.slane %v13194_v24, 5  ;;  %v5600_v14 = vrot.slane %v5598_v36, 5  ;;  %v5606_v48 = vrot.slane %v5604_v19, 5  ;;  %v3537_v63 = vpop.f32.mrf.mxu1 }
 0x286   : > { %v4161_v37 = vrot.slane %v4160_v25, 4  ;;  %v4178_v36 = vshrl.u32 %v3919_v54, 16 }
 0x287   : > { %3811 = vmatmul.bf16.gmra.mxu2 %v11306_v7  ;;  %v13220_v31 = vadd.f32 %v13184_v50, %v2463_v6  ;;  %v13223_v1 = vpop.f32.mrf.mxu0  ;;  %v4171_v7 = vrot.slane %v4170_v40, 4  ;;  %v5578_v50 = vld [vmem:[#allocation3 + $0x8] sm:$0x1]  ;;  %v5610_v6 = vrot.slane %v5608_v46, 4  ;;  %v5601_v8 = vor.u32 %v5600_v14, %v5597_v56 }
 0x288   : > { %v5614_v61 = vshll.u32 %v5578_v50, 16  ;;  %v4702_v24 = vrot.slane %v4700_v45, 4  ;;  %v4181_v40 = vshll.u32 %v3919_v54, 16  ;;  %v4191_v46 = vshrl.u32 %v13226_v15, 16  ;;  %v3921_v50 = vld [vmem:[#allocation2 + $0x98] sm:$0x1] }
 0x289   : > { %15951 = vst [vmem:[#allocation29_spill] sm:$0xff] %v13220_v31  ;;  %v15952_v31 = vld [vmem:[#allocation15_spill] sm:$0xff]  ;;  %4498 = vmatmul.bf16.gmra.mxu3 %v4378_v32  ;;  %v5611_v17 = vor.u32 %v5610_v6, %v5606_v48  ;;  %v5602_v9 = vrot.slane %v5601_v8, 4  ;;  %v11363_v32 = vld [vmem:[%s15896_s3 + $0x40] sm:$0xff]  ;;  %v4176_v0 = vsel %vm11786_vm2, %v4171_v7, %v4175_v41  ;;  %v4701_v56 = vsel %vm12348_vm13, %v10502_v21, %v4700_v45  ;;  %v15954_v6 = vld [vmem:[#allocation16_spill] sm:$0xff] }
 0x28a   : > { %v2115_v11 = vpop.f32.mrf.mxu2  ;;  %4924 = vmatmul.bf16.gmra.mxu0 %v4804_v43  ;;  %v5616_v25 = vrot.slane %v5614_v61, 5  ;;  %v4166_v43 = vsel %vm11786_vm2, %v4161_v37, %v13211_v35  ;;  %6114 = vmatpush.bf16.msra.mxu1 %v11363_v32  ;;  %v4704_v37 = vsel %vm12348_vm13, %v4702_v24, %v4703_v51  ;;  %v4180_v14 = vrot.slane %v4178_v36, 4  ;;  %v4581_v36 = vld [vmem:[#allocation2 + $0x90] sm:$0xe] }
 0x28b   : > { %v2150_v27 = vadd.f32 %v2115_v11, %v15952_v31  ;;  %v5612_v31 = vrot.slane %v5611_v17, 4  ;;  %v5607_v61 = vsel %vm11786_vm2, %v5602_v9, %v5606_v48  ;;  %v4183_v48 = vrot.slane %v4181_v40, 5 }
 0x28c   : > { %v4459_v22 = vpop.f32.mrf.mxu3  ;;  %v5995_v17 = vunpack.c.l.b16 %v5607_v61  ;;  %v4356_v11 = vunpack.c.l.b16 %v4166_v43  ;;  %v4357_v7 = vunpack.c.l.b16 %v4176_v0  ;;  %v4193_v24 = vrot.slane %v4191_v46, 4  ;;  %v3922_v61 = vld [vmem:[#allocation2 + $0x9c] sm:$0xf] }
 0x28d   : > { %v2464_v19 = vadd.f32 %v2429_v34, %v2150_v27  ;;  %v4187_v34 = vshll.u32 %v13226_v15, 16  ;;  %v5617_v41 = vsel %vm11786_vm2, %v5612_v31, %v5616_v25  ;;  %v11307_v27 = vld [vmem:[#allocation2 + $0x78] sm:$0xff]  ;;  %v4782_v51 = vunpack.c.l.b16 %v4701_v56 }
 0x28e   : > { %v5996_v9 = vunpack.c.l.b16 %v5617_v41  ;;  %v4197_v32 = vshll.u32 %v3921_v50, 16  ;;  %v4379_v43 = vpack.c.b16 %v4357_v7, %v4356_v11  ;;  %v10503_v41 = vrot.slane %v4581_v36, 9 }
 0x28f   : > { %v3146_v29 = vadd.f32 %v13191_v57, %v2464_v19  ;;  %v13249_v57 = vpop.f32.mrf.mxu0  ;;  %v4189_v8 = vrot.slane %v4187_v34, 5  ;;  %v4783_v19 = vunpack.c.l.b16 %v4704_v37  ;;  %v13257_v34 = vld [vmem:[#allocation2 + $0xa0] sm:$0xf] }
 0x290   : > { %v6027_v21 = vpack.c.b16 %v5996_v9, %v5995_v17  ;;  %v4199_v37 = vrot.slane %v4197_v32, 5  ;;  %v4202_v9 = vshrl.u32 %v3922_v61, 16 }
 0x291   : > { %v13247_v35 = vadd.f32 %v3537_v63, %v3146_v29  ;;  %v4184_v63 = vor.u32 %v4183_v48, %v4180_v14  ;;  %v4194_v0 = vor.u32 %v4193_v24, %v4189_v8  ;;  %v4707_v29 = vrot.slane %v13226_v15, 5 }
 0x292   : > { %v2117_v54 = vpop.f32.mrf.mxu2  ;;  %6115 = vmatmul.bf16.vlgmr.msra.gmra.mxu1 %v6027_v21  ;;  %v4805_v46 = vpack.c.b16 %v4783_v19, %v4782_v51  ;;  %v4205_v14 = vshll.u32 %v3922_v61, 16  ;;  %v4211_v48 = vshll.u32 %v13257_v34, 16  ;;  %v13273_v51 = vld [vmem:[#allocation2 + $0xa4] sm:$0x1] }
 0x293   : > { %15953 = vst [vmem:[#allocation15_spill] sm:$0xff] %v13247_v35  ;;  %v2151_v45 = vadd.f32 %v2117_v54, %v15954_v6  ;;  %v15956_v54 = vld [vmem:[#allocation17_spill] sm:$0xff]  ;;  %v4195_v15 = vrot.slane %v4194_v0, 4  ;;  %v4709_v7 = vrot.slane %v4707_v29, 4  ;;  %v4710_v6 = vrot.slane %v3921_v50, 5  ;;  %v11362_v50 = vld [vmem:[%s15896_s3 + $0x38] sm:$0xff] }
 0x294   : > { %v4461_v31 = vpop.f32.mrf.mxu3  ;;  %v4708_v24 = vsel %vm12348_vm13, %v10503_v41, %v4707_v29  ;;  %v13283_v32 = vrot.slane %v4211_v48, 5  ;;  %6340 = vmatpush.bf16.msrb.mxu2 %v11362_v50  ;;  %v4221_v41 = vshll.u32 %v13273_v51, 16 }
 0x295   : > { %v2465_v25 = vadd.f32 %v13216_v3, %v2151_v45  ;;  %v4185_v3 = vrot.slane %v4184_v63, 4  ;;  %v4207_v63 = vrot.slane %v4205_v14, 5  ;;  %v4711_v0 = vsel %vm12348_vm13, %v4709_v7, %v4710_v6 }
 0x296   : > { %v4785_v48 = vunpack.c.l.b16 %v4711_v0  ;;  %v13299_v0 = vld [vmem:[#allocation2 + $0xac] sm:$0xf] }
 0x297   : > { %3816 = vmatmul.bf16.gmra.mxu2 %v11307_v27  ;;  %v13254_v40 = vadd.f32 %v13207_v44, %v2465_v25  ;;  %v13259_v56 = vpop.f32.mrf.mxu0  ;;  %v4215_v44 = vshrl.u32 %v13257_v34, 16  ;;  %v13267_v27 = vld [vmem:[%s15895_s2] ss:$0 sm:$0xff]  ;;  %v4190_v21 = vsel %vm11786_vm2, %v4185_v3, %v4189_v8  ;;  %v4204_v25 = vrot.slane %v4202_v9, 4 }
 0x298   : > { %v4358_v29 = vunpack.c.l.b16 %v4190_v21  ;;  %v4784_v3 = vunpack.c.l.b16 %v4708_v24  ;;  %v4714_v9 = vrot.slane %v13257_v34, 5  ;;  %v4223_v21 = vrot.slane %v4221_v41, 5 }
 0x299   : > { %15955 = vst [vmem:[#allocation16_spill] sm:$0xff] %v13254_v40  ;;  %4503 = vmatmul.bf16.gmra.mxu3 %v4379_v43  ;;  %v4217_v8 = vrot.slane %v4215_v44, 4  ;;  %v4200_v43 = vsel %vm11786_vm2, %v4195_v15, %v4199_v37  ;;  %v4208_v37 = vor.u32 %v4207_v63, %v4204_v25  ;;  %v11308_v15 = vld [vmem:[#allocation2 + $0x84] sm:$0xff]  ;;  %v4239_v41 = vshrl.u32 %v13299_v0, 16 }
 0x29a   : > { %v3777_v17 = vpop.f32.mrf.mxu2  ;;  %4929 = vmatmul.bf16.gmra.mxu0 %v4805_v46  ;;  %v4359_v14 = vunpack.c.l.b16 %v4200_v43  ;;  %v4716_v24 = vrot.slane %v4714_v9, 4  ;;  %v3925_v43 = vld [vmem:[#allocation2 + $0xa8] sm:$0xf] }
 0x29b   : > { %v3857_v11 = vadd.f32 %v3777_v17, %v15956_v54  ;;  %v4582_v17 = vld [vmem:[#allocation2 + $0x9c] sm:$0xe]  ;;  %v4218_v44 = vor.u32 %v4217_v8, %v13283_v32  ;;  %v4209_v34 = vrot.slane %v4208_v37, 4  ;;  %v4226_v8 = vshrl.u32 %v3925_v43, 16 }
 0x29c   : > { %v13275_v19 = vpop.f32.mrf.mxu3  ;;  %v10504_v7 = vrot.slane %v4582_v17, 9 }
 0x29d   : > { %v4539_v45 = vadd.f32 %v4459_v22, %v3857_v11  ;;  %v11378_v22 = vld [vmem:[%s15896_s3 + $0xb8] sm:$0xff]  ;;  %v4219_v40 = vrot.slane %v4218_v44, 4  ;;  %v13320_v44 = vld [vmem:[#allocation2 + $0xb0] sm:$0x1] }
 0x29e   : > { %6718 = vmatpush.bf16.msrb.mxu3 %v11378_v22  ;;  %v4380_v22 = vpack.c.b16 %v4359_v14, %v4358_v29  ;;  %v13308_v29 = vsel %vm12348_vm13, %v10504_v7, %v4714_v9  ;;  %v4214_v9 = vsel %vm11786_vm2, %v4209_v34, %v13283_v32  ;;  %v4245_v34 = vshll.u32 %v13320_v44, 16 }
 0x29f   : > { %v4965_v36 = vadd.f32 %v13223_v1, %v4539_v45  ;;  %v13291_v46 = vpop.f32.mrf.mxu0 }
 0x2a1   : > { %v5001_v61 = vadd.f32 %v13267_v27, %v4965_v36  ;;  %v4806_v36 = vpack.c.b16 %v4785_v48, %v4784_v3  ;;  %v4235_v3 = vshll.u32 %v13299_v0, 16 }
 0x2a2   : > { %v3779_v1 = vpop.f32.mrf.mxu2 }
 0x2a3   : > { %v5033_v54 = vmax.f32 %v5001_v61, 0.0  ;;  %v3858_v11 = vadd.f32 %v3779_v1, %v12706_v2  ;;  %v11402_v2 = vld [vmem:[%s15896_s3 + $0xf8] sm:$0xff]  ;;  %v4229_v61 = vshll.u32 %v3925_v43, 16  ;;  %v5418_v1 = vld [vmem:[#allocation3 + $0xc] sm:$0xf]  ;;  %v4224_v43 = vsel %vm11786_vm2, %v4219_v40, %v4223_v21 }
 0x2a4   : > { %v13297_v50 = vpop.f32.mrf.mxu3  ;;  %7032 = vmatpush.bf16.msrb.mxu0 %v11402_v2  ;;  %v11410_v40 = vld [vmem:[%s15896_s3 + $0x138] sm:$0xff] }
 0x2a5   : > { %v5065_v6 = vpack.c.bf16 %v5033_v54, %v5033_v54  ;;  %v4540_v45 = vadd.f32 %v4461_v31, %v3858_v11  ;;  %v4717_v31 = vrot.slane %v13273_v51, 5  ;;  %v4228_v51 = vrot.slane %v4226_v8, 4  ;;  %7714 = vmatpush.bf16.msrb.mxu1 %v11410_v40 }
 0x2a6   : > { %v4231_v54 = vrot.slane %v4229_v61, 5  ;;  %v4237_v11 = vrot.slane %v4235_v3, 5  ;;  %v4583_v3 = vld [vmem:[#allocation2 + $0xa8] sm:$0xe] }
 0x2a7   : > { %v5098_v25 = vshrl.u32 %v5065_v6, 16  ;;  %v4966_v63 = vadd.f32 %v13249_v57, %v4540_v45  ;;  %3821 = vmatmul.bf16.gmra.mxu2 %v11308_v15  ;;  %v5101_v57 = vshll.u32 %v5065_v6, 16  ;;  %v13315_v48 = vpop.f32.mrf.mxu0  ;;  %v4241_v15 = vrot.slane %v4239_v41, 4 }
 0x2a9   : > { %v13312_v17 = vrot.slane %v5098_v25, 7  ;;  %v5002_v14 = vadd.f32 %v13267_v27, %v4966_v63  ;;  %4508 = vmatmul.bf16.gmra.mxu3 %v4380_v22  ;;  %v4718_v25 = vsel %vm12348_vm13, %v4716_v24, %v4717_v31  ;;  %v4232_v63 = vor.u32 %v4231_v54, %v4228_v51 }
 0x2aa   : > { %v3782_v37 = vpop.f32.mrf.mxu2  ;;  %4934 = vmatmul.bf16.gmra.mxu0 %v4806_v36  ;;  %v4242_v32 = vor.u32 %v4241_v15, %v4237_v11  ;;  %v4247_v36 = vrot.slane %v4245_v34, 5  ;;  %v15957_v34 = vld [vmem:[#allocation18_spill] sm:$0xff] }
 0x2ab   : > { %v5103_v7 = vor.u32 %v5101_v57, %v13312_v17  ;;  %v5034_v6 = vmax.f32 %v5002_v14, 0.0  ;;  %v3859_v45 = vadd.f32 %v3782_v37, %v12736_v26  ;;  %v4721_v26 = vrot.slane %v13299_v0, 5 }
 0x2ac   : > { %v13333_v22 = vpop.f32.mrf.mxu3  ;;  %v4233_v21 = vrot.slane %v4232_v63, 4  ;;  %v4243_v24 = vrot.slane %v4242_v32, 4  ;;  %v4786_v57 = vunpack.c.l.b16 %v13308_v29  ;;  %v4787_v14 = vunpack.c.l.b16 %v4718_v25 }
 0x2ad   : > { %v5419_v2 = vsel %vm11944_vm9, %v5103_v7, %v5418_v1  ;;  %v5066_v8 = vpack.c.bf16 %v5034_v6, %v5034_v6  ;;  %v4541_v61 = vadd.f32 %v13275_v19, %v3859_v45  ;;  %v4360_v19 = vunpack.c.l.b16 %v4214_v9  ;;  %v5422_v45 = vld [vmem:[#allocation3 + $0x14] sm:$0x1] }
 0x2ae   : > { %5420 = vst [vmem:[#allocation3 + $0xc] sm:$0xf] %v5419_v2  ;;  %v4361_v1 = vunpack.c.l.b16 %v4224_v43  ;;  %v10505_v0 = vrot.slane %v4583_v3, 9  ;;  %v4238_v7 = vsel %vm11786_vm2, %v4233_v21, %v4237_v11  ;;  %v5104_v6 = vrot.slane %v13312_v17, 4 }
 0x2af   : > { %v5106_v31 = vshrl.u32 %v5066_v8, 16  ;;  %v4967_v41 = vadd.f32 %v13259_v56, %v4541_v61  ;;  %v5109_v37 = vshll.u32 %v5066_v8, 16  ;;  %v13341_v15 = vpop.f32.mrf.mxu0  ;;  %v4248_v29 = vsel %vm11786_vm2, %v4243_v24, %v4247_v36  ;;  %v11309_v8 = vld [vmem:[#allocation2 + $0x90] sm:$0xff] }
 0x2b0   : > { %v4723_v9 = vrot.slane %v4721_v26, 4  ;;  %v4724_v43 = vrot.slane %v13320_v44, 5  ;;  %v4381_v61 = vpack.c.b16 %v4361_v1, %v4360_v19  ;;  %v4807_v3 = vpack.c.b16 %v4787_v14, %v4786_v57 }
 0x2b1   : > { %v5108_v51 = vrot.slane %v5106_v31, 7  ;;  %v5003_v54 = vadd.f32 %v13267_v27, %v4967_v41  ;;  %v13350_v40 = vunpack.c.l.b16 %v4238_v7  ;;  %v4722_v17 = vsel %vm12348_vm13, %v10505_v0, %v4721_v26  ;;  %v13366_v7 = vld [vmem:[#allocation2 + $0xb8] sm:$0xf] }
 0x2b2   : > { %v3784_v56 = vpop.f32.mrf.mxu2  ;;  %v13361_v19 = vunpack.c.l.b16 %v4248_v29  ;;  %v4725_v26 = vsel %vm12348_vm13, %v4723_v9, %v4724_v43  ;;  %v4259_v9 = vshll.u32 %v13366_v7, 16  ;;  %v4263_v43 = vshrl.u32 %v13366_v7, 16 }
 0x2b3   : > { %v5111_v25 = vor.u32 %v5109_v37, %v5108_v51  ;;  %v5113_v63 = vrot.slane %v5108_v51, 4  ;;  %v5035_v32 = vmax.f32 %v5003_v54, 0.0  ;;  %v3860_v2 = vadd.f32 %v3784_v56, %v15957_v34  ;;  %v3928_v37 = vld [vmem:[#allocation2 + $0xb4] sm:$0xf] }
 0x2b4   : > { %v13359_v31 = vpop.f32.mrf.mxu3  ;;  %v4788_v51 = vunpack.c.l.b16 %v4722_v17  ;;  %v4789_v34 = vunpack.c.l.b16 %v4725_v26 }
 0x2b5   : > { %v5112_v11 = vsel %vm11936_vm8, %v5104_v6, %v5111_v25  ;;  %v5423_v21 = vsel %vm11952_vm10, %v5113_v63, %v5422_v45  ;;  %v5067_v44 = vpack.c.bf16 %v5035_v32, %v5035_v32  ;;  %v4542_v24 = vadd.f32 %v13297_v50, %v3860_v2  ;;  %v5532_v36 = vld [vmem:[#allocation3 + $0xc] sm:$0xf]  ;;  %v13377_v2 = vld [vmem:[#allocation2 + $0xbc] sm:$0x1] }
 0x2b6   : > { %5421 = vst [vmem:[#allocation3 + $0x10] sm:$0xf] %v5112_v11  ;;  %v5619_v41 = vshrl.u32 %v5532_v36, 16  ;;  %v5622_v57 = vshll.u32 %v5532_v36, 16  ;;  %v4250_v6 = vshrl.u32 %v3928_v37, 16  ;;  %v4253_v45 = vshll.u32 %v3928_v37, 16 }
 0x2b7   : > { %5424 = vst [vmem:[#allocation3 + $0x14] sm:$0x1] %v5423_v21  ;;  %v5115_v1 = vshrl.u32 %v5067_v44, 16  ;;  %v5118_v14 = vshll.u32 %v5067_v44, 16  ;;  %v4968_v0 = vadd.f32 %v13291_v46, %v4542_v24  ;;  %3826 = vmatmul.bf16.gmra.mxu2 %v11309_v8  ;;  %v13371_v25 = vpop.f32.mrf.mxu0  ;;  %v5425_v46 = vld [vmem:[#allocation3 + $0x18] sm:$0xf] }
 0x2b8   : > { %v5621_v50 = vrot.slane %v5619_v41, 4  ;;  %v5624_v54 = vrot.slane %v5622_v57, 5  ;;  %v4252_v8 = vrot.slane %v4250_v6, 4  ;;  %v4255_v17 = vrot.slane %v4253_v45, 5  ;;  %v15958_v44 = vld [vmem:[#allocation19_spill] sm:$0xff] }
 0x2b9   : > { %v13368_v56 = vrot.slane %v5115_v1, 7  ;;  %v5004_v29 = vadd.f32 %v13267_v27, %v4968_v0  ;;  %4513 = vmatmul.bf16.gmra.mxu3 %v4381_v61  ;;  %v4261_v1 = vrot.slane %v4259_v9, 5  ;;  %v4265_v0 = vrot.slane %v4263_v43, 4 }
 0x2ba   : > { %v3787_v63 = vpop.f32.mrf.mxu2  ;;  %v5625_v36 = vor.u32 %v5624_v54, %v5621_v50  ;;  %4939 = vmatmul.bf16.gmra.mxu0 %v4807_v3  ;;  %v4256_v57 = vor.u32 %v4255_v17, %v4252_v8  ;;  %v13394_v54 = vpack.c.b16 %v4789_v34, %v4788_v51  ;;  %v11377_v8 = vld [vmem:[%s15896_s3 + $0xb0] sm:$0xff] }
 0x2bb   : > { %v5120_v11 = vor.u32 %v5118_v14, %v13368_v56  ;;  %v5036_v21 = vmax.f32 %v5004_v29, 0.0  ;;  %v3861_v24 = vadd.f32 %v3787_v63, %v15958_v44  ;;  %v5121_v41 = vrot.slane %v13368_v56, 4  ;;  %v11361_v63 = vld [vmem:[%s15896_s3 + $0x30] sm:$0xff]  ;;  %6719 = vmatpush.bf16.msrb.mxu3 %v11377_v8 }
 0x2bc   : > { %v4269_v14 = vshll.u32 %v13377_v2, 16  ;;  %v13388_v29 = vpop.f32.mrf.mxu3  ;;  %v4266_v56 = vor.u32 %v4265_v0, %v4261_v1  ;;  %6341 = vmatpush.bf16.msrb.mxu2 %v11361_v63  ;;  %v4584_v0 = vld [vmem:[#allocation2 + $0xb4] sm:$0xe] }
 0x2bd   : > { %v5426_v26 = vsel %vm11944_vm9, %v5120_v11, %v5425_v46  ;;  %v5068_v37 = vpack.c.bf16 %v5036_v21, %v5036_v21  ;;  %v4543_v6 = vadd.f32 %v13333_v22, %v3861_v24  ;;  %v13385_v45 = vld [vmem:[#allocation3 + $0x10] sm:$0xf]  ;;  %v5626_v22 = vrot.slane %v5625_v36, 4 }
 0x2be   : > { %5427 = vst [vmem:[#allocation3 + $0x18] sm:$0xf] %v5426_v26  ;;  %v13390_v61 = vld [vmem:[#allocation3 + $0x14] sm:$0x1]  ;;  %v5628_v3 = vshll.u32 %v13385_v45, 16  ;;  %v5632_v50 = vshrl.u32 %v13385_v45, 16 }
 0x2bf   : > { %v5123_v9 = vshrl.u32 %v5068_v37, 16  ;;  %v4969_v43 = vadd.f32 %v13315_v48, %v4543_v6  ;;  %v5638_v46 = vshll.u32 %v13390_v61, 16  ;;  %v4257_v21 = vrot.slane %v4256_v57, 4  ;;  %v13405_v48 = vpop.f32.mrf.mxu0  ;;  %v5429_v26 = vld [vmem:[#allocation3 + $0x20] sm:$0x1] }
 0x2c0   : > { %v5630_v17 = vrot.slane %v5628_v3, 5  ;;  %v5634_v11 = vrot.slane %v5632_v50, 4  ;;  %v4267_v51 = vrot.slane %v4266_v56, 4  ;;  %v5126_v44 = vshll.u32 %v5068_v37, 16 }
 0x2c1   : > { %v5125_v34 = vrot.slane %v5123_v9, 7  ;;  %v5005_v24 = vadd.f32 %v13267_v27, %v4969_v43  ;;  %v4271_v36 = vrot.slane %v4269_v14, 5  ;;  %v5640_v3 = vrot.slane %v5638_v46, 5  ;;  %v11310_v43 = vld [vmem:[#allocation2 + $0x9c] sm:$0xff] }
 0x2c2   : > { %v3789_v6 = vpop.f32.mrf.mxu2  ;;  %v5631_v32 = vsel %vm11786_vm2, %v5626_v22, %v5630_v17  ;;  %v5635_v35 = vor.u32 %v5634_v11, %v5630_v17  ;;  %v4262_v57 = vsel %vm11786_vm2, %v4257_v21, %v4261_v1  ;;  %v10506_v59 = vrot.slane %v4584_v0, 9 }
 0x2c3   : > { %v5128_v50 = vor.u32 %v5126_v44, %v5125_v34  ;;  %v5130_v37 = vrot.slane %v5125_v34, 4  ;;  %v5037_v56 = vmax.f32 %v5005_v24, 0.0  ;;  %v3862_v9 = vadd.f32 %v3789_v6, %v12814_v38 }
 0x2c4   : > { %v5636_v63 = vrot.slane %v5635_v35, 4  ;;  %v5997_v8 = vunpack.c.l.b16 %v5631_v32  ;;  %v4272_v14 = vsel %vm11786_vm2, %v4267_v51, %v4271_v36  ;;  %v13421_v35 = vpop.f32.mrf.mxu3  ;;  %v13423_v51 = vunpack.c.l.b16 %v4262_v57 }
 0x2c5   : > { %v5129_v22 = vsel %vm11936_vm8, %v5121_v41, %v5128_v50  ;;  %v5430_v46 = vsel %vm11952_vm10, %v5130_v37, %v5429_v26  ;;  %v5069_v17 = vpack.c.bf16 %v5037_v56, %v5037_v56  ;;  %v4544_v1 = vadd.f32 %v13359_v31, %v3862_v9  ;;  %v5534_v11 = vld [vmem:[#allocation3 + $0x18] sm:$0xf]  ;;  %v5432_v9 = vld [vmem:[#allocation3 + $0x24] sm:$0xf] }
 0x2c6   : > { %5428 = vst [vmem:[#allocation3 + $0x1c] sm:$0xf] %v5129_v22  ;;  %v5641_v38 = vsel %vm11786_vm2, %v5636_v63, %v5640_v3  ;;  %v5643_v32 = vshrl.u32 %v5534_v11, 16  ;;  %v5646_v21 = vshll.u32 %v5534_v11, 16  ;;  %v11401_v31 = vld [vmem:[%s15896_s3 + $0xf0] sm:$0xff]  ;;  %v13429_v24 = vunpack.c.l.b16 %v4272_v14 }
 0x2c7   : > { %5431 = vst [vmem:[#allocation3 + $0x20] sm:$0x1] %v5430_v46  ;;  %v5132_v34 = vshrl.u32 %v5069_v17, 16  ;;  %v4970_v41 = vadd.f32 %v13341_v15, %v4544_v1  ;;  %3831 = vmatmul.bf16.gmra.mxu2 %v11310_v43  ;;  %v5998_v44 = vunpack.c.l.b16 %v5641_v38  ;;  %v5135_v36 = vshll.u32 %v5069_v17, 16  ;;  %v3931_v3 = vld [vmem:[#allocation2 + $0xc0] sm:$0xf]  ;;  %v13435_v15 = vpop.f32.mrf.mxu0  ;;  %7033 = vmatpush.bf16.msrb.mxu0 %v11401_v31 }
 0x2c8   : > { %v5645_v0 = vrot.slane %v5643_v32, 4  ;;  %v5648_v26 = vrot.slane %v5646_v21, 5  ;;  %v4728_v6 = vrot.slane %v13366_v7, 5  ;;  %v4731_v56 = vrot.slane %v13377_v2, 5  ;;  %v13454_v31 = vld [vmem:[#allocation2 + $0xc4] sm:$0xf] }
 0x2c9   : > { %v13432_v57 = vrot.slane %v5132_v34, 7  ;;  %v5006_v50 = vadd.f32 %v13267_v27, %v4970_v41  ;;  %v6028_v37 = vpack.c.b16 %v5998_v44, %v5997_v8  ;;  %v4274_v46 = vshrl.u32 %v3931_v3, 16 }
 0x2ca   : > { %v3792_v43 = vpop.f32.mrf.mxu2  ;;  %v5649_v63 = vor.u32 %v5648_v26, %v5645_v0  ;;  %v4729_v14 = vsel %vm12348_vm13, %v10506_v59, %v4728_v6  ;;  %v4730_v22 = vrot.slane %v4728_v6, 4  ;;  %v15959_v11 = vpack.c.b16 %v13361_v19, %v13350_v40  ;;  %4944 = vmatmul.bf16.gmra.mxu0 %v13394_v54  ;;  %v15960_v40 = vld [vmem:[#allocation20_spill] sm:$0xff] }
 0x2cb   : > { %v5137_v7 = vor.u32 %v5135_v36, %v13432_v57  ;;  %v5138_v17 = vrot.slane %v13432_v57, 4  ;;  %v5038_v1 = vmax.f32 %v5006_v50, 0.0  ;;  %v3863_v8 = vadd.f32 %v3792_v43, %v12838_v10  ;;  %6120 = vmatmul.bf16.gmra.mxu1 %v6028_v37 }
 0x2cc   : > { %4518 = vmatmul.bf16.gmra.mxu3 %v15959_v11  ;;  %v5650_v2 = vrot.slane %v5649_v63, 4  ;;  %v4732_v59 = vsel %vm12348_vm13, %v4730_v22, %v4731_v56  ;;  %v4790_v38 = vunpack.c.l.b16 %v4729_v14  ;;  %v4276_v32 = vrot.slane %v4274_v46, 4  ;;  %v13460_v54 = vpop.f32.mrf.mxu3 }
 0x2cd   : > { %v5433_v21 = vsel %vm11944_vm9, %v5137_v7, %v5432_v9  ;;  %v5070_v34 = vpack.c.bf16 %v5038_v1, %v5038_v1  ;;  %v4545_v41 = vadd.f32 %v13388_v29, %v3863_v8  ;;  %v13452_v10 = vld [vmem:[#allocation3 + $0x1c] sm:$0xf]  ;;  %v4791_v44 = vunpack.c.l.b16 %v4732_v59  ;;  %v5436_v1 = vld [vmem:[#allocation3 + $0x2c] sm:$0x1] }
 0x2ce   : > { %v13458_v19 = vadd.f32 %v15960_v40, %v12912_v60  ;;  %5434 = vst [vmem:[#allocation3 + $0x24] sm:$0xf] %v5433_v21  ;;  %v13462_v36 = vld [vmem:[#allocation3 + $0x20] sm:$0x1]  ;;  %v5652_v0 = vshll.u32 %v13452_v10, 16  ;;  %v5656_v26 = vshrl.u32 %v13452_v10, 16  ;;  %v4383_v29 = vpack.c.b16 %v13429_v24, %v13423_v51 }
 0x2cf   : > { %v5140_v6 = vshrl.u32 %v5070_v34, 16  ;;  %v5143_v57 = vshll.u32 %v5070_v34, 16  ;;  %v4971_v50 = vadd.f32 %v13371_v25, %v4545_v41  ;;  %v5662_v37 = vshll.u32 %v13462_v36, 16  ;;  %v11409_v60 = vld [vmem:[%s15896_s3 + $0x130] sm:$0xff]  ;;  %v13476_v46 = vpop.f32.mrf.mxu0  ;;  %v11311_v40 = vld [vmem:[#allocation2 + $0xa8] sm:$0xff] }
 0x2d0   : > { %v5654_v56 = vrot.slane %v5652_v0, 5  ;;  %v5658_v9 = vrot.slane %v5656_v26, 4  ;;  %v13473_v43 = vpack.c.b16 %v4791_v44, %v4790_v38  ;;  %v4277_v63 = vshll.u32 %v3931_v3, 16  ;;  %7715 = vmatpush.bf16.msrb.mxu1 %v11409_v60 }
 0x2d1   : > { %v5142_v14 = vrot.slane %v5140_v6, 7  ;;  %v5007_v22 = vadd.f32 %v13267_v27, %v4971_v50  ;;  %v5664_v7 = vrot.slane %v5662_v37, 5  ;;  %v4283_v25 = vshll.u32 %v13454_v31, 16 }
 0x2d2   : > { %v3794_v8 = vpop.f32.mrf.mxu2  ;;  %v5655_v11 = vsel %vm11786_vm2, %v5650_v2, %v5654_v56  ;;  %v5659_v59 = vor.u32 %v5658_v9, %v5654_v56  ;;  %v4279_v21 = vrot.slane %v4277_v63, 5  ;;  %v4287_v38 = vshrl.u32 %v13454_v31, 16 }
 0x2d3   : > { %v5145_v34 = vor.u32 %v5143_v57, %v5142_v14  ;;  %v5147_v3 = vrot.slane %v5142_v14, 4  ;;  %v5039_v41 = vmax.f32 %v5007_v22, 0.0  ;;  %v3864_v44 = vadd.f32 %v3794_v8, %v12864_v49  ;;  %v13488_v57 = vld [vmem:[#allocation2 + $0xc8] sm:$0x1] }
 0x2d4   : > { %v5660_v0 = vrot.slane %v5659_v59, 4  ;;  %v5999_v26 = vunpack.c.l.b16 %v5655_v11  ;;  %v4280_v6 = vor.u32 %v4279_v21, %v4276_v32  ;;  %v4285_v50 = vrot.slane %v4283_v25, 5  ;;  %v13492_v63 = vpop.f32.mrf.mxu3 }
 0x2d5   : > { %v5146_v37 = vsel %vm11936_vm8, %v5138_v17, %v5145_v34  ;;  %v5437_v2 = vsel %vm11952_vm10, %v5147_v3, %v5436_v1  ;;  %v5071_v60 = vpack.c.bf16 %v5039_v41, %v5039_v41  ;;  %v4546_v56 = vadd.f32 %v13421_v35, %v3864_v44  ;;  %v5536_v9 = vld [vmem:[#allocation3 + $0x24] sm:$0xf]  ;;  %v4585_v35 = vld [vmem:[#allocation2 + $0xc0] sm:$0xe] }
 0x2d6   : > { %5435 = vst [vmem:[#allocation3 + $0x28] sm:$0xf] %v5146_v37  ;;  %v5665_v49 = vsel %vm11786_vm2, %v5660_v0, %v5664_v7  ;;  %v5667_v32 = vshrl.u32 %v5536_v9, 16  ;;  %v5670_v14 = vshll.u32 %v5536_v9, 16  ;;  %v4281_v22 = vrot.slane %v4280_v6, 4 }
 0x2d7   : > { %5438 = vst [vmem:[#allocation3 + $0x2c] sm:$0x1] %v5437_v2  ;;  %v5149_v17 = vshrl.u32 %v5071_v60, 16  ;;  %v5152_v25 = vshll.u32 %v5071_v60, 16  ;;  %v4972_v1 = vadd.f32 %v13405_v48, %v4546_v56  ;;  %3836 = vmatmul.bf16.gmra.mxu2 %v11311_v40  ;;  %v6000_v8 = vunpack.c.l.b16 %v5665_v49  ;;  %v13500_v44 = vpop.f32.mrf.mxu0  ;;  %v5439_v6 = vld [vmem:[#allocation3 + $0x30] sm:$0xf] }
 0x2d8   : > { %v5669_v11 = vrot.slane %v5667_v32, 4  ;;  %v5672_v59 = vrot.slane %v5670_v14, 5  ;;  %v4286_v21 = vsel %vm11786_vm2, %v4281_v22, %v4285_v50  ;;  %v4289_v34 = vrot.slane %v4287_v38, 4 }
 0x2d9   : > { %v13497_v7 = vrot.slane %v5149_v17, 7  ;;  %v5008_v3 = vadd.f32 %v13267_v27, %v4972_v1  ;;  %v6029_v41 = vpack.c.b16 %v6000_v8, %v5999_v26  ;;  %v4293_v0 = vshll.u32 %v13488_v57, 16  ;;  %v11376_v26 = vld [vmem:[%s15896_s3 + $0xa8] sm:$0xff] }
 0x2da   : > { %v3797_v48 = vpop.f32.mrf.mxu2  ;;  %v5673_v40 = vor.u32 %v5672_v59, %v5669_v11  ;;  %v4290_v37 = vor.u32 %v4289_v34, %v4285_v50  ;;  %v13503_v2 = vunpack.c.l.b16 %v4286_v21  ;;  %v10507_v60 = vrot.slane %v4585_v35, 9  ;;  %v11400_v50 = vld [vmem:[%s15896_s3 + $0xe8] sm:$0xff]  ;;  %4949 = vmatmul.bf16.gmra.mxu0 %v13473_v43  ;;  %6720 = vmatpush.bf16.msrb.mxu3 %v11376_v26  ;;  %v5443_v26 = vld [vmem:[#allocation3 + $0x38] sm:$0x1] }
 0x2db   : > { %v5154_v56 = vor.u32 %v5152_v25, %v13497_v7  ;;  %v5155_v38 = vrot.slane %v13497_v7, 4  ;;  %v5040_v9 = vmax.f32 %v5008_v3, 0.0  ;;  %v3865_v49 = vadd.f32 %v3797_v48, %v12898_v39  ;;  %6125 = vmatmul.bf16.gmra.mxu1 %v6029_v41  ;;  %7034 = vmatpush.bf16.msrb.mxu0 %v11400_v50  ;;  %v11360_v34 = vld [vmem:[%s15896_s3 + $0x28] sm:$0xff]  ;;  %v11375_v3 = vld [vmem:[%s15896_s3 + $0xa0] sm:$0xff] }
 0x2dc   : > { %4523 = vmatmul.bf16.gmra.mxu3 %v4383_v29  ;;  %v5674_v32 = vrot.slane %v5673_v40, 4  ;;  %v4291_v14 = vrot.slane %v4290_v37, 4  ;;  %v4295_v22 = vrot.slane %v4293_v0, 5  ;;  %v4735_v39 = vrot.slane %v13454_v31, 5  ;;  %v13525_v1 = vpop.f32.mrf.mxu3  ;;  %v11399_v41 = vld [vmem:[%s15896_s3 + $0xe0] sm:$0xff]  ;;  %6342 = vmatpush.bf16.msrb.mxu2 %v11360_v34 }
 0x2dd   : > { %v5440_v17 = vsel %vm11944_vm9, %v5154_v56, %v5439_v6  ;;  %v5072_v51 = vpack.c.bf16 %v5040_v9, %v5040_v9  ;;  %v4547_v24 = vadd.f32 %v13460_v54, %v3865_v49  ;;  %v13522_v29 = vld [vmem:[#allocation3 + $0x28] sm:$0xf]  ;;  %v4738_v25 = vrot.slane %v13488_v57, 5  ;;  %v3934_v49 = vld [vmem:[#allocation2 + $0xcc] sm:$0xf] }
 0x2de   : > { %5441 = vst [vmem:[#allocation3 + $0x30] sm:$0xf] %v5440_v17  ;;  %v13527_v43 = vld [vmem:[#allocation3 + $0x2c] sm:$0x1]  ;;  %v5676_v8 = vshll.u32 %v13522_v29, 16  ;;  %v5680_v31 = vshrl.u32 %v13522_v29, 16  ;;  %v4296_v35 = vsel %vm11786_vm2, %v4291_v14, %v4295_v22  ;;  %v4736_v54 = vsel %vm12348_vm13, %v10507_v60, %v4735_v39  ;;  %6721 = vmatpush.bf16.msrb.mxu3 %v11375_v3 }
 0x2df   : > { %v5157_v11 = vshrl.u32 %v5072_v51, 16  ;;  %v5160_v59 = vshll.u32 %v5072_v51, 16  ;;  %v4973_v57 = vadd.f32 %v13435_v15, %v4547_v24  ;;  %v5686_v21 = vshll.u32 %v13527_v43, 16  ;;  %v13549_v60 = vpop.f32.mrf.mxu0  ;;  %v11312_v14 = vld [vmem:[#allocation2 + $0xb4] sm:$0xff]  ;;  %7035 = vmatpush.bf16.msrb.mxu0 %v11399_v41 }
 0x2e0   : > { %v5678_v0 = vrot.slane %v5676_v8, 5  ;;  %v5682_v6 = vrot.slane %v5680_v31, 4  ;;  %v13546_v48 = vunpack.c.l.b16 %v4296_v35  ;;  %v4737_v40 = vrot.slane %v4735_v39, 4 }
 0x2e1   : > { %v5159_v15 = vrot.slane %v5157_v11, 7  ;;  %v5009_v37 = vadd.f32 %v13267_v27, %v4973_v57  ;;  %v5688_v56 = vrot.slane %v5686_v21, 5  ;;  %v4792_v9 = vunpack.c.l.b16 %v4736_v54  ;;  %v11359_v54 = vld [vmem:[%s15896_s3 + $0x20] sm:$0xff] }
 0x2e2   : > { %v3799_v50 = vpop.f32.mrf.mxu2  ;;  %v5679_v22 = vsel %vm11786_vm2, %v5674_v32, %v5678_v0  ;;  %v5683_v17 = vor.u32 %v5682_v6, %v5678_v0  ;;  %v4384_v39 = vpack.c.b16 %v13546_v48, %v13503_v2  ;;  %v4739_v51 = vsel %vm12348_vm13, %v4737_v40, %v4738_v25  ;;  %v11374_v32 = vld [vmem:[%s15896_s3 + $0x98] sm:$0xff]  ;;  %v13574_v0 = vld [vmem:[#allocation2 + $0xd0] sm:$0xf]  ;;  %6343 = vmatpush.bf16.msrb.mxu2 %v11359_v54 }
 0x2e3   : > { %v5162_v24 = vor.u32 %v5160_v59, %v5159_v15  ;;  %v5164_v8 = vrot.slane %v5159_v15, 4  ;;  %v5041_v31 = vmax.f32 %v5009_v37, 0.0  ;;  %v3866_v35 = vadd.f32 %v3799_v50, %v13458_v19  ;;  %v11398_v2 = vld [vmem:[%s15896_s3 + $0xd8] sm:$0xff]  ;;  %6722 = vmatpush.bf16.msrb.mxu3 %v11374_v32  ;;  %v5446_v32 = vld [vmem:[#allocation3 + $0x3c] sm:$0xf] }
 0x2e4   : > { %v5684_v11 = vrot.slane %v5683_v17, 4  ;;  %v6001_v25 = vunpack.c.l.b16 %v5679_v22  ;;  %v4793_v57 = vunpack.c.l.b16 %v4739_v51  ;;  %v4298_v59 = vshrl.u32 %v3934_v49, 16  ;;  %v13578_v48 = vpop.f32.mrf.mxu3  ;;  %7036 = vmatpush.bf16.msrb.mxu0 %v11398_v2 }
 0x2e5   : > { %v5163_v19 = vsel %vm11936_vm8, %v5155_v38, %v5162_v24  ;;  %v5444_v21 = vsel %vm11952_vm10, %v5164_v8, %v5443_v26  ;;  %v5073_v34 = vpack.c.bf16 %v5041_v31, %v5041_v31  ;;  %v4548_v3 = vadd.f32 %v13492_v63, %v3866_v35  ;;  %v5538_v41 = vld [vmem:[#allocation3 + $0x30] sm:$0xf]  ;;  %v13580_v38 = vld [vmem:[#allocation2 + $0xd4] sm:$0x1] }
 0x2e6   : > { %5442 = vst [vmem:[#allocation3 + $0x34] sm:$0xf] %v5163_v19  ;;  %v5689_v6 = vsel %vm11786_vm2, %v5684_v11, %v5688_v56  ;;  %v4810_v7 = vpack.c.b16 %v4793_v57, %v4792_v9  ;;  %v5691_v40 = vshrl.u32 %v5538_v41, 16  ;;  %v5694_v15 = vshll.u32 %v5538_v41, 16  ;;  %v11358_v56 = vld [vmem:[%s15896_s3 + $0x18] sm:$0xff]  ;;  %v11373_v9 = vld [vmem:[%s15896_s3 + $0x90] sm:$0xff] }
 0x2e7   : > { %5445 = vst [vmem:[#allocation3 + $0x38] sm:$0x1] %v5444_v21  ;;  %v5166_v37 = vshrl.u32 %v5073_v34, 16  ;;  %v5169_v63 = vshll.u32 %v5073_v34, 16  ;;  %v4974_v26 = vadd.f32 %v13476_v46, %v4548_v3  ;;  %3841 = vmatmul.bf16.gmra.mxu2 %v11312_v14  ;;  %v6002_v50 = vunpack.c.l.b16 %v5689_v6  ;;  %v11397_v8 = vld [vmem:[%s15896_s3 + $0xd0] sm:$0xff]  ;;  %v13595_v35 = vpop.f32.mrf.mxu0  ;;  %6723 = vmatpush.bf16.msrb.mxu3 %v11373_v9 }
 0x2e8   : > { %v5693_v22 = vrot.slane %v5691_v40, 4  ;;  %v5696_v17 = vrot.slane %v5694_v15, 5  ;;  %v4300_v51 = vrot.slane %v4298_v59, 4  ;;  %v4301_v24 = vshll.u32 %v3934_v49, 16  ;;  %6344 = vmatpush.bf16.msrb.mxu2 %v11358_v56  ;;  %7037 = vmatpush.bf16.msrb.mxu0 %v11397_v8 }
 0x2e9   : > { %v13592_v31 = vrot.slane %v5166_v37, 7  ;;  %v5010_v46 = vadd.f32 %v13267_v27, %v4974_v26  ;;  %v6030_v14 = vpack.c.b16 %v6002_v50, %v6001_v25  ;;  %v4307_v54 = vshll.u32 %v13574_v0, 16 }
 0x2ea   : > { %v3802_v2 = vpop.f32.mrf.mxu2  ;;  %v4303_v11 = vrot.slane %v4301_v24, 5  ;;  %v4311_v57 = vshrl.u32 %v13574_v0, 16  ;;  %v4317_v49 = vshll.u32 %v13580_v38, 16  ;;  %v5697_v25 = vor.u32 %v5696_v17, %v5693_v22  ;;  %4954 = vmatmul.bf16.gmra.mxu0 %v4810_v7 }
 0x2eb   : > { %v5171_v59 = vor.u32 %v5169_v63, %v13592_v31  ;;  %v5042_v19 = vmax.f32 %v5010_v46, 0.0  ;;  %v3867_v21 = vadd.f32 %v3802_v2, %v12935_v33  ;;  %6130 = vmatmul.bf16.gmra.mxu1 %v6030_v14  ;;  %v5172_v34 = vrot.slane %v13592_v31, 4  ;;  %v11357_v33 = vld [vmem:[%s15896_s3 + $0x10] sm:$0xff] }
 0x2ec   : > { %4528 = vmatmul.bf16.gmra.mxu3 %v4384_v39  ;;  %v4304_v3 = vor.u32 %v4303_v11, %v4300_v51  ;;  %v4309_v41 = vrot.slane %v4307_v54, 5  ;;  %v4313_v6 = vrot.slane %v4311_v57, 4  ;;  %v4319_v63 = vrot.slane %v4317_v49, 5  ;;  %v11372_v39 = vld [vmem:[%s15896_s3 + $0x88] sm:$0xff]  ;;  %v13616_v50 = vpop.f32.mrf.mxu3  ;;  %6345 = vmatpush.bf16.msrb.mxu2 %v11357_v33 }
 0x2ed   : > { %v5447_v40 = vsel %vm11944_vm9, %v5171_v59, %v5446_v32  ;;  %v5074_v15 = vpack.c.bf16 %v5042_v19, %v5042_v19  ;;  %v4549_v37 = vadd.f32 %v13525_v1, %v3867_v21  ;;  %v13606_v26 = vld [vmem:[#allocation3 + $0x34] sm:$0xf]  ;;  %v3553_v7 = vadd.f32 %v12868_v52, %v12947_v5  ;;  %6724 = vmatpush.bf16.msrb.mxu3 %v11372_v39  ;;  %v11371_v19 = vld [vmem:[%s15896_s3 + $0x80] sm:$0xff] }
 0x2ee   : > { %5448 = vst [vmem:[#allocation3 + $0x3c] sm:$0xf] %v5447_v40  ;;  %v13618_v56 = vld [vmem:[#allocation3 + $0x38] sm:$0x1]  ;;  %v5700_v1 = vshll.u32 %v13606_v26, 16  ;;  %v5704_v9 = vshrl.u32 %v13606_v26, 16  ;;  %v4314_v22 = vor.u32 %v4313_v6, %v4309_v41 }
 0x2ef   : > { %v5174_v17 = vshrl.u32 %v5074_v15, 16  ;;  %v4975_v51 = vadd.f32 %v13500_v44, %v4549_v37  ;;  %v5698_v24 = vrot.slane %v5697_v25, 4  ;;  %v5710_v8 = vshll.u32 %v13618_v56, 16  ;;  %v11408_v52 = vld [vmem:[%s15896_s3 + $0x128] sm:$0xff]  ;;  %v13631_v57 = vpop.f32.mrf.mxu0  ;;  %v11395_v21 = vld [vmem:[%s15896_s3 + $0xc0] sm:$0xff] }
 0x2f0   : > { %v11396_v5 = vld [vmem:[%s15896_s3 + $0xc8] sm:$0xff]  ;;  %v5702_v31 = vrot.slane %v5700_v1, 5  ;;  %v5706_v46 = vrot.slane %v5704_v9, 4  ;;  %v4305_v14 = vrot.slane %v4304_v3, 4  ;;  %v4315_v54 = vrot.slane %v4314_v22, 4  ;;  %7716 = vmatpush.bf16.msrb.mxu1 %v11408_v52  ;;  %v11313_v9 = vld [vmem:[#allocation2 + $0xc0] sm:$0xff] }
 0x2f1   : > { %v4586_v32 = vld [vmem:[#allocation2 + $0xcc] sm:$0xe]  ;;  %v5176_v2 = vrot.slane %v5174_v17, 7  ;;  %v5177_v44 = vshll.u32 %v5074_v15, 16  ;;  %v5011_v11 = vadd.f32 %v13267_v27, %v4975_v51  ;;  %v5712_v49 = vrot.slane %v5710_v8, 5  ;;  %7038 = vmatpush.bf16.msrb.mxu0 %v11396_v5  ;;  %6725 = vmatpush.bf16.msrb.mxu3 %v11371_v19 }
 0x2f2   : > { %v11356_v59 = vld [vmem:[%s15896_s3 + $0x8] sm:$0xff]  ;;  %v5450_v25 = vld [vmem:[#allocation3 + $0x44] sm:$0x1]  ;;  %v3804_v3 = vpop.f32.mrf.mxu2  ;;  %v5703_v27 = vsel %vm11786_vm2, %v5698_v24, %v5702_v31  ;;  %v5707_v6 = vor.u32 %v5706_v46, %v5702_v31  ;;  %v4310_v40 = vsel %vm11786_vm2, %v4305_v14, %v4309_v41  ;;  %v4320_v15 = vsel %vm11786_vm2, %v4315_v54, %v4319_v63 }
 0x2f3   : > { %v5179_v37 = vor.u32 %v5177_v44, %v5176_v2  ;;  %v5181_v33 = vrot.slane %v5176_v2, 4  ;;  %v5043_v39 = vmax.f32 %v5011_v11, 0.0  ;;  %v3868_v1 = vadd.f32 %v3804_v3, %v3553_v7  ;;  %6346 = vmatpush.bf16.msrb.mxu2 %v11356_v59  ;;  %v11355_v7 = vld [vmem:[%s15896_s3] sm:$0xff] }
 0x2f4   : > { %v5708_v22 = vrot.slane %v5707_v6, 4  ;;  %v4368_v17 = vunpack.c.l.b16 %v4310_v40  ;;  %v4369_v51 = vunpack.c.l.b16 %v4320_v15  ;;  %v10508_v8 = vrot.slane %v4586_v32, 9  ;;  %v13658_v14 = vpop.f32.mrf.mxu3  ;;  %v5453_v6 = vld [vmem:[#allocation3 + $0x48] sm:$0xf] }
 0x2f5   : > { %v5180_v24 = vsel %vm11936_vm8, %v5172_v34, %v5179_v37  ;;  %v5451_v41 = vsel %vm11952_vm10, %v5181_v33, %v5450_v25  ;;  %v5075_v52 = vpack.c.bf16 %v5043_v39, %v5043_v39  ;;  %v4550_v63 = vadd.f32 %v13578_v48, %v3868_v1  ;;  %v5540_v5 = vld [vmem:[#allocation3 + $0x3c] sm:$0xf]  ;;  %7039 = vmatpush.bf16.msrb.mxu0 %v11395_v21  ;;  %v6429_v21 = vld [vmem:[#allocation3] sm:$0xe] }
 0x2f6   : > { %5449 = vst [vmem:[#allocation3 + $0x40] sm:$0xf] %v5180_v24  ;;  %v5713_v31 = vsel %vm11786_vm2, %v5708_v22, %v5712_v49  ;;  %v6003_v46 = vunpack.c.l.b16 %v5703_v27  ;;  %v4742_v34 = vrot.slane %v13574_v0, 5  ;;  %v4745_v54 = vrot.slane %v13580_v38, 5  ;;  %v13670_v38 = vld [vmem:[%s15895_s2] ss:$0 sm:$0xff] }
 0x2f7   : > { %5452 = vst [vmem:[#allocation3 + $0x44] sm:$0x1] %v5451_v41  ;;  %v5183_v32 = vshrl.u32 %v5075_v52, 16  ;;  %v4976_v48 = vadd.f32 %v13549_v60, %v4550_v63  ;;  %3846 = vmatmul.bf16.gmra.mxu2 %v11313_v9  ;;  %v6004_v2 = vunpack.c.l.b16 %v5713_v31  ;;  %v4385_v44 = vpack.c.b16 %v4369_v51, %v4368_v17  ;;  %v13673_v27 = vpop.f32.mrf.mxu0  ;;  %v11553_v24 = vld [vmem:[#allocation3 + $0x4] sm:$0xf] }
 0x2f8   : > { %v4743_v11 = vsel %vm12348_vm13, %v10508_v8, %v4742_v34  ;;  %v4744_v59 = vrot.slane %v4742_v34, 4  ;;  %v5715_v19 = vshrl.u32 %v5540_v5, 16  ;;  %v5718_v49 = vshll.u32 %v5540_v5, 16  ;;  %6347 = vmatpush.bf16.msrb.mxu2 %v11355_v7  ;;  %v11554_v34 = vld [vmem:[#allocation3 + $0x8] sm:$0x1] }
 0x2f9   : > { %v13665_v25 = vrot.slane %v5183_v32, 7  ;;  %v5186_v0 = vshll.u32 %v5075_v52, 16  ;;  %v5012_v60 = vadd.f32 %v13670_v38, %v4976_v48  ;;  %v6031_v3 = vpack.c.b16 %v6004_v2, %v6003_v46 }
 0x2fa   : > { %v3807_v40 = vpop.f32.mrf.mxu2  ;;  %v4746_v15 = vsel %vm12348_vm13, %v4744_v59, %v4745_v54  ;;  %v4794_v37 = vunpack.c.l.b16 %v4743_v11  ;;  %v5717_v33 = vrot.slane %v5715_v19, 4  ;;  %v5720_v39 = vrot.slane %v5718_v49, 5 }
 0x2fb   : > { %v5188_v1 = vor.u32 %v5186_v0, %v13665_v25  ;;  %v5044_v9 = vmax.f32 %v5012_v60, 0.0  ;;  %v3869_v22 = vadd.f32 %v3807_v40, %v12976_v42  ;;  %6135 = vmatmul.bf16.gmra.mxu1 %v6031_v3  ;;  %v10701_v17 = vrot.slane %v6429_v21, 9  ;;  %v6430_v60 = vld [vmem:[#allocation3 + $0xc] sm:$0xe]  ;;  %v5457_v3 = vld [vmem:[#allocation3 + $0x50] sm:$0x1] }
 0x2fc   : > { %4533 = vmatmul.bf16.gmra.mxu3 %v4385_v44  ;;  %v3555_v51 = vadd.f32 %v12918_v47, %v12984_v20  ;;  %v4795_v8 = vunpack.c.l.b16 %v4746_v15  ;;  %v6479_v41 = vrot.slane %v11553_v24, 5  ;;  %v13683_v52 = vadd.f32 %v12954_v55, %v13014_v28  ;;  %v13690_v46 = vpop.f32.mrf.mxu3 }
 0x2fd   : > { %v5454_v63 = vsel %vm11944_vm9, %v5188_v1, %v5453_v6  ;;  %v5076_v5 = vpack.c.bf16 %v5044_v9, %v5044_v9  ;;  %v4551_v7 = vadd.f32 %v13616_v50, %v3869_v22  ;;  %v13688_v42 = vld [vmem:[#allocation3 + $0x40] sm:$0xf]  ;;  %v5721_v47 = vor.u32 %v5720_v39, %v5717_v33  ;;  %v11314_v9 = vld [vmem:[#allocation2 + $0xcc] sm:$0xff] }
 0x2fe   : > { %5455 = vst [vmem:[#allocation3 + $0x48] sm:$0xf] %v5454_v63  ;;  %v4811_v31 = vpack.c.b16 %v4795_v8, %v4794_v37  ;;  %v5724_v20 = vshll.u32 %v13688_v42, 16  ;;  %v6482_v54 = vrot.slane %v11554_v34, 5  ;;  %v13694_v28 = vld [vmem:[#allocation3 + $0x44] sm:$0x1]  ;;  %v6480_v50 = vsel %vm12348_vm13, %v10701_v17, %v6479_v41 }
 0x2ff   : > { %v5191_v32 = vshrl.u32 %v5076_v5, 16  ;;  %v4977_v55 = vadd.f32 %v13595_v35, %v4551_v7  ;;  %v5728_v48 = vshrl.u32 %v13688_v42, 16  ;;  %v5189_v2 = vrot.slane %v13665_v25, 4  ;;  %v13702_v0 = vpop.f32.mrf.mxu0 }
 0x300   : > { %4959 = vmatmul.bf16.gmra.mxu0 %v4811_v31  ;;  %v5726_v44 = vrot.slane %v5724_v20, 5  ;;  %v6481_v11 = vrot.slane %v6479_v41, 4  ;;  %v6486_v59 = vrot.slane %v13385_v45, 5  ;;  %v5194_v49 = vshll.u32 %v5076_v5, 16 }
 0x301   : > { %v5193_v19 = vrot.slane %v5191_v32, 7  ;;  %v5013_v21 = vadd.f32 %v13670_v38, %v4977_v55  ;;  %v5730_v35 = vrot.slane %v5728_v48, 4  ;;  %v5722_v40 = vrot.slane %v5721_v47, 4 }
 0x302   : > { %v3809_v6 = vpop.f32.mrf.mxu2  ;;  %v5734_v15 = vshll.u32 %v13694_v28, 16  ;;  %v6483_v25 = vsel %vm12348_vm13, %v6481_v11, %v6482_v54  ;;  %v6606_v37 = vunpack.c.l.b16 %v6480_v50  ;;  %v10702_v24 = vrot.slane %v6430_v60, 9 }
 0x303   : > { %v5196_v33 = vor.u32 %v5194_v49, %v5193_v19  ;;  %v5198_v39 = vrot.slane %v5193_v19, 4  ;;  %v5045_v45 = vmax.f32 %v5013_v21, 0.0  ;;  %v3870_v1 = vadd.f32 %v3809_v6, %v3555_v51  ;;  %v6431_v19 = vld [vmem:[#allocation3 + $0x18] sm:$0xe] }
 0x304   : > { %v5727_v22 = vsel %vm11786_vm2, %v5722_v40, %v5726_v44  ;;  %v5731_v17 = vor.u32 %v5730_v35, %v5726_v44  ;;  %v6607_v8 = vunpack.c.l.b16 %v6483_v25  ;;  %v5736_v51 = vrot.slane %v5734_v15, 5  ;;  %v13714_v20 = vpop.f32.mrf.mxu3 }
 0x305   : > { %v5197_v41 = vsel %vm11936_vm8, %v5189_v2, %v5196_v33  ;;  %v5458_v63 = vsel %vm11952_vm10, %v5198_v39, %v5457_v3  ;;  %v5077_v5 = vpack.c.bf16 %v5045_v45, %v5045_v45  ;;  %v4552_v7 = vadd.f32 %v13658_v14, %v3870_v1  ;;  %v5542_v31 = vld [vmem:[#allocation3 + $0x48] sm:$0xf]  ;;  %v5460_v3 = vld [vmem:[#allocation3 + $0x54] sm:$0xf] }
 0x306   : > { %5456 = vst [vmem:[#allocation3 + $0x4c] sm:$0xf] %v5197_v41  ;;  %v5732_v47 = vrot.slane %v5731_v17, 4  ;;  %v5739_v34 = vshrl.u32 %v5542_v31, 16  ;;  %v6488_v54 = vrot.slane %v6486_v59, 4  ;;  %v6638_v48 = vpack.c.b16 %v6607_v8, %v6606_v37 }
 0x307   : > { %5459 = vst [vmem:[#allocation3 + $0x50] sm:$0x1] %v5458_v63  ;;  %v5200_v32 = vshrl.u32 %v5077_v5, 16  ;;  %v4978_v55 = vadd.f32 %v13631_v57, %v4552_v7  ;;  %3851 = vmatmul.bf16.gmra.mxu2 %v11314_v9  ;;  %v5742_v50 = vshll.u32 %v5542_v31, 16  ;;  %v6005_v44 = vunpack.c.l.b16 %v5727_v22  ;;  %v13727_v60 = vpop.f32.mrf.mxu0 }
 0x308   : > { %v5737_v2 = vsel %vm11786_vm2, %v5732_v47, %v5736_v51  ;;  %v13721_v14 = vsel %vm12348_vm13, %v10702_v24, %v6486_v59  ;;  %v6489_v11 = vrot.slane %v13390_v61, 5  ;;  %v5203_v21 = vshll.u32 %v5077_v5, 16  ;;  %v6432_v47 = vld [vmem:[#allocation3 + $0x24] sm:$0xe] }
 0x309   : > { %v13724_v49 = vrot.slane %v5200_v32, 7  ;;  %v5014_v35 = vadd.f32 %v13670_v38, %v4978_v55  ;;  %v6006_v57 = vunpack.c.l.b16 %v5737_v2  ;;  %v5741_v40 = vrot.slane %v5739_v34, 4  ;;  %v11407_v55 = vld [vmem:[%s15896_s3 + $0x120] sm:$0xff] }
 0x30a   : > { %v3812_v6 = vpop.f32.mrf.mxu2  ;;  %v5744_v15 = vrot.slane %v5742_v50, 5  ;;  %v13731_v25 = vsel %vm12348_vm13, %v6488_v54, %v6489_v11  ;;  %v6493_v59 = vrot.slane %v13452_v10, 5  ;;  %v10703_v39 = vrot.slane %v6431_v19, 9  ;;  %7717 = vmatpush.bf16.msrb.mxu1 %v11407_v55 }
 0x30b   : > { %v5205_v61 = vor.u32 %v5203_v21, %v13724_v49  ;;  %v5046_v37 = vmax.f32 %v5014_v35, 0.0  ;;  %v3871_v33 = vadd.f32 %v3812_v6, %v13002_v16  ;;  %v6032_v45 = vpack.c.b16 %v6006_v57, %v6005_v44  ;;  %v11379_v16 = vld [vmem:[#allocation3 + $0xc] sm:$0xff]  ;;  %v5464_v35 = vld [vmem:[#allocation3 + $0x5c] sm:$0x1] }
 0x30c   : > { %6726 = vmatmul.bf16.vlgmr.msrb.gmra.mxu3 %v6638_v48  ;;  %v6608_v1 = vunpack.c.l.b16 %v13721_v14  ;;  %v6495_v9 = vrot.slane %v6493_v59, 4  ;;  %v6496_v22 = vrot.slane %v13462_v36, 5  ;;  %v6494_v41 = vsel %vm12348_vm13, %v10703_v39, %v6493_v59  ;;  %v13745_v63 = vpop.f32.mrf.mxu3 }
 0x30d   : > { %v5461_v17 = vsel %vm11944_vm9, %v5205_v61, %v5460_v3  ;;  %v5078_v8 = vpack.c.bf16 %v5046_v37, %v5046_v37  ;;  %v4553_v24 = vadd.f32 %v13690_v46, %v3871_v33  ;;  %v13741_v10 = vld [vmem:[#allocation3 + $0x4c] sm:$0xf]  ;;  %6140 = vmatmul.bf16.gmra.mxu1 %v6032_v45  ;;  %v5745_v5 = vor.u32 %v5744_v15, %v5741_v40  ;;  %v11339_v33 = vld [vmem:[#allocation3] sm:$0xff] }
 0x30e   : > { %5462 = vst [vmem:[#allocation3 + $0x54] sm:$0xf] %v5461_v17  ;;  %v5748_v7 = vshll.u32 %v13741_v10, 16  ;;  %v6609_v36 = vunpack.c.l.b16 %v13731_v25  ;;  %v6497_v31 = vsel %vm12348_vm13, %v6495_v9, %v6496_v22  ;;  %v5206_v46 = vrot.slane %v13724_v49, 4  ;;  %v13753_v54 = vld [vmem:[#allocation3 + $0x50] sm:$0x1] }
 0x30f   : > { %v5208_v51 = vshrl.u32 %v5078_v8, 16  ;;  %v4979_v34 = vadd.f32 %v13673_v27, %v4553_v24  ;;  %v5752_v32 = vshrl.u32 %v13741_v10, 16  ;;  %v5211_v48 = vshll.u32 %v5078_v8, 16  ;;  %v13760_v49 = vpop.f32.mrf.mxu0 }
 0x310   : > { %7040 = vmatmul.bf16.vlgmr.msrb.gmra.mxu0 %v11379_v16  ;;  %v5750_v50 = vrot.slane %v5748_v7, 5  ;;  %v6610_v2 = vunpack.c.l.b16 %v6494_v41  ;;  %v6611_v44 = vunpack.c.l.b16 %v6497_v31  ;;  %v6500_v27 = vrot.slane %v13522_v29, 5 }
 0x311   : > { %v5210_v11 = vrot.slane %v5208_v51, 7  ;;  %v5015_v19 = vadd.f32 %v13670_v38, %v4979_v34  ;;  %v5754_v21 = vrot.slane %v5752_v32, 4  ;;  %v5746_v3 = vrot.slane %v5745_v5, 4  ;;  %v6433_v51 = vld [vmem:[#allocation3 + $0x30] sm:$0xe] }
 0x312   : > { %v3814_v57 = vpop.f32.mrf.mxu2  ;;  %v5758_v6 = vshll.u32 %v13753_v54, 16  ;;  %v13764_v40 = vpack.c.b16 %v6611_v44, %v6610_v2  ;;  %v10704_v15 = vrot.slane %v6432_v47, 9  ;;  %v6502_v9 = vrot.slane %v6500_v27, 4 }
 0x313   : > { %v5213_v25 = vor.u32 %v5211_v48, %v5210_v11  ;;  %v5215_v59 = vrot.slane %v5210_v11, 4  ;;  %v5047_v61 = vmax.f32 %v5015_v19, 0.0  ;;  %v3872_v37 = vadd.f32 %v3814_v57, %v13683_v52  ;;  %v5467_v11 = vld [vmem:[#allocation3 + $0x60] sm:$0xf] }
 0x314   : > { %v5755_v39 = vor.u32 %v5754_v21, %v5750_v50  ;;  %v6501_v45 = vsel %vm12348_vm13, %v10704_v15, %v6500_v27  ;;  %v6503_v29 = vrot.slane %v13527_v43, 5  ;;  %v5751_v52 = vsel %vm11786_vm2, %v5746_v3, %v5750_v50  ;;  %v13777_v5 = vpop.f32.mrf.mxu3 }
 0x315   : > { %v5214_v22 = vsel %vm11936_vm8, %v5206_v46, %v5213_v25  ;;  %v5465_v17 = vsel %vm11952_vm10, %v5215_v59, %v5464_v35  ;;  %v5079_v8 = vpack.c.bf16 %v5047_v61, %v5047_v61  ;;  %v4554_v24 = vadd.f32 %v13714_v20, %v3872_v37 }
 0x316   : > { %5463 = vst [vmem:[#allocation3 + $0x58] sm:$0xf] %v5214_v22  ;;  %v5756_v41 = vrot.slane %v5755_v39, 4  ;;  %v5760_v16 = vrot.slane %v5758_v6, 5  ;;  %v6504_v43 = vsel %vm12348_vm13, %v6502_v9, %v6503_v29  ;;  %v6612_v47 = vunpack.c.l.b16 %v6501_v45  ;;  %v5544_v39 = vld [vmem:[#allocation3 + $0x54] sm:$0xf] }
 0x317   : > { %5466 = vst [vmem:[#allocation3 + $0x5c] sm:$0x1] %v5465_v17  ;;  %v5217_v7 = vshrl.u32 %v5079_v8, 16  ;;  %v4980_v31 = vadd.f32 %v13702_v0, %v4554_v24  ;;  %6348 = vmatmul.bf16.vlgmr.msrb.gmra.mxu2 %v11339_v33  ;;  %v6613_v46 = vunpack.c.l.b16 %v6504_v43  ;;  %v5220_v20 = vshll.u32 %v5079_v8, 16  ;;  %v13788_v44 = vpop.f32.mrf.mxu0 }
 0x318   : > { %v5761_v34 = vsel %vm11786_vm2, %v5756_v41, %v5760_v16  ;;  %v6639_v32 = vpack.c.b16 %v6609_v36, %v6608_v1  ;;  %v6507_v55 = vrot.slane %v13606_v26, 5  ;;  %v6007_v21 = vunpack.c.l.b16 %v5751_v52 }
 0x319   : > { %v5219_v48 = vrot.slane %v5217_v7, 7  ;;  %v5016_v50 = vadd.f32 %v13670_v38, %v4980_v31  ;;  %v6008_v2 = vunpack.c.l.b16 %v5761_v34  ;;  %v13790_v0 = vpack.c.b16 %v6613_v46, %v6612_v47 }
 0x31a   : > { %v3817_v19 = vpop.f32.mrf.mxu2  ;;  %v10705_v27 = vrot.slane %v6433_v51, 9  ;;  %v6509_v35 = vrot.slane %v6507_v55, 4  ;;  %v6510_v57 = vrot.slane %v13618_v56, 5  ;;  %v11380_v56 = vld [vmem:[#allocation3 + $0x18] sm:$0xff]  ;;  %v5763_v17 = vshrl.u32 %v5544_v39, 16 }
 0x31b   : > { %v5222_v3 = vor.u32 %v5220_v20, %v5219_v48  ;;  %v5048_v14 = vmax.f32 %v5016_v50, 0.0  ;;  %v3873_v1 = vadd.f32 %v3817_v19, %v13039_v62  ;;  %v5223_v26 = vrot.slane %v5219_v48, 4 }
 0x31c   : > { %6731 = vmatmul.bf16.gmra.mxu3 %v6639_v32  ;;  %v6033_v36 = vpack.c.b16 %v6008_v2, %v6007_v21  ;;  %v6508_v6 = vsel %vm12348_vm13, %v10705_v27, %v6507_v55  ;;  %v6511_v15 = vsel %vm12348_vm13, %v6509_v35, %v6510_v57  ;;  %v3559_v62 = vadd.f32 %v12992_v53, %v13045_v4  ;;  %v13803_v33 = vpop.f32.mrf.mxu3  ;;  %v11340_v35 = vld [vmem:[#allocation3 + $0xc] sm:$0xff] }
 0x31d   : > { %v5468_v25 = vsel %vm11944_vm9, %v5222_v3, %v5467_v11  ;;  %v5080_v59 = vpack.c.bf16 %v5048_v14, %v5048_v14  ;;  %v4555_v61 = vadd.f32 %v13745_v63, %v3873_v1  ;;  %v6615_v37 = vunpack.c.l.b16 %v6511_v15  ;;  %v13805_v45 = vld [vmem:[#allocation3 + $0x58] sm:$0xf]  ;;  %v6434_v15 = vld [vmem:[#allocation3 + $0x3c] sm:$0xe] }
 0x31e   : > { %5469 = vst [vmem:[#allocation3 + $0x60] sm:$0xf] %v5468_v25  ;;  %6145 = vmatmul.bf16.gmra.mxu1 %v6033_v36  ;;  %v13808_v22 = vld [vmem:[#allocation3 + $0x5c] sm:$0x1]  ;;  %v6614_v8 = vunpack.c.l.b16 %v6508_v6  ;;  %v5766_v24 = vshll.u32 %v5544_v39, 16  ;;  %v5772_v52 = vshll.u32 %v13805_v45, 16 }
 0x31f   : > { %v5225_v9 = vshrl.u32 %v5080_v59, 16  ;;  %v4981_v29 = vadd.f32 %v13727_v60, %v4555_v61  ;;  %v5228_v63 = vshll.u32 %v5080_v59, 16  ;;  %v5776_v53 = vshrl.u32 %v13805_v45, 16  ;;  %v13813_v16 = vpop.f32.mrf.mxu0  ;;  %v5471_v60 = vld [vmem:[#allocation3 + $0x68] sm:$0x1] }
 0x320   : > { %7045 = vmatmul.bf16.gmra.mxu0 %v11380_v56  ;;  %v5765_v43 = vrot.slane %v5763_v17, 4  ;;  %v13815_v7 = vpack.c.b16 %v6615_v37, %v6614_v8  ;;  %v5768_v47 = vrot.slane %v5766_v24, 5  ;;  %v5774_v46 = vrot.slane %v5772_v52, 5  ;;  %v5474_v39 = vld [vmem:[#allocation3 + $0x6c] sm:$0xf] }
 0x321   : > { %v5227_v4 = vrot.slane %v5225_v9, 7  ;;  %v5017_v41 = vadd.f32 %v13670_v38, %v4981_v29  ;;  %v5778_v51 = vrot.slane %v5776_v53, 4  ;;  %v5782_v20 = vshll.u32 %v13808_v22, 16 }
 0x322   : > { %v3819_v31 = vpop.f32.mrf.mxu2  ;;  %v5769_v50 = vor.u32 %v5768_v47, %v5765_v43  ;;  %v10706_v29 = vrot.slane %v6434_v15, 9 }
 0x323   : > { %v5230_v34 = vor.u32 %v5228_v63, %v5227_v4  ;;  %v5232_v32 = vrot.slane %v5227_v4, 4  ;;  %v5049_v55 = vmax.f32 %v5017_v41, 0.0  ;;  %v3874_v48 = vadd.f32 %v3819_v31, %v3559_v62  ;;  %v11381_v31 = vld [vmem:[#allocation3 + $0x24] sm:$0xff] }
 0x324   : > { %v5779_v2 = vor.u32 %v5778_v51, %v5774_v46  ;;  %v5770_v57 = vrot.slane %v5769_v50, 4  ;;  %v5784_v14 = vrot.slane %v5782_v20, 5  ;;  %v13823_v1 = vpop.f32.mrf.mxu3 }
 0x325   : > { %v5231_v11 = vsel %vm11936_vm8, %v5223_v26, %v5230_v34  ;;  %v5472_v19 = vsel %vm11952_vm10, %v5232_v32, %v5471_v60  ;;  %v5081_v21 = vpack.c.bf16 %v5049_v55, %v5049_v55  ;;  %v4556_v27 = vadd.f32 %v13777_v5, %v3874_v48  ;;  %v5546_v34 = vld [vmem:[#allocation3 + $0x60] sm:$0xf] }
 0x326   : > { %5470 = vst [vmem:[#allocation3 + $0x64] sm:$0xf] %v5231_v11  ;;  %v5780_v3 = vrot.slane %v5779_v2, 4  ;;  %v6514_v26 = vrot.slane %v13688_v42, 5  ;;  %v5775_v25 = vsel %vm11786_vm2, %v5770_v57, %v5774_v46  ;;  %v6517_v42 = vrot.slane %v13694_v28, 5  ;;  %v15961_v46 = vld [vmem:[#allocation23_spill] sm:$0xff] }
 0x327   : > { %5473 = vst [vmem:[#allocation3 + $0x68] sm:$0x1] %v5472_v19  ;;  %v5234_v36 = vshrl.u32 %v5081_v21, 16  ;;  %v4982_v6 = vadd.f32 %v13760_v49, %v4556_v27  ;;  %6353 = vmatmul.bf16.gmra.mxu2 %v11340_v35  ;;  %v5237_v61 = vshll.u32 %v5081_v21, 16  ;;  %v13832_v62 = vpop.f32.mrf.mxu0  ;;  %v6009_v49 = vunpack.c.l.b16 %v5775_v25  ;;  %v11406_v2 = vld [vmem:[%s15896_s3 + $0x118] sm:$0xff] }
 0x328   : > { %v5785_v5 = vsel %vm11786_vm2, %v5780_v3, %v5784_v14  ;;  %v6516_v17 = vrot.slane %v6514_v26, 4  ;;  %v6515_v4 = vsel %vm12348_vm13, %v10706_v29, %v6514_v26  ;;  %v5790_v21 = vshll.u32 %v5546_v34, 16  ;;  %7718 = vmatpush.bf16.msrb.mxu1 %v11406_v2 }
 0x329   : > { %v5236_v59 = vrot.slane %v5234_v36, 7  ;;  %v5018_v56 = vadd.f32 %v13670_v38, %v4982_v6  ;;  %v6010_v37 = vunpack.c.l.b16 %v5785_v5  ;;  %v6616_v11 = vunpack.c.l.b16 %v6515_v4  ;;  %v5478_v6 = vld [vmem:[#allocation3 + $0x74] sm:$0x1] }
 0x32a   : > { %v3822_v9 = vpop.f32.mrf.mxu2  ;;  %v6518_v41 = vsel %vm12348_vm13, %v6516_v17, %v6517_v42  ;;  %v5792_v26 = vrot.slane %v5790_v21, 5 }
 0x32b   : > { %v5239_v8 = vor.u32 %v5237_v61, %v5236_v59  ;;  %v5050_v63 = vmax.f32 %v5018_v56, 0.0  ;;  %v3875_v24 = vadd.f32 %v3822_v9, %v13063_v58  ;;  %v5240_v52 = vrot.slane %v5236_v59, 4  ;;  %v15962_v58 = vld [vmem:[#allocation21_spill] sm:$0xff] }
 0x32c   : > { %6736 = vmatmul.bf16.gmra.mxu3 %v13764_v40  ;;  %v6034_v53 = vpack.c.b16 %v6010_v37, %v6009_v49  ;;  %v6617_v47 = vunpack.c.l.b16 %v6518_v41  ;;  %v3561_v51 = vadd.f32 %v15962_v58, %v15961_v46  ;;  %v13846_v40 = vpop.f32.mrf.mxu1  ;;  %v13848_v20 = vpop.f32.mrf.mxu3 }
 0x32d   : > { %v5475_v43 = vsel %vm11944_vm9, %v5239_v8, %v5474_v39  ;;  %v5082_v60 = vpack.c.bf16 %v5050_v63, %v5050_v63  ;;  %v4557_v28 = vadd.f32 %v13803_v33, %v3875_v24  ;;  %v13850_v32 = vld [vmem:[#allocation3 + $0x64] sm:$0xf]  ;;  %v5787_v33 = vshrl.u32 %v5546_v34, 16  ;;  %v11341_v63 = vld [vmem:[#allocation3 + $0x18] sm:$0xff] }
 0x32e   : > { %5476 = vst [vmem:[#allocation3 + $0x6c] sm:$0xf] %v5475_v43  ;;  %6150 = vmatmul.bf16.gmra.mxu1 %v6034_v53  ;;  %v13853_v50 = vld [vmem:[#allocation3 + $0x68] sm:$0x1]  ;;  %v5796_v27 = vshll.u32 %v13850_v32, 16  ;;  %v5800_v35 = vshrl.u32 %v13850_v32, 16  ;;  %v13863_v36 = vpack.c.b16 %v6617_v47, %v6616_v11 }
 0x32f   : > { %v5242_v55 = vshrl.u32 %v5082_v60, 16  ;;  %v4983_v48 = vadd.f32 %v13788_v44, %v4557_v28  ;;  %v5245_v19 = vshll.u32 %v5082_v60, 16  ;;  %v13861_v14 = vpop.f32.mrf.mxu0  ;;  %v5789_v44 = vrot.slane %v5787_v33, 4 }
 0x330   : > { %7050 = vmatmul.bf16.gmra.mxu0 %v11381_v31  ;;  %v5798_v25 = vrot.slane %v5796_v27, 5  ;;  %v5802_v5 = vrot.slane %v5800_v35, 4  ;;  %v5806_v59 = vshll.u32 %v13853_v50, 16  ;;  %v6521_v31 = vrot.slane %v13741_v10, 5  ;;  %v15963_v27 = vld [vmem:[#allocation24_spill] sm:$0xff] }
 0x331   : > { %v5244_v57 = vrot.slane %v5242_v55, 7  ;;  %v5019_v3 = vadd.f32 %v13670_v38, %v4983_v48  ;;  %v5793_v9 = vor.u32 %v5792_v26, %v5789_v44  ;;  %v5481_v48 = vld [vmem:[#allocation3 + $0x78] sm:$0xf]  ;;  %v6524_v10 = vrot.slane %v13753_v54, 5 }
 0x332   : > { %v3824_v15 = vpop.f32.mrf.mxu2  ;;  %v5803_v49 = vor.u32 %v5802_v5, %v5798_v25  ;;  %v5808_v41 = vrot.slane %v5806_v59, 5  ;;  %v6523_v11 = vrot.slane %v6521_v31, 4  ;;  %v15964_v59 = vld [vmem:[#allocation25_spill] sm:$0xff] }
 0x333   : > { %v5247_v61 = vor.u32 %v5245_v19, %v5244_v57  ;;  %v5249_v56 = vrot.slane %v5244_v57, 4  ;;  %v5051_v37 = vmax.f32 %v5019_v3, 0.0  ;;  %v3876_v39 = vadd.f32 %v3824_v15, %v3561_v51 }
 0x334   : > { %v13871_v24 = vpop.f32.mrf.mxu1  ;;  %v5794_v53 = vrot.slane %v5793_v9, 4  ;;  %v5804_v4 = vrot.slane %v5803_v49, 4  ;;  %v13873_v43 = vpop.f32.mrf.mxu3 }
 0x335   : > { %v5248_v29 = vsel %vm11936_vm8, %v5240_v52, %v5247_v61  ;;  %v5479_v17 = vsel %vm11952_vm10, %v5249_v56, %v5478_v6  ;;  %v5083_v42 = vpack.c.bf16 %v5051_v37, %v5051_v37  ;;  %v4558_v8 = vadd.f32 %v13823_v1, %v3876_v39  ;;  %v6435_v52 = vld [vmem:[#allocation3 + $0x48] sm:$0xe]  ;;  %v15965_v61 = vld [vmem:[#allocation22_spill] sm:$0xff]  ;;  %v5548_v37 = vld [vmem:[#allocation3 + $0x6c] sm:$0xf] }
 0x336   : > { %5477 = vst [vmem:[#allocation3 + $0x70] sm:$0xf] %v5248_v29  ;;  %v5799_v1 = vsel %vm11786_vm2, %v5794_v53, %v5798_v25  ;;  %v5809_v47 = vsel %vm11786_vm2, %v5804_v4, %v5808_v41  ;;  %v10707_v2 = vrot.slane %v6435_v52, 9  ;;  %v6525_v6 = vsel %vm12348_vm13, %v6523_v11, %v6524_v10  ;;  %v11382_v25 = vld [vmem:[#allocation3 + $0x30] sm:$0xff] }
 0x337   : > { %5480 = vst [vmem:[#allocation3 + $0x74] sm:$0x1] %v5479_v17  ;;  %v5251_v60 = vshrl.u32 %v5083_v42, 16  ;;  %v4984_v28 = vadd.f32 %v13813_v16, %v4558_v8  ;;  %6358 = vmatmul.bf16.gmra.mxu2 %v11341_v63  ;;  %v5254_v58 = vshll.u32 %v5083_v42, 16  ;;  %v6012_v34 = vunpack.c.l.b16 %v5809_v47  ;;  %v13882_v55 = vpop.f32.mrf.mxu0 }
 0x338   : > { %v6011_v16 = vunpack.c.l.b16 %v5799_v1  ;;  %v6522_v44 = vsel %vm12348_vm13, %v10707_v2, %v6521_v31  ;;  %v6619_v5 = vunpack.c.l.b16 %v6525_v6  ;;  %v3563_v56 = vadd.f32 %v15965_v61, %v15964_v59  ;;  %v5485_v31 = vld [vmem:[#allocation3 + $0x80] sm:$0x1] }
 0x339   : > { %v5253_v46 = vrot.slane %v5251_v60, 7  ;;  %v5020_v51 = vadd.f32 %v13670_v38, %v4984_v28  ;;  %v5811_v17 = vshrl.u32 %v5548_v37, 16  ;;  %v6618_v42 = vunpack.c.l.b16 %v6522_v44 }
 0x33a   : > { %v3827_v33 = vpop.f32.mrf.mxu2  ;;  %v6035_v3 = vpack.c.b16 %v6012_v34, %v6011_v16  ;;  %v5814_v63 = vshll.u32 %v5548_v37, 16 }
 0x33b   : > { %v5256_v19 = vor.u32 %v5254_v58, %v5253_v46  ;;  %v5052_v21 = vmax.f32 %v5020_v51, 0.0  ;;  %v3877_v35 = vadd.f32 %v3827_v33, %v15963_v27  ;;  %v5257_v57 = vrot.slane %v5253_v46, 4 }
 0x33c   : > { %6741 = vmatmul.bf16.gmra.mxu3 %v13790_v0  ;;  %v13896_v0 = vpop.f32.mrf.mxu3  ;;  %v13903_v8 = vpop.f32.mrf.mxu1  ;;  %v5813_v52 = vrot.slane %v5811_v17, 4  ;;  %v5816_v47 = vrot.slane %v5814_v63, 5  ;;  %v6531_v63 = vrot.slane %v13808_v22, 5 }
 0x33d   : > { %v5482_v15 = vsel %vm11944_vm9, %v5256_v19, %v5481_v48  ;;  %v5084_v26 = vpack.c.bf16 %v5052_v21, %v5052_v21  ;;  %v4559_v54 = vadd.f32 %v13848_v20, %v3877_v35  ;;  %v13898_v39 = vld [vmem:[#allocation3 + $0x70] sm:$0xf]  ;;  %v11342_v35 = vld [vmem:[#allocation3 + $0x24] sm:$0xff] }
 0x33e   : > { %5483 = vst [vmem:[#allocation3 + $0x78] sm:$0xf] %v5482_v15  ;;  %6155 = vmatmul.bf16.gmra.mxu1 %v6035_v3  ;;  %v13901_v29 = vld [vmem:[#allocation3 + $0x74] sm:$0x1]  ;;  %v5820_v53 = vshll.u32 %v13898_v39, 16  ;;  %v5824_v4 = vshrl.u32 %v13898_v39, 16  ;;  %v5817_v2 = vor.u32 %v5816_v47, %v5813_v52 }
 0x33f   : > { %v5259_v9 = vshrl.u32 %v5084_v26, 16  ;;  %v4985_v49 = vadd.f32 %v13832_v62, %v4559_v54  ;;  %v5262_v20 = vshll.u32 %v5084_v26, 16  ;;  %v13908_v28 = vpop.f32.mrf.mxu0  ;;  %v13910_v62 = vpack.c.b16 %v6619_v5, %v6618_v42 }
 0x340   : > { %7055 = vmatmul.bf16.gmra.mxu0 %v11382_v25  ;;  %v5822_v46 = vrot.slane %v5820_v53, 5  ;;  %v5826_v58 = vrot.slane %v5824_v4, 4  ;;  %v5830_v51 = vshll.u32 %v13901_v29, 16  ;;  %v5818_v3 = vrot.slane %v5817_v2, 4  ;;  %v6436_v25 = vld [vmem:[#allocation3 + $0x54] sm:$0xe] }
 0x341   : > { %v5261_v41 = vrot.slane %v5259_v9, 7  ;;  %v5021_v60 = vadd.f32 %v13670_v38, %v4985_v49 }
 0x342   : > { %v3829_v1 = vpop.f32.mrf.mxu2  ;;  %v5827_v11 = vor.u32 %v5826_v58, %v5822_v46  ;;  %v5832_v6 = vrot.slane %v5830_v51, 5  ;;  %v11383_v51 = vld [vmem:[#allocation3 + $0x3c] sm:$0xff] }
 0x343   : > { %v5264_v34 = vor.u32 %v5262_v20, %v5261_v41  ;;  %v5266_v48 = vrot.slane %v5261_v41, 4  ;;  %v5053_v33 = vmax.f32 %v5021_v60, 0.0  ;;  %v3878_v16 = vadd.f32 %v3829_v1, %v3563_v56  ;;  %v15966_v41 = vld [vmem:[#allocation7_spill] sm:$0xff] }
 0x344   : > { %v5828_v44 = vrot.slane %v5827_v11, 4  ;;  %v13918_v15 = vpop.f32.mrf.mxu3  ;;  %v10708_v20 = vrot.slane %v6436_v25, 9 }
 0x345   : > { %v5265_v10 = vsel %vm11936_vm8, %v5257_v57, %v5264_v34  ;;  %v5486_v19 = vsel %vm11952_vm10, %v5266_v48, %v5485_v31  ;;  %v5085_v21 = vpack.c.bf16 %v5053_v33, %v5053_v33  ;;  %v4560_v27 = vadd.f32 %v13873_v43, %v3878_v16  ;;  %v15967_v48 = vld [vmem:[#allocation8_spill] sm:$0xff]  ;;  %v15968_v33 = vld [vmem:[#allocation26_spill] sm:$0xff]  ;;  %v5550_v2 = vld [vmem:[#allocation3 + $0x78] sm:$0xf] }
 0x346   : > { %5484 = vst [vmem:[#allocation3 + $0x7c] sm:$0xf] %v5265_v10  ;;  %v6528_v57 = vrot.slane %v13805_v45, 5  ;;  %v5823_v43 = vsel %vm11786_vm2, %v5818_v3, %v5822_v46  ;;  %v5833_v59 = vsel %vm11786_vm2, %v5828_v44, %v5832_v6  ;;  %v3565_v16 = vadd.f32 %v15968_v33, %v15967_v48  ;;  %v6437_v33 = vld [vmem:[#allocation3 + $0x60] sm:$0xe] }
 0x347   : > { %5487 = vst [vmem:[#allocation3 + $0x80] sm:$0x1] %v5486_v19  ;;  %v5268_v26 = vshrl.u32 %v5085_v21, 16  ;;  %v4986_v54 = vadd.f32 %v13861_v14, %v4560_v27  ;;  %6363 = vmatmul.bf16.gmra.mxu2 %v11342_v35  ;;  %v5271_v56 = vshll.u32 %v5085_v21, 16  ;;  %v6014_v9 = vunpack.c.l.b16 %v5833_v59  ;;  %v13929_v49 = vpop.f32.mrf.mxu0  ;;  %v5488_v14 = vld [vmem:[#allocation3 + $0x84] sm:$0xf] }
 0x348   : > { %v13922_v5 = vpop.f32.mrf.mxu1  ;;  %v6013_v42 = vunpack.c.l.b16 %v5823_v43  ;;  %v6530_v45 = vrot.slane %v6528_v57, 4  ;;  %v6529_v1 = vsel %vm12348_vm13, %v10708_v20, %v6528_v57  ;;  %v5835_v27 = vshrl.u32 %v5550_v2, 16 }
 0x349   : > { %v5270_v61 = vrot.slane %v5268_v26, 7  ;;  %v5022_v37 = vadd.f32 %v13670_v38, %v4986_v54  ;;  %v6620_v35 = vunpack.c.l.b16 %v6529_v1  ;;  %v5838_v6 = vshll.u32 %v5550_v2, 16 }
 0x34a   : > { %v3832_v17 = vpop.f32.mrf.mxu2  ;;  %v6036_v31 = vpack.c.b16 %v6014_v9, %v6013_v42  ;;  %v6532_v47 = vsel %vm12348_vm13, %v6530_v45, %v6531_v63  ;;  %v5837_v43 = vrot.slane %v5835_v27, 4 }
 0x34b   : > { %v5273_v53 = vor.u32 %v5271_v56, %v5270_v61  ;;  %v5054_v4 = vmax.f32 %v5022_v37, 0.0  ;;  %v3879_v60 = vadd.f32 %v3832_v17, %v15966_v41  ;;  %v5274_v52 = vrot.slane %v5270_v61, 4  ;;  %v5492_v61 = vld [vmem:[#allocation3 + $0x8c] sm:$0x1] }
 0x34c   : > { %6746 = vmatmul.bf16.gmra.mxu3 %v13815_v7  ;;  %v6621_v34 = vunpack.c.l.b16 %v6532_v47  ;;  %v5840_v37 = vrot.slane %v5838_v6, 5  ;;  %v11343_v47 = vld [vmem:[#allocation3 + $0x30] sm:$0xff] }
 0x34d   : > { %v5489_v46 = vsel %vm11944_vm9, %v5273_v53, %v5488_v14  ;;  %v5086_v58 = vpack.c.bf16 %v5054_v4, %v5054_v4  ;;  %v4561_v22 = vadd.f32 %v13896_v0, %v3879_v60  ;;  %v13945_v11 = vld [vmem:[#allocation3 + $0x7c] sm:$0xf] }
 0x34e   : > { %5490 = vst [vmem:[#allocation3 + $0x84] sm:$0xf] %v5489_v46  ;;  %6160 = vmatmul.bf16.gmra.mxu1 %v6036_v31  ;;  %v13948_v21 = vld [vmem:[#allocation3 + $0x80] sm:$0x1]  ;;  %v11405_v0 = vld [vmem:[%s15896_s3 + $0x110] sm:$0xff]  ;;  %v5844_v26 = vshll.u32 %v13945_v11, 16  ;;  %v13960_v59 = vpack.c.b16 %v6621_v34, %v6620_v35  ;;  %v5841_v53 = vor.u32 %v5840_v37, %v5837_v43 }
 0x34f   : > { %v13943_v7 = vpop.f32.mrf.mxu3  ;;  %v5276_v10 = vshrl.u32 %v5086_v58, 16  ;;  %v4987_v19 = vadd.f32 %v13882_v55, %v4561_v22  ;;  %v5279_v3 = vshll.u32 %v5086_v58, 16  ;;  %v5848_v54 = vshrl.u32 %v13945_v11, 16  ;;  %v13958_v57 = vpop.f32.mrf.mxu0  ;;  %7719 = vmatpush.bf16.msrb.mxu1 %v11405_v0  ;;  %v15969_v43 = vld [vmem:[#allocation27_spill] sm:$0xff] }
 0x350   : > { %v13953_v44 = vpop.f32.mrf.mxu1  ;;  %7060 = vmatmul.bf16.gmra.mxu0 %v11383_v51  ;;  %v5846_v9 = vrot.slane %v5844_v26, 5  ;;  %v5854_v17 = vshll.u32 %v13948_v21, 16  ;;  %v5842_v46 = vrot.slane %v5841_v53, 4  ;;  %v10709_v26 = vrot.slane %v6437_v33, 9 }
 0x351   : > { %v5278_v25 = vrot.slane %v5276_v10, 7  ;;  %v5023_v55 = vadd.f32 %v13670_v38, %v4987_v19  ;;  %v5850_v14 = vrot.slane %v5848_v54, 4  ;;  %v6538_v54 = vrot.slane %v13853_v50, 5 }
 0x352   : > { %v3834_v56 = vpop.f32.mrf.mxu2  ;;  %v5856_v22 = vrot.slane %v5854_v17, 5 }
 0x353   : > { %v5281_v42 = vor.u32 %v5279_v3, %v5278_v25  ;;  %v5283_v20 = vrot.slane %v5278_v25, 4  ;;  %v5055_v45 = vmax.f32 %v5023_v55, 0.0  ;;  %v3880_v63 = vadd.f32 %v3834_v56, %v3565_v16 }
 0x354   : > { %v5851_v4 = vor.u32 %v5850_v14, %v5846_v9 }
 0x355   : > { %v5282_v41 = vsel %vm11936_vm8, %v5274_v52, %v5281_v42  ;;  %v5493_v60 = vsel %vm11952_vm10, %v5283_v20, %v5492_v61  ;;  %v5087_v31 = vpack.c.bf16 %v5055_v45, %v5055_v45  ;;  %v4562_v1 = vadd.f32 %v13918_v15, %v3880_v63  ;;  %v11384_v42 = vld [vmem:[#allocation3 + $0x48] sm:$0xff]  ;;  %v15970_v45 = vld [vmem:[#allocation10_spill] sm:$0xff] }
 0x356   : > { %5491 = vst [vmem:[#allocation3 + $0x88] sm:$0xf] %v5282_v41  ;;  %v5852_v58 = vrot.slane %v5851_v4, 4  ;;  %v6535_v52 = vrot.slane %v13850_v32, 5  ;;  %v5847_v15 = vsel %vm11786_vm2, %v5842_v46, %v5846_v9  ;;  %v15971_v63 = vld [vmem:[#allocation9_spill] sm:$0xff] }
 0x357   : > { %v13968_v51 = vpop.f32.mrf.mxu3  ;;  %5494 = vst [vmem:[#allocation3 + $0x8c] sm:$0x1] %v5493_v60  ;;  %v5285_v34 = vshrl.u32 %v5087_v31, 16  ;;  %v4988_v48 = vadd.f32 %v13908_v28, %v4562_v1  ;;  %6368 = vmatmul.bf16.gmra.mxu2 %v11343_v47  ;;  %v5288_v19 = vshll.u32 %v5087_v31, 16  ;;  %v13979_v35 = vpop.f32.mrf.mxu0  ;;  %v5495_v28 = vld [vmem:[#allocation3 + $0x90] sm:$0xf]  ;;  %v6015_v6 = vunpack.c.l.b16 %v5847_v15 }
 0x358   : > { %v13972_v16 = vpop.f32.mrf.mxu1  ;;  %v5857_v2 = vsel %vm11786_vm2, %v5852_v58, %v5856_v22  ;;  %v6537_v32 = vrot.slane %v6535_v52, 4  ;;  %v3567_v53 = vadd.f32 %v15971_v63, %v15970_v45  ;;  %v5552_v4 = vld [vmem:[#allocation3 + $0x84] sm:$0xf] }
 0x359   : > { %v5287_v10 = vrot.slane %v5285_v34, 7  ;;  %v5024_v27 = vadd.f32 %v13670_v38, %v4988_v48  ;;  %v6016_v0 = vunpack.c.l.b16 %v5857_v2  ;;  %v6536_v38 = vsel %vm12348_vm13, %v10709_v26, %v6535_v52  ;;  %v14007_v52 = vld [vmem:[%s15895_s2] ss:$0 sm:$0xff] }
 0x35a   : > { %v3837_v3 = vpop.f32.mrf.mxu2  ;;  %v6539_v9 = vsel %vm12348_vm13, %v6537_v32, %v6538_v54  ;;  %v5859_v47 = vshrl.u32 %v5552_v4, 16  ;;  %v6622_v46 = vunpack.c.l.b16 %v6536_v38  ;;  %v5862_v22 = vshll.u32 %v5552_v4, 16 }
 0x35b   : > { %v5290_v25 = vor.u32 %v5288_v19, %v5287_v10  ;;  %v5056_v55 = vmax.f32 %v5024_v27, 0.0  ;;  %v3881_v61 = vadd.f32 %v3837_v3, %v15969_v43  ;;  %v5291_v56 = vrot.slane %v5287_v10, 4  ;;  %v5499_v19 = vld [vmem:[#allocation3 + $0x98] sm:$0x1] }
 0x35c   : > { %6751 = vmatmul.bf16.gmra.mxu3 %v13863_v36  ;;  %v6037_v37 = vpack.c.b16 %v6016_v0, %v6015_v6  ;;  %v6623_v20 = vunpack.c.l.b16 %v6539_v9  ;;  %v5861_v2 = vrot.slane %v5859_v47, 4  ;;  %v5864_v0 = vrot.slane %v5862_v22, 5 }
 0x35d   : > { %v5496_v14 = vsel %vm11944_vm9, %v5290_v25, %v5495_v28  ;;  %v5088_v17 = vpack.c.bf16 %v5056_v55, %v5056_v55  ;;  %v4563_v50 = vadd.f32 %v13943_v7, %v3881_v61  ;;  %v13995_v41 = vld [vmem:[#allocation3 + $0x88] sm:$0xf] }
 0x35e   : > { %5497 = vst [vmem:[#allocation3 + $0x90] sm:$0xf] %v5496_v14  ;;  %6165 = vmatmul.bf16.gmra.mxu1 %v6037_v37  ;;  %v13998_v1 = vld [vmem:[#allocation3 + $0x8c] sm:$0x1]  ;;  %v5868_v34 = vshll.u32 %v13995_v41, 16  ;;  %v5872_v48 = vshrl.u32 %v13995_v41, 16  ;;  %v14012_v10 = vpack.c.b16 %v6623_v20, %v6622_v46  ;;  %v5865_v55 = vor.u32 %v5864_v0, %v5861_v2 }
 0x35f   : > { %v13993_v36 = vpop.f32.mrf.mxu3  ;;  %v5293_v60 = vshrl.u32 %v5088_v17, 16  ;;  %v4989_v31 = vadd.f32 %v13929_v49, %v4563_v50  ;;  %v5296_v7 = vshll.u32 %v5088_v17, 16  ;;  %v14010_v15 = vpop.f32.mrf.mxu0  ;;  %v5878_v6 = vshll.u32 %v13998_v1, 16  ;;  %v11344_v14 = vld [vmem:[#allocation3 + $0x3c] sm:$0xff] }
 0x360   : > { %v14000_v58 = vpop.f32.mrf.mxu1  ;;  %7065 = vmatmul.bf16.gmra.mxu0 %v11384_v42  ;;  %v5870_v28 = vrot.slane %v5868_v34, 5  ;;  %v5874_v3 = vrot.slane %v5872_v48, 4  ;;  %v5866_v17 = vrot.slane %v5865_v55, 4 }
 0x361   : > { %v5295_v33 = vrot.slane %v5293_v60, 7  ;;  %v5025_v49 = vadd.f32 %v14007_v52, %v4989_v31  ;;  %v5880_v42 = vrot.slane %v5878_v6, 5 }
 0x362   : > { %v3839_v27 = vpop.f32.mrf.mxu2  ;;  %v5875_v43 = vor.u32 %v5874_v3, %v5870_v28 }
 0x363   : > { %v5298_v26 = vor.u32 %v5296_v7, %v5295_v33  ;;  %v5300_v32 = vrot.slane %v5295_v33, 4  ;;  %v5057_v54 = vmax.f32 %v5025_v49, 0.0  ;;  %v3882_v25 = vadd.f32 %v3839_v27, %v3567_v53  ;;  %v6438_v53 = vld [vmem:[#allocation3 + $0x6c] sm:$0xe]  ;;  %v15972_v27 = vld [vmem:[#allocation28_spill] sm:$0xff] }
 0x364   : > { %v5876_v50 = vrot.slane %v5875_v43, 4  ;;  %v10710_v33 = vrot.slane %v6438_v53, 9  ;;  %v6545_v49 = vrot.slane %v13901_v29, 5  ;;  %v15973_v43 = vld [vmem:[#allocation12_spill] sm:$0xff] }
 0x365   : > { %v5299_v61 = vsel %vm11936_vm8, %v5291_v56, %v5298_v26  ;;  %v5500_v37 = vsel %vm11952_vm10, %v5300_v32, %v5499_v19  ;;  %v5089_v38 = vpack.c.bf16 %v5057_v54, %v5057_v54  ;;  %v4564_v9 = vadd.f32 %v13968_v51, %v3882_v25  ;;  %v11385_v25 = vld [vmem:[#allocation3 + $0x54] sm:$0xff] }
 0x366   : > { %5498 = vst [vmem:[#allocation3 + $0x94] sm:$0xf] %v5299_v61  ;;  %v6542_v56 = vrot.slane %v13898_v39, 5  ;;  %v5871_v51 = vsel %vm11786_vm2, %v5866_v17, %v5870_v28  ;;  %v5881_v60 = vsel %vm11786_vm2, %v5876_v50, %v5880_v42  ;;  %v15974_v61 = vld [vmem:[#allocation11_spill] sm:$0xff] }
 0x367   : > { %v14020_v20 = vpop.f32.mrf.mxu3  ;;  %5501 = vst [vmem:[#allocation3 + $0x98] sm:$0x1] %v5500_v37  ;;  %v5302_v45 = vshrl.u32 %v5089_v38, 16  ;;  %v4990_v63 = vadd.f32 %v13958_v57, %v4564_v9  ;;  %6373 = vmatmul.bf16.gmra.mxu2 %v11344_v14  ;;  %v5305_v47 = vshll.u32 %v5089_v38, 16  ;;  %v6018_v7 = vunpack.c.l.b16 %v5881_v60  ;;  %v14031_v22 = vpop.f32.mrf.mxu0  ;;  %v5502_v57 = vld [vmem:[#allocation3 + $0x9c] sm:$0xf] }
 0x368   : > { %v14024_v4 = vpop.f32.mrf.mxu1  ;;  %v6017_v48 = vunpack.c.l.b16 %v5871_v51  ;;  %v6544_v39 = vrot.slane %v6542_v56, 4  ;;  %v6543_v6 = vsel %vm12348_vm13, %v10710_v33, %v6542_v56  ;;  %v3569_v37 = vadd.f32 %v15974_v61, %v15973_v43  ;;  %v5554_v38 = vld [vmem:[#allocation3 + $0x90] sm:$0xf] }
 0x369   : > { %v5304_v31 = vrot.slane %v5302_v45, 7  ;;  %v5026_v46 = vadd.f32 %v14007_v52, %v4990_v63  ;;  %v5883_v42 = vshrl.u32 %v5554_v38, 16  ;;  %v6624_v45 = vunpack.c.l.b16 %v6543_v6 }
 0x36a   : > { %v3842_v34 = vpop.f32.mrf.mxu2  ;;  %v6038_v3 = vpack.c.b16 %v6018_v7, %v6017_v48  ;;  %v6546_v26 = vsel %vm12348_vm13, %v6544_v39, %v6545_v49  ;;  %v5886_v56 = vshll.u32 %v5554_v38, 16  ;;  %v5506_v7 = vld [vmem:[#allocation3 + $0xa4] sm:$0x1] }
 0x36b   : > { %v5307_v2 = vor.u32 %v5305_v47, %v5304_v31  ;;  %v5058_v19 = vmax.f32 %v5026_v46, 0.0  ;;  %v3883_v0 = vadd.f32 %v3842_v34, %v15972_v27  ;;  %v5308_v28 = vrot.slane %v5304_v31, 4 }
 0x36c   : > { %6756 = vmatmul.bf16.gmra.mxu3 %v13910_v62  ;;  %v6625_v55 = vunpack.c.l.b16 %v6546_v26  ;;  %v5885_v47 = vrot.slane %v5883_v42, 4  ;;  %v5888_v34 = vrot.slane %v5886_v56, 5 }
 0x36d   : > { %v5503_v32 = vsel %vm11944_vm9, %v5307_v2, %v5502_v57  ;;  %v5090_v54 = vpack.c.bf16 %v5058_v19, %v5058_v19  ;;  %v4565_v29 = vadd.f32 %v13993_v36, %v3883_v0  ;;  %v14047_v9 = vld [vmem:[#allocation3 + $0x94] sm:$0xf] }
 0x36e   : > { %5504 = vst [vmem:[#allocation3 + $0x9c] sm:$0xf] %v5503_v32  ;;  %6170 = vmatmul.bf16.gmra.mxu1 %v6038_v3  ;;  %v14050_v50 = vld [vmem:[#allocation3 + $0x98] sm:$0x1]  ;;  %v11404_v36 = vld [vmem:[%s15896_s3 + $0x108] sm:$0xff]  ;;  %v5892_v51 = vshll.u32 %v14047_v9, 16  ;;  %v14060_v46 = vpack.c.b16 %v6625_v55, %v6624_v45  ;;  %v5889_v3 = vor.u32 %v5888_v34, %v5885_v47 }
 0x36f   : > { %v14045_v62 = vpop.f32.mrf.mxu3  ;;  %v5310_v14 = vshrl.u32 %v5090_v54, 16  ;;  %v4991_v17 = vadd.f32 %v13979_v35, %v4565_v29  ;;  %v5313_v63 = vshll.u32 %v5090_v54, 16  ;;  %v5896_v60 = vshrl.u32 %v14047_v9, 16  ;;  %7720 = vmatpush.bf16.msrb.mxu1 %v11404_v36  ;;  %v14063_v0 = vpop.f32.mrf.mxu0  ;;  %v15975_v34 = vld [vmem:[#allocation13_spill] sm:$0xff] }
 0x370   : > { %v14055_v53 = vpop.f32.mrf.mxu1  ;;  %7070 = vmatmul.bf16.gmra.mxu0 %v11385_v25  ;;  %v5894_v48 = vrot.slane %v5892_v51, 5  ;;  %v5902_v39 = vshll.u32 %v14050_v50, 16  ;;  %v11345_v25 = vld [vmem:[#allocation3 + $0x48] sm:$0xff]  ;;  %v5890_v55 = vrot.slane %v5889_v3, 4 }
 0x371   : > { %v5312_v31 = vrot.slane %v5310_v14, 7  ;;  %v5027_v35 = vadd.f32 %v14007_v52, %v4991_v17  ;;  %v5898_v33 = vrot.slane %v5896_v60, 4  ;;  %v6439_v17 = vld [vmem:[#allocation3 + $0x78] sm:$0xe]  ;;  %v5509_v60 = vld [vmem:[#allocation3 + $0xa8] sm:$0xf] }
 0x372   : > { %v3844_v57 = vpop.f32.mrf.mxu2  ;;  %v5904_v61 = vrot.slane %v5902_v39, 5 }
 0x373   : > { %v5315_v49 = vor.u32 %v5313_v63, %v5312_v31  ;;  %v5317_v2 = vrot.slane %v5312_v31, 4  ;;  %v5059_v19 = vmax.f32 %v5027_v35, 0.0  ;;  %v3884_v27 = vadd.f32 %v3844_v57, %v3569_v37 }
 0x374   : > { %v5899_v6 = vor.u32 %v5898_v33, %v5894_v48  ;;  %v10711_v35 = vrot.slane %v6439_v17, 9 }
 0x375   : > { %v5316_v26 = vsel %vm11936_vm8, %v5308_v28, %v5315_v49  ;;  %v5507_v32 = vsel %vm11952_vm10, %v5317_v2, %v5506_v7  ;;  %v5091_v54 = vpack.c.bf16 %v5059_v19, %v5059_v19  ;;  %v4566_v29 = vadd.f32 %v14020_v20, %v3884_v27 }
 0x376   : > { %5505 = vst [vmem:[#allocation3 + $0xa0] sm:$0xf] %v5316_v26  ;;  %v5900_v43 = vrot.slane %v5899_v6, 4  ;;  %v6549_v28 = vrot.slane %v13945_v11, 5  ;;  %v5895_v20 = vsel %vm11786_vm2, %v5890_v55, %v5894_v48  ;;  %v6552_v11 = vrot.slane %v13948_v21, 5  ;;  %v11386_v6 = vld [vmem:[#allocation3 + $0x60] sm:$0xff] }
 0x377   : > { %v14070_v38 = vpop.f32.mrf.mxu3  ;;  %5508 = vst [vmem:[#allocation3 + $0xa4] sm:$0x1] %v5507_v32  ;;  %v5319_v37 = vshrl.u32 %v5091_v54, 16  ;;  %v4992_v14 = vadd.f32 %v14010_v15, %v4566_v29  ;;  %6378 = vmatmul.bf16.gmra.mxu2 %v11345_v25  ;;  %v5322_v63 = vshll.u32 %v5091_v54, 16  ;;  %v6019_v15 = vunpack.c.l.b16 %v5895_v20  ;;  %v15976_v32 = vld [vmem:[#allocation29_spill] sm:$0xff] }
 0x378   : > { %v14074_v42 = vpop.f32.mrf.mxu1  ;;  %v5905_v36 = vsel %vm11786_vm2, %v5900_v43, %v5904_v61  ;;  %v6551_v47 = vrot.slane %v6549_v28, 4  ;;  %v6550_v49 = vsel %vm12348_vm13, %v10711_v35, %v6549_v28  ;;  %v5556_v25 = vld [vmem:[#allocation3 + $0x9c] sm:$0xf] }
 0x379   : > { %v5321_v45 = vrot.slane %v5319_v37, 7  ;;  %v5028_v56 = vadd.f32 %v14007_v52, %v4992_v14  ;;  %v6020_v51 = vunpack.c.l.b16 %v5905_v36  ;;  %v6626_v14 = vunpack.c.l.b16 %v6550_v49 }
 0x37a   : > { %v3847_v31 = vpop.f32.mrf.mxu2  ;;  %v6553_v2 = vsel %vm12348_vm13, %v6551_v47, %v6552_v11  ;;  %v5910_v28 = vshll.u32 %v5556_v25, 16 }
 0x37b   : > { %v5324_v7 = vor.u32 %v5322_v63, %v5321_v45  ;;  %v5060_v57 = vmax.f32 %v5028_v56, 0.0  ;;  %v3885_v33 = vadd.f32 %v3847_v31, %v15975_v34  ;;  %v5325_v48 = vrot.slane %v5321_v45, 4 }
 0x37c   : > { %6761 = vmatmul.bf16.gmra.mxu3 %v13960_v59  ;;  %v6039_v39 = vpack.c.b16 %v6020_v51, %v6019_v15  ;;  %v6627_v26 = vunpack.c.l.b16 %v6553_v2  ;;  %v15977_v59 = vld [vmem:[#allocation14_spill] sm:$0xff]  ;;  %v5912_v15 = vrot.slane %v5910_v28, 5  ;;  %v11403_v28 = vld [vmem:[%s15896_s3 + $0x100] sm:$0xff] }
 0x37d   : > { %v5510_v19 = vsel %vm11944_vm9, %v5324_v7, %v5509_v60  ;;  %v5092_v27 = vpack.c.bf16 %v5060_v57, %v5060_v57  ;;  %v4567_v21 = vadd.f32 %v14045_v62, %v3885_v33  ;;  %v14091_v3 = vpop.f32.mrf.mxu0  ;;  %v3571_v54 = vadd.f32 %v15977_v59, %v15976_v32  ;;  %v14097_v55 = vld [vmem:[#allocation3 + $0xa0] sm:$0xf]  ;;  %7721 = vmatpush.bf16.msrb.mxu1 %v11403_v28 }
 0x37e   : > { %5511 = vst [vmem:[#allocation3 + $0xa8] sm:$0xf] %v5510_v19  ;;  %6175 = vmatmul.bf16.gmra.mxu1 %v6039_v39  ;;  %v14100_v37 = vld [vmem:[#allocation3 + $0xa4] sm:$0x1]  ;;  %v5907_v62 = vshrl.u32 %v5556_v25, 16  ;;  %v5916_v20 = vshll.u32 %v14097_v55, 16  ;;  %v14107_v60 = vpack.c.b16 %v6627_v26, %v6626_v14 }
 0x37f   : > { %v14095_v29 = vpop.f32.mrf.mxu3  ;;  %v5327_v43 = vshrl.u32 %v5092_v27, 16  ;;  %v4993_v61 = vadd.f32 %v14031_v22, %v4567_v21  ;;  %v5330_v17 = vshll.u32 %v5092_v27, 16  ;;  %v5920_v36 = vshrl.u32 %v14097_v55, 16  ;;  %v5513_v22 = vld [vmem:[#allocation3 + $0xb0] sm:$0x1] }
 0x380   : > { %7075 = vmatmul.bf16.gmra.mxu0 %v11386_v6  ;;  %v14105_v56 = vpop.f32.mrf.mxu1  ;;  %v5909_v51 = vrot.slane %v5907_v62, 4  ;;  %v5918_v35 = vrot.slane %v5916_v20, 5  ;;  %v5926_v11 = vshll.u32 %v14100_v37, 16  ;;  %v11346_v6 = vld [vmem:[#allocation3 + $0x54] sm:$0xff] }
 0x381   : > { %v5329_v45 = vrot.slane %v5327_v43, 7  ;;  %v5029_v63 = vadd.f32 %v14007_v52, %v4993_v61  ;;  %v5922_v47 = vrot.slane %v5920_v36, 4 }
 0x382   : > { %v3849_v31 = vpop.f32.mrf.mxu2  ;;  %v5913_v39 = vor.u32 %v5912_v15, %v5909_v51  ;;  %v5928_v25 = vrot.slane %v5926_v11, 5 }
 0x383   : > { %v5332_v7 = vor.u32 %v5330_v17, %v5329_v45  ;;  %v5334_v57 = vrot.slane %v5329_v45, 4  ;;  %v5061_v34 = vmax.f32 %v5029_v63, 0.0  ;;  %v3886_v33 = vadd.f32 %v3849_v31, %v3571_v54 }
 0x384   : > { %v5923_v49 = vor.u32 %v5922_v47, %v5918_v35  ;;  %v5914_v32 = vrot.slane %v5913_v39, 4  ;;  %v15978_v47 = vld [vmem:[#allocation15_spill] sm:$0xff] }
 0x385   : > { %v5333_v2 = vsel %vm11936_vm8, %v5325_v48, %v5332_v7  ;;  %v5514_v19 = vsel %vm11952_vm10, %v5334_v57, %v5513_v22  ;;  %v5093_v27 = vpack.c.bf16 %v5061_v34, %v5061_v34  ;;  %v4568_v21 = vadd.f32 %v14070_v38, %v3886_v33  ;;  %v14115_v26 = vpop.f32.mrf.mxu0  ;;  %v5558_v48 = vld [vmem:[#allocation3 + $0xa8] sm:$0xf] }
 0x386   : > { %5512 = vst [vmem:[#allocation3 + $0xac] sm:$0xf] %v5333_v2  ;;  %v5924_v59 = vrot.slane %v5923_v49, 4  ;;  %v5919_v62 = vsel %vm11786_vm2, %v5914_v32, %v5918_v35  ;;  %v5931_v14 = vshrl.u32 %v5558_v48, 16  ;;  %v5934_v17 = vshll.u32 %v5558_v48, 16 }
 0x387   : > { %v14117_v43 = vpop.f32.mrf.mxu3  ;;  %5515 = vst [vmem:[#allocation3 + $0xb0] sm:$0x1] %v5514_v19  ;;  %v5336_v54 = vshrl.u32 %v5093_v27, 16  ;;  %v4994_v61 = vadd.f32 %v14063_v0, %v4568_v21  ;;  %6383 = vmatmul.bf16.gmra.mxu2 %v11346_v6  ;;  %v5339_v36 = vshll.u32 %v5093_v27, 16  ;;  %v5516_v0 = vld [vmem:[#allocation3 + $0xb4] sm:$0xf]  ;;  %v6021_v22 = vunpack.c.l.b16 %v5919_v62 }
 0x388   : > { %v5929_v38 = vsel %vm11786_vm2, %v5924_v59, %v5928_v25  ;;  %v5933_v57 = vrot.slane %v5931_v14, 4  ;;  %v5936_v34 = vrot.slane %v5934_v17, 5  ;;  %v11387_v27 = vld [vmem:[#allocation3 + $0x6c] sm:$0xff] }
 0x389   : > { %v5338_v20 = vrot.slane %v5336_v54, 7  ;;  %v5030_v45 = vadd.f32 %v14007_v52, %v4994_v61  ;;  %v6022_v63 = vunpack.c.l.b16 %v5929_v38  ;;  %v15979_v54 = vld [vmem:[#allocation16_spill] sm:$0xff] }
 0x38a   : > { %v3852_v51 = vpop.f32.mrf.mxu2  ;;  %v14128_v35 = vpop.f32.mrf.mxu1  ;;  %v3573_v61 = vadd.f32 %v13846_v40, %v15979_v54  ;;  %v5937_v48 = vor.u32 %v5936_v34, %v5933_v57 }
 0x38b   : > { %v5341_v31 = vor.u32 %v5339_v36, %v5338_v20  ;;  %v5062_v15 = vmax.f32 %v5030_v45, 0.0  ;;  %v3887_v11 = vadd.f32 %v3852_v51, %v15978_v47  ;;  %v6040_v7 = vpack.c.b16 %v6022_v63, %v6021_v22  ;;  %v5520_v36 = vld [vmem:[#allocation3 + $0xbc] sm:$0x1] }
 0x38c   : > { %6766 = vmatmul.bf16.gmra.mxu3 %v14012_v10  ;;  %v5938_v47 = vrot.slane %v5937_v48, 4 }
 0x38d   : > { %v5517_v33 = vsel %vm11944_vm9, %v5341_v31, %v5516_v0  ;;  %v5094_v39 = vpack.c.bf16 %v5062_v15, %v5062_v15  ;;  %v4569_v49 = vadd.f32 %v14095_v29, %v3887_v11  ;;  %v14135_v2 = vpop.f32.mrf.mxu0  ;;  %v14137_v19 = vld [vmem:[#allocation3 + $0xac] sm:$0xf]  ;;  %v11418_v29 = vld [vmem:[%s15896_s3 + $0x178] sm:$0xff] }
 0x38e   : > { %5518 = vst [vmem:[#allocation3 + $0xb4] sm:$0xf] %v5517_v33  ;;  %6180 = vmatmul.bf16.gmra.mxu1 %v6040_v7  ;;  %v5940_v10 = vshll.u32 %v14137_v19, 16  ;;  %v14143_v59 = vld [vmem:[#allocation3 + $0xb0] sm:$0x1]  ;;  %v5944_v25 = vshrl.u32 %v14137_v19, 16  ;;  %8140 = vmatpush.bf16.msra.mxu2 %v11418_v29 }
 0x38f   : > { %v14139_v21 = vpop.f32.mrf.mxu3  ;;  %v5344_v6 = vshrl.u32 %v5094_v39, 16  ;;  %v4995_v32 = vadd.f32 %v14091_v3, %v4569_v49  ;;  %v5347_v14 = vshll.u32 %v5094_v39, 16  ;;  %v5342_v3 = vrot.slane %v5338_v20, 4  ;;  %v11442_v15 = vld [vmem:[%s15896_s3 + $0x1b8] sm:$0xff] }
 0x390   : > { %7080 = vmatmul.bf16.gmra.mxu0 %v11387_v27  ;;  %v5942_v62 = vrot.slane %v5940_v10, 5  ;;  %v5946_v28 = vrot.slane %v5944_v25, 4  ;;  %v5950_v63 = vshll.u32 %v14143_v59, 16  ;;  %v11347_v33 = vld [vmem:[#allocation3 + $0x60] sm:$0xff]  ;;  %8455 = vmatpush.bf16.msra.mxu3 %v11442_v15 }
 0x391   : > { %v5346_v38 = vrot.slane %v5344_v6, 7  ;;  %v5031_v17 = vadd.f32 %v14007_v52, %v4995_v32 }
 0x392   : > { %v3854_v45 = vpop.f32.mrf.mxu2  ;;  %v14153_v31 = vpop.f32.mrf.mxu1  ;;  %v5947_v11 = vor.u32 %v5946_v28, %v5942_v62  ;;  %v5952_v10 = vrot.slane %v5950_v63, 5  ;;  %v5943_v54 = vsel %vm11786_vm2, %v5938_v47, %v5942_v62  ;;  %v5523_v28 = vld [vmem:[#allocation3 + $0xc0] sm:$0xf] }
 0x393   : > { %v5349_v0 = vor.u32 %v5347_v14, %v5346_v38  ;;  %v5351_v51 = vrot.slane %v5346_v38, 4  ;;  %v5063_v22 = vmax.f32 %v5031_v17, 0.0  ;;  %v3888_v40 = vadd.f32 %v3854_v45, %v3573_v61 }
 0x394   : > { %v5948_v27 = vrot.slane %v5947_v11, 4 }
 0x395   : > { %v5350_v7 = vsel %vm11936_vm8, %v5342_v3, %v5349_v0  ;;  %v5521_v20 = vsel %vm11952_vm10, %v5351_v51, %v5520_v36  ;;  %v5095_v57 = vpack.c.bf16 %v5063_v22, %v5063_v22  ;;  %v4570_v34 = vadd.f32 %v14117_v43, %v3888_v40  ;;  %v14163_v39 = vpop.f32.mrf.mxu0  ;;  %v5560_v49 = vld [vmem:[#allocation3 + $0xb4] sm:$0xf]  ;;  %v11450_v22 = vld [vmem:[%s15896_s3 + $0x1f8] sm:$0xff] }
 0x396   : > { %15980 = vst [vmem:[#allocation17_spill] sm:$0xff] %v14163_v39  ;;  %v5955_v32 = vshrl.u32 %v5560_v49, 16  ;;  %v5958_v43 = vshll.u32 %v5560_v49, 16  ;;  %v5953_v61 = vsel %vm11786_vm2, %v5948_v27, %v5952_v10  ;;  %v6023_v36 = vunpack.c.l.b16 %v5943_v54  ;;  %9137 = vmatpush.bf16.msra.mxu0 %v11450_v22 }
 0x397   : > { %5519 = vst [vmem:[#allocation3 + $0xb8] sm:$0xf] %v5350_v7  ;;  %v14165_v6 = vpop.f32.mrf.mxu3  ;;  %v5353_v25 = vshrl.u32 %v5095_v57, 16  ;;  %v4996_v29 = vadd.f32 %v14115_v26, %v4570_v34  ;;  %6388 = vmatmul.bf16.gmra.mxu2 %v11347_v33  ;;  %v5356_v38 = vshll.u32 %v5095_v57, 16  ;;  %v6024_v17 = vunpack.c.l.b16 %v5953_v61  ;;  %v11388_v7 = vld [vmem:[#allocation3 + $0x78] sm:$0xff] }
 0x398   : > { %5522 = vst [vmem:[#allocation3 + $0xbc] sm:$0x1] %v5521_v20  ;;  %v5957_v45 = vrot.slane %v5955_v32, 4  ;;  %v5960_v62 = vrot.slane %v5958_v43, 5  ;;  %v5527_v43 = vld [vmem:[#allocation3 + $0xc8] sm:$0x1] }
 0x399   : > { %v5355_v48 = vrot.slane %v5353_v25, 7  ;;  %v5032_v14 = vadd.f32 %v14007_v52, %v4996_v29  ;;  %v6041_v40 = vpack.c.b16 %v6024_v17, %v6023_v36  ;;  %v14197_v29 = vld [vmem:[#allocation3 + $0x10] sm:$0xf] }
 0x39a   : > { %v6349_v3 = vpop.f32.mrf.mxu2  ;;  %v5961_v33 = vor.u32 %v5960_v62, %v5957_v45 }
 0x39b   : > { %v5358_v63 = vor.u32 %v5356_v38, %v5355_v48  ;;  %v5064_v0 = vmax.f32 %v5032_v14, 0.0  ;;  %v14173_v26 = vpop.f32.mrf.mxu1  ;;  %v6350_v51 = vadd.f32 %v6349_v3, %v13871_v24  ;;  %v5359_v54 = vrot.slane %v5355_v48, 4 }
 0x39c   : > { %6771 = vmatmul.bf16.gmra.mxu3 %v14060_v46  ;;  %v5962_v36 = vrot.slane %v5961_v33, 4 }
 0x39d   : > { %v5524_v52 = vsel %vm11944_vm9, %v5358_v63, %v5523_v28  ;;  %v5096_v15 = vpack.c.bf16 %v5064_v0, %v5064_v0  ;;  %v14183_v47 = vadd.f32 %v14139_v21, %v6350_v51  ;;  %v14185_v11 = vpop.f32.mrf.mxu0  ;;  %v11458_v21 = vld [vmem:[%s15896_s3 + $0x238] sm:$0xff]  ;;  %v7211_v0 = vshll.u32 %v14197_v29, 16 }
 0x39e   : > { %15981 = vst [vmem:[#allocation18_spill] sm:$0xff] %v14185_v11  ;;  %v14187_v20 = vld [vmem:[#allocation3 + $0xb8] sm:$0xf]  ;;  %6185 = vmatmul.bf16.gmra.mxu1 %v6041_v40  ;;  %v7215_v51 = vshrl.u32 %v14197_v29, 16  ;;  %v11348_v40 = vld [vmem:[#allocation3 + $0x6c] sm:$0xff] }
 0x39f   : > { %5525 = vst [vmem:[#allocation3 + $0xc0] sm:$0xf] %v5524_v52  ;;  %v6732_v24 = vpop.f32.mrf.mxu3  ;;  %v14189_v46 = vld [vmem:[#allocation3 + $0xbc] sm:$0x1]  ;;  %v5964_v57 = vshll.u32 %v14187_v20, 16  ;;  %v5968_v18 = vshrl.u32 %v14187_v20, 16  ;;  %9563 = vmatpush.bf16.msra.mxu1 %v11458_v21 }
 0x3a0   : > { %v5361_v34 = vshrl.u32 %v5096_v15, 16  ;;  %7085 = vmatmul.bf16.gmra.mxu0 %v11388_v7  ;;  %v5974_v10 = vshll.u32 %v14189_v46, 16  ;;  %v5364_v25 = vshll.u32 %v5096_v15, 16  ;;  %v7217_v33 = vrot.slane %v7215_v51, 4 }
 0x3a1   : > { %v5966_v49 = vrot.slane %v5964_v57, 5  ;;  %v5970_v27 = vrot.slane %v5968_v18, 4  ;;  %v7153_v57 = vld [vmem:[#allocation3 + $0xc] sm:$0xf] }
 0x3a2   : > { %v5363_v32 = vrot.slane %v5361_v34, 7  ;;  %v6351_v61 = vpop.f32.mrf.mxu2  ;;  %v5976_v63 = vrot.slane %v5974_v10, 5  ;;  %v7202_v18 = vshrl.u32 %v7153_v57, 16  ;;  %v7205_v34 = vshll.u32 %v7153_v57, 16 }
 0x3a3   : > { %v5971_v38 = vor.u32 %v5970_v27, %v5966_v49  ;;  %v14199_v28 = vpop.f32.mrf.mxu1  ;;  %v6352_v3 = vadd.f32 %v6351_v61, %v13903_v8  ;;  %v5967_v8 = vsel %vm11786_vm2, %v5962_v36, %v5966_v49  ;;  %v6556_v10 = vrot.slane %v13995_v41, 5  ;;  %v11417_v41 = vld [vmem:[%s15896_s3 + $0x170] sm:$0xff] }
 0x3a4   : > { %v5366_v14 = vor.u32 %v5364_v25, %v5363_v32  ;;  %v5368_v17 = vrot.slane %v5363_v32, 4  ;;  %v6025_v23 = vunpack.c.l.b16 %v5967_v8  ;;  %v14222_v25 = vld [vmem:[#allocation3 + $0x14] sm:$0x1]  ;;  %v7204_v61 = vrot.slane %v7202_v18, 4  ;;  %8141 = vmatpush.bf16.msra.mxu2 %v11417_v41 }
 0x3a5   : > { %v5972_v45 = vrot.slane %v5971_v38, 4  ;;  %v14209_v22 = vadd.f32 %v14165_v6, %v6352_v3  ;;  %v14211_v52 = vpop.f32.mrf.mxu0  ;;  %v7213_v6 = vrot.slane %v7211_v0, 5  ;;  %v7207_v38 = vrot.slane %v7205_v34, 5  ;;  %v11441_v34 = vld [vmem:[%s15896_s3 + $0x1b0] sm:$0xff] }
 0x3a6   : > { %v5367_v62 = vsel %vm11936_vm8, %v5359_v54, %v5366_v14  ;;  %v5528_v48 = vsel %vm11952_vm10, %v5368_v17, %v5527_v43  ;;  %15983 = vst [vmem:[#allocation20_spill] sm:$0xff] %v14211_v52  ;;  %v11389_v17 = vld [vmem:[#allocation3 + $0x84] sm:$0xff]  ;;  %v6558_v36 = vrot.slane %v6556_v10, 4  ;;  %8456 = vmatpush.bf16.msra.mxu3 %v11441_v34  ;;  %v6573_v52 = vrot.slane %v14100_v37, 5 }
 0x3a7   : > { %15982 = vst [vmem:[#allocation19_spill] sm:$0xff] %v14209_v22  ;;  %v5977_v15 = vsel %vm11786_vm2, %v5972_v45, %v5976_v63  ;;  %v6734_v7 = vpop.f32.mrf.mxu3  ;;  %6393 = vmatmul.bf16.gmra.mxu2 %v11348_v40  ;;  %v7218_v14 = vor.u32 %v7217_v33, %v7213_v6  ;;  %v14232_v45 = vld [vmem:[#allocation3 + $0x1c] sm:$0xf]  ;;  %v7156_v63 = vld [vmem:[#allocation3 + $0x18] sm:$0xf]  ;;  %v7208_v0 = vor.u32 %v7207_v38, %v7204_v61 }
 0x3a8   : > { %5526 = vst [vmem:[#allocation3 + $0xc4] sm:$0xf] %v5367_v62  ;;  %v6026_v12 = vunpack.c.l.b16 %v5977_v15  ;;  %v7235_v8 = vshll.u32 %v14232_v45, 16  ;;  %v7239_v15 = vshrl.u32 %v14232_v45, 16  ;;  %v7226_v18 = vshrl.u32 %v7156_v63, 16 }
 0x3a9   : > { %5529 = vst [vmem:[#allocation3 + $0xc8] sm:$0x1] %v5528_v48  ;;  %v7219_v51 = vrot.slane %v7218_v14, 4  ;;  %v7209_v61 = vrot.slane %v7208_v0, 4 }
 0x3aa   : > { %v6354_v21 = vpop.f32.mrf.mxu2  ;;  %v6042_v27 = vpack.c.b16 %v6026_v12, %v6025_v23 }
 0x3ab   : > { %v14218_v32 = vpop.f32.mrf.mxu1  ;;  %v6355_v49 = vadd.f32 %v6354_v21, %v13922_v5  ;;  %v7221_v5 = vshll.u32 %v14222_v25, 16  ;;  %v7214_v41 = vsel %vm11786_vm2, %v7209_v61, %v7213_v6  ;;  %v11449_v6 = vld [vmem:[%s15896_s3 + $0x1f0] sm:$0xff] }
 0x3ac   : > { %6776 = vmatmul.bf16.gmra.mxu3 %v14107_v60  ;;  %v6440_v60 = vld [vmem:[#allocation3 + $0x84] sm:$0xe]  ;;  %9138 = vmatpush.bf16.msra.mxu0 %v11449_v6 }
 0x3ad   : > { %v14224_v54 = vadd.f32 %v6732_v24, %v6355_v49  ;;  %v14226_v43 = vpop.f32.mrf.mxu0  ;;  %v6559_v24 = vrot.slane %v13998_v1, 5  ;;  %v10712_v48 = vrot.slane %v6440_v60, 9  ;;  %v7223_v23 = vrot.slane %v7221_v5, 5 }
 0x3ae   : > { %15985 = vst [vmem:[#allocation21_spill] sm:$0xff] %v14226_v43  ;;  %6190 = vmatmul.bf16.gmra.mxu1 %v6042_v27  ;;  %v7229_v1 = vshll.u32 %v7156_v63, 16  ;;  %v11349_v27 = vld [vmem:[#allocation3 + $0x78] sm:$0xff]  ;;  %v14255_v63 = vld [vmem:[#allocation3 + $0x20] sm:$0x1] }
 0x3af   : > { %15984 = vst [vmem:[#allocation23_spill] sm:$0xff] %v14224_v54  ;;  %v6737_v3 = vpop.f32.mrf.mxu3  ;;  %v6560_v40 = vsel %vm12348_vm13, %v6558_v36, %v6559_v24  ;;  %v6557_v33 = vsel %vm12348_vm13, %v10712_v48, %v6556_v10  ;;  %v7224_v38 = vsel %vm11786_vm2, %v7219_v51, %v7223_v23  ;;  %v7241_v36 = vrot.slane %v7239_v15, 4 }
 0x3b0   : > { %7090 = vmatmul.bf16.gmra.mxu0 %v11389_v17  ;;  %v7237_v17 = vrot.slane %v7235_v8, 5  ;;  %v6628_v5 = vunpack.c.l.b16 %v6557_v33  ;;  %v7228_v10 = vrot.slane %v7226_v18, 4  ;;  %v7603_v60 = vunpack.c.l.b16 %v7224_v38 }
 0x3b1   : > { %v6563_v51 = vrot.slane %v14047_v9, 5  ;;  %v7245_v18 = vshll.u32 %v14255_v63, 16  ;;  %v11390_v9 = vld [vmem:[#allocation3 + $0x90] sm:$0xff] }
 0x3b2   : > { %v6356_v62 = vpop.f32.mrf.mxu2  ;;  %v7242_v48 = vor.u32 %v7241_v36, %v7237_v17 }
 0x3b3   : > { %v14239_v57 = vpop.f32.mrf.mxu1  ;;  %v6357_v12 = vadd.f32 %v6356_v62, %v13953_v44  ;;  %v6629_v44 = vunpack.c.l.b16 %v6560_v40  ;;  %v7602_v62 = vunpack.c.l.b16 %v7214_v41  ;;  %v6565_v61 = vrot.slane %v6563_v51, 4  ;;  %v6441_v41 = vld [vmem:[#allocation3 + $0x90] sm:$0xe] }
 0x3b5   : > { %v14247_v21 = vadd.f32 %v6734_v7, %v6357_v12  ;;  %v14249_v49 = vpop.f32.mrf.mxu0  ;;  %v7231_v7 = vrot.slane %v7229_v1, 5  ;;  %v6649_v24 = vpack.c.b16 %v6629_v44, %v6628_v5  ;;  %v7159_v12 = vld [vmem:[#allocation3 + $0x24] sm:$0xf]  ;;  %v7634_v23 = vpack.c.b16 %v7603_v60, %v7602_v62  ;;  %v14265_v1 = vld [vmem:[#allocation3 + $0x28] sm:$0xf]  ;;  %v11457_v44 = vld [vmem:[%s15896_s3 + $0x230] sm:$0xff] }
 0x3b6   : > { %15987 = vst [vmem:[#allocation25_spill] sm:$0xff] %v14249_v49  ;;  %v7250_v38 = vshrl.u32 %v7159_v12, 16  ;;  %v7253_v5 = vshll.u32 %v7159_v12, 16  ;;  %v6566_v60 = vrot.slane %v14050_v50, 5  ;;  %9564 = vmatpush.bf16.msra.mxu1 %v11457_v44 }
 0x3b7   : > { %15986 = vst [vmem:[#allocation24_spill] sm:$0xff] %v14247_v21  ;;  %v6739_v14 = vpop.f32.mrf.mxu3  ;;  %6398 = vmatmul.bf16.gmra.mxu2 %v11349_v27  ;;  %v7232_v15 = vor.u32 %v7231_v7, %v7228_v10  ;;  %v7243_v27 = vrot.slane %v7242_v48, 4  ;;  %v7263_v10 = vshrl.u32 %v14265_v1, 16  ;;  %v7247_v7 = vrot.slane %v7245_v18, 5 }
 0x3b8   : > { %v10713_v48 = vrot.slane %v6441_v41, 9 }
 0x3b9   : > { %v7233_v36 = vrot.slane %v7232_v15, 4  ;;  %v7248_v62 = vsel %vm11786_vm2, %v7243_v27, %v7247_v7  ;;  %v7252_v15 = vrot.slane %v7250_v38, 4  ;;  %v7265_v50 = vrot.slane %v7263_v10, 4  ;;  %v11350_v27 = vld [vmem:[#allocation3 + $0x84] sm:$0xff] }
 0x3ba   : > { %v6359_v0 = vpop.f32.mrf.mxu2 }
 0x3bb   : > { %v14258_v40 = vpop.f32.mrf.mxu1  ;;  %v6360_v8 = vadd.f32 %v6359_v0, %v13972_v16 }
 0x3bc   : > { %6781 = vmatmul.bf16.gmra.mxu3 %v6649_v24  ;;  %v7238_v24 = vsel %vm11786_vm2, %v7233_v36, %v7237_v17  ;;  %v6564_v17 = vsel %vm12348_vm13, %v10713_v48, %v6563_v51 }
 0x3bd   : > { %v14267_v34 = vadd.f32 %v6737_v3, %v6360_v8  ;;  %v14269_v33 = vpop.f32.mrf.mxu0  ;;  %v7259_v3 = vshll.u32 %v14265_v1, 16  ;;  %v6567_v8 = vsel %vm12348_vm13, %v6565_v61, %v6566_v60  ;;  %v7605_v61 = vunpack.c.l.b16 %v7248_v62 }
 0x3be   : > { %15989 = vst [vmem:[#allocation7_spill] sm:$0xff] %v14269_v33  ;;  %7722 = vmatmul.bf16.vlgmr.msrb.gmra.mxu1 %v7634_v23  ;;  %v7255_v23 = vrot.slane %v7253_v5, 5  ;;  %v6631_v38 = vunpack.c.l.b16 %v6567_v8  ;;  %v7604_v41 = vunpack.c.l.b16 %v7238_v24  ;;  %v14300_v5 = vld [vmem:[#allocation3 + $0x1c] sm:$0xf]  ;;  %v6570_v33 = vrot.slane %v14097_v55, 5 }
 0x3bf   : > { %15988 = vst [vmem:[#allocation22_spill] sm:$0xff] %v14267_v34  ;;  %v14271_v16 = vpop.f32.mrf.mxu3  ;;  %v14288_v18 = vrot.slane %v7259_v3, 5  ;;  %v6630_v3 = vunpack.c.l.b16 %v6564_v17  ;;  %v9324_v17 = vrot.slane %v14300_v5, 5 }
 0x3c0   : > { %7095 = vmatmul.bf16.gmra.mxu0 %v11390_v9  ;;  %v14292_v9 = vld [vmem:[#allocation3 + $0x2c] sm:$0x1]  ;;  %v7256_v10 = vor.u32 %v7255_v23, %v7252_v15  ;;  %v7635_v48 = vpack.c.b16 %v7605_v61, %v7604_v41 }
 0x3c1   : > { %v7266_v51 = vor.u32 %v7265_v50, %v14288_v18  ;;  %v7269_v60 = vshll.u32 %v14292_v9, 16 }
 0x3c2   : > { %v6361_v0 = vpop.f32.mrf.mxu2  ;;  %v7257_v50 = vrot.slane %v7256_v10, 4 }
 0x3c3   : > { %v14285_v6 = vpop.f32.mrf.mxu1  ;;  %v6362_v12 = vadd.f32 %v6361_v0, %v14000_v58  ;;  %v7162_v58 = vld [vmem:[#allocation3 + $0x30] sm:$0xf]  ;;  %v7271_v61 = vrot.slane %v7269_v60, 5  ;;  %v14325_v60 = vld [vmem:[#allocation3 + $0x28] sm:$0xf] }
 0x3c4   : > { %v7838_v0 = vld [vmem:[#allocation3 + $0x30] sm:$0xe]  ;;  %v7274_v62 = vshrl.u32 %v7162_v58, 16  ;;  %v7277_v24 = vshll.u32 %v7162_v58, 16  ;;  %v9331_v21 = vrot.slane %v14325_v60, 5 }
 0x3c5   : > { %v14294_v44 = vadd.f32 %v6739_v14, %v6362_v12  ;;  %v14296_v36 = vpop.f32.mrf.mxu0  ;;  %v7163_v14 = vld [vmem:[#allocation3 + $0x34] sm:$0xf]  ;;  %v6650_v12 = vpack.c.b16 %v6631_v38, %v6630_v3  ;;  %v10928_v49 = vrot.slane %v7838_v0, 9  ;;  %v14311_v38 = vld [vmem:[#allocation3 + $0x20] sm:$0x1] }
 0x3c6   : > { %15991 = vst [vmem:[#allocation26_spill] sm:$0xff] %v14296_v36  ;;  %v14304_v36 = vld [vmem:[#allocation3 + $0x38] sm:$0x1]  ;;  %v7283_v41 = vshll.u32 %v7163_v14, 16  ;;  %v9258_v0 = vld [vmem:[#allocation3 + $0x18] sm:$0xe] }
 0x3c7   : > { %15990 = vst [vmem:[#allocation8_spill] sm:$0xff] %v14294_v44  ;;  %v14298_v7 = vpop.f32.mrf.mxu3  ;;  %6403 = vmatmul.bf16.gmra.mxu2 %v11350_v27  ;;  %v7922_v44 = vrot.slane %v7163_v14, 5  ;;  %v7267_v27 = vrot.slane %v7266_v51, 4  ;;  %v7925_v55 = vrot.slane %v14304_v36, 5  ;;  %v14323_v10 = vrot.slane %v7277_v24, 5 }
 0x3c8   : > { %v7287_v51 = vshrl.u32 %v7163_v14, 16  ;;  %v9326_v14 = vrot.slane %v9324_v17, 4 }
 0x3c9   : > { %v7923_v58 = vsel %vm12348_vm13, %v10928_v49, %v7922_v44  ;;  %v7924_v3 = vrot.slane %v7922_v44, 4  ;;  %v7262_v49 = vsel %vm11786_vm2, %v7257_v50, %v14288_v18  ;;  %v6442_v44 = vld [vmem:[#allocation3 + $0x9c] sm:$0xe]  ;;  %v14340_v18 = vrot.slane %v7283_v41, 5 }
 0x3ca   : > { %v6364_v8 = vpop.f32.mrf.mxu2  ;;  %v9327_v50 = vrot.slane %v14311_v38, 5  ;;  %v10714_v11 = vrot.slane %v6442_v44, 9  ;;  %v7289_v54 = vrot.slane %v7287_v51, 4  ;;  %v11440_v44 = vld [vmem:[%s15896_s3 + $0x1a8] sm:$0xff] }
 0x3cb   : > { %v14308_v15 = vpop.f32.mrf.mxu1  ;;  %v6365_v23 = vadd.f32 %v6364_v8, %v14024_v4  ;;  %v14321_v4 = vrot.slane %v7274_v62, 4  ;;  %v11416_v62 = vld [vmem:[%s15896_s3 + $0x168] sm:$0xff]  ;;  %v7926_v24 = vsel %vm12348_vm13, %v7924_v3, %v7925_v55  ;;  %v14344_v3 = vld [vmem:[#allocation3 + $0x2c] sm:$0x1]  ;;  %8457 = vmatpush.bf16.msra.mxu3 %v11440_v44 }
 0x3cc   : > { %6786 = vmatmul.bf16.gmra.mxu3 %v6650_v12  ;;  %v11391_v12 = vld [vmem:[#allocation3 + $0x9c] sm:$0xff]  ;;  %8142 = vmatpush.bf16.msra.mxu2 %v11416_v62  ;;  %v9328_v51 = vsel %vm12348_vm13, %v9326_v14, %v9327_v50 }
 0x3cd   : > { %v14317_v43 = vadd.f32 %v14271_v16, %v6365_v23  ;;  %v14319_v34 = vpop.f32.mrf.mxu0  ;;  %v6572_v16 = vrot.slane %v6570_v33, 4  ;;  %v8034_v23 = vunpack.c.l.b16 %v7923_v58  ;;  %v7280_v41 = vor.u32 %v14323_v10, %v14321_v4 }
 0x3ce   : > { %15993 = vst [vmem:[#allocation10_spill] sm:$0xff] %v14319_v34  ;;  %7727 = vmatmul.bf16.gmra.mxu1 %v7635_v48  ;;  %v7272_v48 = vsel %vm11786_vm2, %v7267_v27, %v7271_v61  ;;  %v8035_v34 = vunpack.c.l.b16 %v7926_v24  ;;  %v9259_v61 = vld [vmem:[#allocation3 + $0x24] sm:$0xe]  ;;  %v9333_v10 = vrot.slane %v9331_v21, 4  ;;  %v9334_v24 = vrot.slane %v14344_v3, 5 }
 0x3cf   : > { %15992 = vst [vmem:[#allocation27_spill] sm:$0xff] %v14317_v43  ;;  %v14327_v8 = vpop.f32.mrf.mxu3  ;;  %v11149_v43 = vrot.slane %v9258_v0, 9  ;;  %v14350_v0 = vunpack.c.l.b16 %v7272_v48  ;;  %v6574_v37 = vsel %vm12348_vm13, %v6572_v16, %v6573_v52  ;;  %v9452_v52 = vunpack.c.l.b16 %v9328_v51  ;;  %v7165_v16 = vld [vmem:[#allocation3 + $0x3c] sm:$0xf] }
 0x3d0   : > { %7100 = vmatmul.bf16.gmra.mxu0 %v11391_v12  ;;  %v14346_v55 = vpack.c.b16 %v8035_v34, %v8034_v23  ;;  %v11150_v4 = vrot.slane %v9259_v61, 9  ;;  %v6633_v48 = vunpack.c.l.b16 %v6574_v37  ;;  %v14374_v23 = vld [vmem:[#allocation3 + $0x40] sm:$0xf]  ;;  %v9335_v61 = vsel %vm12348_vm13, %v9333_v10, %v9334_v24 }
 0x3d1   : > { %v9325_v27 = vsel %vm12348_vm13, %v11149_v43, %v9324_v17  ;;  %v6571_v43 = vsel %vm12348_vm13, %v10714_v11, %v6570_v33  ;;  %v7293_v17 = vshll.u32 %v14304_v36, 16  ;;  %v7290_v11 = vor.u32 %v7289_v54, %v14340_v18  ;;  %v14384_v54 = vld [vmem:[#allocation3 + $0x34] sm:$0xf] }
 0x3d2   : > { %15994 = vst [vmem:[#allocation9_spill] sm:$0xff] %v14346_v55  ;;  %v6366_v58 = vpop.f32.mrf.mxu2  ;;  %v9451_v62 = vunpack.c.l.b16 %v9325_v27  ;;  %v7606_v33 = vunpack.c.l.b16 %v7262_v49  ;;  %v9332_v27 = vsel %vm12348_vm13, %v11150_v4, %v9331_v21  ;;  %v7298_v37 = vshrl.u32 %v7165_v16, 16  ;;  %v7839_v49 = vld [vmem:[#allocation3 + $0x3c] sm:$0xe]  ;;  %v14389_v21 = vld [vmem:[#allocation3 + $0x44] sm:$0x1] }
 0x3d3   : > { %v14358_v12 = vpop.f32.mrf.mxu1  ;;  %v6367_v34 = vadd.f32 %v6366_v58, %v14055_v53  ;;  %v11351_v53 = vld [vmem:[#allocation3 + $0x90] sm:$0xff]  ;;  %v6632_v58 = vunpack.c.l.b16 %v6571_v43  ;;  %v9454_v51 = vunpack.c.l.b16 %v9335_v61  ;;  %v14387_v44 = vrot.slane %v7280_v41, 4 }
 0x3d4   : > { %v14376_v50 = vpack.c.b16 %v9452_v52, %v9451_v62  ;;  %v7295_v52 = vrot.slane %v7293_v17, 5  ;;  %v7301_v4 = vshll.u32 %v7165_v16, 16  ;;  %v9453_v10 = vunpack.c.l.b16 %v9332_v27  ;;  %v11448_v41 = vld [vmem:[%s15896_s3 + $0x1e8] sm:$0xff] }
 0x3d5   : > { %v14369_v14 = vadd.f32 %v14298_v7, %v6367_v34  ;;  %v14382_v7 = vpop.f32.mrf.mxu0  ;;  %v7636_v34 = vpack.c.b16 %v14350_v0, %v7606_v33  ;;  %v6651_v62 = vpack.c.b16 %v6633_v48, %v6632_v58  ;;  %v10929_v43 = vrot.slane %v7839_v49, 9  ;;  %v14403_v48 = vld [vmem:[#allocation3 + $0x38] sm:$0x1]  ;;  %9139 = vmatpush.bf16.msra.mxu0 %v11448_v41 }
 0x3d6   : > { %15996 = vst [vmem:[#allocation12_spill] sm:$0xff] %v14376_v50  ;;  %v7291_v50 = vrot.slane %v7290_v11, 4  ;;  %v9338_v61 = vrot.slane %v14384_v54, 5  ;;  %v14400_v17 = vrot.slane %v7298_v37, 4  ;;  %v7307_v16 = vshll.u32 %v14374_v23, 16 }
 0x3d7   : > { %15995 = vst [vmem:[#allocation28_spill] sm:$0xff] %v14369_v14  ;;  %v14372_v36 = vpop.f32.mrf.mxu3  ;;  %6408 = vmatmul.bf16.gmra.mxu2 %v11351_v53  ;;  %v15899_v53 = vrot.slane %v14137_v19, 5  ;;  %v9260_v14 = vld [vmem:[#allocation3 + $0x30] sm:$0xe]  ;;  %v14405_v11 = vpack.c.b16 %v9454_v51, %v9453_v10  ;;  %v7311_v33 = vshrl.u32 %v14374_v23, 16  ;;  %v11392_v10 = vld [vmem:[#allocation3 + $0xa8] sm:$0xff] }
 0x3d8   : > { %15997 = vst [vmem:[#allocation11_spill] sm:$0xff] %v14382_v7  ;;  %v7929_v7 = vrot.slane %v14374_v23, 5  ;;  %v7296_v37 = vsel %vm11786_vm2, %v7291_v50, %v7295_v52  ;;  %v11151_v51 = vrot.slane %v9260_v14, 9  ;;  %v9340_v50 = vrot.slane %v9338_v61, 4 }
 0x3d9   : > { %15998 = vst [vmem:[#allocation13_spill] sm:$0xff] %v14405_v11  ;;  %v9341_v52 = vrot.slane %v14403_v48, 5  ;;  %v7286_v14 = vsel %vm11786_vm2, %v14387_v44, %v14340_v18  ;;  %v6580_v11 = vrot.slane %v14143_v59, 5  ;;  %v14443_v44 = vrot.slane %v7307_v16, 5  ;;  %v11447_v16 = vld [vmem:[%s15896_s3 + $0x1e0] sm:$0xff] }
 0x3da   : > { %v6369_v24 = vpop.f32.mrf.mxu2  ;;  %v7930_v27 = vsel %vm12348_vm13, %v10929_v43, %v7929_v7  ;;  %v7931_v58 = vrot.slane %v7929_v7, 4  ;;  %v6579_v7 = vrot.slane %v15899_v53, 4  ;;  %v9339_v41 = vsel %vm12348_vm13, %v11151_v51, %v9338_v61  ;;  %v14445_v61 = vld [vmem:[#allocation3 + $0x44] sm:$0x1]  ;;  %v9261_v51 = vld [vmem:[#allocation3 + $0x3c] sm:$0xe]  ;;  %9140 = vmatpush.bf16.msra.mxu0 %v11447_v16 }
 0x3db   : > { %v14394_v55 = vpop.f32.mrf.mxu1  ;;  %v6370_v0 = vadd.f32 %v6369_v24, %v14074_v42  ;;  %v7932_v42 = vrot.slane %v14389_v21, 5  ;;  %v14416_v24 = vld [vmem:[#allocation3 + $0x40] sm:$0xf]  ;;  %v14434_v53 = vunpack.c.l.b16 %v7296_v37 }
 0x3dc   : > { %6791 = vmatmul.bf16.gmra.mxu3 %v6651_v62  ;;  %v7303_v62 = vrot.slane %v7301_v4, 5  ;;  %v8036_v4 = vunpack.c.l.b16 %v7930_v27  ;;  %v7313_v27 = vrot.slane %v7311_v33, 4 }
 0x3dd   : > { %v14412_v49 = vadd.f32 %v14327_v8, %v6370_v0  ;;  %v11456_v8 = vld [vmem:[%s15896_s3 + $0x228] sm:$0xff]  ;;  %v7933_v43 = vsel %vm12348_vm13, %v7931_v58, %v7932_v42  ;;  %v7168_v58 = vld [vmem:[#allocation3 + $0x48] sm:$0xf]  ;;  %v9342_v42 = vsel %vm12348_vm13, %v9340_v50, %v9341_v52  ;;  %v14440_v39 = vpop.f32.mrf.mxu0 }
 0x3de   : > { %7732 = vmatmul.bf16.gmra.mxu1 %v7636_v34  ;;  %v6443_v34 = vld [vmem:[#allocation3 + $0xa8] sm:$0xe]  ;;  %v8037_v0 = vunpack.c.l.b16 %v7933_v43  ;;  %16000 = vst [vmem:[#allocation14_spill] sm:$0xff] %v14440_v39  ;;  %v7304_v18 = vor.u32 %v7303_v62, %v14400_v17  ;;  %v9455_v43 = vunpack.c.l.b16 %v9339_v41  ;;  %v9456_v50 = vunpack.c.l.b16 %v9342_v42  ;;  %v11352_v42 = vld [vmem:[#allocation3 + $0x9c] sm:$0xff] }
 0x3df   : > { %15999 = vst [vmem:[#allocation29_spill] sm:$0xff] %v14412_v49  ;;  %v14418_v23 = vpop.f32.mrf.mxu3  ;;  %9565 = vmatpush.bf16.msra.mxu1 %v11456_v8  ;;  %v9345_v49 = vrot.slane %v14416_v24, 5  ;;  %v6581_v8 = vsel %vm12348_vm13, %v6579_v7, %v6580_v11  ;;  %v11439_v17 = vld [vmem:[%s15896_s3 + $0x1a0] sm:$0xff]  ;;  %v7322_v33 = vshrl.u32 %v7168_v58, 16  ;;  %v7325_v62 = vshll.u32 %v7168_v58, 16 }
 0x3e0   : > { %7105 = vmatmul.bf16.gmra.mxu0 %v11392_v10  ;;  %v14447_v37 = vpack.c.b16 %v8037_v0, %v8036_v4  ;;  %v10715_v10 = vrot.slane %v6443_v34, 9  ;;  %v16003_v4 = vrot.slane %v14137_v19, 5  ;;  %v14464_v7 = vpack.c.b16 %v9456_v50, %v9455_v43  ;;  %8458 = vmatpush.bf16.msra.mxu3 %v11439_v17  ;;  %v11415_v19 = vld [vmem:[%s15896_s3 + $0x160] sm:$0xff] }
 0x3e1   : > { %v9347_v34 = vrot.slane %v9345_v49, 4  ;;  %v11152_v0 = vrot.slane %v9261_v51, 9  ;;  %v7169_v58 = vld [vmem:[#allocation3 + $0x4c] sm:$0xf]  ;;  %v7305_v51 = vrot.slane %v7304_v18, 4  ;;  %v7314_v43 = vor.u32 %v7313_v27, %v14443_v44  ;;  %8143 = vmatpush.bf16.msra.mxu2 %v11415_v19  ;;  %v11437_v19 = vld [vmem:[%s15896_s3 + $0x190] sm:$0xff] }
 0x3e2   : > { %16001 = vst [vmem:[#allocation15_spill] sm:$0xff] %v14447_v37  ;;  %v6371_v59 = vpop.f32.mrf.mxu2  ;;  %v6578_v11 = vsel %vm12348_vm13, %v10715_v10, %v16003_v4  ;;  %v6635_v37 = vunpack.c.l.b16 %v6581_v8  ;;  %v7324_v17 = vrot.slane %v7322_v33, 4  ;;  %v7327_v16 = vrot.slane %v7325_v62, 5 }
 0x3e3   : > { %v14451_v52 = vpop.f32.mrf.mxu1  ;;  %v6372_v39 = vadd.f32 %v6371_v59, %v14105_v56  ;;  %16004 = vst [vmem:[#allocation30_spill] sm:$0xff] %v14464_v7  ;;  %v9348_v56 = vrot.slane %v14445_v61, 5  ;;  %v7608_v59 = vunpack.c.l.b16 %v7286_v14  ;;  %v6634_v18 = vunpack.c.l.b16 %v6578_v11  ;;  %v7840_v7 = vld [vmem:[#allocation3 + $0x48] sm:$0xe] }
 0x3e4   : > { %16002 = vst [vmem:[#allocation16_spill] sm:$0xff] %v14451_v52  ;;  %v7317_v52 = vshll.u32 %v14389_v21, 16  ;;  %v9346_v21 = vsel %vm12348_vm13, %v11152_v0, %v9345_v49  ;;  %v7310_v27 = vsel %vm11786_vm2, %v7305_v51, %v14443_v44  ;;  %v7331_v4 = vshll.u32 %v7169_v58, 16  ;;  %v14491_v49 = vld [vmem:[#allocation3 + $0x50] sm:$0x1]  ;;  %v11445_v51 = vld [vmem:[%s15896_s3 + $0x1d0] sm:$0xff] }
 0x3e5   : > { %v14468_v41 = vadd.f32 %v14372_v36, %v6372_v39  ;;  %v11438_v39 = vld [vmem:[%s15896_s3 + $0x198] sm:$0xff]  ;;  %v9349_v14 = vsel %vm12348_vm13, %v9347_v34, %v9348_v56  ;;  %v7637_v8 = vpack.c.b16 %v14434_v53, %v7608_v59  ;;  %v7335_v34 = vshrl.u32 %v7169_v58, 16  ;;  %v14497_v62 = vpop.f32.mrf.mxu0 }
 0x3e6   : > { %v11446_v36 = vld [vmem:[%s15896_s3 + $0x1d8] sm:$0xff]  ;;  %v9458_v50 = vunpack.c.l.b16 %v9349_v14  ;;  %v7319_v22 = vrot.slane %v7317_v52, 5  ;;  %8459 = vmatpush.bf16.msra.mxu3 %v11438_v39  ;;  %v9457_v0 = vunpack.c.l.b16 %v9346_v21  ;;  %v7315_v11 = vrot.slane %v7314_v43, 4  ;;  %16007 = vst [vmem:[#allocation33_spill] sm:$0xff] %v14497_v62  ;;  %v14518_v62 = vld [vmem:[#allocation3 + $0x4c] sm:$0xf] }
 0x3e7   : > { %16005 = vst [vmem:[#allocation31_spill] sm:$0xff] %v14468_v41  ;;  %v14474_v10 = vpop.f32.mrf.mxu3  ;;  %6413 = vmatmul.bf16.gmra.mxu2 %v11352_v42  ;;  %v6652_v41 = vpack.c.b16 %v6635_v37, %v6634_v18  ;;  %9141 = vmatpush.bf16.msra.mxu0 %v11446_v36  ;;  %v8576_v42 = vld [vmem:[#allocation3 + $0x18] sm:$0xf]  ;;  %v8634_v44 = vshll.u32 %v14300_v5, 16  ;;  %v7936_v59 = vrot.slane %v7169_v58, 5  ;;  %v11414_v52 = vld [vmem:[%s15896_s3 + $0x158] sm:$0xff]  ;;  %v7328_v36 = vor.u32 %v7327_v16, %v7324_v17 }
 0x3e8   : > { %v8638_v58 = vshrl.u32 %v14300_v5, 16  ;;  %v10930_v43 = vrot.slane %v7840_v7, 9  ;;  %v14510_v39 = vpack.c.b16 %v9458_v50, %v9457_v0  ;;  %v7939_v21 = vrot.slane %v14491_v49, 5  ;;  %v11393_v18 = vld [vmem:[#allocation3 + $0xb4] sm:$0xff]  ;;  %8144 = vmatpush.bf16.msra.mxu2 %v11414_v52 }
 0x3e9   : > { %v8625_v56 = vshrl.u32 %v8576_v42, 16  ;;  %v7320_v50 = vsel %vm11786_vm2, %v7315_v11, %v7319_v22  ;;  %v16010_v17 = vrot.slane %v14187_v20, 5  ;;  %v11413_v16 = vld [vmem:[%s15896_s3 + $0x150] sm:$0xff]  ;;  %v14539_v0 = vunpack.c.l.b16 %v7310_v27  ;;  %v6444_v11 = vld [vmem:[#allocation3 + $0xb4] sm:$0xe] }
 0x3ea   : > { %v6374_v53 = vpop.f32.mrf.mxu2  ;;  %16008 = vst [vmem:[#allocation34_spill] sm:$0xff] %v14510_v39  ;;  %8460 = vmatpush.bf16.msra.mxu3 %v11437_v19  ;;  %v7937_v5 = vsel %vm12348_vm13, %v10930_v43, %v7936_v59  ;;  %v6587_v19 = vrot.slane %v14189_v46, 5  ;;  %v9352_v39 = vrot.slane %v14518_v62, 5 }
 0x3eb   : > { %v14495_v33 = vpop.f32.mrf.mxu1  ;;  %v6375_v37 = vadd.f32 %v6374_v53, %v14128_v35  ;;  %v14512_v35 = vrot.slane %v7331_v4, 5  ;;  %v7337_v53 = vrot.slane %v7335_v34, 4  ;;  %9142 = vmatpush.bf16.msra.mxu0 %v11445_v51  ;;  %v11436_v4 = vld [vmem:[%s15896_s3 + $0x188] sm:$0xff]  ;;  %v8628_v34 = vshll.u32 %v8576_v42, 16 }
 0x3ec   : > { %16006 = vst [vmem:[#allocation32_spill] sm:$0xff] %v14495_v33  ;;  %6796 = vmatmul.bf16.gmra.mxu3 %v6652_v41  ;;  %v7938_v41 = vrot.slane %v7936_v59, 4  ;;  %v14541_v59 = vrot.slane %v8634_v44, 5  ;;  %v7341_v51 = vshll.u32 %v14491_v49, 16  ;;  %v8038_v43 = vunpack.c.l.b16 %v7937_v5  ;;  %8145 = vmatpush.bf16.msra.mxu2 %v11413_v16 }
 0x3ed   : > { %v14516_v14 = vadd.f32 %v14418_v23, %v6375_v37  ;;  %v6586_v23 = vrot.slane %v16010_v17, 4  ;;  %v8640_v37 = vrot.slane %v8638_v58, 4  ;;  %v9262_v17 = vld [vmem:[#allocation3 + $0x48] sm:$0xe]  ;;  %v14546_v42 = vunpack.c.l.b16 %v7320_v50 }
 0x3ee   : > { %7737 = vmatmul.bf16.gmra.mxu1 %v7637_v8  ;;  %v11444_v8 = vld [vmem:[%s15896_s3 + $0x1c8] sm:$0xff]  ;;  %v7940_v22 = vsel %vm12348_vm13, %v7938_v41, %v7939_v21  ;;  %v7338_v27 = vor.u32 %v7337_v53, %v14512_v35  ;;  %8461 = vmatpush.bf16.msra.mxu3 %v11436_v4  ;;  %v8627_v44 = vrot.slane %v8625_v56, 4  ;;  %v10716_v21 = vrot.slane %v6444_v11, 9  ;;  %v11435_v56 = vld [vmem:[%s15896_s3 + $0x180] sm:$0xff] }
 0x3ef   : > { %16009 = vst [vmem:[#allocation35_spill] sm:$0xff] %v14516_v14  ;;  %v14522_v7 = vpop.f32.mrf.mxu3  ;;  %v8039_v52 = vunpack.c.l.b16 %v7940_v22  ;;  %v7329_v14 = vrot.slane %v7328_v36, 4  ;;  %v14549_v41 = vld [vmem:[#allocation3 + $0x50] sm:$0x1]  ;;  %v6588_v46 = vsel %vm12348_vm13, %v6586_v23, %v6587_v19  ;;  %9143 = vmatpush.bf16.msra.mxu0 %v11444_v8  ;;  %v8630_v49 = vrot.slane %v8628_v34, 5  ;;  %v11443_v50 = vld [vmem:[%s15896_s3 + $0x1c0] sm:$0xff] }
 0x3f0   : > { %7110 = vmatmul.bf16.gmra.mxu0 %v11393_v18  ;;  %v11412_v53 = vld [vmem:[%s15896_s3 + $0x148] sm:$0xff]  ;;  %v8641_v23 = vor.u32 %v8640_v37, %v14541_v59  ;;  %v8644_v16 = vshll.u32 %v14311_v38, 16  ;;  %v11153_v4 = vrot.slane %v9262_v17, 9  ;;  %v16013_v8 = vrot.slane %v14187_v20, 5  ;;  %v11353_v37 = vld [vmem:[#allocation3 + $0xa8] sm:$0xff] }
 0x3f1   : > { %v14553_v18 = vpack.c.b16 %v8039_v52, %v8038_v43  ;;  %v7334_v34 = vsel %vm11786_vm2, %v7329_v14, %v14512_v35  ;;  %v9354_v22 = vrot.slane %v9352_v39, 4  ;;  %v9355_v11 = vrot.slane %v14549_v41, 5  ;;  %v14577_v52 = vpop.f32.mrf.mxu0  ;;  %8146 = vmatpush.bf16.msra.mxu2 %v11412_v53  ;;  %v11411_v20 = vld [vmem:[%s15896_s3 + $0x140] sm:$0xff] }
 0x3f2   : > { %v6376_v58 = vpop.f32.mrf.mxu2  ;;  %16014 = vst [vmem:[#allocation38_spill] sm:$0xff] %v14577_v52  ;;  %v6637_v38 = vunpack.c.l.b16 %v6588_v46  ;;  %v7339_v43 = vrot.slane %v7338_v27, 4  ;;  %8462 = vmatpush.bf16.msra.mxu3 %v11435_v56  ;;  %v7835_v17 = vld [vmem:[#allocation3 + $0xc] sm:$0xe]  ;;  %v9353_v35 = vsel %vm12348_vm13, %v11153_v4, %v9352_v39  ;;  %v7638_v46 = vpack.c.b16 %v14546_v42, %v14539_v0  ;;  %v8579_v56 = vld [vmem:[#allocation3 + $0x24] sm:$0xf] }
 0x3f3   : > { %16011 = vst [vmem:[#allocation36_spill] sm:$0xff] %v14553_v18  ;;  %v14555_v5 = vpop.f32.mrf.mxu1  ;;  %v6377_v36 = vadd.f32 %v6376_v58, %v14153_v31  ;;  %v6585_v31 = vsel %vm12348_vm13, %v10716_v21, %v16013_v8  ;;  %v7343_v58 = vrot.slane %v7341_v51, 5  ;;  %9144 = vmatpush.bf16.msra.mxu0 %v11443_v50  ;;  %v8631_v21 = vor.u32 %v8630_v49, %v8627_v44  ;;  %v14596_v51 = vld [vmem:[#allocation3 + $0x58] sm:$0xf]  ;;  %v7841_v44 = vld [vmem:[#allocation3 + $0x54] sm:$0xe] }
 0x3f4   : > { %16012 = vst [vmem:[#allocation37_spill] sm:$0xff] %v14555_v5  ;;  %v9356_v27 = vsel %vm12348_vm13, %v9354_v22, %v9355_v11  ;;  %v8642_v53 = vrot.slane %v8641_v23, 4  ;;  %v14594_v52 = vunpack.c.l.b16 %v7334_v34  ;;  %v8646_v39 = vrot.slane %v8644_v16, 5  ;;  %v14602_v34 = vld [vmem:[#allocation3 + $0x5c] sm:$0x1] }
 0x3f5   : > { %v14580_v19 = vadd.f32 %v14474_v10, %v6377_v36  ;;  %v7901_v10 = vrot.slane %v14197_v29, 5  ;;  %v6636_v36 = vunpack.c.l.b16 %v6585_v31  ;;  %v9460_v8 = vunpack.c.l.b16 %v9356_v27  ;;  %8147 = vmatpush.bf16.msra.mxu2 %v11411_v20 }
 0x3f6   : > { %v10925_v4 = vrot.slane %v7835_v17, 9  ;;  %v9459_v49 = vunpack.c.l.b16 %v9353_v35  ;;  %v7344_v50 = vsel %vm11786_vm2, %v7339_v43, %v7343_v58  ;;  %v7904_v22 = vrot.slane %v14222_v25, 5 }
 0x3f7   : > { %16015 = vst [vmem:[#allocation39_spill] sm:$0xff] %v14580_v19  ;;  %v14587_v14 = vpop.f32.mrf.mxu3  ;;  %6418 = vmatmul.bf16.gmra.mxu2 %v11353_v37  ;;  %v6653_v29 = vpack.c.b16 %v6637_v38, %v6636_v36  ;;  %v7943_v0 = vrot.slane %v14596_v51, 5  ;;  %v8632_v23 = vrot.slane %v8631_v21, 4  ;;  %v7903_v31 = vrot.slane %v7901_v10, 4 }
 0x3f8   : > { %v8649_v16 = vshrl.u32 %v8579_v56, 16  ;;  %v14604_v11 = vpack.c.b16 %v9460_v8, %v9459_v49  ;;  %v8647_v43 = vsel %vm11786_vm2, %v8642_v53, %v8646_v39  ;;  %v8652_v20 = vshll.u32 %v8579_v56, 16  ;;  %v11394_v56 = vld [vmem:[#allocation3 + $0xc0] sm:$0xff] }
 0x3f9   : > { %v10931_v25 = vrot.slane %v7841_v44, 9  ;;  %v14611_v17 = vunpack.c.l.b16 %v7344_v50  ;;  %v8637_v35 = vsel %vm11786_vm2, %v8632_v23, %v14541_v59  ;;  %v8658_v58 = vshll.u32 %v14325_v60, 16  ;;  %v14636_v49 = vpop.f32.mrf.mxu0  ;;  %v14638_v50 = vld [vmem:[#allocation3 + $0x58] sm:$0xf] }
 0x3fa   : > { %v6379_v42 = vpop.f32.mrf.mxu2  ;;  %16016 = vst [vmem:[#allocation40_spill] sm:$0xff] %v14604_v11  ;;  %v8662_v21 = vshrl.u32 %v14325_v60, 16  ;;  %v7945_v36 = vrot.slane %v7943_v0, 4  ;;  %v7946_v53 = vrot.slane %v14602_v34, 5  ;;  %v14626_v39 = vunpack.c.l.b16 %v8647_v43  ;;  %v14648_v43 = vld [vmem:[#allocation3 + $0x24] sm:$0xe] }
 0x3fb   : > { %v14606_v37 = vpop.f32.mrf.mxu1  ;;  %v6380_v38 = vadd.f32 %v6379_v42, %v14173_v26  ;;  %v7944_v26 = vsel %vm12348_vm13, %v10931_v25, %v7943_v0  ;;  %v7902_v59 = vsel %vm12348_vm13, %v10925_v4, %v7901_v10  ;;  %v7905_v60 = vsel %vm12348_vm13, %v7903_v31, %v7904_v22  ;;  %16019 = vst [vmem:[#allocation43_spill] sm:$0xff] %v14636_v49  ;;  %v7836_v22 = vld [vmem:[#allocation3 + $0x18] sm:$0xe]  ;;  %v9263_v49 = vld [vmem:[#allocation3 + $0x54] sm:$0xe] }
 0x3fc   : > { %16017 = vst [vmem:[#allocation41_spill] sm:$0xff] %v14606_v37  ;;  %6801 = vmatmul.bf16.gmra.mxu3 %v6653_v29  ;;  %v8668_v44 = vshll.u32 %v14344_v3, 16  ;;  %v8654_v29 = vrot.slane %v8652_v20, 5  ;;  %v7947_v0 = vsel %vm12348_vm13, %v7945_v36, %v7946_v53  ;;  %v14644_v4 = vunpack.c.l.b16 %v8637_v35 }
 0x3fd   : > { %v14619_v27 = vadd.f32 %v14522_v7, %v6380_v38  ;;  %v11455_v7 = vld [vmem:[%s15896_s3 + $0x220] sm:$0xff]  ;;  %v8040_v42 = vunpack.c.l.b16 %v7944_v26  ;;  %v8041_v23 = vunpack.c.l.b16 %v7947_v0  ;;  %v8028_v3 = vunpack.c.l.b16 %v7902_v59  ;;  %v7171_v0 = vld [vmem:[#allocation3 + $0x54] sm:$0xf] }
 0x3fe   : > { %7742 = vmatmul.bf16.gmra.mxu1 %v7638_v46  ;;  %v8651_v46 = vrot.slane %v8649_v16, 4  ;;  %v8029_v31 = vunpack.c.l.b16 %v7905_v60  ;;  %v14646_v38 = vrot.slane %v8658_v58, 5  ;;  %v8664_v16 = vrot.slane %v8662_v21, 4  ;;  %v8582_v60 = vld [vmem:[#allocation3 + $0x30] sm:$0xf] }
 0x3ff   : > { %16018 = vst [vmem:[#allocation42_spill] sm:$0xff] %v14619_v27  ;;  %v14624_v8 = vpop.f32.mrf.mxu3  ;;  %9566 = vmatpush.bf16.msra.mxu1 %v11455_v7  ;;  %v14652_v36 = vrot.slane %v8668_v44, 5  ;;  %v14654_v53 = vpack.c.b16 %v8041_v23, %v8040_v42  ;;  %v9359_v35 = vrot.slane %v14638_v50, 5  ;;  %v10926_v58 = vrot.slane %v7836_v22, 9  ;;  %v14661_v7 = vld [vmem:[#allocation3 + $0x5c] sm:$0x1] }
 0x400   : > { %7115 = vmatmul.bf16.gmra.mxu0 %v11394_v56  ;;  %v8655_v59 = vor.u32 %v8654_v29, %v8651_v46  ;;  %v7908_v21 = vrot.slane %v14232_v45, 5  ;;  %v7355_v25 = vshll.u32 %v14596_v51, 16  ;;  %v7359_v44 = vshrl.u32 %v14596_v51, 16 }
 0x401   : > { %16020 = vst [vmem:[#allocation44_spill] sm:$0xff] %v14654_v53  ;;  %v7911_v42 = vrot.slane %v14255_v63, 5  ;;  %v8665_v46 = vor.u32 %v8664_v16, %v14646_v38  ;;  %v8676_v11 = vshll.u32 %v8582_v60, 16  ;;  %v9361_v51 = vrot.slane %v9359_v35, 4  ;;  %v14688_v53 = vpop.f32.mrf.mxu0 }
 0x402   : > { %v6381_v20 = vpop.f32.mrf.mxu2  ;;  %v9362_v63 = vrot.slane %v14661_v7, 5  ;;  %v7346_v23 = vshrl.u32 %v7171_v0, 16  ;;  %v7349_v27 = vshll.u32 %v7171_v0, 16  ;;  %v14680_v16 = vpack.c.b16 %v8029_v31, %v8028_v3  ;;  %16023 = vst [vmem:[#allocation47_spill] sm:$0xff] %v14688_v53  ;;  %v14692_v31 = vld [vmem:[#allocation3 + $0x68] sm:$0x1] }
 0x403   : > { %v14657_v56 = vpop.f32.mrf.mxu1  ;;  %v6382_v26 = vadd.f32 %v6381_v20, %v14199_v28  ;;  %v11354_v28 = vld [vmem:[#allocation3 + $0xb4] sm:$0xff]  ;;  %v8673_v20 = vshrl.u32 %v8582_v60, 16  ;;  %v14682_v45 = vrot.slane %v7355_v25, 5  ;;  %v7361_v29 = vrot.slane %v7359_v44, 4  ;;  %v7842_v60 = vld [vmem:[#allocation3 + $0x60] sm:$0xe] }
 0x404   : > { %16021 = vst [vmem:[#allocation45_spill] sm:$0xff] %v14657_v56  ;;  %v9363_v19 = vsel %vm12348_vm13, %v9361_v51, %v9362_v63  ;;  %v8666_v0 = vrot.slane %v8665_v46, 4  ;;  %v8678_v44 = vrot.slane %v8676_v11, 5  ;;  %v8682_v37 = vshll.u32 %v14384_v54, 16 }
 0x405   : > { %v14668_v10 = vadd.f32 %v14587_v14, %v6382_v26  ;;  %v8656_v14 = vrot.slane %v8655_v59, 4  ;;  %v14678_v26 = vsel %vm12348_vm13, %v10926_v58, %v7908_v21  ;;  %v7910_v59 = vrot.slane %v7908_v21, 4 }
 0x406   : > { %v11154_v58 = vrot.slane %v9263_v49, 9  ;;  %v8675_v25 = vrot.slane %v8673_v20, 4  ;;  %v8686_v46 = vshrl.u32 %v14384_v54, 16  ;;  %v10932_v21 = vrot.slane %v7842_v60, 9 }
 0x407   : > { %16022 = vst [vmem:[#allocation46_spill] sm:$0xff] %v14668_v10  ;;  %v14673_v22 = vpop.f32.mrf.mxu3  ;;  %6423 = vmatmul.bf16.gmra.mxu2 %v11354_v28  ;;  %v14684_v10 = vld [vmem:[#allocation3 + $0x64] sm:$0xf]  ;;  %v11419_v28 = vld [vmem:[#allocation3 + $0x18] sm:$0xff]  ;;  %v7348_v63 = vrot.slane %v7346_v23, 4  ;;  %v7351_v53 = vrot.slane %v7349_v27, 5  ;;  %v7362_v3 = vor.u32 %v7361_v29, %v14682_v45  ;;  %v9462_v33 = vunpack.c.l.b16 %v9363_v19 }
 0x408   : > { %v7950_v18 = vrot.slane %v14684_v10, 5  ;;  %v9360_v49 = vsel %vm12348_vm13, %v11154_v58, %v9359_v35  ;;  %v16026_v54 = vpack.c.b16 %v14611_v17, %v14594_v52  ;;  %v8661_v27 = vsel %vm11786_vm2, %v8656_v14, %v14646_v38  ;;  %v14726_v17 = vld [vmem:[#allocation3 + $0x64] sm:$0xf] }
 0x409   : > { %v8671_v19 = vsel %vm11786_vm2, %v8666_v0, %v14652_v36  ;;  %v7365_v35 = vshll.u32 %v14602_v34, 16  ;;  %v8679_v23 = vor.u32 %v8678_v44, %v8675_v25  ;;  %v14724_v52 = vrot.slane %v8682_v37, 5  ;;  %v14753_v44 = vpop.f32.mrf.mxu0 }
 0x40a   : > { %v6384_v56 = vpop.f32.mrf.mxu2  ;;  %v7951_v20 = vsel %vm12348_vm13, %v10932_v21, %v7950_v18  ;;  %v16027_v38 = vpack.c.b16 %v14626_v39, %v14644_v4  ;;  %v8688_v36 = vrot.slane %v8686_v46, 4  ;;  %v7363_v0 = vrot.slane %v7362_v3, 4  ;;  %v8585_v39 = vld [vmem:[#allocation3 + $0x3c] sm:$0xf]  ;;  %16032 = vst [vmem:[#allocation51_spill] sm:$0xff] %v14753_v44 }
 0x40b   : > { %v14695_v5 = vpop.f32.mrf.mxu1  ;;  %v6385_v51 = vadd.f32 %v6384_v56, %v14218_v32  ;;  %v7953_v32 = vrot.slane %v14692_v31, 5  ;;  %v8042_v14 = vunpack.c.l.b16 %v7951_v20  ;;  %v16029_v34 = vrot.slane %v14265_v1, 5 }
 0x40c   : > { %16024 = vst [vmem:[#allocation48_spill] sm:$0xff] %v14695_v5  ;;  %8463 = vmatmul.bf16.vlgmr.msra.gmra.mxu3 %v11419_v28  ;;  %v7952_v5 = vrot.slane %v7950_v18, 4  ;;  %v9461_v18 = vunpack.c.l.b16 %v9360_v49  ;;  %v7352_v28 = vor.u32 %v7351_v53, %v7348_v63  ;;  %v16030_v37 = vrot.slane %v14648_v43, 9  ;;  %v14762_v49 = vld [vmem:[#allocation3 + $0x68] sm:$0x1] }
 0x40d   : > { %v14703_v11 = vadd.f32 %v14624_v8, %v6385_v51  ;;  %v14721_v8 = vsel %vm12348_vm13, %v7910_v59, %v7911_v42  ;;  %v14747_v25 = vunpack.c.l.b16 %v8661_v27  ;;  %v9366_v3 = vrot.slane %v14726_v17, 5  ;;  %v7174_v63 = vld [vmem:[#allocation3 + $0x60] sm:$0xf] }
 0x40e   : > { %7747 = vmatmul.bf16.gmra.mxu1 %v16026_v54  ;;  %v7954_v29 = vsel %vm12348_vm13, %v7952_v5, %v7953_v32  ;;  %v14733_v42 = vpack.c.b16 %v9462_v33, %v9461_v18  ;;  %v14741_v59 = vsel %vm12348_vm13, %v16030_v37, %v16029_v34  ;;  %v16031_v5 = vmov %v16029_v34 }
 0x40f   : > { %16025 = vst [vmem:[#allocation49_spill] sm:$0xff] %v14703_v11  ;;  %v14711_v56 = vpop.f32.mrf.mxu3  ;;  %v8043_v60 = vunpack.c.l.b16 %v7954_v29  ;;  %v14745_v58 = vrot.slane %v16031_v5, 4  ;;  %v7367_v46 = vrot.slane %v7365_v35, 5  ;;  %v14758_v1 = vunpack.c.l.b16 %v8671_v19 }
 0x410   : > { %9145 = vmatmul.bf16.vlgmr.msra.gmra.mxu0 %v16027_v38  ;;  %16028 = vst [vmem:[#allocation50_spill] sm:$0xff] %v14733_v42  ;;  %v14760_v21 = vrot.slane %v8679_v23, 4  ;;  %v7379_v20 = vshll.u32 %v14684_v10, 16  ;;  %v7383_v32 = vshrl.u32 %v14684_v10, 16  ;;  %v8689_v54 = vor.u32 %v8688_v36, %v14724_v52  ;;  %v14789_v42 = vld [vmem:[#allocation3 + $0x74] sm:$0x1] }
 0x411   : > { %v14750_v53 = vpack.c.b16 %v8043_v60, %v8042_v14  ;;  %v8697_v27 = vshrl.u32 %v8585_v39, 16  ;;  %v7353_v29 = vrot.slane %v7352_v28, 4  ;;  %v8700_v19 = vshll.u32 %v8585_v39, 16  ;;  %v9264_v14 = vld [vmem:[#allocation3 + $0x60] sm:$0xe]  ;;  %v14799_v11 = vpop.f32.mrf.mxu0 }
 0x412   : > { %v6386_v4 = vpop.f32.mrf.mxu2  ;;  %v8706_v23 = vshll.u32 %v14416_v24, 16  ;;  %v8710_v38 = vshrl.u32 %v14416_v24, 16  ;;  %v9368_v60 = vrot.slane %v9366_v3, 4  ;;  %v9369_v10 = vrot.slane %v14762_v49, 5  ;;  %v14784_v39 = vld [vmem:[#allocation3 + $0x70] sm:$0xf] }
 0x413   : > { %v14755_v43 = vpop.f32.mrf.mxu1  ;;  %v6387_v51 = vadd.f32 %v6386_v4, %v14239_v57  ;;  %v7368_v57 = vsel %vm11786_vm2, %v7363_v0, %v7367_v46  ;;  %v7370_v36 = vshrl.u32 %v7174_v63, 16  ;;  %v7373_v28 = vshll.u32 %v7174_v63, 16  ;;  %v7843_v24 = vld [vmem:[#allocation3 + $0x6c] sm:$0xe]  ;;  %16034 = vst [vmem:[#allocation53_spill] sm:$0xff] %v14799_v11 }
 0x414   : > { %v8692_v0 = vshll.u32 %v14403_v48, 16  ;;  %v7615_v34 = vunpack.c.l.b16 %v7368_v57  ;;  %v14782_v37 = vrot.slane %v7379_v20, 5  ;;  %v7385_v5 = vrot.slane %v7383_v32, 4 }
 0x415   : > { %v14768_v18 = vadd.f32 %v14673_v22, %v6387_v51  ;;  %v7358_v22 = vsel %vm11786_vm2, %v7353_v29, %v14682_v45  ;;  %v9370_v4 = vsel %vm12348_vm13, %v9368_v60, %v9369_v10  ;;  %v11420_v51 = vld [vmem:[#allocation3 + $0x24] sm:$0xff]  ;;  %v8699_v46 = vrot.slane %v8697_v27, 4 }
 0x416   : > { %v7957_v33 = vrot.slane %v14784_v39, 5  ;;  %v11155_v45 = vrot.slane %v9264_v14, 9  ;;  %v7614_v63 = vunpack.c.l.b16 %v7358_v22  ;;  %v8702_v48 = vrot.slane %v8700_v19, 5 }
 0x417   : > { %16033 = vst [vmem:[#allocation52_spill] sm:$0xff] %v14768_v18  ;;  %v14772_v35 = vpop.f32.mrf.mxu3  ;;  %8148 = vmatmul.bf16.vlgmr.msra.gmra.mxu2 %v14680_v16  ;;  %v8690_v16 = vrot.slane %v8689_v54, 4  ;;  %v14791_v20 = vrot.slane %v8706_v23, 5  ;;  %v8712_v32 = vrot.slane %v8710_v38, 4  ;;  %v7372_v60 = vrot.slane %v7370_v36, 4 }
 0x418   : > { %v10933_v10 = vrot.slane %v7843_v24, 9  ;;  %v9367_v54 = vsel %vm12348_vm13, %v11155_v45, %v9366_v3  ;;  %v7640_v27 = vpack.c.b16 %v7615_v34, %v7614_v63  ;;  %v7375_v14 = vrot.slane %v7373_v28, 5 }
 0x419   : > { %v7386_v22 = vor.u32 %v7385_v5, %v14782_v37  ;;  %v9464_v18 = vunpack.c.l.b16 %v9370_v4  ;;  %v7960_v38 = vrot.slane %v14789_v42, 5  ;;  %v9058_v3 = vpack.c.b16 %v14758_v1, %v14747_v25 }
 0x41a   : > { %v6389_v29 = vpop.f32.mrf.mxu2  ;;  %v7958_v23 = vsel %vm12348_vm13, %v10933_v10, %v7957_v33  ;;  %v8694_v28 = vrot.slane %v8692_v0, 5  ;;  %v16035_v34 = vrot.slane %v14292_v9, 5  ;;  %v7389_v5 = vshll.u32 %v14692_v31, 16  ;;  %v14837_v10 = vld [vmem:[#allocation3 + $0x70] sm:$0xf] }
 0x41b   : > { %v14793_v57 = vpop.f32.mrf.mxu1  ;;  %v6390_v44 = vadd.f32 %v6389_v29, %v14258_v40  ;;  %v7959_v40 = vrot.slane %v7957_v33, 4  ;;  %v9463_v33 = vunpack.c.l.b16 %v9367_v54  ;;  %v8685_v25 = vsel %vm11786_vm2, %v14760_v21, %v14724_v52 }
 0x41c   : > { %8468 = vmatmul.bf16.gmra.mxu3 %v11420_v51  ;;  %v8703_v1 = vor.u32 %v8702_v48, %v8699_v46  ;;  %v7376_v0 = vor.u32 %v7375_v14, %v7372_v60  ;;  %v16037_v51 = vunpack.c.l.b16 %v14678_v26  ;;  %v16038_v31 = vunpack.c.l.b16 %v14721_v8 }
 0x41d   : > { %v14802_v19 = vadd.f32 %v14711_v56, %v6390_v44  ;;  %v7919_v56 = vsel %vm12348_vm13, %v14745_v58, %v16035_v34  ;;  %v11454_v44 = vld [vmem:[%s15896_s3 + $0x218] sm:$0xff]  ;;  %v7961_v9 = vsel %vm12348_vm13, %v7959_v40, %v7960_v38  ;;  %v8044_v58 = vunpack.c.l.b16 %v7958_v23 }
 0x41e   : > { %7752 = vmatmul.bf16.gmra.mxu1 %v7640_v27  ;;  %v8045_v24 = vunpack.c.l.b16 %v7961_v9  ;;  %v14826_v4 = vpack.c.b16 %v9464_v18, %v9463_v33  ;;  %v8061_v45 = vpack.c.b16 %v16038_v31, %v16037_v51  ;;  %v7387_v29 = vrot.slane %v7386_v22, 4  ;;  %v14873_v51 = vld [vmem:[#allocation3 + $0x7c] sm:$0xf] }
 0x41f   : > { %v14809_v36 = vpop.f32.mrf.mxu3  ;;  %9567 = vmatpush.bf16.msra.mxu1 %v11454_v44  ;;  %v8695_v52 = vsel %vm11786_vm2, %v8690_v16, %v8694_v28  ;;  %v8713_v21 = vor.u32 %v8712_v32, %v14791_v20  ;;  %v8032_v63 = vunpack.c.l.b16 %v14741_v59  ;;  %v8033_v48 = vunpack.c.l.b16 %v7919_v56  ;;  %v8588_v32 = vld [vmem:[#allocation3 + $0x48] sm:$0xf]  ;;  %v7177_v59 = vld [vmem:[#allocation3 + $0x6c] sm:$0xf] }
 0x420   : > { %9150 = vmatmul.bf16.gmra.mxu0 %v9058_v3  ;;  %16036 = vst [vmem:[#allocation54_spill] sm:$0xff] %v14826_v4  ;;  %v8716_v60 = vshll.u32 %v14445_v61, 16  ;;  %v14839_v18 = vpack.c.b16 %v8045_v24, %v8044_v58  ;;  %v7391_v54 = vrot.slane %v7389_v5, 5  ;;  %v14844_v27 = vunpack.c.l.b16 %v8685_v25  ;;  %v14859_v3 = vld [vmem:[#allocation3 + $0x74] sm:$0x1] }
 0x421   : > { %v7403_v16 = vshll.u32 %v14784_v39, 16  ;;  %v7377_v14 = vrot.slane %v7376_v0, 4  ;;  %v14847_v22 = vunpack.c.l.b16 %v8695_v52  ;;  %v7407_v61 = vshrl.u32 %v14784_v39, 16 }
 0x422   : > { %v6391_v46 = vpop.f32.mrf.mxu2  ;;  %v14850_v23 = vrot.slane %v8703_v1, 4  ;;  %v14857_v38 = vrot.slane %v8713_v21, 4  ;;  %v9373_v28 = vrot.slane %v14837_v10, 5  ;;  %v8718_v39 = vrot.slane %v8716_v60, 5  ;;  %v14886_v60 = vld [vmem:[#allocation3 + $0x80] sm:$0x1] }
 0x423   : > { %v14841_v26 = vpop.f32.mrf.mxu1  ;;  %v6392_v8 = vadd.f32 %v6391_v46, %v14285_v6  ;;  %v7392_v6 = vsel %vm11786_vm2, %v7387_v29, %v7391_v54  ;;  %v7382_v34 = vsel %vm11786_vm2, %v7377_v14, %v14782_v37  ;;  %v8721_v44 = vshrl.u32 %v8588_v32, 16  ;;  %v7844_v37 = vld [vmem:[#allocation3 + $0x78] sm:$0xe]  ;;  %v11421_v29 = vld [vmem:[#allocation3 + $0x30] sm:$0xff] }
 0x424   : > { %v8724_v33 = vshll.u32 %v8588_v32, 16  ;;  %v7394_v5 = vshrl.u32 %v7177_v59, 16  ;;  %v7397_v25 = vshll.u32 %v7177_v59, 16  ;;  %v14869_v1 = vrot.slane %v7403_v16, 5  ;;  %v9265_v59 = vld [vmem:[#allocation3 + $0x6c] sm:$0xe] }
 0x425   : > { %v14853_v40 = vadd.f32 %v14772_v35, %v6392_v8  ;;  %v14867_v35 = vpop.f32.mrf.mxu0  ;;  %v9375_v9 = vrot.slane %v9373_v28, 4  ;;  %v7617_v0 = vunpack.c.l.b16 %v7392_v6  ;;  %v14871_v58 = vpack.c.b16 %v8033_v48, %v8032_v63 }
 0x426   : > { %16040 = vst [vmem:[#allocation56_spill] sm:$0xff] %v14867_v35  ;;  %v7409_v24 = vrot.slane %v7407_v61, 4  ;;  %v9376_v31 = vrot.slane %v14859_v3, 5  ;;  %v9059_v52 = vpack.c.b16 %v14847_v22, %v14844_v27  ;;  %v8719_v21 = vsel %vm11786_vm2, %v14857_v38, %v8718_v39 }
 0x427   : > { %16039 = vst [vmem:[#allocation55_spill] sm:$0xff] %v14853_v40  ;;  %v14865_v56 = vpop.f32.mrf.mxu3  ;;  %8153 = vmatmul.bf16.gmra.mxu2 %v8061_v45  ;;  %v8709_v45 = vsel %vm11786_vm2, %v14850_v23, %v14791_v20  ;;  %v7964_v46 = vrot.slane %v14873_v51, 5  ;;  %v7616_v48 = vunpack.c.l.b16 %v7382_v34  ;;  %v8730_v8 = vshll.u32 %v14518_v62, 16  ;;  %v8591_v34 = vld [vmem:[#allocation3 + $0x54] sm:$0xf] }
 0x428   : > { %v8734_v54 = vshrl.u32 %v14518_v62, 16  ;;  %v9377_v27 = vsel %vm12348_vm13, %v9375_v9, %v9376_v31  ;;  %v7396_v32 = vrot.slane %v7394_v5, 4  ;;  %v7399_v14 = vrot.slane %v7397_v25, 5 }
 0x429   : > { %v10934_v22 = vrot.slane %v7844_v37, 9  ;;  %v7641_v61 = vpack.c.b16 %v7617_v0, %v7616_v48  ;;  %v7410_v23 = vor.u32 %v7409_v24, %v14869_v1  ;;  %v8723_v6 = vrot.slane %v8721_v44, 4 }
 0x42a   : > { %v6394_v63 = vpop.f32.mrf.mxu2  ;;  %v8726_v38 = vrot.slane %v8724_v33, 5  ;;  %v7966_v9 = vrot.slane %v7964_v46, 4  ;;  %v7413_v25 = vshll.u32 %v14789_v42, 16  ;;  %v14905_v0 = vrot.slane %v8730_v8, 5 }
 0x42b   : > { %v14892_v16 = vpop.f32.mrf.mxu1  ;;  %v6395_v20 = vadd.f32 %v6394_v63, %v14308_v15  ;;  %v7965_v39 = vsel %vm12348_vm13, %v10934_v22, %v7964_v46  ;;  %v7967_v15 = vrot.slane %v14886_v60, 5  ;;  %v8736_v24 = vrot.slane %v8734_v54, 4 }
 0x42c   : > { %8473 = vmatmul.bf16.gmra.mxu3 %v11421_v29  ;;  %v11156_v44 = vrot.slane %v9265_v59, 9  ;;  %v7400_v33 = vor.u32 %v7399_v14, %v7396_v32  ;;  %v8745_v37 = vshrl.u32 %v8591_v34, 16  ;;  %v8748_v31 = vshll.u32 %v8591_v34, 16 }
 0x42d   : > { %v14897_v62 = vadd.f32 %v14809_v36, %v6395_v20  ;;  %v7968_v36 = vsel %vm12348_vm13, %v7966_v9, %v7967_v15  ;;  %v7411_v29 = vrot.slane %v7410_v23, 4  ;;  %v8046_v46 = vunpack.c.l.b16 %v7965_v39  ;;  %v14911_v20 = vpop.f32.mrf.mxu0 }
 0x42e   : > { %7757 = vmatmul.bf16.gmra.mxu1 %v7641_v61  ;;  %v8047_v63 = vunpack.c.l.b16 %v7968_v36  ;;  %v9374_v48 = vsel %vm12348_vm13, %v11156_v44, %v9373_v28  ;;  %16042 = vst [vmem:[#allocation58_spill] sm:$0xff] %v14911_v20  ;;  %v14913_v42 = vunpack.c.l.b16 %v8709_v45  ;;  %v14915_v8 = vunpack.c.l.b16 %v8719_v21  ;;  %v15105_v20 = vld [vmem:[#allocation3 + $0x98] sm:$0x1] }
 0x42f   : > { %16041 = vst [vmem:[#allocation57_spill] sm:$0xff] %v14897_v62  ;;  %v14902_v5 = vpop.f32.mrf.mxu3  ;;  %v8727_v54 = vor.u32 %v8726_v38, %v8723_v6  ;;  %v9466_v32 = vunpack.c.l.b16 %v9377_v27  ;;  %v7415_v22 = vrot.slane %v7413_v25, 5  ;;  %v8754_v59 = vshll.u32 %v14638_v50, 16  ;;  %v7180_v6 = vld [vmem:[#allocation3 + $0x78] sm:$0xf] }
 0x430   : > { %9155 = vmatmul.bf16.gmra.mxu0 %v9059_v52  ;;  %v8758_v52 = vshrl.u32 %v14638_v50, 16  ;;  %v14919_v61 = vpack.c.b16 %v8047_v63, %v8046_v46  ;;  %v8737_v34 = vor.u32 %v8736_v24, %v14905_v0  ;;  %v8740_v45 = vshll.u32 %v14549_v41, 16 }
 0x431   : > { %v9465_v21 = vunpack.c.l.b16 %v9374_v48  ;;  %v7401_v39 = vrot.slane %v7400_v33, 4  ;;  %v7416_v27 = vsel %vm11786_vm2, %v7411_v29, %v7415_v22  ;;  %v8747_v38 = vrot.slane %v8745_v37, 4  ;;  %v14952_v48 = vld [vmem:[#allocation3 + $0x88] sm:$0xf] }
 0x432   : > { %v6396_v14 = vpop.f32.mrf.mxu2  ;;  %v8750_v9 = vrot.slane %v8748_v31, 5  ;;  %v7427_v15 = vshll.u32 %v14873_v51, 16  ;;  %v7431_v25 = vshrl.u32 %v14873_v51, 16  ;;  %v8728_v44 = vrot.slane %v8727_v54, 4  ;;  %v8594_v54 = vld [vmem:[#allocation3 + $0x60] sm:$0xf] }
 0x433   : > { %v14921_v23 = vpop.f32.mrf.mxu1  ;;  %v6397_v28 = vadd.f32 %v6396_v14, %v14358_v12  ;;  %v14933_v12 = vld [vmem:[#allocation3 + $0x7c] sm:$0xf]  ;;  %v14935_v24 = vpack.c.b16 %v9466_v32, %v9465_v21  ;;  %v14939_v33 = vrot.slane %v8754_v59, 5  ;;  %v8760_v36 = vrot.slane %v8758_v52, 4 }
 0x434   : > { %v9060_v37 = vpack.c.b16 %v14915_v8, %v14913_v42  ;;  %v7418_v51 = vshrl.u32 %v7180_v6, 16  ;;  %v14947_v31 = vrot.slane %v8740_v45, 5  ;;  %v7619_v29 = vunpack.c.l.b16 %v7416_v27  ;;  %v11422_v32 = vld [vmem:[#allocation3 + $0x3c] sm:$0xff] }
 0x435   : > { %v14929_v50 = vadd.f32 %v14865_v56, %v6397_v28  ;;  %16044 = vst [vmem:[#allocation60_spill] sm:$0xff] %v14935_v24  ;;  %v7406_v56 = vsel %vm11786_vm2, %v7401_v39, %v14869_v1  ;;  %v7421_v46 = vshll.u32 %v7180_v6, 16  ;;  %v8733_v63 = vsel %vm11786_vm2, %v8728_v44, %v14905_v0  ;;  %v14963_v45 = vpop.f32.mrf.mxu0  ;;  %v14979_v44 = vld [vmem:[#allocation3 + $0x8c] sm:$0x1] }
 0x436   : > { %v14955_v14 = vrot.slane %v7427_v15, 5  ;;  %v7433_v1 = vrot.slane %v7431_v25, 4  ;;  %v14957_v22 = vrot.slane %v8737_v34, 4  ;;  %v8751_v42 = vor.u32 %v8750_v9, %v8747_v38  ;;  %16045 = vst [vmem:[#allocation61_spill] sm:$0xff] %v14963_v45  ;;  %v14966_v34 = vld [vmem:[#allocation3 + $0x80] sm:$0x1] }
 0x437   : > { %16043 = vst [vmem:[#allocation59_spill] sm:$0xff] %v14929_v50  ;;  %v14937_v41 = vpop.f32.mrf.mxu3  ;;  %8158 = vmatmul.bf16.gmra.mxu2 %v14871_v58  ;;  %v15900_v58 = vrot.slane %v14933_v12, 5  ;;  %v7121_v8 = vadd.f32 %v14135_v2, %v14183_v47  ;;  %v7618_v52 = vunpack.c.l.b16 %v7406_v56  ;;  %v8761_v28 = vor.u32 %v8760_v36, %v14939_v33  ;;  %v7845_v56 = vld [vmem:[#allocation3 + $0x84] sm:$0xe] }
 0x438   : > { %v8764_v0 = vshll.u32 %v14661_v7, 16  ;;  %v7420_v27 = vrot.slane %v7418_v51, 4  ;;  %v8769_v6 = vshrl.u32 %v8594_v54, 16  ;;  %v7971_v38 = vrot.slane %v14952_v48, 5 }
 0x439   : > { %v7642_v2 = vpack.c.b16 %v7619_v29, %v7618_v52  ;;  %v7423_v47 = vrot.slane %v7421_v46, 5  ;;  %v9382_v15 = vrot.slane %v15900_v58, 4  ;;  %v7434_v25 = vor.u32 %v7433_v1, %v14955_v14  ;;  %v16047_v58 = vld [vmem:[#allocation19_spill] sm:$0xff] }
 0x43a   : > { %v6399_v59 = vpop.f32.mrf.mxu2  ;;  %v8772_v36 = vshll.u32 %v8594_v54, 16  ;;  %v7437_v29 = vshll.u32 %v14886_v60, 16  ;;  %v8743_v46 = vsel %vm11786_vm2, %v14957_v22, %v14947_v31  ;;  %v9383_v54 = vrot.slane %v14966_v34, 5 }
 0x43b   : > { %v7723_v21 = vpop.f32.mrf.mxu1  ;;  %v6400_v39 = vadd.f32 %v6399_v59, %v14394_v55  ;;  %v14977_v55 = vunpack.c.l.b16 %v8733_v63  ;;  %v14991_v63 = vrot.slane %v8751_v42, 4  ;;  %v14994_v1 = vrot.slane %v8761_v28, 4 }
 0x43c   : > { %8478 = vmatmul.bf16.gmra.mxu3 %v11422_v32  ;;  %v14969_v9 = vadd.f32 %v7723_v21, %v7121_v8  ;;  %v9266_v32 = vld [vmem:[#allocation3 + $0x78] sm:$0xe]  ;;  %v14996_v8 = vrot.slane %v8764_v0, 5  ;;  %v14998_v59 = vrot.slane %v8769_v6, 4  ;;  %v7973_v60 = vrot.slane %v7971_v38, 4  ;;  %v16048_v6 = vld [vmem:[#allocation17_spill] sm:$0xff] }
 0x43d   : > { %v14974_v7 = vadd.f32 %v14902_v5, %v6400_v39  ;;  %v11453_v5 = vld [vmem:[%s15896_s3 + $0x210] sm:$0xff]  ;;  %v7424_v52 = vor.u32 %v7423_v47, %v7420_v27  ;;  %v10935_v31 = vrot.slane %v7845_v56, 9  ;;  %v7974_v22 = vrot.slane %v14979_v44, 5  ;;  %v7183_v39 = vld [vmem:[#allocation3 + $0x84] sm:$0xf] }
 0x43e   : > { %7762 = vmatmul.bf16.gmra.mxu1 %v7642_v2  ;;  %v9384_v42 = vsel %vm12348_vm13, %v9382_v15, %v9383_v54  ;;  %v7435_v21 = vrot.slane %v7434_v25, 4  ;;  %v15003_v2 = vrot.slane %v8772_v36, 5  ;;  %v8778_v28 = vshll.u32 %v14726_v17, 16  ;;  %v16049_v15 = vld [vmem:[#allocation16_spill] sm:$0xff]  ;;  %v15015_v54 = vld [vmem:[#allocation3 + $0x88] sm:$0xf] }
 0x43f   : > { %16046 = vst [vmem:[#allocation62_spill] sm:$0xff] %v14974_v7  ;;  %v14981_v51 = vpop.f32.mrf.mxu3  ;;  %9568 = vmatpush.bf16.msra.mxu1 %v11453_v5  ;;  %v11157_v0 = vrot.slane %v9266_v32, 9  ;;  %v7122_v24 = vadd.f32 %v16048_v6, %v16047_v58  ;;  %v7972_v27 = vsel %vm12348_vm13, %v10935_v31, %v7971_v38  ;;  %v7975_v47 = vsel %vm12348_vm13, %v7973_v60, %v7974_v22  ;;  %v15023_v60 = vpop.f32.mrf.mxu0 }
 0x440   : > { %9160 = vmatmul.bf16.gmra.mxu0 %v9060_v37  ;;  %v7439_v37 = vrot.slane %v7437_v29, 5  ;;  %v7451_v36 = vshll.u32 %v14952_v48, 16  ;;  %v7455_v5 = vshrl.u32 %v14952_v48, 16  ;;  %v16050_v32 = vrot.slane %v14933_v12, 5  ;;  %16051 = vst [vmem:[#allocation19_spill] sm:$0xff] %v15023_v60 }
 0x441   : > { %v7425_v38 = vrot.slane %v7424_v52, 4  ;;  %v7442_v31 = vshrl.u32 %v7183_v39, 16  ;;  %v7445_v6 = vshll.u32 %v7183_v39, 16  ;;  %v8048_v22 = vunpack.c.l.b16 %v7972_v27 }
 0x442   : > { %v6401_v4 = vpop.f32.mrf.mxu2  ;;  %v9381_v58 = vsel %vm12348_vm13, %v11157_v0, %v16050_v32  ;;  %v7440_v48 = vsel %vm11786_vm2, %v7435_v21, %v7439_v37  ;;  %v8782_v45 = vshrl.u32 %v14726_v17, 16  ;;  %v9387_v52 = vrot.slane %v15015_v54, 5  ;;  %v15042_v32 = vld [vmem:[#allocation3 + $0x8c] sm:$0x1] }
 0x443   : > { %v7725_v56 = vpop.f32.mrf.mxu1  ;;  %v6402_v25 = vadd.f32 %v6401_v4, %v16049_v15  ;;  %v8049_v15 = vunpack.c.l.b16 %v7975_v47  ;;  %v9467_v0 = vunpack.c.l.b16 %v9381_v58  ;;  %v15038_v39 = vrot.slane %v7451_v36, 5 }
 0x444   : > { %v15021_v29 = vadd.f32 %v7725_v56, %v7122_v24  ;;  %v9468_v24 = vunpack.c.l.b16 %v9384_v42  ;;  %v16053_v56 = vld [vmem:[#allocation9_spill] sm:$0xff]  ;;  %v7621_v37 = vunpack.c.l.b16 %v7440_v48  ;;  %v7444_v27 = vrot.slane %v7442_v31, 4 }
 0x445   : > { %v15026_v4 = vadd.f32 %v14937_v41, %v6402_v25  ;;  %v7430_v41 = vsel %vm11786_vm2, %v7425_v38, %v14955_v14  ;;  %v7457_v25 = vrot.slane %v7455_v5, 4  ;;  %v15040_v21 = vpack.c.b16 %v8049_v15, %v8048_v22  ;;  %v11423_v42 = vld [vmem:[#allocation3 + $0x48] sm:$0xff]  ;;  %v16055_v5 = vld [vmem:[#allocation23_spill] sm:$0xff]  ;;  %v16056_v38 = vld [vmem:[#allocation18_spill] sm:$0xff] }
 0x446   : > { %v7447_v47 = vrot.slane %v7445_v6, 5  ;;  %v15044_v17 = vpack.c.b16 %v9468_v24, %v9467_v0  ;;  %v9034_v58 = vunpack.c.l.b16 %v8743_v46  ;;  %v8767_v14 = vsel %vm11786_vm2, %v14994_v1, %v14996_v8  ;;  %v9267_v15 = vld [vmem:[#allocation3 + $0x84] sm:$0xe] }
 0x447   : > { %16052 = vst [vmem:[#allocation17_spill] sm:$0xff] %v15026_v4  ;;  %v15030_v7 = vpop.f32.mrf.mxu3  ;;  %8163 = vmatmul.bf16.gmra.mxu2 %v16053_v56  ;;  %v8757_v56 = vsel %vm11786_vm2, %v14991_v63, %v14939_v33  ;;  %v9389_v36 = vrot.slane %v9387_v52, 4  ;;  %v7123_v31 = vadd.f32 %v16056_v38, %v16055_v5  ;;  %v7620_v48 = vunpack.c.l.b16 %v7430_v41  ;;  %v16057_v24 = vld [vmem:[#allocation32_spill] sm:$0xff]  ;;  %v7187_v38 = vld [vmem:[#allocation3 + $0x94] sm:$0xf] }
 0x448   : > { %16054 = vst [vmem:[#allocation16_spill] sm:$0xff] %v15044_v17  ;;  %v8775_v22 = vor.u32 %v15003_v2, %v14998_v59  ;;  %v15058_v46 = vrot.slane %v8778_v28, 5  ;;  %v7458_v63 = vor.u32 %v7457_v25, %v15038_v39  ;;  %v15062_v17 = vrot.slane %v8782_v45, 4 }
 0x449   : > { %v9390_v1 = vrot.slane %v15042_v32, 5  ;;  %v7643_v5 = vpack.c.b16 %v7621_v37, %v7620_v48  ;;  %v7448_v41 = vor.u32 %v7447_v47, %v7444_v27  ;;  %v8788_v59 = vshll.u32 %v14762_v49, 16  ;;  %v7846_v49 = vld [vmem:[#allocation3 + $0x90] sm:$0xe]  ;;  %v15087_v48 = vld [vmem:[#allocation3 + $0x98] sm:$0x1] }
 0x44a   : > { %v6404_v6 = vpop.f32.mrf.mxu2  ;;  %v7461_v28 = vshll.u32 %v14979_v44, 16  ;;  %v9061_v25 = vpack.c.b16 %v9034_v58, %v14977_v55  ;;  %v15079_v37 = vunpack.c.l.b16 %v8757_v56  ;;  %v15081_v27 = vrot.slane %v8775_v22, 4 }
 0x44b   : > { %v7728_v0 = vpop.f32.mrf.mxu1  ;;  %v6405_v33 = vadd.f32 %v6404_v6, %v16057_v24  ;;  %v15072_v6 = vld [vmem:[#allocation3 + $0x6c] sm:$0xf]  ;;  %v9391_v45 = vsel %vm12348_vm13, %v9389_v36, %v9390_v1  ;;  %v7459_v47 = vrot.slane %v7458_v63, 4  ;;  %v15085_v44 = vunpack.c.l.b16 %v8767_v14  ;;  %v16060_v24 = vld [vmem:[#allocation24_spill] sm:$0xff] }
 0x44c   : > { %8483 = vmatmul.bf16.gmra.mxu3 %v11423_v42  ;;  %v15065_v8 = vadd.f32 %v7728_v0, %v7123_v31  ;;  %v11158_v42 = vrot.slane %v9267_v15, 9  ;;  %v15089_v15 = vld [vmem:[#allocation3 + $0x94] sm:$0xf]  ;;  %v7978_v36 = vrot.slane %v7187_v38, 5  ;;  %v8785_v58 = vor.u32 %v15062_v17, %v15058_v46  ;;  %v16061_v14 = vld [vmem:[#allocation20_spill] sm:$0xff] }
 0x44d   : > { %v15069_v2 = vadd.f32 %v14981_v51, %v6405_v33  ;;  %v15083_v51 = vpop.f32.mrf.mxu0  ;;  %v15095_v56 = vrot.slane %v8788_v59, 5  ;;  %v8793_v22 = vshrl.u32 %v15072_v6, 16  ;;  %v9470_v0 = vunpack.c.l.b16 %v9391_v45  ;;  %v16062_v59 = vld [vmem:[#allocation37_spill] sm:$0xff] }
 0x44e   : > { %7767 = vmatmul.bf16.gmra.mxu1 %v7643_v5  ;;  %16059 = vst [vmem:[#allocation23_spill] sm:$0xff] %v15083_v51  ;;  %v9388_v55 = vsel %vm12348_vm13, %v11158_v42, %v9387_v52  ;;  %v7124_v33 = vadd.f32 %v16061_v14, %v16060_v24  ;;  %v7449_v63 = vrot.slane %v7448_v41, 4  ;;  %v7463_v1 = vrot.slane %v7461_v28, 5  ;;  %v9268_v42 = vld [vmem:[#allocation3 + $0x90] sm:$0xe] }
 0x44f   : > { %16058 = vst [vmem:[#allocation9_spill] sm:$0xff] %v15069_v2  ;;  %v15077_v31 = vpop.f32.mrf.mxu3  ;;  %v10936_v5 = vrot.slane %v7846_v49, 9  ;;  %v7980_v51 = vrot.slane %v7978_v36, 4  ;;  %v7981_v4 = vrot.slane %v15087_v48, 5  ;;  %v9469_v52 = vunpack.c.l.b16 %v9388_v55  ;;  %v7186_v49 = vld [vmem:[#allocation3 + $0x90] sm:$0xf] }
 0x450   : > { %9165 = vmatmul.bf16.gmra.mxu0 %v9061_v25  ;;  %v9394_v25 = vrot.slane %v15089_v15, 5  ;;  %v7464_v45 = vsel %vm11786_vm2, %v7459_v47, %v7463_v1  ;;  %v7475_v50 = vshll.u32 %v7187_v38, 16  ;;  %v7479_v24 = vshrl.u32 %v7187_v38, 16 }
 0x451   : > { %v7979_v41 = vsel %vm12348_vm13, %v10936_v5, %v7978_v36  ;;  %v7982_v55 = vsel %vm12348_vm13, %v7980_v51, %v7981_v4  ;;  %v15113_v14 = vpack.c.b16 %v9470_v0, %v9469_v52  ;;  %v8796_v47 = vshll.u32 %v15072_v6, 16  ;;  %v16065_v4 = vld [vmem:[#allocation15_spill] sm:$0xff] }
 0x452   : > { %v6406_v2 = vpop.f32.mrf.mxu2  ;;  %v8051_v1 = vunpack.c.l.b16 %v7982_v55  ;;  %v7454_v36 = vsel %vm11786_vm2, %v7449_v63, %v15038_v39  ;;  %v8050_v5 = vunpack.c.l.b16 %v7979_v41  ;;  %v9396_v38 = vrot.slane %v9394_v25, 4  ;;  %v11424_v41 = vld [vmem:[#allocation3 + $0x54] sm:$0xff] }
 0x453   : > { %v7730_v17 = vpop.f32.mrf.mxu1  ;;  %v6407_v60 = vadd.f32 %v6406_v2, %v16062_v59  ;;  %16063 = vst [vmem:[#allocation18_spill] sm:$0xff] %v15113_v14  ;;  %v11159_v59 = vrot.slane %v9268_v42, 9  ;;  %v7623_v51 = vunpack.c.l.b16 %v7464_v45  ;;  %v7466_v0 = vshrl.u32 %v7186_v49, 16 }
 0x454   : > { %v15109_v28 = vadd.f32 %v7730_v17, %v7124_v33  ;;  %v9397_v17 = vrot.slane %v15105_v20, 5  ;;  %v15128_v6 = vrot.slane %v7475_v50, 5  ;;  %v7481_v52 = vrot.slane %v7479_v24, 4 }
 0x455   : > { %v15116_v2 = vadd.f32 %v15030_v7, %v6407_v60  ;;  %v7469_v7 = vshll.u32 %v7186_v49, 16  ;;  %v9395_v60 = vsel %vm12348_vm13, %v11159_v59, %v9394_v25  ;;  %v15130_v42 = vpack.c.b16 %v8051_v1, %v8050_v5  ;;  %v15134_v63 = vpop.f32.mrf.mxu0  ;;  %v16068_v49 = vld [vmem:[#allocation22_spill] sm:$0xff]  ;;  %v16070_v5 = vld [vmem:[#allocation41_spill] sm:$0xff] }
 0x456   : > { %v9398_v39 = vsel %vm12348_vm13, %v9396_v38, %v9397_v17  ;;  %16067 = vst [vmem:[#allocation20_spill] sm:$0xff] %v15134_v63  ;;  %v8786_v55 = vrot.slane %v8785_v58, 4  ;;  %v8795_v14 = vrot.slane %v8793_v22, 4  ;;  %v8802_v45 = vshll.u32 %v14837_v10, 16 }
 0x457   : > { %16064 = vst [vmem:[#allocation32_spill] sm:$0xff] %v15116_v2  ;;  %v15122_v33 = vpop.f32.mrf.mxu3  ;;  %8168 = vmatmul.bf16.gmra.mxu2 %v16065_v4  ;;  %v8798_v4 = vrot.slane %v8796_v47, 5  ;;  %v16069_v2 = vld [vmem:[#allocation21_spill] sm:$0xff]  ;;  %v7622_v50 = vunpack.c.l.b16 %v7454_v36  ;;  %v9471_v59 = vunpack.c.l.b16 %v9395_v60  ;;  %v9472_v24 = vunpack.c.l.b16 %v9398_v39  ;;  %v16074_v39 = vld [vmem:[#allocation8_spill] sm:$0xff] }
 0x458   : > { %16066 = vst [vmem:[#allocation24_spill] sm:$0xff] %v15130_v42  ;;  %v7125_v62 = vadd.f32 %v16069_v2, %v16068_v49  ;;  %v7468_v38 = vrot.slane %v7466_v0, 4  ;;  %v7471_v17 = vrot.slane %v7469_v7, 5  ;;  %v8806_v63 = vshrl.u32 %v14837_v10, 16 }
 0x459   : > { %v7644_v22 = vpack.c.b16 %v7623_v51, %v7622_v50  ;;  %v7482_v47 = vor.u32 %v7481_v52, %v15128_v6  ;;  %v15144_v35 = vpack.c.b16 %v9472_v24, %v9471_v59  ;;  %v9062_v36 = vpack.c.b16 %v15085_v44, %v15079_v37  ;;  %v7190_v51 = vld [vmem:[#allocation3 + $0xa0] sm:$0xf]  ;;  %v16077_v59 = vld [vmem:[#allocation45_spill] sm:$0xff] }
 0x45a   : > { %v6409_v25 = vpop.f32.mrf.mxu2  ;;  %v7485_v0 = vshll.u32 %v15087_v48, 16  ;;  %v8781_v10 = vsel %vm11786_vm2, %v15081_v27, %v15058_v46  ;;  %v7472_v7 = vor.u32 %v7471_v17, %v7468_v38  ;;  %v8799_v37 = vor.u32 %v8798_v4, %v8795_v14  ;;  %v15166_v48 = vld [vmem:[#allocation3 + $0xa0] sm:$0xf]  ;;  %v7847_v14 = vld [vmem:[#allocation3 + $0x9c] sm:$0xe] }
 0x45b   : > { %v7733_v1 = vpop.f32.mrf.mxu1  ;;  %v6410_v42 = vadd.f32 %v6409_v25, %v16070_v5  ;;  %16072 = vst [vmem:[#allocation15_spill] sm:$0xff] %v15144_v35  ;;  %v15164_v44 = vrot.slane %v8802_v45, 5  ;;  %v8808_v52 = vrot.slane %v8806_v63, 4  ;;  %v15168_v46 = vunpack.c.l.b16 %v8781_v10  ;;  %v15179_v5 = vld [vmem:[#allocation3 + $0xa4] sm:$0x1] }
 0x45c   : > { %8488 = vmatmul.bf16.gmra.mxu3 %v11424_v41  ;;  %v15141_v58 = vadd.f32 %v7733_v1, %v7125_v62  ;;  %v8791_v62 = vsel %vm11786_vm2, %v8786_v55, %v15095_v56  ;;  %v8812_v27 = vshll.u32 %v14859_v3, 16  ;;  %v7985_v56 = vrot.slane %v7190_v51, 5  ;;  %v16075_v41 = vld [vmem:[#allocation25_spill] sm:$0xff]  ;;  %v15184_v17 = vld [vmem:[#allocation3 + $0xa4] sm:$0x1] }
 0x45d   : > { %v15147_v2 = vadd.f32 %v15077_v31, %v6410_v42  ;;  %v11452_v31 = vld [vmem:[%s15896_s3 + $0x208] sm:$0xff]  ;;  %v7483_v42 = vrot.slane %v7482_v47, 4  ;;  %v7126_v55 = vadd.f32 %v16075_v41, %v16074_v39  ;;  %v7487_v25 = vrot.slane %v7485_v0, 5  ;;  %v15176_v4 = vpop.f32.mrf.mxu0  ;;  %v11425_v35 = vld [vmem:[#allocation3 + $0x60] sm:$0xff] }
 0x45e   : > { %16071 = vst [vmem:[#allocation37_spill] sm:$0xff] %v15141_v58  ;;  %7772 = vmatmul.bf16.gmra.mxu1 %v7644_v22  ;;  %v15173_v50 = vunpack.c.l.b16 %v8791_v62  ;;  %v9401_v63 = vrot.slane %v15166_v48, 5  ;;  %v7473_v1 = vrot.slane %v7472_v7, 4  ;;  %v15181_v3 = vrot.slane %v8799_v37, 4  ;;  %v8600_v7 = vld [vmem:[#allocation3 + $0x78] sm:$0xf] }
 0x45f   : > { %16073 = vst [vmem:[#allocation22_spill] sm:$0xff] %v15147_v2  ;;  %v15151_v60 = vpop.f32.mrf.mxu3  ;;  %9569 = vmatpush.bf16.msra.mxu1 %v11452_v31  ;;  %v8809_v38 = vor.u32 %v8808_v52, %v15164_v44  ;;  %v7488_v47 = vsel %vm11786_vm2, %v7483_v42, %v7487_v25  ;;  %v7499_v0 = vshll.u32 %v7190_v51, 16  ;;  %v7503_v10 = vshrl.u32 %v7190_v51, 16  ;;  %v9269_v42 = vld [vmem:[#allocation3 + $0x9c] sm:$0xe]  ;;  %v16080_v25 = vld [vmem:[#allocation36_spill] sm:$0xff] }
 0x460   : > { %9170 = vmatmul.bf16.gmra.mxu0 %v9062_v36  ;;  %16076 = vst [vmem:[#allocation21_spill] sm:$0xff] %v15176_v4  ;;  %v7189_v36 = vld [vmem:[#allocation3 + $0x9c] sm:$0xf]  ;;  %v15193_v31 = vrot.slane %v8812_v27, 5  ;;  %v10937_v37 = vrot.slane %v7847_v14, 9  ;;  %v7987_v39 = vrot.slane %v7985_v56, 4  ;;  %v7478_v52 = vsel %vm11786_vm2, %v7473_v1, %v15128_v6 }
 0x461   : > { %v9404_v51 = vrot.slane %v15184_v17, 5  ;;  %v7490_v27 = vshrl.u32 %v7189_v36, 16  ;;  %v8817_v2 = vshrl.u32 %v8600_v7, 16  ;;  %v8820_v4 = vshll.u32 %v8600_v7, 16 }
 0x462   : > { %v6411_v49 = vpop.f32.mrf.mxu2  ;;  %v7986_v14 = vsel %vm12348_vm13, %v10937_v37, %v7985_v56  ;;  %v7624_v58 = vunpack.c.l.b16 %v7478_v52 }
 0x463   : > { %v7735_v45 = vpop.f32.mrf.mxu1  ;;  %v6412_v24 = vadd.f32 %v6411_v49, %v16077_v59  ;;  %v9403_v49 = vrot.slane %v9401_v63, 4  ;;  %v15205_v59 = vrot.slane %v7499_v0, 5  ;;  %v8052_v56 = vunpack.c.l.b16 %v7986_v14 }
 0x464   : > { %v15186_v22 = vadd.f32 %v7735_v45, %v7126_v55  ;;  %v7988_v55 = vrot.slane %v15179_v5, 5  ;;  %v7493_v45 = vshll.u32 %v7189_v36, 16  ;;  %v8822_v14 = vrot.slane %v8820_v4, 5 }
 0x465   : > { %v15191_v62 = vadd.f32 %v15122_v33, %v6412_v24  ;;  %v7625_v33 = vunpack.c.l.b16 %v7488_v47  ;;  %v7505_v24 = vrot.slane %v7503_v10, 4  ;;  %v9405_v1 = vsel %vm12348_vm13, %v9403_v49, %v9404_v51  ;;  %v16081_v47 = vld [vmem:[#allocation27_spill] sm:$0xff]  ;;  %v16083_v10 = vld [vmem:[#allocation48_spill] sm:$0xff] }
 0x466   : > { %16078 = vst [vmem:[#allocation41_spill] sm:$0xff] %v15186_v22  ;;  %v7989_v6 = vsel %vm12348_vm13, %v7987_v39, %v7988_v55  ;;  %v16082_v22 = vld [vmem:[#allocation7_spill] sm:$0xff]  ;;  %v7492_v39 = vrot.slane %v7490_v27, 4  ;;  %v7495_v55 = vrot.slane %v7493_v45, 5  ;;  %v8819_v45 = vrot.slane %v8817_v2, 4 }
 0x467   : > { %16079 = vst [vmem:[#allocation8_spill] sm:$0xff] %v15191_v62  ;;  %v15198_v41 = vpop.f32.mrf.mxu3  ;;  %8173 = vmatmul.bf16.gmra.mxu2 %v16080_v25  ;;  %v8810_v62 = vrot.slane %v8809_v38, 4  ;;  %v11160_v25 = vrot.slane %v9269_v42, 9  ;;  %v7127_v36 = vadd.f32 %v16082_v22, %v16081_v47  ;;  %v8053_v0 = vunpack.c.l.b16 %v7989_v6  ;;  %v15221_v22 = vpop.f32.mrf.mxu0 }
 0x468   : > { %v7645_v7 = vpack.c.b16 %v7625_v33, %v7624_v58  ;;  %v7506_v42 = vor.u32 %v7505_v24, %v15205_v59  ;;  %v8805_v58 = vsel %vm11786_vm2, %v15181_v3, %v15164_v44  ;;  %v7496_v24 = vor.u32 %v7495_v55, %v7492_v39  ;;  %v16086_v44 = vld [vmem:[#allocation28_spill] sm:$0xff]  ;;  %v16087_v3 = vld [vmem:[#allocation26_spill] sm:$0xff] }
 0x469   : > { %v9402_v49 = vsel %vm12348_vm13, %v11160_v25, %v9401_v63  ;;  %v15219_v51 = vpack.c.b16 %v8053_v0, %v8052_v56  ;;  %v7509_v63 = vshll.u32 %v15179_v5, 16  ;;  %v8815_v33 = vsel %vm11786_vm2, %v8810_v62, %v15193_v31  ;;  %v15249_v0 = vld [vmem:[#allocation3 + $0xb0] sm:$0x1] }
 0x46a   : > { %v6414_v40 = vpop.f32.mrf.mxu2  ;;  %v7507_v5 = vrot.slane %v7506_v42, 4  ;;  %v7128_v47 = vadd.f32 %v16087_v3, %v16086_v44  ;;  %v15244_v31 = vunpack.c.l.b16 %v8805_v58  ;;  %v15246_v2 = vunpack.c.l.b16 %v8815_v33  ;;  %v8603_v42 = vld [vmem:[#allocation3 + $0x84] sm:$0xf]  ;;  %v15260_v58 = vld [vmem:[#allocation3 + $0xac] sm:$0xf] }
 0x46b   : > { %v7738_v37 = vpop.f32.mrf.mxu1  ;;  %v6415_v11 = vadd.f32 %v6414_v40, %v16083_v10  ;;  %v9063_v40 = vpack.c.b16 %v15173_v50, %v15168_v46  ;;  %v8826_v46 = vshll.u32 %v14933_v12, 16  ;;  %v8830_v50 = vshrl.u32 %v14933_v12, 16  ;;  %v7192_v12 = vld [vmem:[#allocation3 + $0xa8] sm:$0xf] }
 0x46c   : > { %8493 = vmatmul.bf16.gmra.mxu3 %v11425_v35  ;;  %v15216_v38 = vadd.f32 %v7738_v37, %v7127_v36  ;;  %v9474_v35 = vunpack.c.l.b16 %v9405_v1  ;;  %v7848_v1 = vld [vmem:[#allocation3 + $0xa8] sm:$0xe]  ;;  %v7511_v62 = vrot.slane %v7509_v63, 5  ;;  %v8823_v37 = vor.u32 %v8822_v14, %v8819_v45 }
 0x46d   : > { %v15224_v52 = vadd.f32 %v15151_v60, %v6415_v11  ;;  %v7193_v11 = vld [vmem:[#allocation3 + $0xac] sm:$0xf]  ;;  %v9473_v60 = vunpack.c.l.b16 %v9402_v49  ;;  %v15251_v10 = vrot.slane %v8826_v46, 5  ;;  %v8832_v39 = vrot.slane %v8830_v50, 4 }
 0x46e   : > { %7777 = vmatmul.bf16.gmra.mxu1 %v7645_v7  ;;  %v7992_v25 = vrot.slane %v7193_v11, 5  ;;  %v7497_v49 = vrot.slane %v7496_v24, 4  ;;  %v7512_v7 = vsel %vm11786_vm2, %v7507_v5, %v7511_v62  ;;  %v7523_v63 = vshll.u32 %v7193_v11, 16  ;;  %v16089_v5 = vld [vmem:[#allocation44_spill] sm:$0xff]  ;;  %v16090_v62 = vld [vmem:[#allocation29_spill] sm:$0xff] }
 0x46f   : > { %16084 = vst [vmem:[#allocation25_spill] sm:$0xff] %v15224_v52  ;;  %v15228_v27 = vpop.f32.mrf.mxu3  ;;  %v15240_v6 = vpack.c.b16 %v9474_v35, %v9473_v60  ;;  %v7514_v14 = vshrl.u32 %v7192_v12, 16  ;;  %v7517_v46 = vshll.u32 %v7192_v12, 16  ;;  %v7995_v50 = vrot.slane %v15249_v0, 5  ;;  %v15268_v24 = vpop.f32.mrf.mxu0 }
 0x470   : > { %9175 = vmatmul.bf16.gmra.mxu0 %v9063_v40  ;;  %v10938_v40 = vrot.slane %v7848_v1, 9  ;;  %v7994_v33 = vrot.slane %v7992_v25, 4  ;;  %v7502_v60 = vsel %vm11786_vm2, %v7497_v49, %v15205_v59  ;;  %v8836_v1 = vshll.u32 %v14966_v34, 16  ;;  %v11426_v49 = vld [vmem:[#allocation3 + $0x6c] sm:$0xff] }
 0x471   : > { %16085 = vst [vmem:[#allocation45_spill] sm:$0xff] %v15240_v6  ;;  %v7627_v3 = vunpack.c.l.b16 %v7512_v7  ;;  %v8841_v59 = vshrl.u32 %v8603_v42, 16  ;;  %v7626_v12 = vunpack.c.l.b16 %v7502_v60  ;;  %v7516_v34 = vrot.slane %v7514_v14, 4 }
 0x472   : > { %v6416_v36 = vpop.f32.mrf.mxu2  ;;  %v7993_v44 = vsel %vm12348_vm13, %v10938_v40, %v7992_v25  ;;  %v7519_v6 = vrot.slane %v7517_v46, 5  ;;  %v8854_v52 = vshrl.u32 %v15015_v54, 16 }
 0x473   : > { %v7740_v4 = vpop.f32.mrf.mxu1  ;;  %v6417_v56 = vadd.f32 %v6416_v36, %v14755_v43  ;;  %v7527_v43 = vshrl.u32 %v7193_v11, 16  ;;  %v8833_v11 = vor.u32 %v8832_v39, %v15251_v10  ;;  %v9408_v36 = vrot.slane %v15260_v58, 5 }
 0x474   : > { %v15253_v55 = vadd.f32 %v7740_v4, %v7128_v47  ;;  %v7996_v47 = vsel %vm12348_vm13, %v7994_v33, %v7995_v50  ;;  %v16091_v4 = vld [vmem:[#allocation10_spill] sm:$0xff]  ;;  %v8844_v33 = vshll.u32 %v8603_v42, 16  ;;  %v8850_v50 = vshll.u32 %v15015_v54, 16 }
 0x475   : > { %v15258_v35 = vadd.f32 %v15198_v41, %v6417_v56  ;;  %v8824_v41 = vrot.slane %v8823_v37, 4  ;;  %v7129_v56 = vadd.f32 %v16091_v4, %v16090_v62  ;;  %v15280_v37 = vrot.slane %v7523_v63, 5  ;;  %v15285_v62 = vld [vmem:[#allocation3 + $0xb0] sm:$0x1] }
 0x476   : > { %v7529_v39 = vrot.slane %v7527_v43, 4  ;;  %v8055_v25 = vunpack.c.l.b16 %v7996_v47  ;;  %v7646_v63 = vpack.c.b16 %v7627_v3, %v7626_v12  ;;  %v9410_v14 = vrot.slane %v9408_v36, 4 }
 0x477   : > { %16088 = vst [vmem:[#allocation36_spill] sm:$0xff] %v15258_v35  ;;  %v15265_v45 = vpop.f32.mrf.mxu3  ;;  %8178 = vmatmul.bf16.gmra.mxu2 %v16089_v5  ;;  %v8054_v35 = vunpack.c.l.b16 %v7993_v44  ;;  %v8829_v54 = vsel %vm11786_vm2, %v8824_v41, %v15251_v10  ;;  %v9270_v44 = vld [vmem:[#allocation3 + $0xa8] sm:$0xe]  ;;  %v7520_v3 = vor.u32 %v7519_v6, %v7516_v34  ;;  %v8834_v4 = vrot.slane %v8833_v11, 4 }
 0x478   : > { %v7530_v42 = vor.u32 %v7529_v39, %v15280_v37  ;;  %v8843_v12 = vrot.slane %v8841_v59, 4  ;;  %v8846_v10 = vrot.slane %v8844_v33, 5  ;;  %v15307_v41 = vrot.slane %v8850_v50, 5 }
 0x479   : > { %v15289_v43 = vpack.c.b16 %v8055_v25, %v8054_v35  ;;  %v7533_v35 = vshll.u32 %v15249_v0, 16  ;;  %v15311_v0 = vpop.f32.mrf.mxu0  ;;  %v15313_v39 = vunpack.c.l.b16 %v8829_v54  ;;  %v11161_v34 = vrot.slane %v9270_v44, 9  ;;  %v16093_v25 = vld [vmem:[#allocation31_spill] sm:$0xff] }
 0x47a   : > { %v6419_v5 = vpop.f32.mrf.mxu2  ;;  %v7531_v11 = vrot.slane %v7530_v42, 4 }
 0x47b   : > { %v7743_v7 = vpop.f32.mrf.mxu1  ;;  %v6420_v40 = vadd.f32 %v6419_v5, %v14793_v57  ;;  %v9064_v57 = vpack.c.b16 %v15246_v2, %v15244_v31  ;;  %v9411_v31 = vrot.slane %v15285_v62, 5  ;;  %v8838_v2 = vrot.slane %v8836_v1, 5 }
 0x47c   : > { %8498 = vmatmul.bf16.gmra.mxu3 %v11426_v49  ;;  %v15287_v60 = vadd.f32 %v7743_v7, %v7129_v56  ;;  %v7196_v56 = vld [vmem:[#allocation3 + $0xb8] sm:$0xf]  ;;  %v8856_v49 = vrot.slane %v8854_v52, 4  ;;  %v7849_v52 = vld [vmem:[#allocation3 + $0xb4] sm:$0xe]  ;;  %v9409_v44 = vsel %vm12348_vm13, %v11161_v34, %v9408_v36 }
 0x47d   : > { %v15292_v46 = vadd.f32 %v15228_v27, %v6420_v40  ;;  %v11451_v27 = vld [vmem:[%s15896_s3 + $0x200] sm:$0xff]  ;;  %v9412_v6 = vsel %vm12348_vm13, %v9410_v14, %v9411_v31  ;;  %v7999_v5 = vrot.slane %v7196_v56, 5  ;;  %v16094_v7 = vld [vmem:[#allocation11_spill] sm:$0xff]  ;;  %v7521_v40 = vrot.slane %v7520_v3, 4 }
 0x47e   : > { %16092 = vst [vmem:[#allocation27_spill] sm:$0xff] %v15287_v60  ;;  %7782 = vmatmul.bf16.gmra.mxu1 %v7646_v63  ;;  %v7130_v1 = vadd.f32 %v16094_v7, %v16093_v25  ;;  %v7535_v63 = vrot.slane %v7533_v35, 5  ;;  %v8839_v33 = vsel %vm11786_vm2, %v8834_v4, %v8838_v2  ;;  %v7547_v42 = vshll.u32 %v7196_v56, 16 }
 0x47f   : > { %v15300_v47 = vpop.f32.mrf.mxu3  ;;  %9570 = vmatpush.bf16.msra.mxu1 %v11451_v27  ;;  %v15320_v27 = vld [vmem:[#allocation3 + $0xbc] sm:$0x1]  ;;  %v7551_v54 = vshrl.u32 %v7196_v56, 16  ;;  %v7526_v3 = vsel %vm11786_vm2, %v7521_v40, %v15280_v37  ;;  %v8847_v35 = vor.u32 %v8846_v10, %v8843_v12  ;;  %v8857_v4 = vor.u32 %v8856_v49, %v15307_v41 }
 0x480   : > { %9180 = vmatmul.bf16.gmra.mxu0 %v9064_v57  ;;  %v7195_v57 = vld [vmem:[#allocation3 + $0xb4] sm:$0xf]  ;;  %v10939_v25 = vrot.slane %v7849_v52, 9  ;;  %v8001_v56 = vrot.slane %v7999_v5, 4  ;;  %v8002_v34 = vrot.slane %v15320_v27, 5  ;;  %v15339_v12 = vrot.slane %v7547_v42, 5 }
 0x481   : > { %v7538_v36 = vshrl.u32 %v7195_v57, 16  ;;  %v7541_v37 = vshll.u32 %v7195_v57, 16  ;;  %v7553_v10 = vrot.slane %v7551_v54, 4  ;;  %v9042_v40 = vunpack.c.l.b16 %v8839_v33 }
 0x482   : > { %v6421_v59 = vpop.f32.mrf.mxu2  ;;  %v8000_v49 = vsel %vm12348_vm13, %v10939_v25, %v7999_v5  ;;  %v15351_v57 = vrot.slane %v8847_v35, 4  ;;  %v15353_v42 = vrot.slane %v8857_v4, 4  ;;  %v8860_v54 = vshll.u32 %v15042_v32, 16  ;;  %v15357_v25 = vpop.f32.mrf.mxu0 }
 0x483   : > { %v7745_v50 = vpop.f32.mrf.mxu1  ;;  %v6422_v14 = vadd.f32 %v6421_v59, %v14841_v26  ;;  %v7536_v26 = vsel %vm11786_vm2, %v7531_v11, %v7535_v63  ;;  %v9476_v59 = vunpack.c.l.b16 %v9412_v6  ;;  %v8003_v63 = vsel %vm12348_vm13, %v8001_v56, %v8002_v34  ;;  %v16099_v6 = vld [vmem:[#allocation14_spill] sm:$0xff] }
 0x484   : > { %v15324_v31 = vadd.f32 %v7745_v50, %v7130_v1  ;;  %v9475_v1 = vunpack.c.l.b16 %v9409_v44  ;;  %v7629_v11 = vunpack.c.l.b16 %v7536_v26  ;;  %v16098_v50 = vld [vmem:[#allocation35_spill] sm:$0xff]  ;;  %v8056_v5 = vunpack.c.l.b16 %v8000_v49 }
 0x485   : > { %v15331_v2 = vadd.f32 %v15265_v45, %v6422_v14  ;;  %v15341_v45 = vld [vmem:[#allocation3 + $0xb8] sm:$0xf]  ;;  %v7131_v14 = vadd.f32 %v16099_v6, %v16098_v50  ;;  %v8057_v26 = vunpack.c.l.b16 %v8003_v63  ;;  %v7554_v35 = vor.u32 %v7553_v10, %v15339_v12  ;;  %v9271_v63 = vld [vmem:[#allocation3 + $0xb4] sm:$0xe] }
 0x486   : > { %16095 = vst [vmem:[#allocation7_spill] sm:$0xff] %v15324_v31  ;;  %v15347_v52 = vpack.c.b16 %v9476_v59, %v9475_v1  ;;  %v7628_v31 = vunpack.c.l.b16 %v7526_v3  ;;  %v9415_v33 = vrot.slane %v15341_v45, 5  ;;  %v7540_v1 = vrot.slane %v7538_v36, 4  ;;  %v15364_v3 = vld [vmem:[#allocation3 + $0x90] sm:$0xf] }
 0x487   : > { %16096 = vst [vmem:[#allocation48_spill] sm:$0xff] %v15331_v2  ;;  %v15335_v7 = vpop.f32.mrf.mxu3  ;;  %8183 = vmatmul.bf16.gmra.mxu2 %v14750_v53  ;;  %v11427_v53 = vld [vmem:[#allocation3 + $0x78] sm:$0xff]  ;;  %v7543_v59 = vrot.slane %v7541_v37, 5  ;;  %v7557_v32 = vshll.u32 %v15320_v27, 16  ;;  %v15366_v49 = vpack.c.b16 %v8057_v26, %v8056_v5  ;;  %v7850_v36 = vld [vmem:[#allocation3 + $0xc0] sm:$0xe]  ;;  %v9065_v37 = vpack.c.b16 %v9042_v40, %v15313_v39 }
 0x488   : > { %16097 = vst [vmem:[#allocation28_spill] sm:$0xff] %v15347_v52  ;;  %v7647_v50 = vpack.c.b16 %v7629_v11, %v7628_v31  ;;  %v15371_v52 = vld [vmem:[#allocation3 + $0xc4] sm:$0xf]  ;;  %v8862_v31 = vrot.slane %v8860_v54, 5  ;;  %v9417_v11 = vrot.slane %v9415_v33, 4  ;;  %v11162_v5 = vrot.slane %v9271_v63, 9 }
 0x489   : > { %v10940_v40 = vrot.slane %v7850_v36, 9  ;;  %v8006_v26 = vrot.slane %v15371_v52, 5  ;;  %v16103_v54 = vld [vmem:[#allocation33_spill] sm:$0xff]  ;;  %v16107_v2 = vld [vmem:[#allocation42_spill] sm:$0xff] }
 0x48a   : > { %v6424_v44 = vpop.f32.mrf.mxu2  ;;  %v8863_v39 = vsel %vm11786_vm2, %v15353_v42, %v8862_v31 }
 0x48b   : > { %v7748_v56 = vpop.f32.mrf.mxu1  ;;  %v6425_v34 = vadd.f32 %v6424_v44, %v14892_v16  ;;  %v15373_v16 = vld [vmem:[#allocation3 + $0xbc] sm:$0x1]  ;;  %v8008_v44 = vrot.slane %v8006_v26, 4  ;;  %v9044_v60 = vunpack.c.l.b16 %v8863_v39 }
 0x48c   : > { %8503 = vmatmul.bf16.gmra.mxu3 %v11427_v53  ;;  %v15361_v4 = vadd.f32 %v7748_v56, %v7131_v14  ;;  %v7544_v14 = vor.u32 %v7543_v59, %v7540_v1  ;;  %v15382_v53 = vld [vmem:[#allocation3 + $0xc8] sm:$0x1]  ;;  %v9418_v56 = vrot.slane %v15373_v16, 5  ;;  %v7559_v1 = vrot.slane %v7557_v32, 5 }
 0x48d   : > { %v15369_v6 = vadd.f32 %v15300_v47, %v6425_v34  ;;  %v7555_v47 = vrot.slane %v7554_v35, 4  ;;  %v16102_v34 = vld [vmem:[#allocation39_spill] sm:$0xff]  ;;  %v9416_v35 = vsel %vm12348_vm13, %v11162_v5, %v9415_v33  ;;  %v8009_v42 = vrot.slane %v15382_v53, 5  ;;  %v15404_v33 = vld [vmem:[#allocation3 + $0xc4] sm:$0xf] }
 0x48e   : > { %16100 = vst [vmem:[#allocation26_spill] sm:$0xff] %v15361_v4  ;;  %7787 = vmatmul.bf16.gmra.mxu1 %v7647_v50  ;;  %v7132_v50 = vadd.f32 %v16103_v54, %v16102_v34  ;;  %v9419_v36 = vsel %vm12348_vm13, %v9417_v11, %v9418_v56  ;;  %v7545_v34 = vrot.slane %v7544_v14, 4  ;;  %v7571_v54 = vshll.u32 %v15371_v52, 16  ;;  %v9272_v5 = vld [vmem:[#allocation3 + $0xc0] sm:$0xe]  ;;  %v15411_v4 = vpop.f32.mrf.mxu0 }
 0x48f   : > { %16101 = vst [vmem:[#allocation44_spill] sm:$0xff] %v15369_v6  ;;  %v15376_v10 = vpop.f32.mrf.mxu3  ;;  %v7560_v32 = vsel %vm11786_vm2, %v7555_v47, %v7559_v1  ;;  %v8010_v11 = vsel %vm12348_vm13, %v8008_v44, %v8009_v42  ;;  %v9477_v56 = vunpack.c.l.b16 %v9416_v35  ;;  %v15416_v14 = vld [vmem:[#allocation3 + $0xc8] sm:$0x1] }
 0x490   : > { %9185 = vmatmul.bf16.gmra.mxu0 %v9065_v37  ;;  %v8007_v37 = vsel %vm12348_vm13, %v10940_v40, %v8006_v26  ;;  %v7198_v40 = vld [vmem:[#allocation3 + $0xc0] sm:$0xf]  ;;  %v7575_v26 = vshrl.u32 %v15371_v52, 16  ;;  %v8059_v1 = vunpack.c.l.b16 %v8010_v11  ;;  %v9422_v52 = vrot.slane %v15404_v33, 5  ;;  %v11428_v11 = vld [vmem:[#allocation3 + $0x84] sm:$0xff] }
 0x491   : > { %v8058_v47 = vunpack.c.l.b16 %v8007_v37  ;;  %v7550_v44 = vsel %vm11786_vm2, %v7545_v34, %v15339_v12  ;;  %v7631_v37 = vunpack.c.l.b16 %v7560_v32  ;;  %v16108_v12 = vld [vmem:[#allocation38_spill] sm:$0xff] }
 0x492   : > { %v6426_v63 = vpop.f32.mrf.mxu2  ;;  %v7577_v6 = vrot.slane %v7575_v26, 4  ;;  %v7133_v34 = vadd.f32 %v16108_v12, %v16107_v2  ;;  %v16109_v2 = vsel %vm11786_vm2, %v15351_v57, %v15307_v41  ;;  %v7581_v41 = vshll.u32 %v15382_v53, 16 }
 0x493   : > { %v7750_v31 = vpop.f32.mrf.mxu1  ;;  %v6427_v27 = vadd.f32 %v6426_v63, %v14921_v23  ;;  %v9478_v63 = vunpack.c.l.b16 %v9419_v36  ;;  %v9043_v26 = vunpack.c.l.b16 %v16109_v2 }
 0x494   : > { %v15406_v59 = vadd.f32 %v7750_v31, %v7132_v50  ;;  %v8874_v50 = vshll.u32 %v15089_v15, 16  ;;  %v8878_v31 = vshrl.u32 %v15089_v15, 16  ;;  %v9424_v15 = vrot.slane %v9422_v52, 4 }
 0x495   : > { %v15414_v23 = vadd.f32 %v15335_v7, %v6427_v27  ;;  %v7562_v7 = vshrl.u32 %v7198_v40, 16  ;;  %v15425_v27 = vpack.c.b16 %v8059_v1, %v8058_v47  ;;  %v15427_v35 = vpack.c.b16 %v9478_v63, %v9477_v56 }
 0x496   : > { %16104 = vst [vmem:[#allocation29_spill] sm:$0xff] %v15406_v59  ;;  %v11163_v59 = vrot.slane %v9272_v5, 9  ;;  %v9425_v5 = vrot.slane %v15416_v14, 5  ;;  %v7630_v1 = vunpack.c.l.b16 %v7550_v44  ;;  %v15434_v56 = vrot.slane %v8874_v50, 5 }
 0x497   : > { %16105 = vst [vmem:[#allocation10_spill] sm:$0xff] %v15414_v23  ;;  %8188 = vmatmul.bf16.gmra.mxu2 %v14839_v18  ;;  %v8466_v42 = vpop.f32.mrf.mxu3  ;;  %v7565_v18 = vshll.u32 %v7198_v40, 16  ;;  %v7573_v23 = vrot.slane %v7571_v54, 5  ;;  %v7564_v50 = vrot.slane %v7562_v7, 4 }
 0x498   : > { %16106 = vst [vmem:[#allocation31_spill] sm:$0xff] %v15427_v35  ;;  %v9423_v36 = vsel %vm12348_vm13, %v11163_v59, %v9422_v52  ;;  %v9426_v32 = vsel %vm12348_vm13, %v9424_v15, %v9425_v5  ;;  %v8880_v52 = vrot.slane %v8878_v31, 4  ;;  %v7648_v54 = vpack.c.b16 %v7631_v37, %v7630_v1 }
 0x499   : > { %v9479_v35 = vunpack.c.l.b16 %v9423_v36  ;;  %v9480_v39 = vunpack.c.l.b16 %v9426_v32  ;;  %v7567_v15 = vrot.slane %v7565_v18, 5  ;;  %v7578_v5 = vor.u32 %v7577_v6, %v7573_v23  ;;  %v16113_v18 = vld [vmem:[#allocation43_spill] sm:$0xff] }
 0x49a   : > { %v8149_v47 = vpop.f32.mrf.mxu2  ;;  %v9066_v31 = vpack.c.b16 %v9044_v60, %v9043_v26  ;;  %v16110_v36 = vshrl.u32 %v15364_v3, 16  ;;  %v16111_v37 = vshll.u32 %v15364_v3, 16  ;;  %v8881_v57 = vor.u32 %v8880_v52, %v15434_v56 }
 0x49b   : > { %v7753_v63 = vpop.f32.mrf.mxu1  ;;  %v8229_v59 = vadd.f32 %v8149_v47, %v14969_v9  ;;  %v15449_v9 = vpack.c.b16 %v9480_v39, %v9479_v35  ;;  %v7579_v7 = vrot.slane %v7578_v5, 4  ;;  %v8884_v6 = vshll.u32 %v15105_v20, 16  ;;  %v16112_v35 = vld [vmem:[#allocation46_spill] sm:$0xff] }
 0x49c   : > { %8508 = vmatmul.bf16.gmra.mxu3 %v11428_v11  ;;  %v15439_v40 = vadd.f32 %v7753_v63, %v7133_v34  ;;  %v8867_v11 = vrot.slane %v16110_v36, 4  ;;  %v8870_v12 = vrot.slane %v16111_v37, 5  ;;  %v15455_v34 = vpop.f32.mrf.mxu0  ;;  %v7134_v60 = vadd.f32 %v16113_v18, %v16112_v35 }
 0x49d   : > { %v15447_v44 = vadd.f32 %v15376_v10, %v8229_v59  ;;  %v7568_v10 = vor.u32 %v7567_v15, %v7564_v50  ;;  %v7583_v59 = vrot.slane %v7581_v41, 5  ;;  %v8882_v39 = vrot.slane %v8881_v57, 4  ;;  %v8609_v15 = vld [vmem:[#allocation3 + $0x9c] sm:$0xf] }
 0x49e   : > { %7792 = vmatmul.bf16.gmra.mxu1 %v7648_v54  ;;  %v8871_v32 = vor.u32 %v8870_v12, %v8867_v11  ;;  %v8886_v20 = vrot.slane %v8884_v6, 5  ;;  %v8898_v5 = vshll.u32 %v15166_v48, 16  ;;  %v11429_v11 = vld [vmem:[#allocation3 + $0x90] sm:$0xff]  ;;  %v16115_v12 = vld [vmem:[#allocation47_spill] sm:$0xff] }
 0x49f   : > { %v8469_v1 = vpop.f32.mrf.mxu3  ;;  %v7569_v52 = vrot.slane %v7568_v10, 4  ;;  %v7584_v2 = vsel %vm11786_vm2, %v7579_v7, %v7583_v59  ;;  %v8889_v7 = vshrl.u32 %v8609_v15, 16 }
 0x4a0   : > { %9190 = vmatmul.bf16.gmra.mxu0 %v9066_v31  ;;  %v8872_v26 = vrot.slane %v8871_v32, 4  ;;  %v7633_v31 = vunpack.c.l.b16 %v7584_v2  ;;  %v8900_v18 = vrot.slane %v8898_v5, 5 }
 0x4a1   : > { %v7574_v50 = vsel %vm11786_vm2, %v7569_v52, %v7573_v23 }
 0x4a2   : > { %v8151_v47 = vpop.f32.mrf.mxu2  ;;  %v8877_v37 = vsel %vm11786_vm2, %v8872_v26, %v15434_v56  ;;  %v7632_v57 = vunpack.c.l.b16 %v7574_v50  ;;  %v16117_v26 = vld [vmem:[#allocation51_spill] sm:$0xff] }
 0x4a3   : > { %v7755_v63 = vpop.f32.mrf.mxu1  ;;  %v8230_v3 = vadd.f32 %v8151_v47, %v15021_v29  ;;  %v8887_v29 = vsel %vm11786_vm2, %v8882_v39, %v8886_v20  ;;  %v8891_v39 = vrot.slane %v8889_v7, 4  ;;  %v8908_v20 = vshll.u32 %v15184_v17, 16 }
 0x4a4   : > { %v15463_v54 = vadd.f32 %v7755_v63, %v7134_v60  ;;  %v15476_v36 = vpop.f32.mrf.mxu0  ;;  %v9046_v10 = vunpack.c.l.b16 %v8887_v29  ;;  %v7649_v32 = vpack.c.b16 %v7633_v31, %v7632_v57  ;;  %v8922_v57 = vshll.u32 %v15260_v58, 16 }
 0x4a5   : > { %v15465_v53 = vadd.f32 %v8466_v42, %v8230_v3  ;;  %v8902_v42 = vshrl.u32 %v15166_v48, 16  ;;  %v8892_v48 = vshll.u32 %v8609_v15, 16  ;;  %v9045_v3 = vunpack.c.l.b16 %v8877_v37 }
 0x4a7   : > { %8193 = vmatmul.bf16.gmra.mxu2 %v14919_v61  ;;  %v16114_v61 = vld [vmem:[#allocation49_spill] sm:$0xff]  ;;  %v8904_v60 = vrot.slane %v8902_v42, 4  ;;  %v8471_v63 = vpop.f32.mrf.mxu3  ;;  %v9067_v59 = vpack.c.b16 %v9046_v10, %v9045_v3  ;;  %v8894_v52 = vrot.slane %v8892_v48, 5  ;;  %v8926_v10 = vshrl.u32 %v15260_v58, 16 }
 0x4a8   : > { %v7135_v41 = vadd.f32 %v16115_v12, %v16114_v61  ;;  %v8910_v61 = vrot.slane %v8908_v20, 5 }
 0x4a9   : > { %v8905_v2 = vor.u32 %v8904_v60, %v8900_v18  ;;  %v8895_v31 = vor.u32 %v8894_v52, %v8891_v39  ;;  %v8924_v39 = vrot.slane %v8922_v57, 5  ;;  %v8928_v52 = vrot.slane %v8926_v10, 4 }
 0x4aa   : > { %v8154_v23 = vpop.f32.mrf.mxu2 }
 0x4ab   : > { %v7758_v6 = vpop.f32.mrf.mxu1  ;;  %v8231_v35 = vadd.f32 %v8154_v23, %v15065_v8  ;;  %v16116_v8 = vld [vmem:[#allocation52_spill] sm:$0xff]  ;;  %v8896_v17 = vrot.slane %v8895_v31, 4  ;;  %v8612_v23 = vld [vmem:[#allocation3 + $0xa8] sm:$0xf]  ;;  %v16121_v31 = vld [vmem:[#allocation55_spill] sm:$0xff] }
 0x4ac   : > { %8513 = vmatmul.bf16.gmra.mxu3 %v11429_v11  ;;  %v15484_v47 = vadd.f32 %v7758_v6, %v7135_v41  ;;  %v7136_v50 = vadd.f32 %v16117_v26, %v16116_v8  ;;  %v15491_v15 = vpop.f32.mrf.mxu0  ;;  %v16118_v6 = vld [vmem:[#allocation53_spill] sm:$0xff] }
 0x4ad   : > { %v15486_v56 = vadd.f32 %v8469_v1, %v8231_v35  ;;  %v8906_v1 = vrot.slane %v8905_v2, 4  ;;  %v8901_v7 = vsel %vm11786_vm2, %v8896_v17, %v8900_v18  ;;  %v7137_v35 = vadd.f32 %v16118_v6, %v14802_v19  ;;  %v16120_v18 = vld [vmem:[#allocation12_spill] sm:$0xff] }
 0x4ae   : > { %7797 = vmatmul.bf16.gmra.mxu1 %v7649_v32  ;;  %v8913_v32 = vshrl.u32 %v8612_v23, 16  ;;  %v9047_v58 = vunpack.c.l.b16 %v8901_v7 }
 0x4af   : > { %v8474_v12 = vpop.f32.mrf.mxu3  ;;  %v8911_v41 = vsel %vm11786_vm2, %v8906_v1, %v8910_v61  ;;  %v16122_v1 = vld [vmem:[#allocation56_spill] sm:$0xff] }
 0x4b0   : > { %9195 = vmatmul.bf16.gmra.mxu0 %v9067_v59  ;;  %v9048_v60 = vunpack.c.l.b16 %v8911_v41  ;;  %v8916_v59 = vshll.u32 %v8612_v23, 16  ;;  %v8915_v26 = vrot.slane %v8913_v32, 4  ;;  %v7138_v61 = vadd.f32 %v16122_v1, %v16121_v31  ;;  %v16123_v23 = vld [vmem:[#allocation41_spill] sm:$0xff]  ;;  %v8615_v32 = vld [vmem:[#allocation3 + $0xb4] sm:$0xf] }
 0x4b1   : > { %v8940_v31 = vshll.u32 %v8615_v32, 16 }
 0x4b2   : > { %v8156_v29 = vpop.f32.mrf.mxu2  ;;  %v9068_v19 = vpack.c.b16 %v9048_v60, %v9047_v58  ;;  %v16125_v58 = vld [vmem:[#allocation57_spill] sm:$0xff] }
 0x4b3   : > { %v7760_v5 = vpop.f32.mrf.mxu1  ;;  %v8232_v42 = vadd.f32 %v8156_v29, %v15109_v28  ;;  %v11430_v28 = vld [vmem:[#allocation3 + $0x9c] sm:$0xff]  ;;  %v8929_v29 = vor.u32 %v8928_v52, %v8924_v39 }
 0x4b4   : > { %v15494_v11 = vadd.f32 %v7760_v5, %v7136_v50  ;;  %v15510_v20 = vpop.f32.mrf.mxu0  ;;  %v8918_v50 = vrot.slane %v8916_v59, 5 }
 0x4b5   : > { %v15496_v37 = vadd.f32 %v8471_v63, %v8232_v42  ;;  %v16119_v63 = vld [vmem:[#allocation37_spill] sm:$0xff]  ;;  %v8932_v42 = vshll.u32 %v15285_v62, 16 }
 0x4b6   : > { %v8919_v10 = vor.u32 %v8918_v50, %v8915_v26 }
 0x4b7   : > { %8198 = vmatmul.bf16.gmra.mxu2 %v15040_v21  ;;  %v8476_v5 = vpop.f32.mrf.mxu3  ;;  %v8934_v6 = vrot.slane %v8932_v42, 5 }
 0x4b8   : > { %v8920_v60 = vrot.slane %v8919_v10, 4  ;;  %v8942_v10 = vrot.slane %v8940_v31, 5  ;;  %v16130_v31 = vld [vmem:[#allocation62_spill] sm:$0xff] }
 0x4ba   : > { %v8159_v48 = vpop.f32.mrf.mxu2  ;;  %v8925_v59 = vsel %vm11786_vm2, %v8920_v60, %v8924_v39  ;;  %v16127_v39 = vld [vmem:[#allocation13_spill] sm:$0xff] }
 0x4bb   : > { %v7763_v21 = vpop.f32.mrf.mxu1  ;;  %v8233_v3 = vadd.f32 %v8159_v48, %v16119_v63  ;;  %v16124_v48 = vld [vmem:[#allocation24_spill] sm:$0xff]  ;;  %v8950_v63 = vshrl.u32 %v15341_v45, 16  ;;  %v16129_v60 = vld [vmem:[#allocation61_spill] sm:$0xff] }
 0x4bc   : > { %8518 = vmatmul.bf16.gmra.mxu3 %v11430_v28  ;;  %v15508_v2 = vadd.f32 %v7763_v21, %v7137_v35  ;;  %v15523_v35 = vpop.f32.mrf.mxu0  ;;  %v8946_v21 = vshll.u32 %v15341_v45, 16  ;;  %v9049_v45 = vunpack.c.l.b16 %v8925_v59 }
 0x4bd   : > { %v15512_v8 = vadd.f32 %v8474_v12, %v8233_v3  ;;  %v8930_v12 = vrot.slane %v8929_v29, 4  ;;  %v11431_v3 = vld [vmem:[#allocation3 + $0xa8] sm:$0xff]  ;;  %v8937_v29 = vshrl.u32 %v8615_v32, 16 }
 0x4be   : > { %9571 = vmatmul.bf16.vlgmr.msra.gmra.mxu1 %v16120_v18  ;;  %v16126_v18 = vld [vmem:[#allocation58_spill] sm:$0xff]  ;;  %v8948_v1 = vrot.slane %v8946_v21, 5 }
 0x4bf   : > { %v8935_v62 = vsel %vm11786_vm2, %v8930_v12, %v8934_v6  ;;  %v8479_v52 = vpop.f32.mrf.mxu3 }
 0x4c0   : > { %9200 = vmatmul.bf16.gmra.mxu0 %v9068_v19  ;;  %v7139_v19 = vadd.f32 %v16126_v18, %v16125_v58  ;;  %v9050_v50 = vunpack.c.l.b16 %v8935_v62 }
 0x4c2   : > { %v8161_v17 = vpop.f32.mrf.mxu2 }
 0x4c3   : > { %v7765_v41 = vpop.f32.mrf.mxu1  ;;  %v8234_v57 = vadd.f32 %v8161_v17, %v16123_v23  ;;  %v9069_v23 = vpack.c.b16 %v9050_v50, %v9049_v45  ;;  %v8970_v50 = vshll.u32 %v15404_v33, 16 }
 0x4c4   : > { %v15519_v28 = vadd.f32 %v7765_v41, %v7138_v61  ;;  %v8952_v61 = vrot.slane %v8950_v63, 4  ;;  %v15540_v6 = vpop.f32.mrf.mxu0 }
 0x4c5   : > { %v15521_v7 = vadd.f32 %v8476_v5, %v8234_v57  ;;  %v8939_v57 = vrot.slane %v8937_v29, 4  ;;  %v8974_v29 = vshrl.u32 %v15404_v33, 16 }
 0x4c6   : > { %v8953_v12 = vor.u32 %v8952_v61, %v8948_v1  ;;  %v16131_v61 = vld [vmem:[#allocation19_spill] sm:$0xff] }
 0x4c7   : > { %8203 = vmatmul.bf16.gmra.mxu2 %v16124_v48  ;;  %v16128_v48 = vld [vmem:[#allocation59_spill] sm:$0xff]  ;;  %v7141_v45 = vadd.f32 %v16131_v61, %v16130_v31  ;;  %v11433_v31 = vld [vmem:[#allocation3 + $0xc0] sm:$0xff]  ;;  %v16135_v61 = vld [vmem:[#allocation9_spill] sm:$0xff] }
 0x4c8   : > { %v7140_v62 = vadd.f32 %v16129_v60, %v16128_v48  ;;  %v8954_v59 = vrot.slane %v8953_v12, 4  ;;  %v8972_v12 = vrot.slane %v8970_v50, 5  ;;  %v16132_v60 = vld [vmem:[#allocation30_spill] sm:$0xff] }
 0x4ca   : > { %v8164_v26 = vpop.f32.mrf.mxu2 }
 0x4cb   : > { %v7768_v5 = vpop.f32.mrf.mxu1  ;;  %v8235_v42 = vadd.f32 %v8164_v26, %v15216_v38  ;;  %v8956_v38 = vshll.u32 %v15373_v16, 16 }
 0x4cc   : > { %8523 = vmatmul.bf16.gmra.mxu3 %v11431_v3  ;;  %v15535_v17 = vadd.f32 %v7768_v5, %v7139_v19  ;;  %v8943_v3 = vor.u32 %v8942_v10, %v8939_v57  ;;  %v8618_v5 = vld [vmem:[#allocation3 + $0xc0] sm:$0xf] }
 0x4cd   : > { %v15537_v41 = vadd.f32 %v8479_v52, %v8235_v42  ;;  %v8481_v52 = vpop.f32.mrf.mxu3  ;;  %v8958_v19 = vrot.slane %v8956_v38, 5  ;;  %v8961_v57 = vshrl.u32 %v8618_v5, 16  ;;  %v8964_v10 = vshll.u32 %v8618_v5, 16 }
 0x4ce   : > { %9576 = vmatmul.bf16.gmra.mxu1 %v16127_v39  ;;  %v8944_v26 = vrot.slane %v8943_v3, 4  ;;  %v8976_v38 = vrot.slane %v8974_v29, 4  ;;  %v16133_v3 = vld [vmem:[#allocation17_spill] sm:$0xff] }
 0x4cf   : > { %v8959_v16 = vsel %vm11786_vm2, %v8954_v59, %v8958_v19  ;;  %v16134_v59 = vld [vmem:[#allocation23_spill] sm:$0xff] }
 0x4d0   : > { %9205 = vmatmul.bf16.gmra.mxu0 %v9069_v23  ;;  %v8949_v42 = vsel %vm11786_vm2, %v8944_v26, %v8948_v1  ;;  %v9052_v39 = vunpack.c.l.b16 %v8959_v16  ;;  %v15559_v23 = vpop.f32.mrf.mxu0  ;;  %v8966_v1 = vrot.slane %v8964_v10, 5 }
 0x4d1   : > { %v9051_v33 = vunpack.c.l.b16 %v8949_v42 }
 0x4d2   : > { %v8166_v32 = vpop.f32.mrf.mxu2 }
 0x4d3   : > { %v7770_v21 = vpop.f32.mrf.mxu1  ;;  %v8236_v63 = vadd.f32 %v8166_v32, %v15253_v55  ;;  %v11432_v55 = vld [vmem:[#allocation3 + $0xb4] sm:$0xff]  ;;  %v8963_v32 = vrot.slane %v8961_v57, 4 }
 0x4d4   : > { %v15546_v58 = vadd.f32 %v7770_v21, %v7140_v62  ;;  %v9070_v62 = vpack.c.b16 %v9052_v39, %v9051_v33  ;;  %v8977_v21 = vor.u32 %v8976_v38, %v8972_v12  ;;  %v16137_v33 = vld [vmem:[#allocation34_spill] sm:$0xff] }
 0x4d5   : > { %v15548_v18 = vadd.f32 %v8481_v52, %v8236_v63  ;;  %v8980_v63 = vshll.u32 %v15416_v14, 16  ;;  %v7142_v52 = vadd.f32 %v16134_v59, %v16133_v3  ;;  %v8967_v26 = vor.u32 %v8966_v1, %v8963_v32  ;;  %v16139_v32 = vld [vmem:[#allocation21_spill] sm:$0xff]  ;;  %v15587_v3 = vld [vmem:[#allocation3 + $0xd0] sm:$0xf]  ;;  %v15589_v59 = vld [vmem:[#allocation3 + $0xd4] sm:$0x1] }
 0x4d6   : > { %v8978_v16 = vrot.slane %v8977_v21, 4 }
 0x4d7   : > { %8208 = vmatmul.bf16.gmra.mxu2 %v15219_v51  ;;  %v8982_v5 = vrot.slane %v8980_v63, 5  ;;  %v8621_v63 = vld [vmem:[#allocation3 + $0xcc] sm:$0xf] }
 0x4d8   : > { %v15569_v29 = vpop.f32.mrf.mxu0 }
 0x4d9   : > { %v8983_v42 = vsel %vm11786_vm2, %v8978_v16, %v8982_v5  ;;  %v8998_v16 = vshrl.u32 %v15587_v3, 16  ;;  %v9004_v5 = vshll.u32 %v15589_v59, 16 }
 0x4db   : > { %v7773_v51 = vpop.f32.mrf.mxu1 }
 0x4dc   : > { %8528 = vmatmul.bf16.gmra.mxu3 %v11432_v55  ;;  %v15561_v48 = vadd.f32 %v7773_v51, %v7141_v45  ;;  %v8968_v55 = vrot.slane %v8967_v26, 4  ;;  %v16136_v45 = vld [vmem:[#allocation20_spill] sm:$0xff]  ;;  %v9054_v51 = vunpack.c.l.b16 %v8983_v42  ;;  %v8994_v26 = vshll.u32 %v15587_v3, 16 }
 0x4dd   : > { %v7143_v39 = vadd.f32 %v16136_v45, %v16135_v61  ;;  %v9000_v61 = vrot.slane %v8998_v16, 4 }
 0x4de   : > { %9581 = vmatmul.bf16.gmra.mxu1 %v16132_v60  ;;  %v8973_v14 = vsel %vm11786_vm2, %v8968_v55, %v8972_v12  ;;  %v11434_v55 = vld [vmem:[#allocation3 + $0xcc] sm:$0xff] }
 0x4df   : > { %v9053_v38 = vunpack.c.l.b16 %v8973_v14  ;;  %v8996_v14 = vrot.slane %v8994_v26, 5 }
 0x4e0   : > { %9210 = vmatmul.bf16.gmra.mxu0 %v9070_v62  ;;  %v15581_v60 = vpop.f32.mrf.mxu0  ;;  %v16138_v62 = vld [vmem:[#allocation32_spill] sm:$0xff] }
 0x4e1   : > { %v7144_v1 = vadd.f32 %v16139_v32, %v16138_v62 }
 0x4e3   : > { %v7775_v19 = vpop.f32.mrf.mxu1 }
 0x4e4   : > { %v15567_v50 = vadd.f32 %v7775_v19, %v7142_v52  ;;  %v8985_v52 = vshrl.u32 %v8621_v63, 16  ;;  %v8988_v19 = vshll.u32 %v8621_v63, 16 }
 0x4e6   : > { %v8987_v42 = vrot.slane %v8985_v52, 4 }
 0x4e7   : > { %8213 = vmatmul.bf16.gmra.mxu2 %v15289_v43  ;;  %v9071_v43 = vpack.c.b16 %v9054_v51, %v9053_v38  ;;  %v16140_v51 = vld [vmem:[#allocation22_spill] sm:$0xff]  ;;  %v9001_v38 = vor.u32 %v9000_v61, %v8996_v14 }
 0x4e8   : > { %v15595_v45 = vpop.f32.mrf.mxu0 }
 0x4eb   : > { %v7778_v57 = vpop.f32.mrf.mxu1 }
 0x4ec   : > { %8533 = vmatmul.bf16.gmra.mxu3 %v11433_v31  ;;  %v15578_v10 = vadd.f32 %v7778_v57, %v7143_v39  ;;  %v8990_v31 = vrot.slane %v8988_v19, 5  ;;  %v7145_v57 = vadd.f32 %v15221_v22, %v16140_v51  ;;  %v16142_v22 = vld [vmem:[#allocation8_spill] sm:$0xff] }
 0x4ed   : > { %v7146_v16 = vadd.f32 %v15268_v24, %v16142_v22  ;;  %v16145_v51 = vld [vmem:[#allocation36_spill] sm:$0xff] }
 0x4ee   : > { %9586 = vmatmul.bf16.gmra.mxu1 %v16137_v33  ;;  %v8991_v39 = vor.u32 %v8990_v31, %v8987_v42  ;;  %v9006_v33 = vrot.slane %v9004_v5, 5  ;;  %v16143_v31 = vld [vmem:[#allocation25_spill] sm:$0xff] }
 0x4f0   : > { %9215 = vmatmul.bf16.gmra.mxu0 %v9071_v43  ;;  %v8992_v62 = vrot.slane %v8991_v39, 4  ;;  %v15608_v5 = vpop.f32.mrf.mxu0  ;;  %v16144_v39 = vld [vmem:[#allocation50_spill] sm:$0xff] }
 0x4f3   : > { %v7780_v21 = vpop.f32.mrf.mxu1 }
 0x4f4   : > { %v15585_v12 = vadd.f32 %v7780_v21, %v7144_v1  ;;  %v9002_v1 = vrot.slane %v9001_v38, 4  ;;  %v16141_v21 = vld [vmem:[#allocation40_spill] sm:$0xff] }
 0x4f6   : > { %v9007_v63 = vsel %vm11786_vm2, %v9002_v1, %v9006_v33  ;;  %v7149_v33 = vadd.f32 %v15411_v4, %v15292_v46  ;;  %v16149_v46 = vld [vmem:[#allocation60_spill] sm:$0xff]  ;;  %v16150_v4 = vld [vmem:[#allocation10_spill] sm:$0xff] }
 0x4f7   : > { %8218 = vmatmul.bf16.gmra.mxu2 %v15366_v49  ;;  %v8997_v49 = vsel %vm11786_vm2, %v8992_v62, %v8996_v14  ;;  %v9056_v19 = vunpack.c.l.b16 %v9007_v63  ;;  %v7147_v14 = vadd.f32 %v15311_v0, %v16143_v31  ;;  %v16146_v62 = vld [vmem:[#allocation54_spill] sm:$0xff]  ;;  %v16147_v0 = vld [vmem:[#allocation48_spill] sm:$0xff] }
 0x4f8   : > { %v9055_v52 = vunpack.c.l.b16 %v8997_v49  ;;  %v7150_v1 = vadd.f32 %v15455_v34, %v16147_v0  ;;  %v9226_v34 = vadd.f32 %v15510_v20, %v15447_v44  ;;  %v9227_v20 = vadd.f32 %v15523_v35, %v15465_v53 }
 0x4f9   : > { %v9228_v53 = vadd.f32 %v15540_v6, %v15486_v56 }
 0x4fa   : > { %v9072_v26 = vpack.c.b16 %v9056_v19, %v9055_v52 }
 0x4fb   : > { %v7783_v43 = vpop.f32.mrf.mxu1 }
 0x4fc   : > { %8538 = vmatmul.bf16.gmra.mxu3 %v11434_v55  ;;  %v15599_v32 = vadd.f32 %v7783_v43, %v7145_v57  ;;  %v7148_v57 = vadd.f32 %v15357_v25, %v16145_v51  ;;  %v16148_v25 = vld [vmem:[#allocation44_spill] sm:$0xff]  ;;  %v15653_v51 = vpop.f32.mrf.mxu2 }
 0x4fd   : > { %v7151_v63 = vadd.f32 %v15476_v36, %v16148_v25 }
 0x4fe   : > { %9591 = vmatmul.bf16.gmra.mxu1 %v16141_v21 }
 0x500   : > { %9220 = vmatmul.bf16.gmra.mxu0 %v9072_v26  ;;  %v7152_v26 = vadd.f32 %v15491_v15, %v16150_v4  ;;  %v16151_v15 = vld [vmem:[#allocation16_spill] sm:$0xff]  ;;  %v11558_v4 = vld [vmem:[%s11876_s9 + $0x10] sm:$0xff] }
 0x503   : > { %v7785_v55 = vpop.f32.mrf.mxu1 }
 0x504   : > { %v15610_v42 = vadd.f32 %v7785_v55, %v7146_v16  ;;  %v15645_v55 = vld [vmem:[%s15897_s4] ss:$0 sm:$0xff]  ;;  %v15668_v35 = vpop.f32.mrf.mxu2 }
 0x507   : > { %8223 = vmatmul.bf16.gmra.mxu2 %v15425_v27 }
 0x50b   : > { %v7788_v61 = vpop.f32.mrf.mxu1 }
 0x50c   : > { %v15615_v30 = vadd.f32 %v7788_v61, %v7147_v14  ;;  %v11556_v61 = vld [vmem:[%s11876_s9] sm:$0xff] }
 0x50e   : > { %9596 = vmatmul.bf16.gmra.mxu1 %v16144_v39 }
 0x513   : > { %v7790_v24 = vpop.f32.mrf.mxu1 }
 0x514   : > { %v15620_v38 = vadd.f32 %v7790_v24, %v7148_v57 }
 0x51b   : > { %v7793_v43 = vpop.f32.mrf.mxu1 }
 0x51c   : > { %v15624_v27 = vadd.f32 %v7793_v43, %v7149_v33  ;;  %v15661_v43 = vpop.f32.mrf.mxu3 }
 0x51e   : > { %9601 = vmatmul.bf16.gmra.mxu1 %v16146_v62  ;;  %v11557_v62 = vld [vmem:[%s11876_s9 + $0x8] sm:$0xff] }
 0x523   : > { %v7795_v49 = vpop.f32.mrf.mxu1 }
 0x524   : > { %v15629_v21 = vadd.f32 %v7795_v49, %v7150_v1  ;;  %v15664_v1 = vpop.f32.mrf.mxu0 }
 0x52b   : > { %v7798_v52 = vpop.f32.mrf.mxu1 }
 0x52c   : > { %v15633_v19 = vadd.f32 %v7798_v52, %v7151_v63  ;;  %v15678_v6 = vpop.f32.mrf.mxu0 }
 0x52e   : > { %9606 = vmatmul.bf16.gmra.mxu1 %v16149_v46  ;;  %v16152_v46 = vld [vmem:[#allocation18_spill] sm:$0xff] }
 0x533   : > { %v7800_v22 = vpop.f32.mrf.mxu1 }
 0x534   : > { %v15638_v16 = vadd.f32 %v7800_v22, %v7152_v26  ;;  %v15674_v22 = vpop.f32.mrf.mxu3 }
 0x53b   : > { %v9572_v36 = vpop.f32.mrf.mxu1 }
 0x53c   : > { %v9652_v31 = vadd.f32 %v9572_v36, %v9226_v34  ;;  %v9229_v36 = vadd.f32 %v15559_v23, %v15496_v37 }
 0x53e   : > { %v9688_v14 = vadd.f32 %v15645_v55, %v9652_v31  ;;  %9611 = vmatmul.bf16.gmra.mxu1 %v16151_v15 }
 0x540   : > { %v9720_v39 = vadd.f32 %v11556_v61, %v9688_v14  ;;  %v15681_v14 = vpop.f32.mrf.mxu2  ;;  %v11559_v61 = vld [vmem:[%s11876_s9 + $0x18] sm:$0xff] }
 0x542   : > { %v9752_v44 = vmax.f32 %v9720_v39, 0.0 }
 0x543   : > { %v9574_v57 = vpop.f32.mrf.mxu1 }
 0x544   : > { %9784 = vst [vmem:[%s15657_s30] sm:$0xff] %v9752_v44  ;;  %v9653_v24 = vadd.f32 %v9574_v57, %v9227_v20  ;;  %v9230_v20 = vadd.f32 %v15569_v29, %v15512_v8  ;;  %v15687_v57 = vpop.f32.mrf.mxu3  ;;  %v9231_v8 = vadd.f32 %v15581_v60, %v15521_v7 }
 0x546   : > { %v9689_v33 = vadd.f32 %v15645_v55, %v9653_v24  ;;  %v15690_v24 = vpop.f32.mrf.mxu0 }
 0x548   : > { %v9721_v0 = vadd.f32 %v11557_v62, %v9689_v33  ;;  %v16153_v62 = vld [vmem:[#allocation15_spill] sm:$0xff] }
 0x54a   : > { %v9753_v49 = vmax.f32 %v9721_v0, 0.0  ;;  %v15694_v0 = vpop.f32.mrf.mxu2 }
 0x54b   : > { %v9577_v25 = vpop.f32.mrf.mxu1 }
 0x54c   : > { %9785 = vst [vmem:[%s15657_s30 + $0x8] sm:$0xff] %v9753_v49  ;;  %v9654_v63 = vadd.f32 %v9577_v25, %v9228_v53  ;;  %v11560_v49 = vld [vmem:[%s11876_s9 + $0x20] sm:$0xff] }
 0x54e   : > { %v9690_v52 = vadd.f32 %v15645_v55, %v9654_v63  ;;  %9616 = vmatmul.bf16.gmra.mxu1 %v16152_v46 }
 0x550   : > { %v9722_v26 = vadd.f32 %v11558_v4, %v9690_v52  ;;  %v8491_v52 = vpop.f32.mrf.mxu3  ;;  %v15701_v4 = vpop.f32.mrf.mxu0 }
 0x552   : > { %v9754_v34 = vmax.f32 %v9722_v26, 0.0  ;;  %v11561_v26 = vld [vmem:[%s11876_s9 + $0x28] sm:$0xff] }
 0x553   : > { %v9579_v56 = vpop.f32.mrf.mxu1 }
 0x554   : > { %9786 = vst [vmem:[%s15657_s30 + $0x10] sm:$0xff] %v9754_v34  ;;  %v9655_v31 = vadd.f32 %v9579_v56, %v9229_v36  ;;  %v15704_v36 = vpop.f32.mrf.mxu2 }
 0x556   : > { %v9691_v15 = vadd.f32 %v15645_v55, %v9655_v31  ;;  %v9232_v31 = vadd.f32 %v15595_v45, %v15537_v41  ;;  %v9233_v41 = vadd.f32 %v15608_v5, %v15548_v18 }
 0x558   : > { %v9723_v39 = vadd.f32 %v11559_v61, %v9691_v15  ;;  %v16154_v61 = vld [vmem:[#allocation45_spill] sm:$0xff] }
 0x55a   : > { %v9755_v44 = vmax.f32 %v9723_v39, 0.0  ;;  %v8494_v39 = vpop.f32.mrf.mxu3 }
 0x55b   : > { %v9582_v37 = vpop.f32.mrf.mxu1 }
 0x55c   : > { %9787 = vst [vmem:[%s15657_s30 + $0x18] sm:$0xff] %v9755_v44  ;;  %v9656_v23 = vadd.f32 %v9582_v37, %v9230_v20  ;;  %v11562_v44 = vld [vmem:[%s11876_s9 + $0x30] sm:$0xff]  ;;  %v8181_v45 = vpop.f32.mrf.mxu2 }
 0x55d   : > { %v16155_v37 = vld [vmem:[#allocation27_spill] sm:$0xff] }
 0x55e   : > { %v9692_v33 = vadd.f32 %v15645_v55, %v9656_v23  ;;  %9621 = vmatmul.bf16.gmra.mxu1 %v16153_v62  ;;  %v8237_v23 = vadd.f32 %v15653_v51, %v16155_v37  ;;  %v16156_v51 = vld [vmem:[#allocation7_spill] sm:$0xff] }
 0x560   : > { %v9724_v53 = vadd.f32 %v11560_v49, %v9692_v33  ;;  %v15714_v33 = vpop.f32.mrf.mxu0 }
 0x562   : > { %v9756_v25 = vmax.f32 %v9724_v53, 0.0 }
 0x563   : > { %v9584_v29 = vpop.f32.mrf.mxu1 }
 0x564   : > { %9788 = vst [vmem:[%s15657_s30 + $0x20] sm:$0xff] %v9756_v25  ;;  %v9657_v63 = vadd.f32 %v9584_v29, %v9231_v8  ;;  %v8552_v25 = vadd.f32 %v15661_v43, %v8237_v23  ;;  %v11563_v29 = vld [vmem:[%s11876_s9 + $0x38] sm:$0xff] }
 0x566   : > { %v9693_v46 = vadd.f32 %v15645_v55, %v9657_v63 }
 0x568   : > { %v9725_v34 = vadd.f32 %v11561_v26, %v9693_v46  ;;  %v8496_v46 = vpop.f32.mrf.mxu3  ;;  %v8238_v26 = vadd.f32 %v15668_v35, %v16156_v51  ;;  %v15725_v5 = vpop.f32.mrf.mxu0 }
 0x56a   : > { %v9757_v56 = vmax.f32 %v9725_v34, 0.0  ;;  %v8553_v43 = vadd.f32 %v15674_v22, %v8238_v26 }
 0x56b   : > { %v9587_v15 = vpop.f32.mrf.mxu1 }
 0x56c   : > { %9789 = vst [vmem:[%s15657_s30 + $0x28] sm:$0xff] %v9757_v56  ;;  %v9658_v7 = vadd.f32 %v9587_v15, %v9232_v31  ;;  %v9234_v56 = vadd.f32 %v15664_v1, %v8552_v25  ;;  %v15728_v15 = vpop.f32.mrf.mxu2  ;;  %v9235_v37 = vadd.f32 %v15678_v6, %v8553_v43 }
 0x56e   : > { %v9694_v60 = vadd.f32 %v15645_v55, %v9658_v7  ;;  %9626 = vmatmul.bf16.gmra.mxu1 %v16154_v61  ;;  %v11564_v61 = vld [vmem:[%s11876_s9 + $0x40] sm:$0xff] }
 0x570   : > { %v9726_v20 = vadd.f32 %v11562_v44, %v9694_v60  ;;  %v16157_v60 = vld [vmem:[#allocation28_spill] sm:$0xff]  ;;  %v16158_v44 = vld [vmem:[#allocation26_spill] sm:$0xff]  ;;  %v15737_v23 = vpop.f32.mrf.mxu3 }
 0x571   : > { %v8239_v1 = vadd.f32 %v15681_v14, %v16158_v44 }
 0x572   : > { %v9758_v62 = vmax.f32 %v9726_v20, 0.0 }
 0x573   : > { %v9589_v49 = vpop.f32.mrf.mxu1  ;;  %v8554_v22 = vadd.f32 %v15687_v57, %v8239_v1 }
 0x574   : > { %9790 = vst [vmem:[%s15657_s30 + $0x30] sm:$0xff] %v9758_v62  ;;  %v9659_v53 = vadd.f32 %v9589_v49, %v9233_v41  ;;  %v15741_v49 = vpop.f32.mrf.mxu0  ;;  %v15744_v25 = vpop.f32.mrf.mxu2 }
 0x575   : > { %v9236_v51 = vadd.f32 %v15690_v24, %v8554_v22  ;;  %v8242_v22 = vadd.f32 %v8181_v45, %v15463_v54 }
 0x576   : > { %v9695_v8 = vadd.f32 %v15645_v55, %v9659_v53 }
 0x578   : > { %v9727_v63 = vadd.f32 %v11563_v29, %v9695_v8  ;;  %v11565_v8 = vld [vmem:[%s11876_s9 + $0x48] sm:$0xff]  ;;  %v16159_v29 = vld [vmem:[#allocation29_spill] sm:$0xff]  ;;  %v8501_v57 = vpop.f32.mrf.mxu3 }
 0x57a   : > { %v9759_v34 = vmax.f32 %v9727_v63, 0.0  ;;  %v8240_v63 = vadd.f32 %v15694_v0, %v16159_v29  ;;  %v8241_v0 = vadd.f32 %v15704_v36, %v15439_v40 }
 0x57b   : > { %v9592_v18 = vpop.f32.mrf.mxu1 }
 0x57c   : > { %9791 = vst [vmem:[%s15657_s30 + $0x38] sm:$0xff] %v9759_v34  ;;  %v9660_v31 = vadd.f32 %v9592_v18, %v9234_v56  ;;  %v8555_v56 = vadd.f32 %v8491_v52, %v8240_v63  ;;  %v15753_v43 = vpop.f32.mrf.mxu0  ;;  %v8556_v1 = vadd.f32 %v8494_v39, %v8241_v0  ;;  %v9273_v39 = vld [vmem:[#allocation3 + $0xcc] sm:$0xe]  ;;  %v8557_v63 = vadd.f32 %v8496_v46, %v8242_v22 }
 0x57d   : > { %v11164_v54 = vrot.slane %v9273_v39, 9 }
 0x57e   : > { %v9696_v7 = vadd.f32 %v15645_v55, %v9660_v31  ;;  %9631 = vmatmul.bf16.gmra.mxu1 %v16157_v60  ;;  %v16160_v31 = vld [vmem:[#allocation31_spill] sm:$0xff]  ;;  %v9238_v40 = vadd.f32 %v15714_v33, %v8556_v1 }
 0x580   : > { %v9728_v35 = vadd.f32 %v11564_v61, %v9696_v7  ;;  %v11566_v7 = vld [vmem:[%s11876_s9 + $0x50] sm:$0xff]  ;;  %v8189_v61 = vpop.f32.mrf.mxu2 }
 0x582   : > { %v9760_v20 = vmax.f32 %v9728_v35, 0.0  ;;  %v9237_v35 = vadd.f32 %v15701_v4, %v8555_v56 }
 0x583   : > { %v9594_v62 = vpop.f32.mrf.mxu1 }
 0x584   : > { %9792 = vst [vmem:[%s15657_s30 + $0x40] sm:$0xff] %v9760_v20  ;;  %v9661_v41 = vadd.f32 %v9594_v62, %v9235_v37  ;;  %v8504_v37 = vpop.f32.mrf.mxu3  ;;  %v11567_v62 = vld [vmem:[%s11876_s9 + $0x58] sm:$0xff] }
 0x586   : > { %v9697_v53 = vadd.f32 %v15645_v55, %v9661_v41 }
 0x588   : > { %v9729_v14 = vadd.f32 %v11565_v8, %v9697_v53  ;;  %v15763_v53 = vpop.f32.mrf.mxu0  ;;  %v8191_v36 = vpop.f32.mrf.mxu2 }
 0x58a   : > { %v9761_v6 = vmax.f32 %v9729_v14, 0.0  ;;  %v9429_v14 = vrot.slane %v15587_v3, 5  ;;  %v8243_v3 = vadd.f32 %v15728_v15, %v15484_v47 }
 0x58b   : > { %v9597_v26 = vpop.f32.mrf.mxu1 }
 0x58c   : > { %9793 = vst [vmem:[%s15657_s30 + $0x48] sm:$0xff] %v9761_v6  ;;  %v9662_v34 = vadd.f32 %v9597_v26, %v9236_v51  ;;  %v9431_v45 = vrot.slane %v9429_v14, 4  ;;  %v9432_v51 = vrot.slane %v15589_v59, 5  ;;  %v11568_v26 = vld [vmem:[%s11876_s9 + $0x60] sm:$0xff]  ;;  %v8506_v33 = vpop.f32.mrf.mxu3  ;;  %v8558_v0 = vadd.f32 %v15737_v23, %v8243_v3 }
 0x58e   : > { %v9698_v18 = vadd.f32 %v15645_v55, %v9662_v34  ;;  %9636 = vmatmul.bf16.gmra.mxu1 %v16160_v31  ;;  %v9430_v31 = vsel %vm12348_vm13, %v11164_v54, %v9429_v14  ;;  %v9240_v13 = vadd.f32 %v15741_v49, %v8558_v0 }
 0x58f   : > { %v9481_v47 = vunpack.c.l.b16 %v9430_v31 }
 0x590   : > { %v9730_v60 = vadd.f32 %v11566_v7, %v9698_v18  ;;  %v9239_v18 = vadd.f32 %v15725_v5, %v8557_v63  ;;  %v9188_v7 = vpop.f32.mrf.mxu0  ;;  %v11569_v5 = vld [vmem:[%s11876_s9 + $0x68] sm:$0xff] }
 0x592   : > { %v9762_v24 = vmax.f32 %v9730_v60, 0.0  ;;  %v8194_v60 = vpop.f32.mrf.mxu2 }
 0x593   : > { %v9599_v44 = vpop.f32.mrf.mxu1 }
 0x594   : > { %9794 = vst [vmem:[%s15657_s30 + $0x50] sm:$0xff] %v9762_v24  ;;  %v9663_v52 = vadd.f32 %v9599_v44, %v9237_v35  ;;  %v8244_v44 = vadd.f32 %v15744_v25, %v15494_v11  ;;  %v8245_v11 = vadd.f32 %v8189_v61, %v15508_v2 }
 0x596   : > { %v9699_v20 = vadd.f32 %v15645_v55, %v9663_v52  ;;  %v8559_v23 = vadd.f32 %v8501_v57, %v8244_v44  ;;  %v8560_v57 = vadd.f32 %v8504_v37, %v8245_v11 }
 0x598   : > { %v9731_v41 = vadd.f32 %v11567_v62, %v9699_v20  ;;  %v8509_v20 = vpop.f32.mrf.mxu3  ;;  %v9191_v22 = vpop.f32.mrf.mxu0  ;;  %v9241_v49 = vadd.f32 %v15753_v43, %v8559_v23  ;;  %v9242_v2 = vadd.f32 %v15763_v53, %v8560_v57 }
 0x59a   : > { %v9763_v8 = vmax.f32 %v9731_v41, 0.0 }
 0x59b   : > { %v9602_v4 = vpop.f32.mrf.mxu1 }
 0x59c   : > { %9795 = vst [vmem:[%s15657_s30 + $0x58] sm:$0xff] %v9763_v8  ;;  %v9664_v29 = vadd.f32 %v9602_v4, %v9238_v40  ;;  %v8196_v40 = vpop.f32.mrf.mxu2  ;;  %v11570_v4 = vld [vmem:[%s11876_s9 + $0x70] sm:$0xff] }
 0x59d   : > { %v8248_v44 = vadd.f32 %v8196_v40, %v15546_v58 }
 0x59e   : > { %v9700_v6 = vadd.f32 %v15645_v55, %v9664_v29  ;;  %9641 = vmatmul.bf16.gmra.mxu1 %v15449_v9  ;;  %v9433_v9 = vsel %vm12348_vm13, %v9431_v45, %v9432_v51  ;;  %v11571_v45 = vld [vmem:[%s11876_s9 + $0x78] sm:$0xff] }
 0x59f   : > { %v9482_v15 = vunpack.c.l.b16 %v9433_v9  ;;  %v8247_v9 = vadd.f32 %v8194_v60, %v15535_v17 }
 0x5a0   : > { %v9732_v34 = vadd.f32 %v11568_v26, %v9700_v6  ;;  %v8511_v63 = vpop.f32.mrf.mxu3  ;;  %v9193_v54 = vpop.f32.mrf.mxu0 }
 0x5a1   : > { %v9498_v1 = vpack.c.b16 %v9482_v15, %v9481_v47  ;;  %v8562_v47 = vadd.f32 %v8509_v20, %v8247_v9  ;;  %v11574_v20 = vld [vmem:[%s11876_s9 + $0x90] sm:$0xff] }
 0x5a2   : > { %v9764_v56 = vmax.f32 %v9732_v34, 0.0  ;;  %v8246_v34 = vadd.f32 %v8191_v36, %v15519_v28 }
 0x5a3   : > { %v9604_v46 = vpop.f32.mrf.mxu1  ;;  %v9244_v17 = vadd.f32 %v9191_v22, %v8562_v47 }
 0x5a4   : > { %9796 = vst [vmem:[%s15657_s30 + $0x60] sm:$0xff] %v9764_v56  ;;  %v9665_v59 = vadd.f32 %v9604_v46, %v9239_v18  ;;  %v8199_v26 = vpop.f32.mrf.mxu2  ;;  %v8561_v56 = vadd.f32 %v8506_v33, %v8246_v34  ;;  %v11572_v46 = vld [vmem:[%s11876_s9 + $0x80] sm:$0xff]  ;;  %v11573_v33 = vld [vmem:[%s11876_s9 + $0x88] sm:$0xff] }
 0x5a6   : > { %v9701_v24 = vadd.f32 %v15645_v55, %v9665_v59  ;;  %v9243_v28 = vadd.f32 %v9188_v7, %v8561_v56 }
 0x5a8   : > { %v9733_v35 = vadd.f32 %v11569_v5, %v9701_v24  ;;  %v8514_v37 = vpop.f32.mrf.mxu3  ;;  %v9196_v59 = vpop.f32.mrf.mxu0 }
 0x5aa   : > { %v9765_v52 = vmax.f32 %v9733_v35, 0.0 }
 0x5ab   : > { %v9607_v62 = vpop.f32.mrf.mxu1 }
 0x5ac   : > { %9797 = vst [vmem:[%s15657_s30 + $0x68] sm:$0xff] %v9765_v52  ;;  %v9666_v41 = vadd.f32 %v9607_v62, %v9240_v13  ;;  %v8201_v36 = vpop.f32.mrf.mxu2  ;;  %v8563_v62 = vadd.f32 %v8511_v63, %v8248_v44  ;;  %v11578_v44 = vld [vmem:[%s11876_s9 + $0xb0] sm:$0xff] }
 0x5ad   : > { %v8250_v57 = vadd.f32 %v8201_v36, %v15567_v50 }
 0x5ae   : > { %v9702_v8 = vadd.f32 %v15645_v55, %v9666_v41  ;;  %9646 = vmatmul.bf16.gmra.mxu1 %v9498_v1 }
 0x5b0   : > { %v9734_v14 = vadd.f32 %v11570_v4, %v9702_v8  ;;  %v8516_v35 = vpop.f32.mrf.mxu3  ;;  %v9198_v13 = vpop.f32.mrf.mxu0  ;;  %v8249_v8 = vadd.f32 %v8199_v26, %v15561_v48 }
 0x5b1   : > { %v8565_v26 = vadd.f32 %v8516_v35, %v8250_v57 }
 0x5b2   : > { %v9766_v25 = vmax.f32 %v9734_v14, 0.0  ;;  %v9245_v14 = vadd.f32 %v9193_v54, %v8563_v62  ;;  %v8564_v11 = vadd.f32 %v8514_v37, %v8249_v8  ;;  %v11579_v8 = vld [vmem:[%s11876_s9 + $0xb8] sm:$0xff] }
 0x5b3   : > { %v9609_v29 = vpop.f32.mrf.mxu1  ;;  %v9247_v50 = vadd.f32 %v9198_v13, %v8565_v26 }
 0x5b4   : > { %9798 = vst [vmem:[%s15657_s30 + $0x70] sm:$0xff] %v9766_v25  ;;  %v9667_v39 = vadd.f32 %v9609_v29, %v9241_v49  ;;  %v8204_v1 = vpop.f32.mrf.mxu2  ;;  %v9246_v48 = vadd.f32 %v9196_v59, %v8564_v11 }
 0x5b5   : > { %v8251_v56 = vadd.f32 %v8204_v1, %v15578_v10 }
 0x5b6   : > { %v9703_v6 = vadd.f32 %v15645_v55, %v9667_v39  ;;  %v11575_v39 = vld [vmem:[%s11876_s9 + $0x98] sm:$0xff] }
 0x5b8   : > { %v9735_v51 = vadd.f32 %v11571_v45, %v9703_v6  ;;  %v8519_v58 = vpop.f32.mrf.mxu3  ;;  %v9201_v25 = vpop.f32.mrf.mxu0 }
 0x5ba   : > { %v9767_v3 = vmax.f32 %v9735_v51, 0.0 }
 0x5bb   : > { %v9612_v61 = vpop.f32.mrf.mxu1 }
 0x5bc   : > { %9799 = vst [vmem:[%s15657_s30 + $0x78] sm:$0xff] %v9767_v3  ;;  %v9668_v43 = vadd.f32 %v9612_v61, %v9242_v2  ;;  %v8206_v29 = vpop.f32.mrf.mxu2  ;;  %v11576_v2 = vld [vmem:[%s11876_s9 + $0xa0] sm:$0xff] }
 0x5be   : > { %v9704_v18 = vadd.f32 %v15645_v55, %v9668_v43 }
 0x5c0   : > { %v9736_v31 = vadd.f32 %v11572_v46, %v9704_v18  ;;  %v8521_v51 = vpop.f32.mrf.mxu3  ;;  %v9203_v3 = vpop.f32.mrf.mxu0 }
 0x5c2   : > { %v9768_v0 = vmax.f32 %v9736_v31, 0.0  ;;  %v8566_v31 = vadd.f32 %v8519_v58, %v8251_v56 }
 0x5c3   : > { %v9614_v24 = vpop.f32.mrf.mxu1 }
 0x5c4   : > { %9800 = vst [vmem:[%s15657_s30 + $0x80] sm:$0xff] %v9768_v0  ;;  %v9669_v53 = vadd.f32 %v9614_v24, %v9243_v28  ;;  %v8209_v43 = vpop.f32.mrf.mxu2  ;;  %v11577_v0 = vld [vmem:[%s11876_s9 + $0xa8] sm:$0xff]  ;;  %v8252_v24 = vadd.f32 %v8206_v29, %v15585_v12  ;;  %v9248_v47 = vadd.f32 %v9201_v25, %v8566_v31 }
 0x5c6   : > { %v9705_v15 = vadd.f32 %v15645_v55, %v9669_v53 }
 0x5c8   : > { %v9737_v5 = vadd.f32 %v11573_v33, %v9705_v15  ;;  %v8524_v59 = vpop.f32.mrf.mxu3  ;;  %v9206_v36 = vpop.f32.mrf.mxu0 }
 0x5ca   : > { %v9769_v52 = vmax.f32 %v9737_v5, 0.0  ;;  %v8567_v5 = vadd.f32 %v8521_v51, %v8252_v24 }
 0x5cb   : > { %v9617_v60 = vpop.f32.mrf.mxu1 }
 0x5cc   : > { %9801 = vst [vmem:[%s15657_s30 + $0x88] sm:$0xff] %v9769_v52  ;;  %v9670_v7 = vadd.f32 %v9617_v60, %v9244_v17  ;;  %v8211_v10 = vpop.f32.mrf.mxu2  ;;  %v8253_v60 = vadd.f32 %v8209_v43, %v15599_v32 }
 0x5ce   : > { %v9706_v41 = vadd.f32 %v15645_v55, %v9670_v7  ;;  %v9249_v7 = vadd.f32 %v9203_v3, %v8567_v5  ;;  %v11583_v5 = vld [vmem:[%s11876_s9 + $0xd8] sm:$0xff] }
 0x5d0   : > { %v9738_v23 = vadd.f32 %v11574_v20, %v9706_v41  ;;  %v8526_v17 = vpop.f32.mrf.mxu3  ;;  %v9208_v1 = vpop.f32.mrf.mxu0  ;;  %v8568_v20 = vadd.f32 %v8524_v59, %v8253_v60  ;;  %v11582_v59 = vld [vmem:[%s11876_s9 + $0xd0] sm:$0xff] }
 0x5d2   : > { %v9770_v4 = vmax.f32 %v9738_v23, 0.0 }
 0x5d3   : > { %v9619_v40 = vpop.f32.mrf.mxu1 }
 0x5d4   : > { %9802 = vst [vmem:[%s15657_s30 + $0x90] sm:$0xff] %v9770_v4  ;;  %v9671_v22 = vadd.f32 %v9619_v40, %v9245_v14  ;;  %v8214_v41 = vpop.f32.mrf.mxu2  ;;  %v8254_v14 = vadd.f32 %v8211_v10, %v15610_v42  ;;  %v9250_v40 = vadd.f32 %v9206_v36, %v8568_v20 }
 0x5d6   : > { %v9707_v49 = vadd.f32 %v15645_v55, %v9671_v22 }
 0x5d8   : > { %v9739_v63 = vadd.f32 %v11575_v39, %v9707_v49  ;;  %v8529_v32 = vpop.f32.mrf.mxu3  ;;  %v9211_v25 = vpop.f32.mrf.mxu0  ;;  %v8569_v49 = vadd.f32 %v8526_v17, %v8254_v14 }
 0x5da   : > { %v9771_v6 = vmax.f32 %v9739_v63, 0.0  ;;  %v11580_v63 = vld [vmem:[%s11876_s9 + $0xc0] sm:$0xff]  ;;  %v9251_v42 = vadd.f32 %v9208_v1, %v8569_v49 }
 0x5db   : > { %v9622_v45 = vpop.f32.mrf.mxu1 }
 0x5dc   : > { %9803 = vst [vmem:[%s15657_s30 + $0x98] sm:$0xff] %v9771_v6  ;;  %v9672_v54 = vadd.f32 %v9622_v45, %v9246_v48  ;;  %v8216_v39 = vpop.f32.mrf.mxu2  ;;  %v8255_v6 = vadd.f32 %v8214_v41, %v15615_v30  ;;  %v11584_v41 = vld [vmem:[%s11876_s9 + $0xe0] sm:$0xff] }
 0x5dd   : > { %v8256_v56 = vadd.f32 %v8216_v39, %v15620_v38 }
 0x5de   : > { %v9708_v34 = vadd.f32 %v15645_v55, %v9672_v54  ;;  %v8570_v26 = vadd.f32 %v8529_v32, %v8255_v6 }
 0x5e0   : > { %v9740_v61 = vadd.f32 %v11576_v2, %v9708_v34  ;;  %v8531_v51 = vpop.f32.mrf.mxu3  ;;  %v9213_v3 = vpop.f32.mrf.mxu0  ;;  %v11581_v2 = vld [vmem:[%s11876_s9 + $0xc8] sm:$0xff]  ;;  %v9252_v30 = vadd.f32 %v9211_v25, %v8570_v26 }
 0x5e1   : > { %v11585_v25 = vld [vmem:[%s11876_s9 + $0xe8] sm:$0xff] }
 0x5e2   : > { %v9772_v18 = vmax.f32 %v9740_v61, 0.0 }
 0x5e3   : > { %v9624_v37 = vpop.f32.mrf.mxu1 }
 0x5e4   : > { %9804 = vst [vmem:[%s15657_s30 + $0xa0] sm:$0xff] %v9772_v18  ;;  %v9673_v46 = vadd.f32 %v9624_v37, %v9247_v50  ;;  %v8219_v43 = vpop.f32.mrf.mxu2 }
 0x5e5   : > { %v8257_v36 = vadd.f32 %v8219_v43, %v15624_v27 }
 0x5e6   : > { %v9709_v9 = vadd.f32 %v15645_v55, %v9673_v46  ;;  %v8571_v46 = vadd.f32 %v8531_v51, %v8256_v56 }
 0x5e8   : > { %v9741_v28 = vadd.f32 %v11577_v0, %v9709_v9  ;;  %v8534_v9 = vpop.f32.mrf.mxu3 }
 0x5ea   : > { %v9773_v53 = vmax.f32 %v9741_v28, 0.0  ;;  %v9216_v28 = vpop.f32.mrf.mxu0 }
 0x5eb   : > { %v9627_v15 = vpop.f32.mrf.mxu1 }
 0x5ec   : > { %9805 = vst [vmem:[%s15657_s30 + $0xa8] sm:$0xff] %v9773_v53  ;;  %v9674_v33 = vadd.f32 %v9627_v15, %v9248_v47  ;;  %v9253_v53 = vadd.f32 %v9213_v3, %v8571_v46  ;;  %v8221_v38 = vpop.f32.mrf.mxu2  ;;  %v8572_v15 = vadd.f32 %v8534_v9, %v8257_v36 }
 0x5ee   : > { %v9710_v35 = vadd.f32 %v15645_v55, %v9674_v33  ;;  %v9254_v60 = vadd.f32 %v9216_v28, %v8572_v15 }
 0x5f0   : > { %v9742_v52 = vadd.f32 %v11578_v44, %v9710_v35  ;;  %v8536_v44 = vpop.f32.mrf.mxu3 }
 0x5f2   : > { %v9774_v13 = vmax.f32 %v9742_v52, 0.0  ;;  %v8258_v52 = vadd.f32 %v8221_v38, %v15629_v21 }
 0x5f3   : > { %v9629_v12 = vpop.f32.mrf.mxu1 }
 0x5f4   : > { %9806 = vst [vmem:[%s15657_s30 + $0xb0] sm:$0xff] %v9774_v13  ;;  %v9675_v62 = vadd.f32 %v9629_v12, %v9249_v7  ;;  %v9218_v7 = vpop.f32.mrf.mxu0  ;;  %v8224_v12 = vpop.f32.mrf.mxu2  ;;  %v8573_v1 = vadd.f32 %v8536_v44, %v8258_v52 }
 0x5f6   : > { %v9711_v23 = vadd.f32 %v15645_v55, %v9675_v62  ;;  %v9255_v21 = vadd.f32 %v9218_v7, %v8573_v1 }
 0x5f8   : > { %v9743_v4 = vadd.f32 %v11579_v8, %v9711_v23  ;;  %v8539_v23 = vpop.f32.mrf.mxu3  ;;  %v8259_v8 = vadd.f32 %v8224_v12, %v15633_v19 }
 0x5fa   : > { %v9775_v58 = vmax.f32 %v9743_v4, 0.0  ;;  %v8574_v32 = vadd.f32 %v8539_v23, %v8259_v8 }
 0x5fb   : > { %v9632_v22 = vpop.f32.mrf.mxu1 }
 0x5fc   : > { %9807 = vst [vmem:[%s15657_s30 + $0xb8] sm:$0xff] %v9775_v58  ;;  %v9676_v11 = vadd.f32 %v9632_v22, %v9250_v40  ;;  %v9221_v40 = vpop.f32.mrf.mxu0 }
 0x5fe   : > { %v9712_v29 = vadd.f32 %v15645_v55, %v9676_v11  ;;  %v8226_v11 = vpop.f32.mrf.mxu2 }
 0x5ff   : > { %v8260_v39 = vadd.f32 %v8226_v11, %v15638_v16 }
 0x600   : > { %v9744_v57 = vadd.f32 %v11580_v63, %v9712_v29  ;;  %v9256_v29 = vadd.f32 %v9221_v40, %v8574_v32  ;;  %v8541_v63 = vpop.f32.mrf.mxu3 }
 0x602   : > { %v9776_v48 = vmax.f32 %v9744_v57, 0.0 }
 0x603   : > { %v9634_v45 = vpop.f32.mrf.mxu1 }
 0x604   : > { %9808 = vst [vmem:[%s15657_s30 + $0xc0] sm:$0xff] %v9776_v48  ;;  %v9677_v54 = vadd.f32 %v9634_v45, %v9251_v42  ;;  %v8575_v48 = vadd.f32 %v8541_v63, %v8260_v39  ;;  %v9223_v45 = vpop.f32.mrf.mxu0 }
 0x606   : > { %v9713_v34 = vadd.f32 %v15645_v55, %v9677_v54  ;;  %v11586_v54 = vld [vmem:[%s11876_s9 + $0xf0] sm:$0xff]  ;;  %v9257_v26 = vadd.f32 %v9223_v45, %v8575_v48 }
 0x608   : > { %v9745_v61 = vadd.f32 %v11581_v2, %v9713_v34 }
 0x60a   : > { %v9777_v18 = vmax.f32 %v9745_v61, 0.0  ;;  %v11587_v61 = vld [vmem:[%s11876_s9 + $0xf8] sm:$0xff] }
 0x60b   : > { %v9637_v50 = vpop.f32.mrf.mxu1 }
 0x60c   : > { %9809 = vst [vmem:[%s15657_s30 + $0xc8] sm:$0xff] %v9777_v18  ;;  %v9678_v37 = vadd.f32 %v9637_v50, %v9252_v30 }
 0x60e   : > { %v9714_v31 = vadd.f32 %v15645_v55, %v9678_v37 }
 0x610   : > { %v9746_v0 = vadd.f32 %v11582_v59, %v9714_v31 }
 0x612   : > { %v9778_v24 = vmax.f32 %v9746_v0, 0.0 }
 0x613   : > { %v9639_v47 = vpop.f32.mrf.mxu1 }
 0x614   : > { %9810 = vst [vmem:[%s15657_s30 + $0xd0] sm:$0xff] %v9778_v24  ;;  %v9679_v10 = vadd.f32 %v9639_v47, %v9253_v53 }
 0x616   : > { %v9715_v33 = vadd.f32 %v15645_v55, %v9679_v10 }
 0x618   : > { %v9747_v35 = vadd.f32 %v11583_v5, %v9715_v33 }
 0x61a   : > { %v9779_v17 = vmax.f32 %v9747_v35, 0.0 }
 0x61b   : > { %v9642_v27 = vpop.f32.mrf.mxu1 }
 0x61c   : > { %9811 = vst [vmem:[%s15657_s30 + $0xd8] sm:$0xff] %v9779_v17  ;;  %v9680_v13 = vadd.f32 %v9642_v27, %v9254_v60 }
 0x61e   : > { %v9716_v62 = vadd.f32 %v15645_v55, %v9680_v13 }
 0x620   : > { %v9748_v20 = vadd.f32 %v11584_v41, %v9716_v62 }
 0x622   : > { %v9780_v4 = vmax.f32 %v9748_v20, 0.0 }
 0x623   : > { %v9644_v14 = vpop.f32.mrf.mxu1 }
 0x624   : > { %9812 = vst [vmem:[%s15657_s30 + $0xe0] sm:$0xff] %v9780_v4  ;;  %v9681_v58 = vadd.f32 %v9644_v14, %v9255_v21 }
 0x626   : > { %v9717_v22 = vadd.f32 %v15645_v55, %v9681_v58 }
 0x628   : > { %v9749_v49 = vadd.f32 %v11585_v25, %v9717_v22 }
 0x62a   : > { %v9781_v19 = vmax.f32 %v9749_v49, 0.0 }
 0x62b   : > { %v9647_v57 = vpop.f32.mrf.mxu1 }
 0x62c   : > { %9813 = vst [vmem:[%s15657_s30 + $0xe8] sm:$0xff] %v9781_v19  ;;  %v9682_v6 = vadd.f32 %v9647_v57, %v9256_v29 }
 0x62e   : > { %v9718_v42 = vadd.f32 %v15645_v55, %v9682_v6 }
 0x630   : > { %v9750_v51 = vadd.f32 %v11586_v54, %v9718_v42 }
 0x632   : > { %v9782_v34 = vmax.f32 %v9750_v51, 0.0 }
 0x633   : > { %v9649_v16 = vpop.f32.mrf.mxu1 }
 0x634   : > { %9814 = vst [vmem:[%s15657_s30 + $0xf0] sm:$0xff] %v9782_v34  ;;  %v9683_v3 = vadd.f32 %v9649_v16, %v9257_v26 }
 0x636   : > { %v9719_v2 = vadd.f32 %v15645_v55, %v9683_v3 }
 0x638   : > { %v9751_v43 = vadd.f32 %v11587_v61, %v9719_v2 }
 0x63a   : > { %v9783_v56 = vmax.f32 %v9751_v43, 0.0 }
 0x63c   : > { %9815 = vst [vmem:[%s15657_s30 + $0xf8] sm:$0xff] %v9783_v56 }
 0x63d   : > { %11615 = shalt.err (!%p11612_p3)
}
 0x63e   : > { %s11653_s25 = smov 128   ;;  %s11654_s26 = smov 8  }
 0x63f   : > { %11476 = dma.vmem_to_hbm [thread:$0]  (%p11723_p5), %s9830_s11, 4096, %s9832_s12, %s9817_s22, %s11653_s25, %s11653_s25, %s11654_s26  }
 0x640 PF: > { %p11482_p4 = scmp.ge.s32.totalorder %s11650_s21, 2  ;;  %s9846_s30 = sand.u32 1, %s11638_s18  }
 0x641   : > { %s9847_s6 = scalar_lea.sflag [#allocation5], %s9846_s30 }
 0x642   : > { %p11479_p7 = pnand %p11482_p4, %p11727_p6 }
 0x644   : > { %p11480_p8 = pneg %p11479_p7 }
 0x646   : > { %11633 = dma.done.wait (%p11480_p8), %s9847_s6, 4096  }
 0x647   : > { %11635 = vsyncadd (%p11480_p8), %s9847_s6, 4294963200  ;;  %p15_p9 = scmp.ge.s32.totalorder %s11710_s24, 4   ;;  %s16161_s18 = smov %s11642_s19 }
 0x648   : > { %s16162_s19 = smov %s11646_s20  ;;  %s16163_s20 = smov %s11721_s27 }
 0x649   : > { %s16164_s21 = smov %s11710_s24  ;;  %17 = sbr.rel (!%p15_p9) target bundleno = 3 (0x3), region = 95 }
 0x64e   :  { %9853 = vsyncpa [#allocation5], 1 }
 0x64f   :  { %9855 = vsyncpa [#allocation5 + $0x1], 1 }

</bundles_post_ra>
